<compile_context>
chip_gen: v7x
topology: tpu7x:2x2x1
jax: 0.10.0
libtpu: 0.0.40
codegen_flags: <defaults>
</compile_context>

<pallas_src>
import jax
import jax.numpy as jnp
from jax.experimental import pallas as pl
from jax.experimental.pallas import tpu as pltpu

# ----------------------------- model constants ------------------------------
CTX_DIM = 512          # CLIP text feature dim / tffa num_channels
HID = 2 * CTX_DIM      # 1024, tffa hidden/output dim
IN_PLANES = 512        # self.in_planes after reduce_feat_dim
NUM_CLASSES = 16       # num_classes (small, synthetic)
CLS_PAD = 128          # lane-dense padded classifier width
N_CTX = 4              # PromptLearner n_ctx
N_CLS_CTX = 4          # PromptLearner n_cls_ctx
SEQ_LEN = 77           # CLIP tokenized prompt length
BN_EPS = 1e-5
NORM_EPS = 1e-12
TEXT_BATCH = NUM_CLASSES   # all class prompts through the TFFA per call
IMG_BATCH = 8


def _full_spec(shape):
    """BlockSpec covering the whole array at every grid step."""
    nd = len(shape)
    return pl.BlockSpec(shape, lambda i, _nd=nd: (0,) * _nd)


# =============================================================================
# Single fused kernel, grid=(1,):
#   * TFFA branch: int8 weights manually DMA'd from HBM, f32 accumulation,
#     per-output-channel dequant scales applied in the epilogue.
#   * head branch: L2-norm of global_feat + eval-BN folded classifier;
#     runs underneath the weight DMA.
# =============================================================================
def _fused_kernel(x_text_ref, s1_ref, b1_ref, s2_ref, b2_ref, s5_ref, b5_ref,
                  w1_hbm, w2_hbm, w5_hbm,
                  gfeat_ref, wcls_ref, bcls_ref,
                  text_ref, score_ref, gnorm_ref,
                  w1_v, w2_v, w5_v, dma_sem):
    # Kick off the int8 weight DMAs immediately; everything that does not
    # depend on them executes under the fetch.
    c1 = pltpu.make_async_copy(w1_hbm, w1_v, dma_sem.at[0])
    c2 = pltpu.make_async_copy(w2_hbm, w2_v, dma_sem.at[1])
    c3 = pltpu.make_async_copy(w5_hbm, w5_v, dma_sem.at[2])
    c1.start(); c2.start(); c3.start()

    # ---------------- head branch (hidden under weight DMA) -----------------
    g = gfeat_ref[...]                                        # (BI, 512) f32
    inv_g = jax.lax.rsqrt(jnp.sum(g * g, axis=1, keepdims=True) + NORM_EPS)
    gnorm_ref[...] = g * inv_g
    # Eval BN folded into the bias-free classifier: score = x @ (scale*W) + shift@W
    # (dropout_rate = 0.0 -> identity).  wcls kept f32 for logit accuracy.
    score_ref[...] = (jnp.dot(g, wcls_ref[...],
                              preferred_element_type=jnp.float32)
                      + bcls_ref[...])

    # ---------------- TFFA branch (int8 weights, f32 accum) -----------------
    x = x_text_ref[...]                                       # (BT, 512) f32
    c1.wait()
    h = jnp.dot(x, w1_v[...].astype(jnp.float32),
                preferred_element_type=jnp.float32)
    h = jnp.maximum(h * s1_ref[...] + b1_ref[...], 0.0)
    c2.wait()
    h = jnp.dot(h, w2_v[...].astype(jnp.float32),
                preferred_element_type=jnp.float32)
    h = jnp.maximum(h * s2_ref[...] + b2_ref[...], 0.0)
    c3.wait()
    h = jnp.dot(h, w5_v[...].astype(jnp.float32),
                preferred_element_type=jnp.float32)
    h = h * s5_ref[...] + b5_ref[...]
    inv = jax.lax.rsqrt(jnp.sum(h * h, axis=1, keepdims=True) + NORM_EPS)
    text_ref[...] = h * inv


def fused_forward(kparams, text_feats, global_feat):
    """Runs both branches in one pallas_call (single grid step).

    Returns (text_features, cls_score, global_feat, global_feat_norm).
    """
    (w1q, s1, b1, w2q, s2, b2, w5q, s5, b5, wcls_f, bcls_f) = kparams
    bt = text_feats.shape[0]
    bi = global_feat.shape[0]

    out_shape = (
        jax.ShapeDtypeStruct((bt, HID), jnp.float32),        # text_features
        jax.ShapeDtypeStruct((bi, CLS_PAD), jnp.float32),    # padded cls_score
        jax.ShapeDtypeStruct((bi, IN_PLANES), jnp.float32),  # global_feat_norm
    )
    out_specs = (
        _full_spec((bt, HID)),
        _full_spec((bi, CLS_PAD)),
        _full_spec((bi, IN_PLANES)),
    )
    in_specs = [
        _full_spec(text_feats.shape),        # x_text
        _full_spec(s1.shape), _full_spec(b1.shape),
        _full_spec(s2.shape), _full_spec(b2.shape),
        _full_spec(s5.shape), _full_spec(b5.shape),
        pl.BlockSpec(memory_space=pl.ANY),   # w1q (HBM, manual DMA)
        pl.BlockSpec(memory_space=pl.ANY),   # w2q
        pl.BlockSpec(memory_space=pl.ANY),   # w5q
        _full_spec(global_feat.shape),       # global_feat
        _full_spec(wcls_f.shape),            # folded classifier weight (f32)
        _full_spec(bcls_f.shape),            # folded classifier bias
    ]

    text_features, score_pad, gnorm = pl.pallas_call(
        _fused_kernel,
        out_shape=out_shape,
        grid=(1,),
        in_specs=in_specs,
        out_specs=out_specs,
        scratch_shapes=[
            pltpu.VMEM((CTX_DIM, HID), jnp.int8),   # w1 buffer
            pltpu.VMEM((HID, HID), jnp.int8),       # w2 buffer
            pltpu.VMEM((HID, HID), jnp.int8),       # w5 buffer
            pltpu.SemaphoreType.DMA((3,)),
        ],
        compiler_params=pltpu.CompilerParams(
            dimension_semantics=("arbitrary",)),
    )(text_feats, s1, b1, s2, b2, s5, b5, w1q, w2q, w5q,
      global_feat, wcls_f, bcls_f)

    cls_score = score_pad[:, :NUM_CLASSES]
    # global_feat is returned unchanged (no identity copy through the kernel).
    return text_features, cls_score, global_feat, gnorm


# =============================================================================
# PromptLearner (glue: gather + concat, plain JAX)
# =============================================================================
def prompt_learner_forward(pl_params, label):
    cls_ctx_all, prefix, suffix = pl_params
    b = label.shape[0]
    cls_ctx = cls_ctx_all[label]                                   # (B, 4, 512)
    pre = jnp.broadcast_to(prefix, (b,) + prefix.shape[1:])        # (B, 5, 512)
    suf = jnp.broadcast_to(suffix, (b,) + suffix.shape[1:])        # (B, 68, 512)
    return jnp.concatenate([pre, cls_ctx, suf], axis=1)            # (B, 77, 512)


# =============================================================================
# Deterministic parameter init (matching the PyTorch __init__ semantics)
# =============================================================================
def init_params(key):
    ks = jax.random.split(key, 8)

    def kaiming_fan_out(k, in_f, out_f):
        # nn.init.kaiming_normal_(weight(out,in), a=0, mode='fan_out') -> std=sqrt(2/out_f)
        std = (2.0 / out_f) ** 0.5
        w = jax.random.normal(k, (out_f, in_f), jnp.float32) * std
        return w.T  # store as (in, out)

    # TextFeedForwardAligment
    tffa = (
        kaiming_fan_out(ks[0], CTX_DIM, HID), jnp.zeros((1, HID), jnp.float32),
        kaiming_fan_out(ks[1], HID, HID),     jnp.zeros((1, HID), jnp.float32),
        kaiming_fan_out(ks[2], HID, HID),     jnp.zeros((1, HID), jnp.float32),
    )

    # bottleneck BatchNorm1d (weight=1, bias=0 frozen) + running stats
    # classifier Linear(in_planes, num_classes, bias=False), init normal std=0.001
    wcls = (jax.random.normal(ks[3], (NUM_CLASSES, IN_PLANES), jnp.float32) * 0.001).T
    head = (
        jnp.ones((1, IN_PLANES), jnp.float32),    # gamma
        jnp.zeros((1, IN_PLANES), jnp.float32),   # beta (requires_grad_(False))
        jnp.zeros((1, IN_PLANES), jnp.float32),   # running_mean
        jnp.ones((1, IN_PLANES), jnp.float32),    # running_var
        wcls,                                     # (IN_PLANES, NUM_CLASSES)
    )

    # PromptLearner buffers / parameter
    cls_ctx = jax.random.normal(ks[4], (NUM_CLASSES, N_CLS_CTX, CTX_DIM), jnp.float32) * 0.02
    prefix = jax.random.normal(ks[5], (1, N_CTX + 1, CTX_DIM), jnp.float32) * 0.02
    suffix = jax.random.normal(
        ks[6], (1, SEQ_LEN - (N_CTX + 1 + N_CLS_CTX), CTX_DIM), jnp.float32) * 0.02
    prompt = (cls_ctx, prefix, suffix)

    return tffa, head, prompt


def _quantize_per_col(w):
    """Symmetric int8 quantization with per-output-channel (column) scales."""
    amax = jnp.max(jnp.abs(w), axis=0, keepdims=True)            # (1, out)
    scale = jnp.maximum(amax, 1e-8) / 127.0
    wq = jnp.clip(jnp.round(w / scale), -127.0, 127.0).astype(jnp.int8)
    return wq, scale.astype(jnp.float32)


def prepare_kernel_params(tffa, head):
    """int8 TFFA weight storage + eval-mode BN folded into the bias-free classifier."""
    w1, b1, w2, b2, w5, b5 = tffa
    gamma, beta, mean, var, wcls = head

    w1q, s1 = _quantize_per_col(w1)
    w2q, s2 = _quantize_per_col(w2)
    w5q, s5 = _quantize_per_col(w5)

    scale = gamma * jax.lax.rsqrt(var + BN_EPS)        # (1, IN_PLANES)
    shift = beta - mean * scale                        # (1, IN_PLANES)
    w_fold = wcls * scale.reshape(IN_PLANES, 1)        # (IN_PLANES, NUM_CLASSES)
    b_fold = shift @ wcls                              # (1, NUM_CLASSES)
    # pad classifier output to a lane-dense 128 columns (sliced back outside)
    w_fold = jnp.pad(w_fold, ((0, 0), (0, CLS_PAD - NUM_CLASSES)))
    b_fold = jnp.pad(b_fold, ((0, 0), (0, CLS_PAD - NUM_CLASSES)))

    return (w1q, s1, b1, w2q, s2, b2, w5q, s5, b5,
            w_fold.astype(jnp.float32), b_fold.astype(jnp.float32))


# ------------------------------ pure-JAX refs --------------------------------
def _tffa_ref(p, x):
    w1, b1, w2, b2, w5, b5 = p
    h = jnp.maximum(x @ w1 + b1, 0.0)
    h = jnp.maximum(h @ w2 + b2, 0.0)
    h = h @ w5 + b5
    return h / jnp.linalg.norm(h, axis=1, keepdims=True)


def _head_ref(p, x):
    gamma, beta, mean, var, wcls = p
    gnorm = x / jnp.linalg.norm(x, axis=1, keepdims=True)
    bn = (x - mean) / jnp.sqrt(var + BN_EPS) * gamma + beta
    return bn @ wcls, x, gnorm


# =============================================================================
if __name__ == "__main__":
    key = jax.random.PRNGKey(0)
    kp, k_feat, k_text = jax.random.split(key, 3)
    tffa_params, head_params, prompt_params = init_params(kp)
    kernel_params = prepare_kernel_params(tffa_params, head_params)

    # Synthetic inputs (shapes implied by the module):
    #   global_feat: output of self.base(x) image backbone  -> (B_img, 512)
    #   text_feats : output of CLIP text_encoder(prompts)   -> (B_txt, 512)
    # The text branch runs all NUM_CLASSES prompts at once (as in get_text).
    global_feat_in = jax.random.normal(k_feat, (IMG_BATCH, IN_PLANES), jnp.float32)
    text_feats_in = jax.random.normal(k_text, (TEXT_BATCH, CTX_DIM), jnp.float32)
    label = jnp.arange(TEXT_BATCH, dtype=jnp.int32) % NUM_CLASSES

    # get_text branch glue (PromptLearner -> [text_encoder omitted])
    prompts = prompt_learner_forward(prompt_params, label)
    assert prompts.shape == (TEXT_BATCH, SEQ_LEN, CTX_DIM)

    fused = jax.jit(fused_forward)
    text_features, cls_score, global_feat, global_feat_norm = fused(
        kernel_params, text_feats_in, global_feat_in)
    jax.block_until_ready((text_features, cls_score, global_feat, global_feat_norm))

    # sanity vs pure-JAX f32 references
    tf_ref = _tffa_ref(tffa_params, text_feats_in)
    sc_ref, gf_ref, gn_ref = _head_ref(head_params, global_feat_in)
    assert text_features.shape == (TEXT_BATCH, HID)
    assert cls_score.shape == (IMG_BATCH, NUM_CLASSES)
    assert global_feat_norm.shape == (IMG_BATCH, IN_PLANES)
    assert jnp.allclose(text_features, tf_ref, rtol=5e-2, atol=5e-2)
    assert jnp.allclose(cls_score, sc_ref, rtol=5e-2, atol=5e-2)
    assert jnp.allclose(global_feat, gf_ref, rtol=1e-5, atol=1e-5)
    assert jnp.allclose(global_feat_norm, gn_ref, rtol=5e-2, atol=5e-2)

    print("KERNEL_OK")
</pallas_src>

<mosaic_0001>
module attributes {stable_mosaic.version = 11 : i64} {
  func.func @_fused_kernel(%arg0: i32, %arg1: memref<16x512xf32, #tpu.memory_space<vmem>>, %arg2: memref<1x1024xf32, #tpu.memory_space<vmem>>, %arg3: memref<1x1024xf32, #tpu.memory_space<vmem>>, %arg4: memref<1x1024xf32, #tpu.memory_space<vmem>>, %arg5: memref<1x1024xf32, #tpu.memory_space<vmem>>, %arg6: memref<1x1024xf32, #tpu.memory_space<vmem>>, %arg7: memref<1x1024xf32, #tpu.memory_space<vmem>>, %arg8: memref<512x1024xi8, #tpu.memory_space<any>>, %arg9: memref<1024x1024xi8, #tpu.memory_space<any>>, %arg10: memref<1024x1024xi8, #tpu.memory_space<any>>, %arg11: memref<8x512xf32, #tpu.memory_space<vmem>>, %arg12: memref<512x128xf32, #tpu.memory_space<vmem>>, %arg13: memref<1x128xf32, #tpu.memory_space<vmem>>, %arg14: memref<16x1024xf32, #tpu.memory_space<vmem>>, %arg15: memref<8x128xf32, #tpu.memory_space<vmem>>, %arg16: memref<8x512xf32, #tpu.memory_space<vmem>>, %arg17: memref<512x1024xi8, #tpu.memory_space<vmem>>, %arg18: memref<1024x1024xi8, #tpu.memory_space<vmem>>, %arg19: memref<1024x1024xi8, #tpu.memory_space<vmem>>, %arg20: memref<3x!tpu.dma_semaphore, #tpu.memory_space<semaphore_mem>>) attributes {dimension_semantics = [#tpu.dimension_semantics<arbitrary>], iteration_bounds = array<i64: 1>, scalar_prefetch = 0 : i64, scratch_operands = 4 : i64, tpu.core_type = #tpu.core_type<tc>, window_params = [{pipeline_mode = #tpu.pipeline_mode<synchronous>, transform_indices = @transform_0, window_bounds = array<i64: 16, 512>}, {pipeline_mode = #tpu.pipeline_mode<synchronous>, transform_indices = @transform_1, window_bounds = array<i64: 1, 1024>}, {pipeline_mode = #tpu.pipeline_mode<synchronous>, transform_indices = @transform_2, window_bounds = array<i64: 1, 1024>}, {pipeline_mode = #tpu.pipeline_mode<synchronous>, transform_indices = @transform_3, window_bounds = array<i64: 1, 1024>}, {pipeline_mode = #tpu.pipeline_mode<synchronous>, transform_indices = @transform_4, window_bounds = array<i64: 1, 1024>}, {pipeline_mode = #tpu.pipeline_mode<synchronous>, transform_indices = @transform_5, window_bounds = array<i64: 1, 1024>}, {pipeline_mode = #tpu.pipeline_mode<synchronous>, transform_indices = @transform_6, window_bounds = array<i64: 1, 1024>}, {}, {}, {}, {pipeline_mode = #tpu.pipeline_mode<synchronous>, transform_indices = @transform_10, window_bounds = array<i64: 8, 512>}, {pipeline_mode = #tpu.pipeline_mode<synchronous>, transform_indices = @transform_11, window_bounds = array<i64: 512, 128>}, {pipeline_mode = #tpu.pipeline_mode<synchronous>, transform_indices = @transform_12, window_bounds = array<i64: 1, 128>}, {pipeline_mode = #tpu.pipeline_mode<synchronous>, transform_indices = @transform_13, window_bounds = array<i64: 16, 1024>}, {pipeline_mode = #tpu.pipeline_mode<synchronous>, transform_indices = @transform_14, window_bounds = array<i64: 8, 128>}, {pipeline_mode = #tpu.pipeline_mode<synchronous>, transform_indices = @transform_15, window_bounds = array<i64: 8, 512>}]} {
    %c0_i32 = arith.constant 0 : i32
    %0 = tpu.memref_slice %arg20[%c0_i32] : memref<3x!tpu.dma_semaphore, #tpu.memory_space<semaphore_mem>> -> memref<1x!tpu.dma_semaphore, #tpu.memory_space<semaphore_mem>>
    %1 = tpu.memref_squeeze %0 : memref<1x!tpu.dma_semaphore, #tpu.memory_space<semaphore_mem>> -> memref<!tpu.dma_semaphore, #tpu.memory_space<semaphore_mem>>
    tpu.enqueue_dma source(%arg8 : memref<512x1024xi8, #tpu.memory_space<any>>) target(%arg17 : memref<512x1024xi8, #tpu.memory_space<vmem>>) target_semaphore(%1 : memref<!tpu.dma_semaphore, #tpu.memory_space<semaphore_mem>>)
    %c1_i32 = arith.constant 1 : i32
    %2 = tpu.memref_slice %arg20[%c1_i32] : memref<3x!tpu.dma_semaphore, #tpu.memory_space<semaphore_mem>> -> memref<1x!tpu.dma_semaphore, #tpu.memory_space<semaphore_mem>>
    %3 = tpu.memref_squeeze %2 : memref<1x!tpu.dma_semaphore, #tpu.memory_space<semaphore_mem>> -> memref<!tpu.dma_semaphore, #tpu.memory_space<semaphore_mem>>
    tpu.enqueue_dma source(%arg9 : memref<1024x1024xi8, #tpu.memory_space<any>>) target(%arg18 : memref<1024x1024xi8, #tpu.memory_space<vmem>>) target_semaphore(%3 : memref<!tpu.dma_semaphore, #tpu.memory_space<semaphore_mem>>)
    %c2_i32 = arith.constant 2 : i32
    %4 = tpu.memref_slice %arg20[%c2_i32] : memref<3x!tpu.dma_semaphore, #tpu.memory_space<semaphore_mem>> -> memref<1x!tpu.dma_semaphore, #tpu.memory_space<semaphore_mem>>
    %5 = tpu.memref_squeeze %4 : memref<1x!tpu.dma_semaphore, #tpu.memory_space<semaphore_mem>> -> memref<!tpu.dma_semaphore, #tpu.memory_space<semaphore_mem>>
    tpu.enqueue_dma source(%arg10 : memref<1024x1024xi8, #tpu.memory_space<any>>) target(%arg19 : memref<1024x1024xi8, #tpu.memory_space<vmem>>) target_semaphore(%5 : memref<!tpu.dma_semaphore, #tpu.memory_space<semaphore_mem>>)
    %c0 = arith.constant 0 : index
    %c0_0 = arith.constant 0 : index
    %6 = vector.load %arg11[%c0, %c0_0] : memref<8x512xf32, #tpu.memory_space<vmem>>, vector<8x512xf32>
    %7 = arith.mulf %6, %6 : vector<8x512xf32>
    %cst = arith.constant dense<0.000000e+00> : vector<8xf32>
    %8 = vector.multi_reduction <add>, %7, %cst [1] : vector<8x512xf32> to vector<8xf32>
    %9 = vector.shape_cast %8 : vector<8xf32> to vector<8x1xf32>
    %cst_1 = arith.constant 9.99999996E-13 : f32
    %10 = vector.broadcast %cst_1 : f32 to vector<8x1xf32>
    %11 = arith.addf %9, %10 : vector<8x1xf32>
    %12 = math.rsqrt %11 : vector<8x1xf32>
    %13 = vector.broadcast %12 : vector<8x1xf32> to vector<8x512xf32>
    %14 = arith.mulf %6, %13 : vector<8x512xf32>
    %c0_2 = arith.constant 0 : index
    %c0_3 = arith.constant 0 : index
    %15 = vector.load %arg16[%c0_2, %c0_3] : memref<8x512xf32, #tpu.memory_space<vmem>>, vector<8x512xf32>
    tpu.vector_store %arg16[%c0_2, %c0_3], %14 {strides = array<i32>} : memref<8x512xf32, #tpu.memory_space<vmem>>, vector<8x512xf32>,
    %c0_4 = arith.constant 0 : index
    %c0_5 = arith.constant 0 : index
    %16 = vector.load %arg12[%c0_4, %c0_5] : memref<512x128xf32, #tpu.memory_space<vmem>>, vector<512x128xf32>
    %cst_6 = arith.constant dense<0.000000e+00> : vector<8x128xf32>
    %17 = tpu.matmul %6, %16, %cst_6 {dimension_numbers = #tpu.dot_dimension_numbers<[1], [0], [0], [1], [0, 0, 1, 1], [], []>} : vector<8x512xf32>, vector<512x128xf32>, vector<8x128xf32> -> vector<8x128xf32>
    %c0_7 = arith.constant 0 : index
    %c0_8 = arith.constant 0 : index
    %18 = vector.load %arg13[%c0_7, %c0_8] : memref<1x128xf32, #tpu.memory_space<vmem>>, vector<1x128xf32>
    %19 = vector.broadcast %18 : vector<1x128xf32> to vector<8x128xf32>
    %20 = arith.addf %17, %19 : vector<8x128xf32>
    %c0_9 = arith.constant 0 : index
    %c0_10 = arith.constant 0 : index
    %21 = vector.load %arg15[%c0_9, %c0_10] : memref<8x128xf32, #tpu.memory_space<vmem>>, vector<8x128xf32>
    tpu.vector_store %arg15[%c0_9, %c0_10], %20 {strides = array<i32>} : memref<8x128xf32, #tpu.memory_space<vmem>>, vector<8x128xf32>,
    %c0_11 = arith.constant 0 : index
    %c0_12 = arith.constant 0 : index
    %22 = vector.load %arg1[%c0_11, %c0_12] : memref<16x512xf32, #tpu.memory_space<vmem>>, vector<16x512xf32>
    %c0_i32_13 = arith.constant 0 : i32
    %23 = tpu.memref_slice %arg20[%c0_i32_13] : memref<3x!tpu.dma_semaphore, #tpu.memory_space<semaphore_mem>> -> memref<1x!tpu.dma_semaphore, #tpu.memory_space<semaphore_mem>>
    %24 = tpu.memref_squeeze %23 : memref<1x!tpu.dma_semaphore, #tpu.memory_space<semaphore_mem>> -> memref<!tpu.dma_semaphore, #tpu.memory_space<semaphore_mem>>
    tpu.wait_dma2 semaphore(%24 : memref<!tpu.dma_semaphore, #tpu.memory_space<semaphore_mem>>) src(%arg8 : memref<512x1024xi8, #tpu.memory_space<any>>) dst(%arg17 : memref<512x1024xi8, #tpu.memory_space<vmem>>)
    %c0_14 = arith.constant 0 : index
    %c0_15 = arith.constant 0 : index
    %25 = vector.load %arg17[%c0_14, %c0_15] : memref<512x1024xi8, #tpu.memory_space<vmem>>, vector<512x1024xi8>
    %26 = arith.sitofp %25 : vector<512x1024xi8> to vector<512x1024xf32>
    %cst_16 = arith.constant dense<0.000000e+00> : vector<16x1024xf32>
    %27 = tpu.matmul %22, %26, %cst_16 {dimension_numbers = #tpu.dot_dimension_numbers<[1], [0], [0], [1], [0, 0, 1, 1], [], []>} : vector<16x512xf32>, vector<512x1024xf32>, vector<16x1024xf32> -> vector<16x1024xf32>
    %c0_17 = arith.constant 0 : index
    %c0_18 = arith.constant 0 : index
    %28 = vector.load %arg2[%c0_17, %c0_18] : memref<1x1024xf32, #tpu.memory_space<vmem>>, vector<1x1024xf32>
    %29 = vector.broadcast %28 : vector<1x1024xf32> to vector<16x1024xf32>
    %30 = arith.mulf %27, %29 : vector<16x1024xf32>
    %c0_19 = arith.constant 0 : index
    %c0_20 = arith.constant 0 : index
    %31 = vector.load %arg3[%c0_19, %c0_20] : memref<1x1024xf32, #tpu.memory_space<vmem>>, vector<1x1024xf32>
    %32 = vector.broadcast %31 : vector<1x1024xf32> to vector<16x1024xf32>
    %33 = arith.addf %30, %32 : vector<16x1024xf32>
    %cst_21 = arith.constant 0.000000e+00 : f32
    %34 = vector.broadcast %cst_21 : f32 to vector<16x1024xf32>
    %35 = arith.maximumf %33, %34 : vector<16x1024xf32>
    %c1_i32_22 = arith.constant 1 : i32
    %36 = tpu.memref_slice %arg20[%c1_i32_22] : memref<3x!tpu.dma_semaphore, #tpu.memory_space<semaphore_mem>> -> memref<1x!tpu.dma_semaphore, #tpu.memory_space<semaphore_mem>>
    %37 = tpu.memref_squeeze %36 : memref<1x!tpu.dma_semaphore, #tpu.memory_space<semaphore_mem>> -> memref<!tpu.dma_semaphore, #tpu.memory_space<semaphore_mem>>
    tpu.wait_dma2 semaphore(%37 : memref<!tpu.dma_semaphore, #tpu.memory_space<semaphore_mem>>) src(%arg9 : memref<1024x1024xi8, #tpu.memory_space<any>>) dst(%arg18 : memref<1024x1024xi8, #tpu.memory_space<vmem>>)
    %c0_23 = arith.constant 0 : index
    %c0_24 = arith.constant 0 : index
    %38 = vector.load %arg18[%c0_23, %c0_24] : memref<1024x1024xi8, #tpu.memory_space<vmem>>, vector<1024x1024xi8>
    %39 = arith.sitofp %38 : vector<1024x1024xi8> to vector<1024x1024xf32>
    %cst_25 = arith.constant dense<0.000000e+00> : vector<16x1024xf32>
    %40 = tpu.matmul %35, %39, %cst_25 {dimension_numbers = #tpu.dot_dimension_numbers<[1], [0], [0], [1], [0, 0, 1, 1], [], []>} : vector<16x1024xf32>, vector<1024x1024xf32>, vector<16x1024xf32> -> vector<16x1024xf32>
    %c0_26 = arith.constant 0 : index
    %c0_27 = arith.constant 0 : index
    %41 = vector.load %arg4[%c0_26, %c0_27] : memref<1x1024xf32, #tpu.memory_space<vmem>>, vector<1x1024xf32>
    %42 = vector.broadcast %41 : vector<1x1024xf32> to vector<16x1024xf32>
    %43 = arith.mulf %40, %42 : vector<16x1024xf32>
    %c0_28 = arith.constant 0 : index
    %c0_29 = arith.constant 0 : index
    %44 = vector.load %arg5[%c0_28, %c0_29] : memref<1x1024xf32, #tpu.memory_space<vmem>>, vector<1x1024xf32>
    %45 = vector.broadcast %44 : vector<1x1024xf32> to vector<16x1024xf32>
    %46 = arith.addf %43, %45 : vector<16x1024xf32>
    %cst_30 = arith.constant 0.000000e+00 : f32
    %47 = vector.broadcast %cst_30 : f32 to vector<16x1024xf32>
    %48 = arith.maximumf %46, %47 : vector<16x1024xf32>
    %c2_i32_31 = arith.constant 2 : i32
    %49 = tpu.memref_slice %arg20[%c2_i32_31] : memref<3x!tpu.dma_semaphore, #tpu.memory_space<semaphore_mem>> -> memref<1x!tpu.dma_semaphore, #tpu.memory_space<semaphore_mem>>
    %50 = tpu.memref_squeeze %49 : memref<1x!tpu.dma_semaphore, #tpu.memory_space<semaphore_mem>> -> memref<!tpu.dma_semaphore, #tpu.memory_space<semaphore_mem>>
    tpu.wait_dma2 semaphore(%50 : memref<!tpu.dma_semaphore, #tpu.memory_space<semaphore_mem>>) src(%arg10 : memref<1024x1024xi8, #tpu.memory_space<any>>) dst(%arg19 : memref<1024x1024xi8, #tpu.memory_space<vmem>>)
    %c0_32 = arith.constant 0 : index
    %c0_33 = arith.constant 0 : index
    %51 = vector.load %arg19[%c0_32, %c0_33] : memref<1024x1024xi8, #tpu.memory_space<vmem>>, vector<1024x1024xi8>
    %52 = arith.sitofp %51 : vector<1024x1024xi8> to vector<1024x1024xf32>
    %cst_34 = arith.constant dense<0.000000e+00> : vector<16x1024xf32>
    %53 = tpu.matmul %48, %52, %cst_34 {dimension_numbers = #tpu.dot_dimension_numbers<[1], [0], [0], [1], [0, 0, 1, 1], [], []>} : vector<16x1024xf32>, vector<1024x1024xf32>, vector<16x1024xf32> -> vector<16x1024xf32>
    %c0_35 = arith.constant 0 : index
    %c0_36 = arith.constant 0 : index
    %54 = vector.load %arg6[%c0_35, %c0_36] : memref<1x1024xf32, #tpu.memory_space<vmem>>, vector<1x1024xf32>
    %55 = vector.broadcast %54 : vector<1x1024xf32> to vector<16x1024xf32>
    %56 = arith.mulf %53, %55 : vector<16x1024xf32>
    %c0_37 = arith.constant 0 : index
    %c0_38 = arith.constant 0 : index
    %57 = vector.load %arg7[%c0_37, %c0_38] : memref<1x1024xf32, #tpu.memory_space<vmem>>, vector<1x1024xf32>
    %58 = vector.broadcast %57 : vector<1x1024xf32> to vector<16x1024xf32>
    %59 = arith.addf %56, %58 : vector<16x1024xf32>
    %60 = arith.mulf %59, %59 : vector<16x1024xf32>
    %cst_39 = arith.constant dense<0.000000e+00> : vector<16xf32>
    %61 = vector.multi_reduction <add>, %60, %cst_39 [1] : vector<16x1024xf32> to vector<16xf32>
    %62 = vector.shape_cast %61 : vector<16xf32> to vector<16x1xf32>
    %cst_40 = arith.constant 9.99999996E-13 : f32
    %63 = vector.broadcast %cst_40 : f32 to vector<16x1xf32>
    %64 = arith.addf %62, %63 : vector<16x1xf32>
    %65 = math.rsqrt %64 : vector<16x1xf32>
    %66 = vector.broadcast %65 : vector<16x1xf32> to vector<16x1024xf32>
    %67 = arith.mulf %59, %66 : vector<16x1024xf32>
    %c0_41 = arith.constant 0 : index
    %c0_42 = arith.constant 0 : index
    %68 = vector.load %arg14[%c0_41, %c0_42] : memref<16x1024xf32, #tpu.memory_space<vmem>>, vector<16x1024xf32>
    tpu.vector_store %arg14[%c0_41, %c0_42], %67 {strides = array<i32>} : memref<16x1024xf32, #tpu.memory_space<vmem>>, vector<16x1024xf32>,
    return
  }
  func.func @transform_0(%arg0: i32) -> (i32, i32) {
    %c0_i32 = arith.constant 0 : i32
    %c0_i32_0 = arith.constant 0 : i32
    %c0_i32_1 = arith.constant 0 : i32
    return %c0_i32, %c0_i32_0 : i32, i32
  }
  func.func @transform_1(%arg0: i32) -> (i32, i32) {
    %c0_i32 = arith.constant 0 : i32
    %c0_i32_0 = arith.constant 0 : i32
    %c0_i32_1 = arith.constant 0 : i32
    return %c0_i32, %c0_i32_0 : i32, i32
  }
  func.func @transform_2(%arg0: i32) -> (i32, i32) {
    %c0_i32 = arith.constant 0 : i32
    %c0_i32_0 = arith.constant 0 : i32
    %c0_i32_1 = arith.constant 0 : i32
    return %c0_i32, %c0_i32_0 : i32, i32
  }
  func.func @transform_3(%arg0: i32) -> (i32, i32) {
    %c0_i32 = arith.constant 0 : i32
    %c0_i32_0 = arith.constant 0 : i32
    %c0_i32_1 = arith.constant 0 : i32
    return %c0_i32, %c0_i32_0 : i32, i32
  }
  func.func @transform_4(%arg0: i32) -> (i32, i32) {
    %c0_i32 = arith.constant 0 : i32
    %c0_i32_0 = arith.constant 0 : i32
    %c0_i32_1 = arith.constant 0 : i32
    return %c0_i32, %c0_i32_0 : i32, i32
  }
  func.func @transform_5(%arg0: i32) -> (i32, i32) {
    %c0_i32 = arith.constant 0 : i32
    %c0_i32_0 = arith.constant 0 : i32
    %c0_i32_1 = arith.constant 0 : i32
    return %c0_i32, %c0_i32_0 : i32, i32
  }
  func.func @transform_6(%arg0: i32) -> (i32, i32) {
    %c0_i32 = arith.constant 0 : i32
    %c0_i32_0 = arith.constant 0 : i32
    %c0_i32_1 = arith.constant 0 : i32
    return %c0_i32, %c0_i32_0 : i32, i32
  }
  func.func @transform_10(%arg0: i32) -> (i32, i32) {
    %c0_i32 = arith.constant 0 : i32
    %c0_i32_0 = arith.constant 0 : i32
    %c0_i32_1 = arith.constant 0 : i32
    return %c0_i32, %c0_i32_0 : i32, i32
  }
  func.func @transform_11(%arg0: i32) -> (i32, i32) {
    %c0_i32 = arith.constant 0 : i32
    %c0_i32_0 = arith.constant 0 : i32
    %c0_i32_1 = arith.constant 0 : i32
    return %c0_i32, %c0_i32_0 : i32, i32
  }
  func.func @transform_12(%arg0: i32) -> (i32, i32) {
    %c0_i32 = arith.constant 0 : i32
    %c0_i32_0 = arith.constant 0 : i32
    %c0_i32_1 = arith.constant 0 : i32
    return %c0_i32, %c0_i32_0 : i32, i32
  }
  func.func @transform_13(%arg0: i32) -> (i32, i32) {
    %c0_i32 = arith.constant 0 : i32
    %c0_i32_0 = arith.constant 0 : i32
    %c0_i32_1 = arith.constant 0 : i32
    return %c0_i32, %c0_i32_0 : i32, i32
  }
  func.func @transform_14(%arg0: i32) -> (i32, i32) {
    %c0_i32 = arith.constant 0 : i32
    %c0_i32_0 = arith.constant 0 : i32
    %c0_i32_1 = arith.constant 0 : i32
    return %c0_i32, %c0_i32_0 : i32, i32
  }
  func.func @transform_15(%arg0: i32) -> (i32, i32) {
    %c0_i32 = arith.constant 0 : i32
    %c0_i32_0 = arith.constant 0 : i32
    %c0_i32_1 = arith.constant 0 : i32
    return %c0_i32, %c0_i32_0 : i32, i32
  }
}

</mosaic_0001>

<bundles_post_ra>
// kernel: fused_forward.1
= control target key start
LH: loop header
LB: loop body
LE: loop exit
PB: predicated region body
PF: predicated region fallthrough
CT: control target
= control target key end

     0   :  { %21 = vsyncpa [#allocation7], 0  ;;  %s13651_s0 = inlined_call_operand.hbm [shape: f32[16,512], index: 0, kind: input, shape index: {}]   ;;  %s13652_s1 = inlined_call_operand.hbm [shape: f32[1,1024], index: 1, kind: input, shape index: {}]   ;;  %s13653_s2 = inlined_call_operand.hbm [shape: f32[1,1024], index: 2, kind: input, shape index: {}]   ;;  %s13654_s3 = inlined_call_operand.vmem [shape: f32[1,1024], index: 3, kind: input, shape index: {}]   ;;  %s13655_s4 = inlined_call_operand.hbm [shape: f32[1,1024], index: 4, kind: input, shape index: {}]   ;;  %s13656_s5 = inlined_call_operand.hbm [shape: f32[1,1024], index: 5, kind: input, shape index: {}]   ;;  %s13657_s6 = inlined_call_operand.hbm [shape: f32[1,1024], index: 6, kind: input, shape index: {}]   ;;  %s13658_s7 = inlined_call_operand.hbm [shape: s8[512,1024], index: 7, kind: input, shape index: {}]   ;;  %s13659_s8 = inlined_call_operand.hbm [shape: s8[1024,1024], index: 8, kind: input, shape index: {}]   ;;  %s13660_s9 = inlined_call_operand.hbm [shape: s8[1024,1024], index: 9, kind: input, shape index: {}]   ;;  %s13661_s10 = inlined_call_operand.vmem [shape: f32[8,512], index: 10, kind: input, shape index: {}]   ;;  %s13662_s11 = inlined_call_operand.hbm [shape: f32[512,128], index: 11, kind: input, shape index: {}]   ;;  %s13663_s12 = inlined_call_operand.vmem [shape: f32[1,128], index: 12, kind: input, shape index: {}]   ;;  %s13664_s13 = inlined_call_operand.hbm [shape: f32[16,1024], index: 13, kind: output, shape index: {0}]   ;;  %s13665_s14 = inlined_call_operand.hbm [shape: f32[8,128], index: 14, kind: output, shape index: {1}]   ;;  %s13666_s15 = inlined_call_operand.hbm [shape: f32[8,512], index: 15, kind: output, shape index: {2}]  }
   0x1   :  { %22 = vsyncpa [#allocation10], 0 }
   0x2   :  { %23 = vsyncpa [#allocation13], 0 }
   0x3   :  { %24 = vsyncpa [#allocation16], 0 }
   0x4   :  { %25 = vsyncpa [#allocation8], 0 }
   0x5   :  { %26 = vsyncpa [#allocation20], 0  ;;  %s12912_s18 = smov [#allocation9]   ;;  %s12913_s20 = smov [#allocation12]  }
   0x6   :  { %s45_s19 = sshll.u32 %s12912_s18, 4  ;;  %s67_s21 = sshll.u32 %s12913_s20, 4  ;;  %s46_s19 = int_to_ptr.vmem [resolvable:$true] %s45_s19  ;;  %s68_s21 = int_to_ptr.vmem [resolvable:$true] %s67_s21 }
   0x7   :  { %s12608_s24 = scalar_lea.hbm %s13652_s1, 128 }
   0x8   :  { %p12609_p0 = scmp.ne.s32.totalorder %s13652_s1, %s12608_s24  ;;  %p12612_p1 = scmp.lt.u32.totalorder %s12608_s24, %s13652_s1 }
   0xa   :  { %p12614_p2 = pnand %p12612_p1, %p12609_p0 }
   0xc   :  { %12617 = shalt.err (!%p12614_p2)
}
   0xd   :  { %s12618_s29 = scalar_lea.vmem %s46_s19, 128  ;;  %p12623_p4 = scmp.lt.s32.totalorder %s46_s19, %s46_s19 }
   0xe   :  { %p12619_p3 = scmp.ne.s32.totalorder %s46_s19, %s12618_s29  ;;  %p12624_p5 = scmp.lt.s32.totalorder %s12618_s29, %s12618_s29 }
  0x10   :  { %p12625_p6 = por %p12624_p5, %p12623_p4 }
  0x12   :  { %p12626_p7 = pnand %p12625_p6, %p12619_p3 }
  0x14   :  { %12629 = shalt.err (!%p12626_p7)
}
  0x15   :  { %48 = dma.hbm_to_vmem [thread:$0]  %s13652_s1, 128, %s46_s19, [#allocation10]  }
  0x16   :  { %s12630_s20 = scalar_lea.hbm %s13655_s4, 128 }
  0x17   :  { %p12631_p8 = scmp.ne.s32.totalorder %s13655_s4, %s12630_s20  ;;  %p12634_p9 = scmp.lt.u32.totalorder %s12630_s20, %s13655_s4 }
  0x19   :  { %p12636_p10 = pnand %p12634_p9, %p12631_p8 }
  0x1b   :  { %12639 = shalt.err (!%p12636_p10)
}
  0x1c   :  { %s12640_s26 = scalar_lea.vmem %s68_s21, 128  ;;  %p12645_p12 = scmp.lt.s32.totalorder %s68_s21, %s68_s21 }
  0x1d   :  { %p12641_p11 = scmp.ne.s32.totalorder %s68_s21, %s12640_s26  ;;  %p12646_p13 = scmp.lt.s32.totalorder %s12640_s26, %s12640_s26 }
  0x1f   :  { %p12647_p0 = por %p12646_p13, %p12645_p12 }
  0x21   :  { %p12648_p1 = pnand %p12647_p0, %p12641_p11 }
  0x23   :  { %12651 = shalt.err (!%p12648_p1)
}
  0x24   :  { %70 = dma.hbm_to_vmem [thread:$0]  %s13655_s4, 128, %s68_s21, [#allocation13]  }
  0x25   :  { %s12914_s27 = smov [#allocation15]   ;;  %s12915_s29 = smov [#allocation6]  }
  0x26   :  { %s87_s28 = sshll.u32 %s12914_s27, 4  ;;  %s32_s30 = sshll.u32 %s12915_s29, 4  ;;  %s88_s28 = int_to_ptr.vmem [resolvable:$true] %s87_s28  ;;  %s13035_s30 = int_to_ptr.vmem [resolvable:$true] %s32_s30 }
  0x27   :  { %s12652_s18 = scalar_lea.hbm %s13657_s6, 128 }
  0x28   :  { %p12653_p2 = scmp.ne.s32.totalorder %s13657_s6, %s12652_s18  ;;  %p12656_p3 = scmp.lt.u32.totalorder %s12652_s18, %s13657_s6 }
  0x2a   :  { %p12658_p4 = pnand %p12656_p3, %p12653_p2 }
  0x2c   :  { %12661 = shalt.err (!%p12658_p4)
}
  0x2d   :  { %s12662_s4 = scalar_lea.vmem %s88_s28, 128  ;;  %p12667_p6 = scmp.lt.s32.totalorder %s88_s28, %s88_s28 }
  0x2e   :  { %p12663_p5 = scmp.ne.s32.totalorder %s88_s28, %s12662_s4  ;;  %p12668_p7 = scmp.lt.s32.totalorder %s12662_s4, %s12662_s4 }
  0x30   :  { %p12669_p8 = por %p12668_p7, %p12667_p6 }
  0x32   :  { %p12670_p9 = pnand %p12669_p8, %p12663_p5 }
  0x34   :  { %12673 = shalt.err (!%p12670_p9)
}
  0x35   :  { %90 = dma.hbm_to_vmem [thread:$0]  %s13657_s6, 128, %s88_s28, [#allocation16]  }
  0x36   :  { %s12674_s19 = scalar_lea.hbm %s13651_s0, 1024 }
  0x37   :  { %p12675_p10 = scmp.ne.s32.totalorder %s13651_s0, %s12674_s19  ;;  %p12678_p11 = scmp.lt.u32.totalorder %s12674_s19, %s13651_s0 }
  0x39   :  { %p12680_p12 = pnand %p12678_p11, %p12675_p10 }
  0x3b   :  { %12683 = shalt.err (!%p12680_p12)
}
  0x3c   :  { %s12684_s18 = scalar_lea.vmem %s13035_s30, 1024  ;;  %p12689_p0 = scmp.lt.s32.totalorder %s13035_s30, %s13035_s30 }
  0x3d   :  { %p12685_p13 = scmp.ne.s32.totalorder %s13035_s30, %s12684_s18  ;;  %p12690_p1 = scmp.lt.s32.totalorder %s12684_s18, %s12684_s18 }
  0x3f   :  { %p12691_p2 = por %p12690_p1, %p12689_p0 }
  0x41   :  { %p12692_p3 = pnand %p12691_p2, %p12685_p13 }
  0x43   :  { %12695 = shalt.err (!%p12692_p3)
}
  0x44   :  { %s12916_s6 = smov 512   ;;  %s12917_s28 = smov 32  }
  0x45   :  { %38 = dma.hbm_to_vmem [thread:$0]  %s13651_s0, 1024, %s13035_s30, [#allocation7], %s12916_s6, %s12916_s6, %s12917_s28  }
  0x46   :  { %s12918_s23 = smov [#allocation11]   ;;  %s12919_s4 = smov [#allocation14]  }
  0x47   :  { %s55_s24 = sshll.u32 %s12918_s23, 4  ;;  %s77_s21 = sshll.u32 %s12919_s4, 4  ;;  %s56_s24 = int_to_ptr.vmem [resolvable:$true] %s55_s24  ;;  %s78_s21 = int_to_ptr.vmem [resolvable:$true] %s77_s21 }
  0x48   :  { %s12696_s1 = scalar_lea.hbm %s13653_s2, 128 }
  0x49   :  { %p12697_p4 = scmp.ne.s32.totalorder %s13653_s2, %s12696_s1  ;;  %p12700_p5 = scmp.lt.u32.totalorder %s12696_s1, %s13653_s2 }
  0x4b   :  { %p12702_p6 = pnand %p12700_p5, %p12697_p4 }
  0x4d   :  { %12705 = shalt.err (!%p12702_p6)
}
  0x4e   :  { %s12706_s0 = scalar_lea.vmem %s56_s24, 128  ;;  %p12711_p8 = scmp.lt.s32.totalorder %s56_s24, %s56_s24 }
  0x4f   :  { %p12707_p7 = scmp.ne.s32.totalorder %s56_s24, %s12706_s0  ;;  %p12712_p9 = scmp.lt.s32.totalorder %s12706_s0, %s12706_s0 }
  0x51   :  { %p12713_p10 = por %p12712_p9, %p12711_p8 }
  0x53   :  { %p12714_p11 = pnand %p12713_p10, %p12707_p7 }
  0x55   :  { %12717 = shalt.err (!%p12714_p11)
}
  0x56   :  { %58 = dma.hbm_to_vmem [thread:$0]  %s13653_s2, 128, %s56_s24, [#allocation10]  }
  0x57   :  { %s12718_s28 = scalar_lea.hbm %s13656_s5, 128 }
  0x58   :  { %p12719_p12 = scmp.ne.s32.totalorder %s13656_s5, %s12718_s28  ;;  %p12722_p13 = scmp.lt.u32.totalorder %s12718_s28, %s13656_s5 }
  0x5a   :  { %p12724_p0 = pnand %p12722_p13, %p12719_p12 }
  0x5c   :  { %12727 = shalt.err (!%p12724_p0)
}
  0x5d   :  { %s12728_s25 = scalar_lea.vmem %s78_s21, 128  ;;  %p12733_p2 = scmp.lt.s32.totalorder %s78_s21, %s78_s21 }
  0x5e   :  { %p12729_p1 = scmp.ne.s32.totalorder %s78_s21, %s12728_s25  ;;  %p12734_p3 = scmp.lt.s32.totalorder %s12728_s25, %s12728_s25 }
  0x60   :  { %p12735_p4 = por %p12734_p3, %p12733_p2 }
  0x62   :  { %p12736_p5 = pnand %p12735_p4, %p12729_p1 }
  0x64   :  { %12739 = shalt.err (!%p12736_p5)
}
  0x65   :  { %80 = dma.hbm_to_vmem [thread:$0]  %s13656_s5, 128, %s78_s21, [#allocation13]  }
  0x66   :  { %s12920_s26 = smov [#allocation17]   ;;  %s12740_s29 = scalar_lea.hbm %s13662_s11, 8192 }
  0x67   :  { %s98_s1 = sshll.u32 %s12920_s26, 4  ;;  %p12741_p6 = scmp.ne.s32.totalorder %s13662_s11, %s12740_s29  ;;  %s99_s1 = int_to_ptr.vmem [resolvable:$true] %s98_s1 }
  0x68   :  { %p12744_p7 = scmp.lt.u32.totalorder %s12740_s29, %s13662_s11 }
  0x6a   :  { %p12746_p8 = pnand %p12744_p7, %p12741_p6 }
  0x6c   :  { %12749 = shalt.err (!%p12746_p8)
}
  0x6d   :  { %s12750_s18 = scalar_lea.vmem %s99_s1, 8192  ;;  %p12755_p10 = scmp.lt.s32.totalorder %s99_s1, %s99_s1 }
  0x6e   :  { %p12751_p9 = scmp.ne.s32.totalorder %s99_s1, %s12750_s18  ;;  %p12756_p11 = scmp.lt.s32.totalorder %s12750_s18, %s12750_s18 }
  0x70   :  { %p12757_p12 = por %p12756_p11, %p12755_p10 }
  0x72   :  { %p12758_p13 = pnand %p12757_p12, %p12751_p9 }
  0x74   :  { %12761 = shalt.err (!%p12758_p13)
}
  0x75   :  { %s12921_s5 = smov 128   ;;  %s12922_s21 = smov 8  }
  0x76   :  { %104 = dma.hbm_to_vmem [thread:$0]  %s13662_s11, 8192, %s99_s1, [#allocation16], %s12921_s5, %s12921_s5, %s12922_s21  }
  0x77   :  { %12894 = dma.done.wait [#allocation7], 1024  }
  0x78   :  { %12895 = vsyncadd [#allocation7], 4294966272 }
  0x79   :  { %12896 = dma.done.wait [#allocation10], 256  }
  0x7a   :  { %12897 = vsyncadd [#allocation10], 4294967040 }
  0x7b   :  { %12898 = dma.done.wait [#allocation13], 256  }
  0x7c   :  { %12899 = vsyncadd [#allocation13], 4294967040 }
  0x7d   :  { %12900 = dma.done.wait [#allocation16], 8320  }
  0x7e   :  { %12901 = vsyncadd [#allocation16], 4294958976  ;;  %v13102_v0 = vld [vmem:[#allocation6] sm:$0xff]  ;;  %v13104_v1 = vld [vmem:[#allocation6 + $0x8] sm:$0xff]  ;;  %s12924_s1 = smov [#allocation3]   ;;  %s12762_s16 = scalar_lea.hbm %s13658_s7, 16384 }
  0x7f   :  { %v13106_v2 = vld [vmem:[#allocation6 + $0x10] sm:$0xff]  ;;  %v13108_v3 = vld [vmem:[#allocation6 + $0x18] sm:$0xff]  ;;  %v13110_v4 = vld [vmem:[#allocation6 + $0x20] sm:$0xff]  ;;  %s147_s19 = sshll.u32 %s12924_s1, 4  ;;  %p12763_p0 = scmp.ne.s32.totalorder %s13658_s7, %s12762_s16  ;;  %s148_s19 = int_to_ptr.vmem [resolvable:$true] %s147_s19 }
  0x80   :  { %v13112_v5 = vld [vmem:[#allocation6 + $0x28] sm:$0xff]  ;;  %v13114_v6 = vld [vmem:[#allocation6 + $0x30] sm:$0xff]  ;;  %v13116_v7 = vld [vmem:[#allocation6 + $0x38] sm:$0xff]  ;;  %p12766_p1 = scmp.lt.u32.totalorder %s12762_s16, %s13658_s7 }
  0x81   :  { %v202_v8 = vld [vmem:[#allocation17 + $0x80] sm:$0xff]  ;;  %v203_v9 = vld [vmem:[#allocation17 + $0x88] sm:$0xff]  ;;  %v204_v19 = vld [vmem:[#allocation17 + $0x90] sm:$0xff] }
  0x82   :  { %v186_v10 = vld [vmem:[#allocation17] sm:$0xff]  ;;  %v187_v11 = vld [vmem:[#allocation17 + $0x8] sm:$0xff]  ;;  %v9847_v12 = vpack.c.bf16 %v203_v9, %v202_v8  ;;  %v205_v20 = vld [vmem:[#allocation17 + $0x98] sm:$0xff]  ;;  %p12768_p2 = pnand %p12766_p1, %p12763_p0 }
  0x83   :  { %v9849_v13 = vpack.c.bf16 %v187_v11, %v186_v10  ;;  %v234_v14 = vld [vmem:[#allocation17 + $0x180] sm:$0xff]  ;;  %v235_v15 = vld [vmem:[#allocation17 + $0x188] sm:$0xff]  ;;  %v9851_v22 = vpack.c.bf16 %v205_v20, %v204_v19  ;;  %v188_v23 = vld [vmem:[#allocation17 + $0x10] sm:$0xff] }
  0x84   :  { %v218_v16 = vld [vmem:[#allocation17 + $0x100] sm:$0xff]  ;;  %v9879_v17 = vpack.c.bf16 %v235_v15, %v234_v14  ;;  %v219_v18 = vld [vmem:[#allocation17 + $0x108] sm:$0xff]  ;;  %9848 = vmatprep.subr.bf16.mxu0 %v9847_v12  ;;  %v189_v24 = vld [vmem:[#allocation17 + $0x18] sm:$0xff] }
  0x85   :  { %v9881_v21 = vpack.c.bf16 %v219_v18, %v218_v16  ;;  %v236_v25 = vld [vmem:[#allocation17 + $0x190] sm:$0xff]  ;;  %9850 = vmatpush3.bf16.msra.mxu0 %v9849_v13  ;;  %v9853_v26 = vpack.c.bf16 %v189_v24, %v188_v23  ;;  %v237_v27 = vld [vmem:[#allocation17 + $0x198] sm:$0xff]  ;;  %v206_v32 = vld [vmem:[#allocation17 + $0xa0] sm:$0xff] }
  0x86   :  { %9880 = vmatprep.subr.bf16.mxu1 %v9879_v17  ;;  %v220_v28 = vld [vmem:[#allocation17 + $0x110] sm:$0xff]  ;;  %v221_v29 = vld [vmem:[#allocation17 + $0x118] sm:$0xff]  ;;  %9852 = vmatprep.subr.bf16.mxu0 %v9851_v22  ;;  %v9883_v30 = vpack.c.bf16 %v237_v27, %v236_v25  ;;  %v207_v33 = vld [vmem:[#allocation17 + $0xa8] sm:$0xff] }
  0x87   :  { %9882 = vmatpush3.bf16.msra.mxu1 %v9881_v21  ;;  %v9885_v31 = vpack.c.bf16 %v221_v29, %v220_v28  ;;  %v190_v34 = vld [vmem:[#allocation17 + $0x20] sm:$0xff]  ;;  %v9855_v35 = vpack.c.bf16 %v207_v33, %v206_v32  ;;  %v191_v36 = vld [vmem:[#allocation17 + $0x28] sm:$0xff]  ;;  %v208_v42 = vld [vmem:[#allocation17 + $0xb0] sm:$0xff] }
  0x88   :  { %v238_v37 = vld [vmem:[#allocation17 + $0x1a0] sm:$0xff]  ;;  %v239_v38 = vld [vmem:[#allocation17 + $0x1a8] sm:$0xff]  ;;  %9884 = vmatprep.subr.bf16.mxu1 %v9883_v30  ;;  %v9857_v43 = vpack.c.bf16 %v191_v36, %v190_v34  ;;  %v209_v44 = vld [vmem:[#allocation17 + $0xb8] sm:$0xff] }
  0x89   :  { %v9887_v39 = vpack.c.bf16 %v239_v38, %v238_v37  ;;  %v222_v40 = vld [vmem:[#allocation17 + $0x120] sm:$0xff]  ;;  %v223_v41 = vld [vmem:[#allocation17 + $0x128] sm:$0xff]  ;;  %9854 = vmatpush3.bf16.msra.mxu0 %v9853_v26  ;;  %v192_v45 = vld [vmem:[#allocation17 + $0x30] sm:$0xff]  ;;  %v9859_v48 = vpack.c.bf16 %v209_v44, %v208_v42 }
  0x8a   :  { %v193_v46 = vld [vmem:[#allocation17 + $0x38] sm:$0xff]  ;;  %9856 = vmatprep.subr.bf16.mxu0 %v9855_v35  ;;  %v9889_v47 = vpack.c.bf16 %v223_v41, %v222_v40  ;;  %v240_v49 = vld [vmem:[#allocation17 + $0x1b0] sm:$0xff]  ;;  %v210_v54 = vld [vmem:[#allocation17 + $0xc0] sm:$0xff] }
  0x8b   :  { %9886 = vmatpush3.bf16.msra.mxu1 %v9885_v31  ;;  %v241_v50 = vld [vmem:[#allocation17 + $0x1b8] sm:$0xff]  ;;  %v224_v51 = vld [vmem:[#allocation17 + $0x130] sm:$0xff]  ;;  %v211_v55 = vld [vmem:[#allocation17 + $0xc8] sm:$0xff]  ;;  %v9861_v57 = vpack.c.bf16 %v193_v46, %v192_v45 }
  0x8c   :  { %9888 = vmatprep.subr.bf16.mxu1 %v9887_v39  ;;  %v9891_v52 = vpack.c.bf16 %v241_v50, %v240_v49  ;;  %v225_v53 = vld [vmem:[#allocation17 + $0x138] sm:$0xff]  ;;  %v242_v56 = vld [vmem:[#allocation17 + $0x1c0] sm:$0xff]  ;;  %v243_v58 = vld [vmem:[#allocation17 + $0x1c8] sm:$0xff]  ;;  %v9863_v60 = vpack.c.bf16 %v211_v55, %v210_v54 }
  0x8d   :  { %9858 = vmatpush3.bf16.msra.mxu0 %v9857_v43  ;;  %v9893_v59 = vpack.c.bf16 %v225_v53, %v224_v51  ;;  %v194_v61 = vld [vmem:[#allocation17 + $0x40] sm:$0xff]  ;;  %v195_v62 = vld [vmem:[#allocation17 + $0x48] sm:$0xff]  ;;  %v9895_v8 = vpack.c.bf16 %v243_v58, %v242_v56  ;;  %v212_v10 = vld [vmem:[#allocation17 + $0xd0] sm:$0xff] }
  0x8e   :  { %9860 = vmatprep.subr.bf16.mxu0 %v9859_v48  ;;  %v226_v63 = vld [vmem:[#allocation17 + $0x140] sm:$0xff]  ;;  %v227_v9 = vld [vmem:[#allocation17 + $0x148] sm:$0xff]  ;;  %v213_v11 = vld [vmem:[#allocation17 + $0xd8] sm:$0xff]  ;;  %v9865_v14 = vpack.c.bf16 %v195_v62, %v194_v61 }
  0x8f   :  { %9890 = vmatpush3.bf16.msra.mxu1 %v9889_v47  ;;  %v244_v12 = vld [vmem:[#allocation17 + $0x1d0] sm:$0xff]  ;;  %v245_v13 = vld [vmem:[#allocation17 + $0x1d8] sm:$0xff]  ;;  %v9897_v15 = vpack.c.bf16 %v227_v9, %v226_v63  ;;  %v9867_v16 = vpack.c.bf16 %v213_v11, %v212_v10  ;;  %v214_v22 = vld [vmem:[#allocation17 + $0xe0] sm:$0xff] }
  0x90   :  { %9892 = vmatprep.subr.bf16.mxu1 %v9891_v52  ;;  %v196_v17 = vld [vmem:[#allocation17 + $0x50] sm:$0xff]  ;;  %v197_v18 = vld [vmem:[#allocation17 + $0x58] sm:$0xff]  ;;  %v9899_v20 = vpack.c.bf16 %v245_v13, %v244_v12  ;;  %v215_v23 = vld [vmem:[#allocation17 + $0xe8] sm:$0xff] }
  0x91   :  { %9862 = vmatpush3.bf16.msra.mxu0 %v9861_v57  ;;  %v228_v19 = vld [vmem:[#allocation17 + $0x150] sm:$0xff]  ;;  %v229_v21 = vld [vmem:[#allocation17 + $0x158] sm:$0xff]  ;;  %v198_v24 = vld [vmem:[#allocation17 + $0x60] sm:$0xff]  ;;  %v9869_v27 = vpack.c.bf16 %v197_v18, %v196_v17  ;;  %v9871_v32 = vpack.c.bf16 %v215_v23, %v214_v22 }
  0x92   :  { %9864 = vmatprep.subr.bf16.mxu0 %v9863_v60  ;;  %v246_v25 = vld [vmem:[#allocation17 + $0x1e0] sm:$0xff]  ;;  %v247_v26 = vld [vmem:[#allocation17 + $0x1e8] sm:$0xff]  ;;  %v9901_v31 = vpack.c.bf16 %v229_v21, %v228_v19  ;;  %v13126_v34 = vld [vmem:[%s13661_s10] sm:$0xff] }
  0x93   :  { %9894 = vmatpush3.bf16.msra.mxu1 %v9893_v59  ;;  %v199_v28 = vld [vmem:[#allocation17 + $0x68] sm:$0xff]  ;;  %v230_v29 = vld [vmem:[#allocation17 + $0x160] sm:$0xff]  ;;  %v13131_v35 = vld [vmem:[%s13661_s10 + $0x18] sm:$0xff]  ;;  %v9903_v36 = vpack.c.bf16 %v247_v26, %v246_v25  ;;  %v167_v40 = vmul.f32 %v13126_v34, %v13126_v34 }
  0x94   :  { %9896 = vmatprep.subr.bf16.mxu1 %v9895_v8  ;;  %v231_v30 = vld [vmem:[#allocation17 + $0x168] sm:$0xff]  ;;  %v13121_v33 = vld [vmem:[%s13661_s10 + $0x8] sm:$0xff]  ;;  %v216_v37 = vld [vmem:[#allocation17 + $0xf0] sm:$0xff]  ;;  %391 = vmatprep.mubr.f32.mxu1 %v13131_v35  ;;  %v9873_v45 = vpack.c.bf16 %v199_v28, %v198_v24  ;;  %v170_v46 = vmul.f32 %v13131_v35, %v13131_v35 }
  0x95   :  { %9866 = vmatpush3.bf16.msra.mxu0 %v9865_v14  ;;  %v217_v38 = vld [vmem:[#allocation17 + $0xf8] sm:$0xff]  ;;  %v168_v39 = vmul.f32 %v13121_v33, %v13121_v33  ;;  %321 = vmatprep.mubr.f32.mxu0 %v13121_v33  ;;  %v13141_v41 = vld [vmem:[%s13661_s10 + $0x10] sm:$0xff]  ;;  %v248_v42 = vld [vmem:[#allocation17 + $0x1f0] sm:$0xff]  ;;  %v9905_v48 = vpack.c.bf16 %v231_v30, %v230_v29  ;;  %s12923_s10 = smov [#allocation2]  }
  0x96   :  { %9868 = vmatprep.subr.bf16.mxu0 %v9867_v16  ;;  %v249_v43 = vld [vmem:[#allocation17 + $0x1f8] sm:$0xff]  ;;  %v169_v44 = vmul.f32 %v13141_v41, %v13141_v41  ;;  %v9875_v49 = vpack.c.bf16 %v217_v38, %v216_v37  ;;  %v200_v50 = vld [vmem:[#allocation17 + $0x70] sm:$0xff]  ;;  %s135_s26 = sshll.u32 %s12923_s10, 4  ;;  %s136_s26 = int_to_ptr.vmem [resolvable:$true] %s135_s26 }
  0x97   :  { %9898 = vmatpush3.bf16.msra.mxu1 %v9897_v15  ;;  %v171_v47 = vadd.f32 %v168_v39, %v167_v40  ;;  %v201_v51 = vld [vmem:[#allocation17 + $0x78] sm:$0xff]  ;;  %v9907_v52 = vpack.c.bf16 %v249_v43, %v248_v42  ;;  %v232_v53 = vld [vmem:[#allocation17 + $0x170] sm:$0xff] }
  0x98   :  { %9900 = vmatprep.subr.bf16.mxu1 %v9899_v20  ;;  %v233_v54 = vld [vmem:[#allocation17 + $0x178] sm:$0xff]  ;;  %v9877_v56 = vpack.c.bf16 %v201_v51, %v200_v50 }
  0x99   :  { %9870 = vmatpush3.bf16.msra.mxu0 %v9869_v27  ;;  %v172_v55 = vadd.f32 %v171_v47, %v169_v44  ;;  %v9909_v58 = vpack.c.bf16 %v233_v54, %v232_v53 }
  0x9a   :  { %9872 = vmatprep.subr.bf16.mxu0 %v9871_v32 }
  0x9b   :  { %9902 = vmatpush3.bf16.msra.mxu1 %v9901_v31  ;;  %v173_v57 = vadd.f32 %v172_v55, %v170_v46 }
  0x9c   :  { %9904 = vmatprep.subr.bf16.mxu1 %v9903_v36 }
  0x9d   :  { %9874 = vmatpush3.bf16.msra.mxu0 %v9873_v45  ;;  %174 = vadd.xlane.f32.xlu0 %v173_v57 }
  0x9e   :  { %9876 = vmatprep.subr.bf16.mxu0 %v9875_v49 }
  0x9f   :  { %9906 = vmatpush3.bf16.msra.mxu1 %v9905_v48 }
  0xa0   :  { %9908 = vmatprep.subr.bf16.mxu1 %v9907_v52 }
  0xa1   :  { %9878 = vmatpush3.bf16.msra.mxu0 %v9877_v56 }
  0xa3   :  { %9910 = vmatpush3.bf16.msra.mxu1 %v9909_v58 }
  0xa4   :  { %322 = vmatmul.mubr.f32.vlgmr.msra.gmra.mrb[0].mxu0 %v13126_v34 }
  0xa6   :  { %392 = vmatmul.mubr.f32.vlgmr.msra.gmra.mrb[0].mxu1 %v13141_v41 }
  0xa7   :  { %12771 = shalt.err (!%p12768_p2)  }
  0xa8   :  { %s12772_s5 = scalar_lea.vmem %s136_s26, 16384  ;;  %p12777_p4 = scmp.lt.s32.totalorder %s136_s26, %s136_s26 }
  0xa9   :  { %p12773_p3 = scmp.ne.s32.totalorder %s136_s26, %s12772_s5  ;;  %p12778_p5 = scmp.lt.s32.totalorder %s12772_s5, %s12772_s5 }
  0xab   :  { %p12779_p6 = por %p12778_p5, %p12777_p4 }
  0xad   :  { %p12780_p7 = pnand %p12779_p6, %p12773_p3 }
  0xaf   :  { %12783 = shalt.err (!%p12780_p7)  }
  0xb0   :  { %138 = dma.hbm_to_vmem [thread:$0]  %s13658_s7, 16384, %s136_s26, [#allocation5] }
  0xb1   :  { %s12784_s20 = scalar_lea.hbm %s13659_s8, 32768 }
  0xb2   :  { %p12785_p8 = scmp.ne.s32.totalorder %s13659_s8, %s12784_s20  ;;  %p12788_p9 = scmp.lt.u32.totalorder %s12784_s20, %s13659_s8 }
  0xb4   :  { %p12790_p10 = pnand %p12788_p9, %p12785_p8 }
  0xb6   :  { %12793 = shalt.err (!%p12790_p10)  }
  0xb7   :  { %s12794_s2 = scalar_lea.vmem %s148_s19, 32768  ;;  %p12799_p12 = scmp.lt.s32.totalorder %s148_s19, %s148_s19 }
  0xb8   :  { %p12795_p11 = scmp.ne.s32.totalorder %s148_s19, %s12794_s2  ;;  %p12800_p13 = scmp.lt.s32.totalorder %s12794_s2, %s12794_s2 }
  0xba   :  { %p12801_p0 = por %p12800_p13, %p12799_p12 }
  0xbc   :  { %p12802_p1 = pnand %p12801_p0, %p12795_p11 }
  0xbe   :  { %12805 = shalt.err (!%p12802_p1)  }
  0xbf   :  { %150 = dma.hbm_to_vmem [thread:$0]  %s13659_s8, 32768, %s148_s19, [#allocation5 + $0x1] }
  0xc0   :  { %s12925_s10 = smov [#allocation4]   ;;  %s12806_s29 = scalar_lea.hbm %s13660_s9, 32768 }
  0xc1   :  { %s159_s26 = sshll.u32 %s12925_s10, 4  ;;  %p12807_p2 = scmp.ne.s32.totalorder %s13660_s9, %s12806_s29  ;;  %s160_s26 = int_to_ptr.vmem [resolvable:$true] %s159_s26 }
  0xc2   :  { %p12810_p3 = scmp.lt.u32.totalorder %s12806_s29, %s13660_s9 }
  0xc4   :  { %p12812_p4 = pnand %p12810_p3, %p12807_p2 }
  0xc6   :  { %12815 = shalt.err (!%p12812_p4)  }
  0xc7   :  { %s12816_s18 = scalar_lea.vmem %s160_s26, 32768  ;;  %p12821_p6 = scmp.lt.s32.totalorder %s160_s26, %s160_s26 }
  0xc8   :  { %p12817_p5 = scmp.ne.s32.totalorder %s160_s26, %s12816_s18  ;;  %p12822_p7 = scmp.lt.s32.totalorder %s12816_s18, %s12816_s18 }
  0xca   :  { %p12823_p8 = por %p12822_p7, %p12821_p6 }
  0xcc   :  { %p12824_p9 = pnand %p12823_p8, %p12817_p5 }
  0xce   :  { %12827 = shalt.err (!%p12824_p9)  }
  0xcf   :  { %162 = dma.hbm_to_vmem [thread:$0]  %s13660_s9, 32768, %s160_s26, [#allocation5 + $0x2]  ;;  %v9773_v11 = vld [vmem:[%s13663_s12] ss:$0 sm:$0xff] }
 0x12a   :  { %v175_v59 = vpop.xlane.xlu0 %174 }
 0x12b   :  { %v176_v60 = vadd.f32 1e-12, %v175_v59 }
 0x12d   :  { %12602 = vrsqrt.f32 %v176_v60 }
 0x137   :  { %v12603_v61 = vpop.eup %12602 }
 0x138   :  { %v178_v62 = vmul.f32 %v12603_v61, %v13126_v34  ;;  %v179_v63 = vmul.f32 %v12603_v61, %v13121_v33  ;;  %v180_v8 = vmul.f32 %v12603_v61, %v13141_v41  ;;  %v181_v9 = vmul.f32 %v12603_v61, %v13131_v35 }
 0x13a   :  { %182 = vst [vmem:[#allocation21] sm:$0xff] %v178_v62  ;;  %183 = vst [vmem:[#allocation21 + $0x8] sm:$0xff] %v179_v63 }
 0x13b   :  { %184 = vst [vmem:[#allocation21 + $0x10] sm:$0xff] %v180_v8  ;;  %185 = vst [vmem:[#allocation21 + $0x18] sm:$0xff] %v181_v9 }
 0x177   :  { %v9809_v10 = vpop.f32.mrb[0].mxu0 }
 0x178   :  { %v9810_v12 = vpop.f32.mrb[1].mxu0 }
 0x179   :  { %v9844_v13 = vpop.f32.mrb[0].mxu1  ;;  %v9811_v14 = vadd.f32 %v9810_v12, %v9809_v10 }
 0x17a   :  { %v9845_v15 = vpop.f32.mrb[1].mxu1 }
 0x17b   :  { %v9846_v16 = vadd.f32 %v9845_v15, %v9844_v13  ;;  %v324_v17 = vadd.f32 %v9811_v14, %v9773_v11 }
 0x17d   :  { %v394_v18 = vadd.f32 %v9846_v16, %v324_v17 }
 0x17f   :  { %397 = vst [vmem:[#allocation19] sm:$0xff] %v394_v18 }
 0x180   :  { %12902 = dma.done.wait [#allocation5], 16384 }
 0x181   :  { %12903 = vsyncadd [#allocation5], 4294950912  ;;  %1626 = vmatprep.mubr.f32.mxu0 %v13104_v1  ;;  %1780 = vmatprep.mubr.f32.mxu1 %v13104_v1  ;;  %v411_v19 = vld [vmem:[#allocation2 + $0x8] sm:$0xff]  ;;  %v413_v20 = vld [vmem:[#allocation2 + $0x18] sm:$0xff] }
 0x182   :  { %v410_v21 = vld [vmem:[#allocation2] sm:$0xff]  ;;  %v9911_v22 = vunpack.c.l.s8.bf16 %v411_v19  ;;  %v9915_v23 = vunpack.c.h.s8.bf16 %v411_v19  ;;  %v10039_v24 = vunpack.c.l.s8.bf16 %v413_v20  ;;  %v10043_v25 = vunpack.c.h.s8.bf16 %v413_v20  ;;  %v412_v26 = vld [vmem:[#allocation2 + $0x10] sm:$0xff]  ;;  %v419_v29 = vld [vmem:[#allocation2 + $0x48] sm:$0xff] }
 0x183   :  { %v9913_v27 = vunpack.c.l.s8.bf16 %v410_v21  ;;  %v10041_v28 = vunpack.c.l.s8.bf16 %v412_v26  ;;  %v421_v30 = vld [vmem:[#allocation2 + $0x58] sm:$0xff]  ;;  %v9917_v31 = vunpack.c.h.s8.bf16 %v410_v21  ;;  %v10045_v32 = vunpack.c.h.s8.bf16 %v412_v26  ;;  %v418_v35 = vld [vmem:[#allocation2 + $0x40] sm:$0xff]  ;;  %v420_v36 = vld [vmem:[#allocation2 + $0x50] sm:$0xff] }
 0x184   :  { %9912 = vmatprep.subr.bf16.mxu0 %v9911_v22  ;;  %10040 = vmatprep.subr.bf16.mxu1 %v10039_v24  ;;  %v9919_v33 = vunpack.c.l.s8.bf16 %v419_v29  ;;  %v10047_v34 = vunpack.c.l.s8.bf16 %v421_v30  ;;  %v9921_v37 = vunpack.c.l.s8.bf16 %v418_v35  ;;  %v10049_v38 = vunpack.c.l.s8.bf16 %v420_v36  ;;  %v427_v41 = vld [vmem:[#allocation2 + $0x88] sm:$0xff]  ;;  %v429_v42 = vld [vmem:[#allocation2 + $0x98] sm:$0xff]  ;;  %v426_v47 = vld [vmem:[#allocation2 + $0x80] sm:$0xff] }
 0x185   :  { %9914 = vmatpush1.bf16.msra.mxu0 %v9913_v27  ;;  %10042 = vmatpush1.bf16.msra.mxu1 %v10041_v28  ;;  %v9923_v39 = vunpack.c.h.s8.bf16 %v419_v29  ;;  %v10051_v40 = vunpack.c.h.s8.bf16 %v421_v30  ;;  %v9925_v43 = vunpack.c.h.s8.bf16 %v418_v35  ;;  %v10053_v44 = vunpack.c.h.s8.bf16 %v420_v36  ;;  %v428_v48 = vld [vmem:[#allocation2 + $0x90] sm:$0xff]  ;;  %v435_v53 = vld [vmem:[#allocation2 + $0xc8] sm:$0xff]  ;;  %v437_v54 = vld [vmem:[#allocation2 + $0xd8] sm:$0xff] }
 0x186   :  { %9916 = vmatprep.subr.bf16.mxu0 %v9915_v23  ;;  %10044 = vmatprep.subr.bf16.mxu1 %v10043_v25  ;;  %v9927_v45 = vunpack.c.l.s8.bf16 %v427_v41  ;;  %v10055_v46 = vunpack.c.l.s8.bf16 %v429_v42  ;;  %v9929_v49 = vunpack.c.l.s8.bf16 %v426_v47  ;;  %v10057_v50 = vunpack.c.l.s8.bf16 %v428_v48  ;;  %v434_v59 = vld [vmem:[#allocation2 + $0xc0] sm:$0xff]  ;;  %v436_v60 = vld [vmem:[#allocation2 + $0xd0] sm:$0xff]  ;;  %v443_v9 = vld [vmem:[#allocation2 + $0x108] sm:$0xff] }
 0x187   :  { %v9931_v51 = vunpack.c.h.s8.bf16 %v427_v41  ;;  %v10059_v52 = vunpack.c.h.s8.bf16 %v429_v42  ;;  %v9933_v55 = vunpack.c.h.s8.bf16 %v426_v47  ;;  %v10061_v56 = vunpack.c.h.s8.bf16 %v428_v48  ;;  %v445_v10 = vld [vmem:[#allocation2 + $0x118] sm:$0xff]  ;;  %v442_v15 = vld [vmem:[#allocation2 + $0x100] sm:$0xff]  ;;  %v444_v16 = vld [vmem:[#allocation2 + $0x110] sm:$0xff] }
 0x188   :  { %v9935_v57 = vunpack.c.l.s8.bf16 %v435_v53  ;;  %v10063_v58 = vunpack.c.l.s8.bf16 %v437_v54  ;;  %v9937_v61 = vunpack.c.l.s8.bf16 %v434_v59  ;;  %v10065_v62 = vunpack.c.l.s8.bf16 %v436_v60  ;;  %v451_v21 = vld [vmem:[#allocation2 + $0x148] sm:$0xff]  ;;  %v453_v22 = vld [vmem:[#allocation2 + $0x158] sm:$0xff]  ;;  %v450_v27 = vld [vmem:[#allocation2 + $0x140] sm:$0xff] }
 0x189   :  { %9918 = vmatpush1.bf16.msra.mxu0 %v9917_v31  ;;  %10046 = vmatpush1.bf16.msra.mxu1 %v10045_v32  ;;  %v9939_v63 = vunpack.c.h.s8.bf16 %v435_v53  ;;  %v10067_v8 = vunpack.c.h.s8.bf16 %v437_v54  ;;  %v9941_v11 = vunpack.c.h.s8.bf16 %v434_v59  ;;  %v10069_v12 = vunpack.c.h.s8.bf16 %v436_v60  ;;  %v452_v28 = vld [vmem:[#allocation2 + $0x150] sm:$0xff] }
 0x18a   :  { %9920 = vmatprep.subr.bf16.mxu0 %v9919_v33  ;;  %10048 = vmatprep.subr.bf16.mxu1 %v10047_v34  ;;  %v9943_v13 = vunpack.c.l.s8.bf16 %v443_v9  ;;  %v10071_v14 = vunpack.c.l.s8.bf16 %v445_v10  ;;  %v9945_v17 = vunpack.c.l.s8.bf16 %v442_v15  ;;  %v10073_v18 = vunpack.c.l.s8.bf16 %v444_v16  ;;  %v459_v33 = vld [vmem:[#allocation2 + $0x188] sm:$0xff]  ;;  %v461_v34 = vld [vmem:[#allocation2 + $0x198] sm:$0xff] }
 0x18b   :  { %v9947_v19 = vunpack.c.h.s8.bf16 %v443_v9  ;;  %v10075_v20 = vunpack.c.h.s8.bf16 %v445_v10  ;;  %v9949_v23 = vunpack.c.h.s8.bf16 %v442_v15  ;;  %v10077_v24 = vunpack.c.h.s8.bf16 %v444_v16 }
 0x18c   :  { %v9951_v25 = vunpack.c.l.s8.bf16 %v451_v21  ;;  %v10079_v26 = vunpack.c.l.s8.bf16 %v453_v22  ;;  %v9953_v29 = vunpack.c.l.s8.bf16 %v450_v27  ;;  %v10081_v30 = vunpack.c.l.s8.bf16 %v452_v28 }
 0x18d   :  { %9922 = vmatpush1.bf16.msra.mxu0 %v9921_v37  ;;  %10050 = vmatpush1.bf16.msra.mxu1 %v10049_v38  ;;  %v9955_v31 = vunpack.c.h.s8.bf16 %v451_v21  ;;  %v10083_v32 = vunpack.c.h.s8.bf16 %v453_v22  ;;  %v9957_v35 = vunpack.c.h.s8.bf16 %v450_v27  ;;  %v10085_v36 = vunpack.c.h.s8.bf16 %v452_v28 }
 0x18e   :  { %9924 = vmatprep.subr.bf16.mxu0 %v9923_v39  ;;  %10052 = vmatprep.subr.bf16.mxu1 %v10051_v40  ;;  %v9959_v37 = vunpack.c.l.s8.bf16 %v459_v33  ;;  %v10087_v38 = vunpack.c.l.s8.bf16 %v461_v34  ;;  %v458_v39 = vld [vmem:[#allocation2 + $0x180] sm:$0xff]  ;;  %v460_v40 = vld [vmem:[#allocation2 + $0x190] sm:$0xff] }
 0x18f   :  { %v9961_v41 = vunpack.c.l.s8.bf16 %v458_v39  ;;  %v10089_v42 = vunpack.c.l.s8.bf16 %v460_v40  ;;  %v9965_v47 = vunpack.c.h.s8.bf16 %v458_v39  ;;  %v10093_v48 = vunpack.c.h.s8.bf16 %v460_v40 }
 0x191   :  { %9926 = vmatpush1.bf16.msra.mxu0 %v9925_v43  ;;  %10054 = vmatpush1.bf16.msra.mxu1 %v10053_v44  ;;  %v9963_v43 = vunpack.c.h.s8.bf16 %v459_v33  ;;  %v10091_v44 = vunpack.c.h.s8.bf16 %v461_v34 }
 0x192   :  { %9928 = vmatprep.subr.bf16.mxu0 %v9927_v45  ;;  %10056 = vmatprep.subr.bf16.mxu1 %v10055_v46  ;;  %v467_v45 = vld [vmem:[#allocation2 + $0x1c8] sm:$0xff]  ;;  %v469_v46 = vld [vmem:[#allocation2 + $0x1d8] sm:$0xff] }
 0x195   :  { %9930 = vmatpush1.bf16.msra.mxu0 %v9929_v49  ;;  %10058 = vmatpush1.bf16.msra.mxu1 %v10057_v50  ;;  %v9967_v49 = vunpack.c.l.s8.bf16 %v467_v45  ;;  %v10095_v50 = vunpack.c.l.s8.bf16 %v469_v46 }
 0x196   :  { %9932 = vmatprep.subr.bf16.mxu0 %v9931_v51  ;;  %10060 = vmatprep.subr.bf16.mxu1 %v10059_v52  ;;  %v466_v51 = vld [vmem:[#allocation2 + $0x1c0] sm:$0xff]  ;;  %v468_v52 = vld [vmem:[#allocation2 + $0x1d0] sm:$0xff] }
 0x197   :  { %v9969_v53 = vunpack.c.l.s8.bf16 %v466_v51  ;;  %v10097_v54 = vunpack.c.l.s8.bf16 %v468_v52  ;;  %v9973_v59 = vunpack.c.h.s8.bf16 %v466_v51  ;;  %v10101_v60 = vunpack.c.h.s8.bf16 %v468_v52 }
 0x199   :  { %9934 = vmatpush1.bf16.msra.mxu0 %v9933_v55  ;;  %10062 = vmatpush1.bf16.msra.mxu1 %v10061_v56  ;;  %v9971_v55 = vunpack.c.h.s8.bf16 %v467_v45  ;;  %v10099_v56 = vunpack.c.h.s8.bf16 %v469_v46 }
 0x19a   :  { %9936 = vmatprep.subr.bf16.mxu0 %v9935_v57  ;;  %10064 = vmatprep.subr.bf16.mxu1 %v10063_v58  ;;  %v475_v57 = vld [vmem:[#allocation2 + $0x208] sm:$0xff]  ;;  %v477_v58 = vld [vmem:[#allocation2 + $0x218] sm:$0xff] }
 0x19d   :  { %9938 = vmatpush1.bf16.msra.mxu0 %v9937_v61  ;;  %10066 = vmatpush1.bf16.msra.mxu1 %v10065_v62  ;;  %v9975_v61 = vunpack.c.l.s8.bf16 %v475_v57  ;;  %v10103_v62 = vunpack.c.l.s8.bf16 %v477_v58 }
 0x19e   :  { %9940 = vmatprep.subr.bf16.mxu0 %v9939_v63  ;;  %10068 = vmatprep.subr.bf16.mxu1 %v10067_v8  ;;  %v474_v63 = vld [vmem:[#allocation2 + $0x200] sm:$0xff]  ;;  %v476_v8 = vld [vmem:[#allocation2 + $0x210] sm:$0xff] }
 0x19f   :  { %v9977_v9 = vunpack.c.l.s8.bf16 %v474_v63  ;;  %v10105_v10 = vunpack.c.l.s8.bf16 %v476_v8  ;;  %v9981_v15 = vunpack.c.h.s8.bf16 %v474_v63  ;;  %v10109_v16 = vunpack.c.h.s8.bf16 %v476_v8 }
 0x1a1   :  { %9942 = vmatpush1.bf16.msra.mxu0 %v9941_v11  ;;  %10070 = vmatpush1.bf16.msra.mxu1 %v10069_v12  ;;  %v9979_v11 = vunpack.c.h.s8.bf16 %v475_v57  ;;  %v10107_v12 = vunpack.c.h.s8.bf16 %v477_v58 }
 0x1a2   :  { %9944 = vmatprep.subr.bf16.mxu0 %v9943_v13  ;;  %10072 = vmatprep.subr.bf16.mxu1 %v10071_v14  ;;  %v483_v13 = vld [vmem:[#allocation2 + $0x248] sm:$0xff]  ;;  %v485_v14 = vld [vmem:[#allocation2 + $0x258] sm:$0xff] }
 0x1a5   :  { %9946 = vmatpush1.bf16.msra.mxu0 %v9945_v17  ;;  %10074 = vmatpush1.bf16.msra.mxu1 %v10073_v18  ;;  %v9983_v17 = vunpack.c.l.s8.bf16 %v483_v13  ;;  %v10111_v18 = vunpack.c.l.s8.bf16 %v485_v14 }
 0x1a6   :  { %9948 = vmatprep.subr.bf16.mxu0 %v9947_v19  ;;  %10076 = vmatprep.subr.bf16.mxu1 %v10075_v20  ;;  %v482_v19 = vld [vmem:[#allocation2 + $0x240] sm:$0xff]  ;;  %v484_v20 = vld [vmem:[#allocation2 + $0x250] sm:$0xff] }
 0x1a7   :  { %v9985_v21 = vunpack.c.l.s8.bf16 %v482_v19  ;;  %v10113_v22 = vunpack.c.l.s8.bf16 %v484_v20  ;;  %v9989_v27 = vunpack.c.h.s8.bf16 %v482_v19  ;;  %v10117_v28 = vunpack.c.h.s8.bf16 %v484_v20 }
 0x1a9   :  { %9950 = vmatpush1.bf16.msra.mxu0 %v9949_v23  ;;  %10078 = vmatpush1.bf16.msra.mxu1 %v10077_v24  ;;  %v9987_v23 = vunpack.c.h.s8.bf16 %v483_v13  ;;  %v10115_v24 = vunpack.c.h.s8.bf16 %v485_v14 }
 0x1aa   :  { %9952 = vmatprep.subr.bf16.mxu0 %v9951_v25  ;;  %10080 = vmatprep.subr.bf16.mxu1 %v10079_v26  ;;  %v491_v25 = vld [vmem:[#allocation2 + $0x288] sm:$0xff]  ;;  %v493_v26 = vld [vmem:[#allocation2 + $0x298] sm:$0xff] }
 0x1ad   :  { %9954 = vmatpush1.bf16.msra.mxu0 %v9953_v29  ;;  %10082 = vmatpush1.bf16.msra.mxu1 %v10081_v30  ;;  %v9991_v29 = vunpack.c.l.s8.bf16 %v491_v25  ;;  %v10119_v30 = vunpack.c.l.s8.bf16 %v493_v26 }
 0x1ae   :  { %9956 = vmatprep.subr.bf16.mxu0 %v9955_v31  ;;  %10084 = vmatprep.subr.bf16.mxu1 %v10083_v32  ;;  %v490_v31 = vld [vmem:[#allocation2 + $0x280] sm:$0xff]  ;;  %v492_v32 = vld [vmem:[#allocation2 + $0x290] sm:$0xff] }
 0x1af   :  { %v9993_v33 = vunpack.c.l.s8.bf16 %v490_v31  ;;  %v10121_v34 = vunpack.c.l.s8.bf16 %v492_v32  ;;  %v9997_v39 = vunpack.c.h.s8.bf16 %v490_v31  ;;  %v10125_v40 = vunpack.c.h.s8.bf16 %v492_v32 }
 0x1b1   :  { %9958 = vmatpush1.bf16.msra.mxu0 %v9957_v35  ;;  %10086 = vmatpush1.bf16.msra.mxu1 %v10085_v36  ;;  %v9995_v35 = vunpack.c.h.s8.bf16 %v491_v25  ;;  %v10123_v36 = vunpack.c.h.s8.bf16 %v493_v26 }
 0x1b2   :  { %9960 = vmatprep.subr.bf16.mxu0 %v9959_v37  ;;  %10088 = vmatprep.subr.bf16.mxu1 %v10087_v38  ;;  %v499_v37 = vld [vmem:[#allocation2 + $0x2c8] sm:$0xff]  ;;  %v501_v38 = vld [vmem:[#allocation2 + $0x2d8] sm:$0xff] }
 0x1b5   :  { %9962 = vmatpush1.bf16.msra.mxu0 %v9961_v41  ;;  %10090 = vmatpush1.bf16.msra.mxu1 %v10089_v42  ;;  %v9999_v41 = vunpack.c.l.s8.bf16 %v499_v37  ;;  %v10127_v42 = vunpack.c.l.s8.bf16 %v501_v38 }
 0x1b6   :  { %9964 = vmatprep.subr.bf16.mxu0 %v9963_v43  ;;  %10092 = vmatprep.subr.bf16.mxu1 %v10091_v44  ;;  %v498_v43 = vld [vmem:[#allocation2 + $0x2c0] sm:$0xff]  ;;  %v500_v44 = vld [vmem:[#allocation2 + $0x2d0] sm:$0xff] }
 0x1b7   :  { %v10001_v45 = vunpack.c.l.s8.bf16 %v498_v43  ;;  %v10129_v46 = vunpack.c.l.s8.bf16 %v500_v44  ;;  %v10005_v51 = vunpack.c.h.s8.bf16 %v498_v43  ;;  %v10133_v52 = vunpack.c.h.s8.bf16 %v500_v44 }
 0x1b9   :  { %9966 = vmatpush1.bf16.msra.mxu0 %v9965_v47  ;;  %10094 = vmatpush1.bf16.msra.mxu1 %v10093_v48  ;;  %v10003_v47 = vunpack.c.h.s8.bf16 %v499_v37  ;;  %v10131_v48 = vunpack.c.h.s8.bf16 %v501_v38 }
 0x1ba   :  { %9968 = vmatprep.subr.bf16.mxu0 %v9967_v49  ;;  %10096 = vmatprep.subr.bf16.mxu1 %v10095_v50  ;;  %v507_v49 = vld [vmem:[#allocation2 + $0x308] sm:$0xff]  ;;  %v509_v50 = vld [vmem:[#allocation2 + $0x318] sm:$0xff] }
 0x1bd   :  { %9970 = vmatpush1.bf16.msra.mxu0 %v9969_v53  ;;  %10098 = vmatpush1.bf16.msra.mxu1 %v10097_v54  ;;  %v10007_v53 = vunpack.c.l.s8.bf16 %v507_v49  ;;  %v10135_v54 = vunpack.c.l.s8.bf16 %v509_v50 }
 0x1be   :  { %9972 = vmatprep.subr.bf16.mxu0 %v9971_v55  ;;  %10100 = vmatprep.subr.bf16.mxu1 %v10099_v56  ;;  %v506_v55 = vld [vmem:[#allocation2 + $0x300] sm:$0xff]  ;;  %v508_v56 = vld [vmem:[#allocation2 + $0x310] sm:$0xff] }
 0x1bf   :  { %v10009_v57 = vunpack.c.l.s8.bf16 %v506_v55  ;;  %v10137_v58 = vunpack.c.l.s8.bf16 %v508_v56  ;;  %v10013_v63 = vunpack.c.h.s8.bf16 %v506_v55  ;;  %v10141_v8 = vunpack.c.h.s8.bf16 %v508_v56 }
 0x1c1   :  { %9974 = vmatpush1.bf16.msra.mxu0 %v9973_v59  ;;  %10102 = vmatpush1.bf16.msra.mxu1 %v10101_v60  ;;  %v10011_v59 = vunpack.c.h.s8.bf16 %v507_v49  ;;  %v10139_v60 = vunpack.c.h.s8.bf16 %v509_v50 }
 0x1c2   :  { %9976 = vmatprep.subr.bf16.mxu0 %v9975_v61  ;;  %10104 = vmatprep.subr.bf16.mxu1 %v10103_v62  ;;  %v515_v61 = vld [vmem:[#allocation2 + $0x348] sm:$0xff]  ;;  %v517_v62 = vld [vmem:[#allocation2 + $0x358] sm:$0xff] }
 0x1c4   :  { %1627 = vmatmul.mubr.f32.vlgmr.msra.gmra.mrb[2].mxu0 %v13102_v0  ;;  %1781 = vmatmul.mubr.f32.vlgmr.msra.gmra.mrb[2].mxu1 %v13102_v0 }
 0x1c5   :  { %9978 = vmatpush1.bf16.msra.mxu0 %v9977_v9  ;;  %10106 = vmatpush1.bf16.msra.mxu1 %v10105_v10  ;;  %v10015_v9 = vunpack.c.l.s8.bf16 %v515_v61  ;;  %v10143_v10 = vunpack.c.l.s8.bf16 %v517_v62 }
 0x1c6   :  { %9980 = vmatprep.subr.bf16.mxu0 %v9979_v11  ;;  %10108 = vmatprep.subr.bf16.mxu1 %v10107_v12  ;;  %v514_v11 = vld [vmem:[#allocation2 + $0x340] sm:$0xff]  ;;  %v516_v12 = vld [vmem:[#allocation2 + $0x350] sm:$0xff] }
 0x1c7   :  { %1632 = vmatprep.mubr.f32.mxu0 %v13112_v5  ;;  %1786 = vmatprep.mubr.f32.mxu1 %v13112_v5  ;;  %v10017_v13 = vunpack.c.l.s8.bf16 %v514_v11  ;;  %v10145_v14 = vunpack.c.l.s8.bf16 %v516_v12  ;;  %v10021_v19 = vunpack.c.h.s8.bf16 %v514_v11  ;;  %v10149_v20 = vunpack.c.h.s8.bf16 %v516_v12 }
 0x1c8   :  { %1633 = vmatmul.mubr.f32.gmra.mrb[4].mxu0 %v13110_v4  ;;  %1787 = vmatmul.mubr.f32.gmra.mrb[4].mxu1 %v13110_v4 }
 0x1c9   :  { %9982 = vmatpush1.bf16.msra.mxu0 %v9981_v15  ;;  %10110 = vmatpush1.bf16.msra.mxu1 %v10109_v16  ;;  %v10019_v15 = vunpack.c.h.s8.bf16 %v515_v61  ;;  %v10147_v16 = vunpack.c.h.s8.bf16 %v517_v62 }
 0x1ca   :  { %9984 = vmatprep.subr.bf16.mxu0 %v9983_v17  ;;  %10112 = vmatprep.subr.bf16.mxu1 %v10111_v18  ;;  %v523_v17 = vld [vmem:[#allocation2 + $0x388] sm:$0xff]  ;;  %v525_v18 = vld [vmem:[#allocation2 + $0x398] sm:$0xff] }
 0x1cb   :  { %1703 = vmatprep.mubr.f32.mxu0 %v13108_v3  ;;  %1857 = vmatprep.mubr.f32.mxu1 %v13108_v3 }
 0x1cd   :  { %9986 = vmatpush1.bf16.msra.mxu0 %v9985_v21  ;;  %10114 = vmatpush1.bf16.msra.mxu1 %v10113_v22  ;;  %v10023_v21 = vunpack.c.l.s8.bf16 %v523_v17  ;;  %v10151_v22 = vunpack.c.l.s8.bf16 %v525_v18 }
 0x1ce   :  { %9988 = vmatprep.subr.bf16.mxu0 %v9987_v23  ;;  %10116 = vmatprep.subr.bf16.mxu1 %v10115_v24  ;;  %v522_v23 = vld [vmem:[#allocation2 + $0x380] sm:$0xff]  ;;  %v524_v24 = vld [vmem:[#allocation2 + $0x390] sm:$0xff] }
 0x1cf   :  { %v10025_v25 = vunpack.c.l.s8.bf16 %v522_v23  ;;  %v10153_v26 = vunpack.c.l.s8.bf16 %v524_v24  ;;  %v10029_v31 = vunpack.c.h.s8.bf16 %v522_v23  ;;  %v10157_v32 = vunpack.c.h.s8.bf16 %v524_v24 }
 0x1d1   :  { %9990 = vmatpush1.bf16.msra.mxu0 %v9989_v27  ;;  %10118 = vmatpush1.bf16.msra.mxu1 %v10117_v28  ;;  %v10027_v27 = vunpack.c.h.s8.bf16 %v523_v17  ;;  %v10155_v28 = vunpack.c.h.s8.bf16 %v525_v18 }
 0x1d2   :  { %9992 = vmatprep.subr.bf16.mxu0 %v9991_v29  ;;  %10120 = vmatprep.subr.bf16.mxu1 %v10119_v30  ;;  %v531_v29 = vld [vmem:[#allocation2 + $0x3c8] sm:$0xff]  ;;  %v533_v30 = vld [vmem:[#allocation2 + $0x3d8] sm:$0xff] }
 0x1d5   :  { %9994 = vmatpush1.bf16.msra.mxu0 %v9993_v33  ;;  %10122 = vmatpush1.bf16.msra.mxu1 %v10121_v34  ;;  %v10031_v33 = vunpack.c.l.s8.bf16 %v531_v29  ;;  %v10159_v34 = vunpack.c.l.s8.bf16 %v533_v30 }
 0x1d6   :  { %9996 = vmatprep.subr.bf16.mxu0 %v9995_v35  ;;  %10124 = vmatprep.subr.bf16.mxu1 %v10123_v36  ;;  %v530_v35 = vld [vmem:[#allocation2 + $0x3c0] sm:$0xff]  ;;  %v532_v36 = vld [vmem:[#allocation2 + $0x3d0] sm:$0xff] }
 0x1d7   :  { %v10033_v37 = vunpack.c.l.s8.bf16 %v530_v35  ;;  %v10161_v38 = vunpack.c.l.s8.bf16 %v532_v36  ;;  %v10037_v43 = vunpack.c.h.s8.bf16 %v530_v35  ;;  %v10165_v44 = vunpack.c.h.s8.bf16 %v532_v36 }
 0x1d9   :  { %9998 = vmatpush1.bf16.msra.mxu0 %v9997_v39  ;;  %10126 = vmatpush1.bf16.msra.mxu1 %v10125_v40  ;;  %v10035_v39 = vunpack.c.h.s8.bf16 %v531_v29  ;;  %v10163_v40 = vunpack.c.h.s8.bf16 %v533_v30 }
 0x1da   :  { %10000 = vmatprep.subr.bf16.mxu0 %v9999_v41  ;;  %10128 = vmatprep.subr.bf16.mxu1 %v10127_v42  ;;  %v415_v41 = vld [vmem:[#allocation2 + $0x28] sm:$0xff]  ;;  %v417_v42 = vld [vmem:[#allocation2 + $0x38] sm:$0xff] }
 0x1dd   :  { %10002 = vmatpush1.bf16.msra.mxu0 %v10001_v45  ;;  %10130 = vmatpush1.bf16.msra.mxu1 %v10129_v46  ;;  %v10167_v45 = vunpack.c.l.s8.bf16 %v415_v41  ;;  %v10295_v46 = vunpack.c.l.s8.bf16 %v417_v42 }
 0x1de   :  { %10004 = vmatprep.subr.bf16.mxu0 %v10003_v47  ;;  %10132 = vmatprep.subr.bf16.mxu1 %v10131_v48  ;;  %v414_v47 = vld [vmem:[#allocation2 + $0x20] sm:$0xff]  ;;  %v416_v48 = vld [vmem:[#allocation2 + $0x30] sm:$0xff] }
 0x1df   :  { %v10169_v49 = vunpack.c.l.s8.bf16 %v414_v47  ;;  %v10297_v50 = vunpack.c.l.s8.bf16 %v416_v48  ;;  %v10173_v55 = vunpack.c.h.s8.bf16 %v414_v47  ;;  %v10301_v56 = vunpack.c.h.s8.bf16 %v416_v48 }
 0x1e1   :  { %10006 = vmatpush1.bf16.msra.mxu0 %v10005_v51  ;;  %10134 = vmatpush1.bf16.msra.mxu1 %v10133_v52  ;;  %v10171_v51 = vunpack.c.h.s8.bf16 %v415_v41  ;;  %v10299_v52 = vunpack.c.h.s8.bf16 %v417_v42 }
 0x1e2   :  { %10008 = vmatprep.subr.bf16.mxu0 %v10007_v53  ;;  %10136 = vmatprep.subr.bf16.mxu1 %v10135_v54  ;;  %v423_v53 = vld [vmem:[#allocation2 + $0x68] sm:$0xff]  ;;  %v425_v54 = vld [vmem:[#allocation2 + $0x78] sm:$0xff] }
 0x1e5   :  { %10010 = vmatpush1.bf16.msra.mxu0 %v10009_v57  ;;  %10138 = vmatpush1.bf16.msra.mxu1 %v10137_v58  ;;  %v10175_v57 = vunpack.c.l.s8.bf16 %v423_v53  ;;  %v10303_v58 = vunpack.c.l.s8.bf16 %v425_v54 }
 0x1e6   :  { %10012 = vmatprep.subr.bf16.mxu0 %v10011_v59  ;;  %10140 = vmatprep.subr.bf16.mxu1 %v10139_v60  ;;  %v422_v59 = vld [vmem:[#allocation2 + $0x60] sm:$0xff]  ;;  %v424_v60 = vld [vmem:[#allocation2 + $0x70] sm:$0xff] }
 0x1e7   :  { %v10177_v61 = vunpack.c.l.s8.bf16 %v422_v59  ;;  %v10305_v62 = vunpack.c.l.s8.bf16 %v424_v60  ;;  %v10181_v11 = vunpack.c.h.s8.bf16 %v422_v59  ;;  %v10309_v12 = vunpack.c.h.s8.bf16 %v424_v60 }
 0x1e9   :  { %10014 = vmatpush1.bf16.msra.mxu0 %v10013_v63  ;;  %10142 = vmatpush1.bf16.msra.mxu1 %v10141_v8  ;;  %v10179_v63 = vunpack.c.h.s8.bf16 %v423_v53  ;;  %v10307_v8 = vunpack.c.h.s8.bf16 %v425_v54 }
 0x1ea   :  { %10016 = vmatprep.subr.bf16.mxu0 %v10015_v9  ;;  %10144 = vmatprep.subr.bf16.mxu1 %v10143_v10  ;;  %v431_v9 = vld [vmem:[#allocation2 + $0xa8] sm:$0xff]  ;;  %v433_v10 = vld [vmem:[#allocation2 + $0xb8] sm:$0xff] }
 0x1ed   :  { %10018 = vmatpush1.bf16.msra.mxu0 %v10017_v13  ;;  %10146 = vmatpush1.bf16.msra.mxu1 %v10145_v14  ;;  %v10183_v13 = vunpack.c.l.s8.bf16 %v431_v9  ;;  %v10311_v14 = vunpack.c.l.s8.bf16 %v433_v10 }
 0x1ee   :  { %10020 = vmatprep.subr.bf16.mxu0 %v10019_v15  ;;  %10148 = vmatprep.subr.bf16.mxu1 %v10147_v16  ;;  %v430_v15 = vld [vmem:[#allocation2 + $0xa0] sm:$0xff]  ;;  %v432_v16 = vld [vmem:[#allocation2 + $0xb0] sm:$0xff] }
 0x1ef   :  { %v10185_v17 = vunpack.c.l.s8.bf16 %v430_v15  ;;  %v10313_v18 = vunpack.c.l.s8.bf16 %v432_v16  ;;  %v10317_v23 = vunpack.c.h.s8.bf16 %v432_v16 }
 0x1f1   :  { %10022 = vmatpush1.bf16.msra.mxu0 %v10021_v19  ;;  %10150 = vmatpush1.bf16.msra.mxu1 %v10149_v20  ;;  %v10187_v19 = vunpack.c.h.s8.bf16 %v431_v9  ;;  %v10315_v20 = vunpack.c.h.s8.bf16 %v433_v10 }
 0x1f2   :  { %10024 = vmatprep.subr.bf16.mxu0 %v10023_v21  ;;  %10152 = vmatprep.subr.bf16.mxu1 %v10151_v22  ;;  %v439_v21 = vld [vmem:[#allocation2 + $0xe8] sm:$0xff]  ;;  %v10189_v22 = vunpack.c.h.s8.bf16 %v430_v15 }
 0x1f3   :  { %v10191_v24 = vunpack.c.l.s8.bf16 %v439_v21  ;;  %v10195_v30 = vunpack.c.h.s8.bf16 %v439_v21 }
 0x1f5   :  { %10026 = vmatpush1.bf16.msra.mxu0 %v10025_v25  ;;  %10154 = vmatpush1.bf16.msra.mxu1 %v10153_v26  ;;  %v438_v26 = vld [vmem:[#allocation2 + $0xe0] sm:$0xff] }
 0x1f6   :  { %10028 = vmatprep.subr.bf16.mxu0 %v10027_v27  ;;  %10156 = vmatprep.subr.bf16.mxu1 %v10155_v28  ;;  %v440_v27 = vld [vmem:[#allocation2 + $0xf0] sm:$0xff]  ;;  %v10193_v28 = vunpack.c.l.s8.bf16 %v438_v26 }
 0x1f7   :  { %v10321_v29 = vunpack.c.l.s8.bf16 %v440_v27  ;;  %v10325_v35 = vunpack.c.h.s8.bf16 %v440_v27 }
 0x1f9   :  { %10030 = vmatpush1.bf16.msra.mxu0 %v10029_v31  ;;  %10158 = vmatpush1.bf16.msra.mxu1 %v10157_v32  ;;  %v447_v32 = vld [vmem:[#allocation2 + $0x128] sm:$0xff] }
 0x1fa   :  { %10032 = vmatprep.subr.bf16.mxu0 %v10031_v33  ;;  %10160 = vmatprep.subr.bf16.mxu1 %v10159_v34  ;;  %v449_v33 = vld [vmem:[#allocation2 + $0x138] sm:$0xff]  ;;  %v10197_v34 = vunpack.c.h.s8.bf16 %v438_v26  ;;  %v10199_v36 = vunpack.c.l.s8.bf16 %v447_v32  ;;  %v10203_v42 = vunpack.c.h.s8.bf16 %v447_v32 }
 0x1fd   :  { %10034 = vmatpush1.bf16.msra.mxu0 %v10033_v37  ;;  %10162 = vmatpush1.bf16.msra.mxu1 %v10161_v38  ;;  %v10327_v37 = vunpack.c.l.s8.bf16 %v449_v33  ;;  %v446_v38 = vld [vmem:[#allocation2 + $0x120] sm:$0xff] }
 0x1fe   :  { %10036 = vmatprep.subr.bf16.mxu0 %v10035_v39  ;;  %10164 = vmatprep.subr.bf16.mxu1 %v10163_v40  ;;  %v448_v39 = vld [vmem:[#allocation2 + $0x130] sm:$0xff]  ;;  %v10201_v40 = vunpack.c.l.s8.bf16 %v446_v38 }
 0x1ff   :  { %v10329_v41 = vunpack.c.l.s8.bf16 %v448_v39  ;;  %v10333_v47 = vunpack.c.h.s8.bf16 %v448_v39 }
 0x201   :  { %10038 = vmatpush1.bf16.msra.mxu0 %v10037_v43  ;;  %10166 = vmatpush1.bf16.msra.mxu1 %v10165_v44  ;;  %v10331_v43 = vunpack.c.h.s8.bf16 %v449_v33  ;;  %v455_v44 = vld [vmem:[#allocation2 + $0x168] sm:$0xff] }
 0x202   :  { %10168 = vmatprep.subr.bf16.mxu0 %v10167_v45  ;;  %10296 = vmatprep.subr.bf16.mxu1 %v10295_v46  ;;  %v457_v45 = vld [vmem:[#allocation2 + $0x178] sm:$0xff]  ;;  %v10205_v46 = vunpack.c.h.s8.bf16 %v446_v38  ;;  %v10207_v48 = vunpack.c.l.s8.bf16 %v455_v44  ;;  %v10211_v54 = vunpack.c.h.s8.bf16 %v455_v44 }
 0x204   :  { %1704 = vmatmul.mubr.f32.vlgmr.msra.gmra.mrb[2].mxu0 %v13106_v2  ;;  %1858 = vmatmul.mubr.f32.vlgmr.msra.gmra.mrb[2].mxu1 %v13106_v2 }
 0x205   :  { %10170 = vmatpush1.bf16.msra.mxu0 %v10169_v49  ;;  %10298 = vmatpush1.bf16.msra.mxu1 %v10297_v50  ;;  %v10335_v49 = vunpack.c.l.s8.bf16 %v457_v45  ;;  %v454_v50 = vld [vmem:[#allocation2 + $0x160] sm:$0xff] }
 0x206   :  { %1709 = vmatprep.mubr.f32.mxu0 %v13116_v7  ;;  %1863 = vmatprep.mubr.f32.mxu1 %v13116_v7 }
 0x207   :  { %10172 = vmatprep.subr.bf16.mxu0 %v10171_v51  ;;  %10300 = vmatprep.subr.bf16.mxu1 %v10299_v52  ;;  %v456_v51 = vld [vmem:[#allocation2 + $0x170] sm:$0xff]  ;;  %v10209_v52 = vunpack.c.l.s8.bf16 %v454_v50 }
 0x208   :  { %1710 = vmatmul.mubr.f32.gmra.mrb[4].mxu0 %v13114_v6  ;;  %1864 = vmatmul.mubr.f32.gmra.mrb[4].mxu1 %v13114_v6  ;;  %v10337_v53 = vunpack.c.l.s8.bf16 %v456_v51  ;;  %v10341_v59 = vunpack.c.h.s8.bf16 %v456_v51  ;;  %v496_v51 = vld [vmem:[#allocation2 + $0x2b0] sm:$0xff] }
 0x209   :  { %10174 = vmatpush1.bf16.msra.mxu0 %v10173_v55  ;;  %10302 = vmatpush1.bf16.msra.mxu1 %v10301_v56  ;;  %v10339_v55 = vunpack.c.h.s8.bf16 %v457_v45  ;;  %v463_v56 = vld [vmem:[#allocation2 + $0x1a8] sm:$0xff] }
 0x20a   :  { %10176 = vmatprep.subr.bf16.mxu0 %v10175_v57  ;;  %10304 = vmatprep.subr.bf16.mxu1 %v10303_v58  ;;  %v465_v57 = vld [vmem:[#allocation2 + $0x1b8] sm:$0xff]  ;;  %v10213_v58 = vunpack.c.h.s8.bf16 %v454_v50  ;;  %v10215_v60 = vunpack.c.l.s8.bf16 %v463_v56  ;;  %v10219_v10 = vunpack.c.h.s8.bf16 %v463_v56  ;;  %v494_v50 = vld [vmem:[#allocation2 + $0x2a0] sm:$0xff]  ;;  %v503_v56 = vld [vmem:[#allocation2 + $0x2e8] sm:$0xff] }
 0x20b   :  { %1934 = vmatprep.mubr.f32.mxu0 %v13104_v1  ;;  %2088 = vmatprep.mubr.f32.mxu1 %v13104_v1  ;;  %v441_v1 = vld [vmem:[#allocation2 + $0xf8] sm:$0xff] }
 0x20c   :  { %v10319_v25 = vunpack.c.l.s8.bf16 %v441_v1  ;;  %v10323_v31 = vunpack.c.h.s8.bf16 %v441_v1 }
 0x20d   :  { %10178 = vmatpush1.bf16.msra.mxu0 %v10177_v61  ;;  %10306 = vmatpush1.bf16.msra.mxu1 %v10305_v62  ;;  %v10343_v61 = vunpack.c.l.s8.bf16 %v465_v57  ;;  %v462_v62 = vld [vmem:[#allocation2 + $0x1a0] sm:$0xff] }
 0x20e   :  { %10180 = vmatprep.subr.bf16.mxu0 %v10179_v63  ;;  %10308 = vmatprep.subr.bf16.mxu1 %v10307_v8  ;;  %v464_v63 = vld [vmem:[#allocation2 + $0x1b0] sm:$0xff]  ;;  %v10217_v8 = vunpack.c.l.s8.bf16 %v462_v62 }
 0x20f   :  { %v10345_v9 = vunpack.c.l.s8.bf16 %v464_v63  ;;  %v10349_v15 = vunpack.c.h.s8.bf16 %v464_v63 }
 0x211   :  { %10182 = vmatpush1.bf16.msra.mxu0 %v10181_v11  ;;  %10310 = vmatpush1.bf16.msra.mxu1 %v10309_v12  ;;  %v10347_v11 = vunpack.c.h.s8.bf16 %v465_v57  ;;  %v471_v12 = vld [vmem:[#allocation2 + $0x1e8] sm:$0xff]  ;;  %v10253_v57 = vunpack.c.h.s8.bf16 %v494_v50 }
 0x212   :  { %10184 = vmatprep.subr.bf16.mxu0 %v10183_v13  ;;  %10312 = vmatprep.subr.bf16.mxu1 %v10311_v14  ;;  %v473_v13 = vld [vmem:[#allocation2 + $0x1f8] sm:$0xff]  ;;  %v10221_v14 = vunpack.c.h.s8.bf16 %v462_v62  ;;  %v10223_v16 = vunpack.c.l.s8.bf16 %v471_v12  ;;  %v10227_v1 = vunpack.c.h.s8.bf16 %v471_v12  ;;  %v504_v62 = vld [vmem:[#allocation2 + $0x2f0] sm:$0xff] }
 0x213   :  { %v513_v12 = vld [vmem:[#allocation2 + $0x338] sm:$0xff] }
 0x215   :  { %10186 = vmatpush1.bf16.msra.mxu0 %v10185_v17  ;;  %10314 = vmatpush1.bf16.msra.mxu1 %v10313_v18  ;;  %v10351_v17 = vunpack.c.l.s8.bf16 %v473_v13  ;;  %v470_v18 = vld [vmem:[#allocation2 + $0x1e0] sm:$0xff] }
 0x216   :  { %10188 = vmatprep.subr.bf16.mxu0 %v10187_v19  ;;  %10316 = vmatprep.subr.bf16.mxu1 %v10315_v20  ;;  %v472_v19 = vld [vmem:[#allocation2 + $0x1f0] sm:$0xff]  ;;  %v10225_v20 = vunpack.c.l.s8.bf16 %v470_v18 }
 0x217   :  { %v10353_v21 = vunpack.c.l.s8.bf16 %v472_v19  ;;  %v10357_v26 = vunpack.c.h.s8.bf16 %v472_v19 }
 0x219   :  { %10190 = vmatpush1.bf16.msra.mxu0 %v10189_v22  ;;  %10318 = vmatpush1.bf16.msra.mxu1 %v10317_v23  ;;  %v10355_v22 = vunpack.c.h.s8.bf16 %v473_v13  ;;  %v479_v23 = vld [vmem:[#allocation2 + $0x228] sm:$0xff] }
 0x21a   :  { %10192 = vmatprep.subr.bf16.mxu0 %v10191_v24  ;;  %10320 = vmatprep.subr.bf16.mxu1 %v10319_v25  ;;  %v481_v24 = vld [vmem:[#allocation2 + $0x238] sm:$0xff]  ;;  %v10229_v25 = vunpack.c.h.s8.bf16 %v470_v18  ;;  %v10231_v27 = vunpack.c.l.s8.bf16 %v479_v23  ;;  %v10235_v33 = vunpack.c.h.s8.bf16 %v479_v23  ;;  %v512_v18 = vld [vmem:[#allocation2 + $0x330] sm:$0xff] }
 0x21b   :  { %v521_v23 = vld [vmem:[#allocation2 + $0x378] sm:$0xff] }
 0x21d   :  { %10194 = vmatpush1.bf16.msra.mxu0 %v10193_v28  ;;  %10322 = vmatpush1.bf16.msra.mxu1 %v10321_v29  ;;  %v10359_v28 = vunpack.c.l.s8.bf16 %v481_v24  ;;  %v478_v29 = vld [vmem:[#allocation2 + $0x220] sm:$0xff] }
 0x21e   :  { %10196 = vmatprep.subr.bf16.mxu0 %v10195_v30  ;;  %10324 = vmatprep.subr.bf16.mxu1 %v10323_v31  ;;  %v480_v30 = vld [vmem:[#allocation2 + $0x230] sm:$0xff]  ;;  %v10233_v31 = vunpack.c.l.s8.bf16 %v478_v29 }
 0x21f   :  { %v10361_v32 = vunpack.c.l.s8.bf16 %v480_v30  ;;  %v10365_v38 = vunpack.c.h.s8.bf16 %v480_v30 }
 0x221   :  { %10198 = vmatpush1.bf16.msra.mxu0 %v10197_v34  ;;  %10326 = vmatpush1.bf16.msra.mxu1 %v10325_v35  ;;  %v10363_v34 = vunpack.c.h.s8.bf16 %v481_v24  ;;  %v487_v35 = vld [vmem:[#allocation2 + $0x268] sm:$0xff] }
 0x222   :  { %10200 = vmatprep.subr.bf16.mxu0 %v10199_v36  ;;  %10328 = vmatprep.subr.bf16.mxu1 %v10327_v37  ;;  %v489_v36 = vld [vmem:[#allocation2 + $0x278] sm:$0xff]  ;;  %v10237_v37 = vunpack.c.h.s8.bf16 %v478_v29  ;;  %v10239_v39 = vunpack.c.l.s8.bf16 %v487_v35  ;;  %v10243_v44 = vunpack.c.h.s8.bf16 %v487_v35  ;;  %v520_v29 = vld [vmem:[#allocation2 + $0x370] sm:$0xff] }
 0x223   :  { %v10371_v45 = vunpack.c.h.s8.bf16 %v489_v36  ;;  %v529_v35 = vld [vmem:[#allocation2 + $0x3b8] sm:$0xff] }
 0x225   :  { %10202 = vmatpush1.bf16.msra.mxu0 %v10201_v40  ;;  %10330 = vmatpush1.bf16.msra.mxu1 %v10329_v41  ;;  %v10367_v40 = vunpack.c.l.s8.bf16 %v489_v36  ;;  %v486_v41 = vld [vmem:[#allocation2 + $0x260] sm:$0xff] }
 0x226   :  { %10204 = vmatprep.subr.bf16.mxu0 %v10203_v42  ;;  %10332 = vmatprep.subr.bf16.mxu1 %v10331_v43  ;;  %v488_v42 = vld [vmem:[#allocation2 + $0x270] sm:$0xff] }
 0x227   :  { %v10369_v43 = vunpack.c.l.s8.bf16 %v488_v42 }
 0x229   :  { %10206 = vmatpush1.bf16.msra.mxu0 %v10205_v46  ;;  %10334 = vmatpush1.bf16.msra.mxu1 %v10333_v47  ;;  %v495_v46 = vld [vmem:[#allocation2 + $0x2a8] sm:$0xff]  ;;  %v497_v47 = vld [vmem:[#allocation2 + $0x2b8] sm:$0xff] }
 0x22a   :  { %10208 = vmatprep.subr.bf16.mxu0 %v10207_v48  ;;  %10336 = vmatprep.subr.bf16.mxu1 %v10335_v49  ;;  %v10373_v48 = vunpack.c.h.s8.bf16 %v488_v42  ;;  %v10375_v49 = vunpack.c.l.s8.bf16 %v497_v47 }
 0x22d   :  { %10210 = vmatpush1.bf16.msra.mxu0 %v10209_v52  ;;  %10338 = vmatpush1.bf16.msra.mxu1 %v10337_v53  ;;  %v10249_v52 = vunpack.c.l.s8.bf16 %v494_v50  ;;  %v10377_v53 = vunpack.c.l.s8.bf16 %v496_v51  ;;  %v536_v50 = vld [vmem:[#allocation2 + $0x3f0] sm:$0xff] }
 0x22e   :  { %10212 = vmatprep.subr.bf16.mxu0 %v10211_v54  ;;  %10340 = vmatprep.subr.bf16.mxu1 %v10339_v55  ;;  %v10251_v54 = vunpack.c.h.s8.bf16 %v495_v46  ;;  %v10379_v55 = vunpack.c.h.s8.bf16 %v497_v47 }
 0x231   :  { %10214 = vmatpush1.bf16.msra.mxu0 %v10213_v58  ;;  %10342 = vmatpush1.bf16.msra.mxu1 %v10341_v59  ;;  %v10381_v58 = vunpack.c.h.s8.bf16 %v496_v51  ;;  %v10255_v59 = vunpack.c.l.s8.bf16 %v503_v56 }
 0x232   :  { %10216 = vmatprep.subr.bf16.mxu0 %v10215_v60  ;;  %10344 = vmatprep.subr.bf16.mxu1 %v10343_v61  ;;  %v502_v61 = vld [vmem:[#allocation2 + $0x2e0] sm:$0xff] }
 0x233   :  { %v10257_v63 = vunpack.c.l.s8.bf16 %v502_v61  ;;  %v10261_v13 = vunpack.c.h.s8.bf16 %v502_v61 }
 0x235   :  { %10218 = vmatpush1.bf16.msra.mxu0 %v10217_v8  ;;  %10346 = vmatpush1.bf16.msra.mxu1 %v10345_v9  ;;  %v10385_v8 = vunpack.c.l.s8.bf16 %v504_v62  ;;  %v10259_v9 = vunpack.c.h.s8.bf16 %v503_v56  ;;  %v10421_v56 = vunpack.c.h.s8.bf16 %v536_v50 }
 0x236   :  { %10220 = vmatprep.subr.bf16.mxu0 %v10219_v10  ;;  %10348 = vmatprep.subr.bf16.mxu1 %v10347_v11  ;;  %v511_v11 = vld [vmem:[#allocation2 + $0x328] sm:$0xff] }
 0x239   :  { %10222 = vmatpush1.bf16.msra.mxu0 %v10221_v14  ;;  %10350 = vmatpush1.bf16.msra.mxu1 %v10349_v15  ;;  %v10389_v14 = vunpack.c.h.s8.bf16 %v504_v62  ;;  %v10263_v15 = vunpack.c.l.s8.bf16 %v511_v11 }
 0x23a   :  { %10224 = vmatprep.subr.bf16.mxu0 %v10223_v16  ;;  %10352 = vmatprep.subr.bf16.mxu1 %v10351_v17  ;;  %v10391_v16 = vunpack.c.l.s8.bf16 %v513_v12  ;;  %v510_v17 = vld [vmem:[#allocation2 + $0x320] sm:$0xff] }
 0x23b   :  { %v10265_v19 = vunpack.c.l.s8.bf16 %v510_v17  ;;  %v10269_v24 = vunpack.c.h.s8.bf16 %v510_v17 }
 0x23d   :  { %10226 = vmatpush1.bf16.msra.mxu0 %v10225_v20  ;;  %10354 = vmatpush1.bf16.msra.mxu1 %v10353_v21  ;;  %v10393_v20 = vunpack.c.l.s8.bf16 %v512_v18  ;;  %v10267_v21 = vunpack.c.h.s8.bf16 %v511_v11 }
 0x23e   :  { %10228 = vmatprep.subr.bf16.mxu0 %v10227_v1  ;;  %10356 = vmatprep.subr.bf16.mxu1 %v10355_v22  ;;  %v10395_v1 = vunpack.c.h.s8.bf16 %v513_v12  ;;  %v519_v22 = vld [vmem:[#allocation2 + $0x368] sm:$0xff] }
 0x241   :  { %10230 = vmatpush1.bf16.msra.mxu0 %v10229_v25  ;;  %10358 = vmatpush1.bf16.msra.mxu1 %v10357_v26  ;;  %v10397_v25 = vunpack.c.h.s8.bf16 %v512_v18  ;;  %v10271_v26 = vunpack.c.l.s8.bf16 %v519_v22 }
 0x242   :  { %10232 = vmatprep.subr.bf16.mxu0 %v10231_v27  ;;  %10360 = vmatprep.subr.bf16.mxu1 %v10359_v28  ;;  %v10399_v27 = vunpack.c.l.s8.bf16 %v521_v23  ;;  %v518_v28 = vld [vmem:[#allocation2 + $0x360] sm:$0xff] }
 0x243   :  { %v10273_v30 = vunpack.c.l.s8.bf16 %v518_v28  ;;  %v10277_v36 = vunpack.c.h.s8.bf16 %v518_v28 }
 0x244   :  { %1935 = vmatmul.mubr.f32.vlgmr.msra.gmra.mrb[6].mxu0 %v13102_v0  ;;  %2089 = vmatmul.mubr.f32.vlgmr.msra.gmra.mrb[6].mxu1 %v13102_v0  ;;  %v10241_v0 = vunpack.c.l.s8.bf16 %v486_v41 }
 0x245   :  { %10234 = vmatpush1.bf16.msra.mxu0 %v10233_v31  ;;  %10362 = vmatpush1.bf16.msra.mxu1 %v10361_v32  ;;  %v10401_v31 = vunpack.c.l.s8.bf16 %v520_v29  ;;  %v10275_v32 = vunpack.c.h.s8.bf16 %v519_v22 }
 0x246   :  { %10236 = vmatprep.subr.bf16.mxu0 %v10235_v33  ;;  %10364 = vmatprep.subr.bf16.mxu1 %v10363_v34  ;;  %v10403_v33 = vunpack.c.h.s8.bf16 %v521_v23  ;;  %v527_v34 = vld [vmem:[#allocation2 + $0x3a8] sm:$0xff] }
 0x247   :  { %1940 = vmatprep.mubr.f32.mxu0 %v13112_v5  ;;  %2094 = vmatprep.mubr.f32.mxu1 %v13112_v5  ;;  %v10245_v5 = vunpack.c.h.s8.bf16 %v486_v41  ;;  %v528_v41 = vld [vmem:[#allocation2 + $0x3b0] sm:$0xff] }
 0x248   :  { %1941 = vmatmul.mubr.f32.gmra.mrb[8].mxu0 %v13110_v4  ;;  %2095 = vmatmul.mubr.f32.gmra.mrb[8].mxu1 %v13110_v4  ;;  %v10247_v4 = vunpack.c.l.s8.bf16 %v495_v46  ;;  %v537_v46 = vld [vmem:[#allocation2 + $0x3f8] sm:$0xff] }
 0x249   :  { %10238 = vmatpush1.bf16.msra.mxu0 %v10237_v37  ;;  %10366 = vmatpush1.bf16.msra.mxu1 %v10365_v38  ;;  %v10405_v37 = vunpack.c.h.s8.bf16 %v520_v29  ;;  %v10279_v38 = vunpack.c.l.s8.bf16 %v527_v34 }
 0x24a   :  { %10240 = vmatprep.subr.bf16.mxu0 %v10239_v39  ;;  %10368 = vmatprep.subr.bf16.mxu1 %v10367_v40  ;;  %v10407_v39 = vunpack.c.l.s8.bf16 %v529_v35  ;;  %v526_v40 = vld [vmem:[#allocation2 + $0x3a0] sm:$0xff] }
 0x24b   :  { %2011 = vmatprep.mubr.f32.mxu0 %v13108_v3  ;;  %2165 = vmatprep.mubr.f32.mxu1 %v13108_v3  ;;  %v505_v3 = vld [vmem:[#allocation2 + $0x2f8] sm:$0xff]  ;;  %v10281_v42 = vunpack.c.l.s8.bf16 %v526_v40  ;;  %v10285_v47 = vunpack.c.h.s8.bf16 %v526_v40 }
 0x24c   :  { %v10383_v60 = vunpack.c.l.s8.bf16 %v505_v3  ;;  %v10387_v10 = vunpack.c.h.s8.bf16 %v505_v3  ;;  %v2180_v3 = vlaneseq }
 0x24d   :  { %10242 = vmatpush1.bf16.msra.mxu0 %v10241_v0  ;;  %10370 = vmatpush1.bf16.msra.mxu1 %v10369_v43  ;;  %v10409_v0 = vunpack.c.l.s8.bf16 %v528_v41  ;;  %v10283_v43 = vunpack.c.h.s8.bf16 %v527_v34 }
 0x24e   :  { %10244 = vmatprep.subr.bf16.mxu0 %v10243_v44  ;;  %10372 = vmatprep.subr.bf16.mxu1 %v10371_v45  ;;  %v10411_v44 = vunpack.c.h.s8.bf16 %v529_v35  ;;  %v535_v45 = vld [vmem:[#allocation2 + $0x3e8] sm:$0xff] }
 0x251   :  { %10246 = vmatpush1.bf16.msra.mxu0 %v10245_v5  ;;  %10374 = vmatpush1.bf16.msra.mxu1 %v10373_v48  ;;  %v10413_v5 = vunpack.c.h.s8.bf16 %v528_v41  ;;  %v10287_v48 = vunpack.c.l.s8.bf16 %v535_v45 }
 0x252   :  { %10248 = vmatprep.subr.bf16.mxu0 %v10247_v4  ;;  %10376 = vmatprep.subr.bf16.mxu1 %v10375_v49  ;;  %v10415_v4 = vunpack.c.l.s8.bf16 %v537_v46  ;;  %v534_v49 = vld [vmem:[#allocation2 + $0x3e0] sm:$0xff] }
 0x253   :  { %v10289_v51 = vunpack.c.l.s8.bf16 %v534_v49 }
 0x255   :  { %10250 = vmatpush1.bf16.msra.mxu0 %v10249_v52  ;;  %10378 = vmatpush1.bf16.msra.mxu1 %v10377_v53  ;;  %v10417_v52 = vunpack.c.l.s8.bf16 %v536_v50  ;;  %v10291_v53 = vunpack.c.h.s8.bf16 %v535_v45 }
 0x256   :  { %10252 = vmatprep.subr.bf16.mxu0 %v10251_v54  ;;  %10380 = vmatprep.subr.bf16.mxu1 %v10379_v55  ;;  %v10419_v54 = vunpack.c.h.s8.bf16 %v537_v46  ;;  %v10293_v55 = vunpack.c.h.s8.bf16 %v534_v49 }
 0x259   :  { %10254 = vmatpush1.bf16.msra.mxu0 %v10253_v57  ;;  %10382 = vmatpush1.bf16.msra.mxu1 %v10381_v58  ;;  %v2181_v57 = vshrl.u32 %v2180_v3, 7 }
 0x25a   :  { %10256 = vmatprep.subr.bf16.mxu0 %v10255_v59  ;;  %10384 = vmatprep.subr.bf16.mxu1 %v10383_v60  ;;  %v2178_v60 = vld [vmem:[#allocation9] sm:$0xff] }
 0x25b   :  { %v13225_v58 = vsub.s32 0, %v2181_v57  ;;  %v13227_v59 = vsub.s32 2, %v2181_v57  ;;  %v13229_v61 = vsub.s32 1, %v2181_v57  ;;  %v13231_v62 = vsub.s32 3, %v2181_v57 }
 0x25c   :  { %v13261_v45 = vsub.s32 5, %v2181_v57  ;;  %v13263_v46 = vsub.s32 7, %v2181_v57 }
 0x25d   :  { %10258 = vmatpush1.bf16.msra.mxu0 %v10257_v63  ;;  %10386 = vmatpush1.bf16.msra.mxu1 %v10385_v8  ;;  %v2183_v63 = vrot.slane %v2178_v60, %v13225_v58  ;;  %v2187_v8 = vrot.slane %v2178_v60, %v13229_v61 }
 0x25e   :  { %10260 = vmatprep.subr.bf16.mxu0 %v10259_v9  ;;  %10388 = vmatprep.subr.bf16.mxu1 %v10387_v10 }
 0x261   :  { %10262 = vmatpush1.bf16.msra.mxu0 %v10261_v13  ;;  %10390 = vmatpush1.bf16.msra.mxu1 %v10389_v14 }
 0x262   :  { %10264 = vmatprep.subr.bf16.mxu0 %v10263_v15  ;;  %10392 = vmatprep.subr.bf16.mxu1 %v10391_v16 }
 0x265   :  { %10266 = vmatpush1.bf16.msra.mxu0 %v10265_v19  ;;  %10394 = vmatpush1.bf16.msra.mxu1 %v10393_v20 }
 0x266   :  { %10268 = vmatprep.subr.bf16.mxu0 %v10267_v21  ;;  %10396 = vmatprep.subr.bf16.mxu1 %v10395_v1 }
 0x269   :  { %10270 = vmatpush1.bf16.msra.mxu0 %v10269_v24  ;;  %10398 = vmatpush1.bf16.msra.mxu1 %v10397_v25 }
 0x26a   :  { %10272 = vmatprep.subr.bf16.mxu0 %v10271_v26  ;;  %10400 = vmatprep.subr.bf16.mxu1 %v10399_v27 }
 0x26d   :  { %10274 = vmatpush1.bf16.msra.mxu0 %v10273_v30  ;;  %10402 = vmatpush1.bf16.msra.mxu1 %v10401_v31 }
 0x26e   :  { %10276 = vmatprep.subr.bf16.mxu0 %v10275_v32  ;;  %10404 = vmatprep.subr.bf16.mxu1 %v10403_v33 }
 0x271   :  { %10278 = vmatpush1.bf16.msra.mxu0 %v10277_v36  ;;  %10406 = vmatpush1.bf16.msra.mxu1 %v10405_v37 }
 0x272   :  { %10280 = vmatprep.subr.bf16.mxu0 %v10279_v38  ;;  %10408 = vmatprep.subr.bf16.mxu1 %v10407_v39 }
 0x275   :  { %10282 = vmatpush1.bf16.msra.mxu0 %v10281_v42  ;;  %10410 = vmatpush1.bf16.msra.mxu1 %v10409_v0 }
 0x276   :  { %10284 = vmatprep.subr.bf16.mxu0 %v10283_v43  ;;  %10412 = vmatprep.subr.bf16.mxu1 %v10411_v44  ;;  %v13257_v43 = vsub.s32 4, %v2181_v57  ;;  %v13259_v44 = vsub.s32 6, %v2181_v57 }
 0x279   :  { %10286 = vmatpush1.bf16.msra.mxu0 %v10285_v47  ;;  %10414 = vmatpush1.bf16.msra.mxu1 %v10413_v5  ;;  %v2199_v47 = vrot.slane %v2178_v60, %v13257_v43  ;;  %v2207_v5 = vrot.slane %v2178_v60, %v13259_v44 }
 0x27a   :  { %10288 = vmatprep.subr.bf16.mxu0 %v10287_v48  ;;  %10416 = vmatprep.subr.bf16.mxu1 %v10415_v4  ;;  %v2203_v48 = vrot.slane %v2178_v60, %v13261_v45  ;;  %v2211_v4 = vrot.slane %v2178_v60, %v13263_v46 }
 0x27d   :  { %10290 = vmatpush1.bf16.msra.mxu0 %v10289_v51  ;;  %10418 = vmatpush1.bf16.msra.mxu1 %v10417_v52 }
 0x27e   :  { %10292 = vmatprep.subr.bf16.mxu0 %v10291_v53  ;;  %10420 = vmatprep.subr.bf16.mxu1 %v10419_v54 }
 0x281   :  { %10294 = vmatpush1.bf16.msra.mxu0 %v10293_v55  ;;  %10422 = vmatpush1.bf16.msra.mxu1 %v10421_v56 }
 0x284   :  { %2012 = vmatmul.mubr.f32.vlgmr.msra.gmra.mrb[6].mxu0 %v13106_v2  ;;  %2166 = vmatmul.mubr.f32.vlgmr.msra.gmra.mrb[6].mxu1 %v13106_v2  ;;  %v2236_v2 = vld [vmem:[#allocation11] sm:$0xff] }
 0x285   :  { %2017 = vmatprep.mubr.f32.mxu0 %v13116_v7  ;;  %2171 = vmatprep.mubr.f32.mxu1 %v13116_v7  ;;  %v2191_v7 = vrot.slane %v2178_v60, %v13227_v59  ;;  %v2241_v9 = vrot.slane %v2236_v2, %v13225_v58  ;;  %v2249_v10 = vrot.slane %v2236_v2, %v13227_v59 }
 0x286   :  { %v2245_v13 = vrot.slane %v2236_v2, %v13229_v61  ;;  %v2253_v14 = vrot.slane %v2236_v2, %v13231_v62  ;;  %v2257_v49 = vrot.slane %v2236_v2, %v13257_v43  ;;  %v2265_v50 = vrot.slane %v2236_v2, %v13259_v44 }
 0x287   :  { %v2261_v53 = vrot.slane %v2236_v2, %v13261_v45  ;;  %v2269_v54 = vrot.slane %v2236_v2, %v13263_v46 }
 0x288   :  { %2018 = vmatmul.mubr.f32.gmra.mrb[8].mxu0 %v13114_v6  ;;  %2172 = vmatmul.mubr.f32.gmra.mrb[8].mxu1 %v13114_v6  ;;  %v2195_v6 = vrot.slane %v2178_v60, %v13231_v62 }
 0x2d7   :  { %v1705_v11 = vpop.f32.mrb[2].mxu0  ;;  %v1859_v12 = vpop.f32.mrb[2].mxu1 }
 0x2d8   :  { %v2220_v15 = vmul.f32 %v2183_v63, %v1705_v11  ;;  %v2222_v16 = vmul.f32 %v2191_v7, %v1859_v12  ;;  %v1707_v17 = vpop.f32.mrb[3].mxu0  ;;  %v1861_v18 = vpop.f32.mrb[3].mxu1 }
 0x2d9   :  { %v2221_v19 = vmul.f32 %v2187_v8, %v1707_v17  ;;  %v2223_v20 = vmul.f32 %v2195_v6, %v1861_v18 }
 0x2da   :  { %v2278_v21 = vadd.f32 %v2241_v9, %v2220_v15  ;;  %v2280_v1 = vadd.f32 %v2249_v10, %v2222_v16 }
 0x2db   :  { %v2279_v22 = vadd.f32 %v2245_v13, %v2221_v19  ;;  %v2281_v23 = vadd.f32 %v2253_v14, %v2223_v20  ;;  %v1711_v24 = vpop.f32.mrb[4].mxu0  ;;  %v1865_v25 = vpop.f32.mrb[4].mxu1 }
 0x2dc   :  { %v13241_v26 = vmax.f32 %v2278_v21, 0.0  ;;  %v13243_v27 = vmax.f32 %v2280_v1, 0.0  ;;  %v2228_v28 = vmul.f32 %v2183_v63, %v1711_v24  ;;  %v2230_v29 = vmul.f32 %v2191_v7, %v1865_v25  ;;  %v1713_v30 = vpop.f32.mrb[5].mxu0  ;;  %v1867_v31 = vpop.f32.mrb[5].mxu1 }
 0x2dd   :  { %v13245_v32 = vmax.f32 %v2279_v22, 0.0  ;;  %v13247_v33 = vmax.f32 %v2281_v23, 0.0  ;;  %v2229_v34 = vmul.f32 %v2187_v8, %v1713_v30  ;;  %v2231_v35 = vmul.f32 %v2195_v6, %v1867_v31 }
 0x2de   :  { %v2286_v36 = vadd.f32 %v2241_v9, %v2228_v28  ;;  %v2288_v37 = vadd.f32 %v2249_v10, %v2230_v29 }
 0x2df   :  { %v2287_v38 = vadd.f32 %v2245_v13, %v2229_v34  ;;  %v2289_v39 = vadd.f32 %v2253_v14, %v2231_v35 }
 0x2e0   :  { %v13249_v40 = vmax.f32 %v2286_v36, 0.0  ;;  %v13251_v41 = vmax.f32 %v2288_v37, 0.0 }
 0x2e1   :  { %v13253_v42 = vmax.f32 %v2287_v38, 0.0  ;;  %v13255_v0 = vmax.f32 %v2289_v39, 0.0 }
 0x357   :  { %v2013_v51 = vpop.f32.mrb[6].mxu0  ;;  %v2167_v52 = vpop.f32.mrb[6].mxu1 }
 0x358   :  { %v2224_v55 = vmul.f32 %v2199_v47, %v2013_v51  ;;  %v2226_v56 = vmul.f32 %v2207_v5, %v2167_v52  ;;  %v2015_v3 = vpop.f32.mrb[7].mxu0  ;;  %v2169_v57 = vpop.f32.mrb[7].mxu1 }
 0x359   :  { %v2225_v63 = vmul.f32 %v2203_v48, %v2015_v3  ;;  %v2227_v7 = vmul.f32 %v2211_v4, %v2169_v57 }
 0x35a   :  { %v2282_v8 = vadd.f32 %v2257_v49, %v2224_v55  ;;  %v2284_v6 = vadd.f32 %v2265_v50, %v2226_v56 }
 0x35b   :  { %v2283_v9 = vadd.f32 %v2261_v53, %v2225_v63  ;;  %v2285_v60 = vadd.f32 %v2269_v54, %v2227_v7  ;;  %v2019_v10 = vpop.f32.mrb[8].mxu0  ;;  %v2173_v11 = vpop.f32.mrb[8].mxu1 }
 0x35c   :  { %v13273_v12 = vmax.f32 %v2282_v8, 0.0  ;;  %v13275_v13 = vmax.f32 %v2284_v6, 0.0  ;;  %v2232_v14 = vmul.f32 %v2199_v47, %v2019_v10  ;;  %v2234_v15 = vmul.f32 %v2207_v5, %v2173_v11  ;;  %v2021_v16 = vpop.f32.mrb[9].mxu0  ;;  %v2175_v2 = vpop.f32.mrb[9].mxu1 }
 0x35d   :  { %v13277_v17 = vmax.f32 %v2283_v9, 0.0  ;;  %v13279_v18 = vmax.f32 %v2285_v60, 0.0  ;;  %v2233_v19 = vmul.f32 %v2203_v48, %v2021_v16  ;;  %v2235_v20 = vmul.f32 %v2211_v4, %v2175_v2 }
 0x35e   :  { %v2290_v21 = vadd.f32 %v2257_v49, %v2232_v14  ;;  %v2292_v1 = vadd.f32 %v2265_v50, %v2234_v15 }
 0x35f   :  { %v2291_v22 = vadd.f32 %v2261_v53, %v2233_v19  ;;  %v2293_v23 = vadd.f32 %v2269_v54, %v2235_v20 }
 0x360   :  { %v13281_v24 = vmax.f32 %v2290_v21, 0.0  ;;  %v13283_v25 = vmax.f32 %v2292_v1, 0.0 }
 0x361   :  { %v13285_v28 = vmax.f32 %v2291_v22, 0.0  ;;  %v13287_v29 = vmax.f32 %v2293_v23, 0.0 }
 0x362   :  { %12904 = dma.done.wait [#allocation5 + $0x1], 32768 }
 0x363   :  { %12905 = vsyncadd [#allocation5 + $0x1], 4294934528  ;;  %4682 = vmatprep.mubr.f32.mxu0 %v13245_v32  ;;  %4990 = vmatprep.mubr.f32.mxu1 %v13245_v32  ;;  %v2315_v30 = vld [vmem:[#allocation3 + $0x8] sm:$0xff]  ;;  %v2317_v31 = vld [vmem:[#allocation3 + $0x18] sm:$0xff] }
 0x364   :  { %v2314_v34 = vld [vmem:[#allocation3] sm:$0xff]  ;;  %v10423_v35 = vunpack.c.l.s8.bf16 %v2315_v30  ;;  %v10427_v36 = vunpack.c.h.s8.bf16 %v2315_v30  ;;  %v10679_v37 = vunpack.c.l.s8.bf16 %v2317_v31  ;;  %v10683_v38 = vunpack.c.h.s8.bf16 %v2317_v31  ;;  %v2316_v39 = vld [vmem:[#allocation3 + $0x10] sm:$0xff]  ;;  %v2323_v48 = vld [vmem:[#allocation3 + $0x48] sm:$0xff] }
 0x365   :  { %v10425_v47 = vunpack.c.l.s8.bf16 %v2314_v34  ;;  %v10681_v5 = vunpack.c.l.s8.bf16 %v2316_v39  ;;  %v2325_v4 = vld [vmem:[#allocation3 + $0x58] sm:$0xff]  ;;  %v10429_v49 = vunpack.c.h.s8.bf16 %v2314_v34  ;;  %v10685_v50 = vunpack.c.h.s8.bf16 %v2316_v39  ;;  %v2322_v53 = vld [vmem:[#allocation3 + $0x40] sm:$0xff]  ;;  %v2324_v54 = vld [vmem:[#allocation3 + $0x50] sm:$0xff] }
 0x366   :  { %10424 = vmatprep.subr.bf16.mxu0 %v10423_v35  ;;  %10680 = vmatprep.subr.bf16.mxu1 %v10679_v37  ;;  %v10431_v51 = vunpack.c.l.s8.bf16 %v2323_v48  ;;  %v10687_v52 = vunpack.c.l.s8.bf16 %v2325_v4  ;;  %v10433_v55 = vunpack.c.l.s8.bf16 %v2322_v53  ;;  %v10689_v56 = vunpack.c.l.s8.bf16 %v2324_v54  ;;  %v2331_v63 = vld [vmem:[#allocation3 + $0x88] sm:$0xff]  ;;  %v2333_v7 = vld [vmem:[#allocation3 + $0x98] sm:$0xff]  ;;  %v2330_v10 = vld [vmem:[#allocation3 + $0x80] sm:$0xff] }
 0x367   :  { %10426 = vmatpush1.bf16.msra.mxu0 %v10425_v47  ;;  %10682 = vmatpush1.bf16.msra.mxu1 %v10681_v5  ;;  %v10435_v3 = vunpack.c.h.s8.bf16 %v2323_v48  ;;  %v10691_v57 = vunpack.c.h.s8.bf16 %v2325_v4  ;;  %v10437_v8 = vunpack.c.h.s8.bf16 %v2322_v53  ;;  %v10693_v6 = vunpack.c.h.s8.bf16 %v2324_v54  ;;  %v2332_v11 = vld [vmem:[#allocation3 + $0x90] sm:$0xff]  ;;  %v2339_v19 = vld [vmem:[#allocation3 + $0xc8] sm:$0xff]  ;;  %v2341_v20 = vld [vmem:[#allocation3 + $0xd8] sm:$0xff] }
 0x368   :  { %10428 = vmatprep.subr.bf16.mxu0 %v10427_v36  ;;  %10684 = vmatprep.subr.bf16.mxu1 %v10683_v38  ;;  %v10439_v9 = vunpack.c.l.s8.bf16 %v2331_v63  ;;  %v10695_v60 = vunpack.c.l.s8.bf16 %v2333_v7  ;;  %v10441_v14 = vunpack.c.l.s8.bf16 %v2330_v10  ;;  %v10697_v15 = vunpack.c.l.s8.bf16 %v2332_v11  ;;  %v2338_v30 = vld [vmem:[#allocation3 + $0xc0] sm:$0xff]  ;;  %v2340_v31 = vld [vmem:[#allocation3 + $0xd0] sm:$0xff]  ;;  %v2347_v38 = vld [vmem:[#allocation3 + $0x108] sm:$0xff] }
 0x369   :  { %v10443_v16 = vunpack.c.h.s8.bf16 %v2331_v63  ;;  %v10699_v2 = vunpack.c.h.s8.bf16 %v2333_v7  ;;  %v10445_v21 = vunpack.c.h.s8.bf16 %v2330_v10  ;;  %v10701_v1 = vunpack.c.h.s8.bf16 %v2332_v11  ;;  %v2349_v39 = vld [vmem:[#allocation3 + $0x118] sm:$0xff] }
 0x36a   :  { %v10447_v22 = vunpack.c.l.s8.bf16 %v2339_v19  ;;  %v10703_v23 = vunpack.c.l.s8.bf16 %v2341_v20  ;;  %v10449_v34 = vunpack.c.l.s8.bf16 %v2338_v30  ;;  %v10705_v35 = vunpack.c.l.s8.bf16 %v2340_v31 }
 0x36b   :  { %10430 = vmatpush1.bf16.msra.mxu0 %v10429_v49  ;;  %10686 = vmatpush1.bf16.msra.mxu1 %v10685_v50  ;;  %v10451_v36 = vunpack.c.h.s8.bf16 %v2339_v19  ;;  %v10707_v37 = vunpack.c.h.s8.bf16 %v2341_v20  ;;  %v10453_v47 = vunpack.c.h.s8.bf16 %v2338_v30  ;;  %v10709_v5 = vunpack.c.h.s8.bf16 %v2340_v31  ;;  %v2346_v49 = vld [vmem:[#allocation3 + $0x100] sm:$0xff]  ;;  %v2348_v50 = vld [vmem:[#allocation3 + $0x110] sm:$0xff] }
 0x36c   :  { %10432 = vmatprep.subr.bf16.mxu0 %v10431_v51  ;;  %10688 = vmatprep.subr.bf16.mxu1 %v10687_v52  ;;  %v10455_v48 = vunpack.c.l.s8.bf16 %v2347_v38  ;;  %v10711_v4 = vunpack.c.l.s8.bf16 %v2349_v39  ;;  %v10457_v51 = vunpack.c.l.s8.bf16 %v2346_v49  ;;  %v10713_v52 = vunpack.c.l.s8.bf16 %v2348_v50 }
 0x36d   :  { %v10459_v53 = vunpack.c.h.s8.bf16 %v2347_v38  ;;  %v10715_v54 = vunpack.c.h.s8.bf16 %v2349_v39 }
 0x36f   :  { %10434 = vmatpush1.bf16.msra.mxu0 %v10433_v55  ;;  %10690 = vmatpush1.bf16.msra.mxu1 %v10689_v56  ;;  %v2355_v55 = vld [vmem:[#allocation3 + $0x148] sm:$0xff]  ;;  %v2357_v56 = vld [vmem:[#allocation3 + $0x158] sm:$0xff] }
 0x370   :  { %10436 = vmatprep.subr.bf16.mxu0 %v10435_v3  ;;  %10692 = vmatprep.subr.bf16.mxu1 %v10691_v57  ;;  %v10461_v3 = vunpack.c.h.s8.bf16 %v2346_v49  ;;  %v10717_v57 = vunpack.c.h.s8.bf16 %v2348_v50  ;;  %v10463_v63 = vunpack.c.l.s8.bf16 %v2355_v55  ;;  %v10719_v7 = vunpack.c.l.s8.bf16 %v2357_v56 }
 0x371   :  { %v10467_v10 = vunpack.c.h.s8.bf16 %v2355_v55  ;;  %v10723_v11 = vunpack.c.h.s8.bf16 %v2357_v56 }
 0x373   :  { %10438 = vmatpush1.bf16.msra.mxu0 %v10437_v8  ;;  %10694 = vmatpush1.bf16.msra.mxu1 %v10693_v6  ;;  %v2354_v8 = vld [vmem:[#allocation3 + $0x140] sm:$0xff]  ;;  %v2356_v6 = vld [vmem:[#allocation3 + $0x150] sm:$0xff] }
 0x374   :  { %10440 = vmatprep.subr.bf16.mxu0 %v10439_v9  ;;  %10696 = vmatprep.subr.bf16.mxu1 %v10695_v60  ;;  %v10465_v9 = vunpack.c.l.s8.bf16 %v2354_v8  ;;  %v10721_v60 = vunpack.c.l.s8.bf16 %v2356_v6 }
 0x377   :  { %10442 = vmatpush1.bf16.msra.mxu0 %v10441_v14  ;;  %10698 = vmatpush1.bf16.msra.mxu1 %v10697_v15  ;;  %v2363_v14 = vld [vmem:[#allocation3 + $0x188] sm:$0xff]  ;;  %v2365_v15 = vld [vmem:[#allocation3 + $0x198] sm:$0xff] }
 0x378   :  { %10444 = vmatprep.subr.bf16.mxu0 %v10443_v16  ;;  %10700 = vmatprep.subr.bf16.mxu1 %v10699_v2  ;;  %v10469_v16 = vunpack.c.h.s8.bf16 %v2354_v8  ;;  %v10725_v2 = vunpack.c.h.s8.bf16 %v2356_v6  ;;  %v10471_v19 = vunpack.c.l.s8.bf16 %v2363_v14  ;;  %v10727_v20 = vunpack.c.l.s8.bf16 %v2365_v15 }
 0x379   :  { %v10475_v30 = vunpack.c.h.s8.bf16 %v2363_v14  ;;  %v10731_v31 = vunpack.c.h.s8.bf16 %v2365_v15 }
 0x37b   :  { %10446 = vmatpush1.bf16.msra.mxu0 %v10445_v21  ;;  %10702 = vmatpush1.bf16.msra.mxu1 %v10701_v1  ;;  %v2362_v21 = vld [vmem:[#allocation3 + $0x180] sm:$0xff]  ;;  %v2364_v1 = vld [vmem:[#allocation3 + $0x190] sm:$0xff] }
 0x37c   :  { %10448 = vmatprep.subr.bf16.mxu0 %v10447_v22  ;;  %10704 = vmatprep.subr.bf16.mxu1 %v10703_v23  ;;  %v10473_v22 = vunpack.c.l.s8.bf16 %v2362_v21  ;;  %v10729_v23 = vunpack.c.l.s8.bf16 %v2364_v1 }
 0x37f   :  { %10450 = vmatpush1.bf16.msra.mxu0 %v10449_v34  ;;  %10706 = vmatpush1.bf16.msra.mxu1 %v10705_v35  ;;  %v2371_v34 = vld [vmem:[#allocation3 + $0x1c8] sm:$0xff]  ;;  %v2373_v35 = vld [vmem:[#allocation3 + $0x1d8] sm:$0xff] }
 0x380   :  { %10452 = vmatprep.subr.bf16.mxu0 %v10451_v36  ;;  %10708 = vmatprep.subr.bf16.mxu1 %v10707_v37  ;;  %v10477_v36 = vunpack.c.h.s8.bf16 %v2362_v21  ;;  %v10733_v37 = vunpack.c.h.s8.bf16 %v2364_v1  ;;  %v10479_v38 = vunpack.c.l.s8.bf16 %v2371_v34  ;;  %v10735_v39 = vunpack.c.l.s8.bf16 %v2373_v35 }
 0x381   :  { %v10483_v49 = vunpack.c.h.s8.bf16 %v2371_v34  ;;  %v10739_v50 = vunpack.c.h.s8.bf16 %v2373_v35 }
 0x383   :  { %10454 = vmatpush1.bf16.msra.mxu0 %v10453_v47  ;;  %10710 = vmatpush1.bf16.msra.mxu1 %v10709_v5  ;;  %v2370_v47 = vld [vmem:[#allocation3 + $0x1c0] sm:$0xff]  ;;  %v2372_v5 = vld [vmem:[#allocation3 + $0x1d0] sm:$0xff] }
 0x384   :  { %10456 = vmatprep.subr.bf16.mxu0 %v10455_v48  ;;  %10712 = vmatprep.subr.bf16.mxu1 %v10711_v4  ;;  %v10481_v48 = vunpack.c.l.s8.bf16 %v2370_v47  ;;  %v10737_v4 = vunpack.c.l.s8.bf16 %v2372_v5 }
 0x387   :  { %10458 = vmatpush1.bf16.msra.mxu0 %v10457_v51  ;;  %10714 = vmatpush1.bf16.msra.mxu1 %v10713_v52  ;;  %v2379_v51 = vld [vmem:[#allocation3 + $0x208] sm:$0xff]  ;;  %v2381_v52 = vld [vmem:[#allocation3 + $0x218] sm:$0xff] }
 0x388   :  { %10460 = vmatprep.subr.bf16.mxu0 %v10459_v53  ;;  %10716 = vmatprep.subr.bf16.mxu1 %v10715_v54  ;;  %v10485_v53 = vunpack.c.h.s8.bf16 %v2370_v47  ;;  %v10741_v54 = vunpack.c.h.s8.bf16 %v2372_v5  ;;  %v10487_v55 = vunpack.c.l.s8.bf16 %v2379_v51  ;;  %v10743_v56 = vunpack.c.l.s8.bf16 %v2381_v52 }
 0x389   :  { %v10491_v8 = vunpack.c.h.s8.bf16 %v2379_v51  ;;  %v10747_v6 = vunpack.c.h.s8.bf16 %v2381_v52 }
 0x38b   :  { %10462 = vmatpush1.bf16.msra.mxu0 %v10461_v3  ;;  %10718 = vmatpush1.bf16.msra.mxu1 %v10717_v57  ;;  %v2378_v3 = vld [vmem:[#allocation3 + $0x200] sm:$0xff]  ;;  %v2380_v57 = vld [vmem:[#allocation3 + $0x210] sm:$0xff] }
 0x38c   :  { %10464 = vmatprep.subr.bf16.mxu0 %v10463_v63  ;;  %10720 = vmatprep.subr.bf16.mxu1 %v10719_v7  ;;  %v10489_v63 = vunpack.c.l.s8.bf16 %v2378_v3  ;;  %v10745_v7 = vunpack.c.l.s8.bf16 %v2380_v57 }
 0x38f   :  { %10466 = vmatpush1.bf16.msra.mxu0 %v10465_v9  ;;  %10722 = vmatpush1.bf16.msra.mxu1 %v10721_v60  ;;  %v2387_v9 = vld [vmem:[#allocation3 + $0x248] sm:$0xff]  ;;  %v2389_v60 = vld [vmem:[#allocation3 + $0x258] sm:$0xff] }
 0x390   :  { %10468 = vmatprep.subr.bf16.mxu0 %v10467_v10  ;;  %10724 = vmatprep.subr.bf16.mxu1 %v10723_v11  ;;  %v10493_v10 = vunpack.c.h.s8.bf16 %v2378_v3  ;;  %v10749_v11 = vunpack.c.h.s8.bf16 %v2380_v57  ;;  %v10495_v14 = vunpack.c.l.s8.bf16 %v2387_v9  ;;  %v10751_v15 = vunpack.c.l.s8.bf16 %v2389_v60 }
 0x391   :  { %v10499_v21 = vunpack.c.h.s8.bf16 %v2387_v9  ;;  %v10755_v1 = vunpack.c.h.s8.bf16 %v2389_v60 }
 0x393   :  { %10470 = vmatpush1.bf16.msra.mxu0 %v10469_v16  ;;  %10726 = vmatpush1.bf16.msra.mxu1 %v10725_v2  ;;  %v2386_v16 = vld [vmem:[#allocation3 + $0x240] sm:$0xff]  ;;  %v2388_v2 = vld [vmem:[#allocation3 + $0x250] sm:$0xff] }
 0x394   :  { %10472 = vmatprep.subr.bf16.mxu0 %v10471_v19  ;;  %10728 = vmatprep.subr.bf16.mxu1 %v10727_v20  ;;  %v10497_v19 = vunpack.c.l.s8.bf16 %v2386_v16  ;;  %v10753_v20 = vunpack.c.l.s8.bf16 %v2388_v2 }
 0x397   :  { %10474 = vmatpush1.bf16.msra.mxu0 %v10473_v22  ;;  %10730 = vmatpush1.bf16.msra.mxu1 %v10729_v23  ;;  %v2395_v22 = vld [vmem:[#allocation3 + $0x288] sm:$0xff]  ;;  %v2397_v23 = vld [vmem:[#allocation3 + $0x298] sm:$0xff] }
 0x398   :  { %10476 = vmatprep.subr.bf16.mxu0 %v10475_v30  ;;  %10732 = vmatprep.subr.bf16.mxu1 %v10731_v31  ;;  %v10501_v30 = vunpack.c.h.s8.bf16 %v2386_v16  ;;  %v10757_v31 = vunpack.c.h.s8.bf16 %v2388_v2  ;;  %v10503_v34 = vunpack.c.l.s8.bf16 %v2395_v22  ;;  %v10759_v35 = vunpack.c.l.s8.bf16 %v2397_v23 }
 0x399   :  { %v10507_v47 = vunpack.c.h.s8.bf16 %v2395_v22  ;;  %v10763_v5 = vunpack.c.h.s8.bf16 %v2397_v23 }
 0x39b   :  { %10478 = vmatpush1.bf16.msra.mxu0 %v10477_v36  ;;  %10734 = vmatpush1.bf16.msra.mxu1 %v10733_v37  ;;  %v2394_v36 = vld [vmem:[#allocation3 + $0x280] sm:$0xff]  ;;  %v2396_v37 = vld [vmem:[#allocation3 + $0x290] sm:$0xff] }
 0x39c   :  { %10480 = vmatprep.subr.bf16.mxu0 %v10479_v38  ;;  %10736 = vmatprep.subr.bf16.mxu1 %v10735_v39  ;;  %v10505_v38 = vunpack.c.l.s8.bf16 %v2394_v36  ;;  %v10761_v39 = vunpack.c.l.s8.bf16 %v2396_v37 }
 0x39f   :  { %10482 = vmatpush1.bf16.msra.mxu0 %v10481_v48  ;;  %10738 = vmatpush1.bf16.msra.mxu1 %v10737_v4  ;;  %v2403_v48 = vld [vmem:[#allocation3 + $0x2c8] sm:$0xff]  ;;  %v2405_v4 = vld [vmem:[#allocation3 + $0x2d8] sm:$0xff] }
 0x3a0   :  { %10484 = vmatprep.subr.bf16.mxu0 %v10483_v49  ;;  %10740 = vmatprep.subr.bf16.mxu1 %v10739_v50  ;;  %v10509_v49 = vunpack.c.h.s8.bf16 %v2394_v36  ;;  %v10765_v50 = vunpack.c.h.s8.bf16 %v2396_v37  ;;  %v10511_v51 = vunpack.c.l.s8.bf16 %v2403_v48  ;;  %v10767_v52 = vunpack.c.l.s8.bf16 %v2405_v4 }
 0x3a1   :  { %v10515_v3 = vunpack.c.h.s8.bf16 %v2403_v48  ;;  %v10771_v57 = vunpack.c.h.s8.bf16 %v2405_v4 }
 0x3a3   :  { %10486 = vmatpush1.bf16.msra.mxu0 %v10485_v53  ;;  %10742 = vmatpush1.bf16.msra.mxu1 %v10741_v54  ;;  %v2402_v53 = vld [vmem:[#allocation3 + $0x2c0] sm:$0xff]  ;;  %v2404_v54 = vld [vmem:[#allocation3 + $0x2d0] sm:$0xff] }
 0x3a4   :  { %10488 = vmatprep.subr.bf16.mxu0 %v10487_v55  ;;  %10744 = vmatprep.subr.bf16.mxu1 %v10743_v56  ;;  %v10513_v55 = vunpack.c.l.s8.bf16 %v2402_v53  ;;  %v10769_v56 = vunpack.c.l.s8.bf16 %v2404_v54 }
 0x3a6   :  { %4683 = vmatmul.mubr.f32.vlgmr.msra.gmra.mrb[10].mxu0 %v13241_v26  ;;  %4991 = vmatmul.mubr.f32.vlgmr.msra.gmra.mrb[10].mxu1 %v13241_v26 }
 0x3a7   :  { %10490 = vmatpush1.bf16.msra.mxu0 %v10489_v63  ;;  %10746 = vmatpush1.bf16.msra.mxu1 %v10745_v7  ;;  %v2411_v63 = vld [vmem:[#allocation3 + $0x308] sm:$0xff]  ;;  %v2413_v7 = vld [vmem:[#allocation3 + $0x318] sm:$0xff] }
 0x3a8   :  { %10492 = vmatprep.subr.bf16.mxu0 %v10491_v8  ;;  %10748 = vmatprep.subr.bf16.mxu1 %v10747_v6  ;;  %v10517_v8 = vunpack.c.h.s8.bf16 %v2402_v53  ;;  %v10773_v6 = vunpack.c.h.s8.bf16 %v2404_v54  ;;  %v10519_v9 = vunpack.c.l.s8.bf16 %v2411_v63  ;;  %v10775_v60 = vunpack.c.l.s8.bf16 %v2413_v7 }
 0x3a9   :  { %4688 = vmatprep.mubr.f32.mxu0 %v13253_v42  ;;  %4996 = vmatprep.mubr.f32.mxu1 %v13253_v42  ;;  %v10523_v16 = vunpack.c.h.s8.bf16 %v2411_v63  ;;  %v10779_v2 = vunpack.c.h.s8.bf16 %v2413_v7 }
 0x3aa   :  { %4689 = vmatmul.mubr.f32.gmra.mrb[12].mxu0 %v13249_v40  ;;  %4997 = vmatmul.mubr.f32.gmra.mrb[12].mxu1 %v13249_v40 }
 0x3ab   :  { %10494 = vmatpush1.bf16.msra.mxu0 %v10493_v10  ;;  %10750 = vmatpush1.bf16.msra.mxu1 %v10749_v11  ;;  %v2410_v10 = vld [vmem:[#allocation3 + $0x300] sm:$0xff]  ;;  %v2412_v11 = vld [vmem:[#allocation3 + $0x310] sm:$0xff] }
 0x3ac   :  { %10496 = vmatprep.subr.bf16.mxu0 %v10495_v14  ;;  %10752 = vmatprep.subr.bf16.mxu1 %v10751_v15  ;;  %v10521_v14 = vunpack.c.l.s8.bf16 %v2410_v10  ;;  %v10777_v15 = vunpack.c.l.s8.bf16 %v2412_v11 }
 0x3ad   :  { %4759 = vmatprep.mubr.f32.mxu0 %v13247_v33  ;;  %5067 = vmatprep.mubr.f32.mxu1 %v13247_v33 }
 0x3af   :  { %10498 = vmatpush1.bf16.msra.mxu0 %v10497_v19  ;;  %10754 = vmatpush1.bf16.msra.mxu1 %v10753_v20  ;;  %v2419_v19 = vld [vmem:[#allocation3 + $0x348] sm:$0xff]  ;;  %v2421_v20 = vld [vmem:[#allocation3 + $0x358] sm:$0xff] }
 0x3b0   :  { %10500 = vmatprep.subr.bf16.mxu0 %v10499_v21  ;;  %10756 = vmatprep.subr.bf16.mxu1 %v10755_v1  ;;  %v10525_v21 = vunpack.c.h.s8.bf16 %v2410_v10  ;;  %v10781_v1 = vunpack.c.h.s8.bf16 %v2412_v11  ;;  %v10527_v22 = vunpack.c.l.s8.bf16 %v2419_v19  ;;  %v10783_v23 = vunpack.c.l.s8.bf16 %v2421_v20 }
 0x3b1   :  { %v10531_v36 = vunpack.c.h.s8.bf16 %v2419_v19  ;;  %v10787_v37 = vunpack.c.h.s8.bf16 %v2421_v20 }
 0x3b3   :  { %10502 = vmatpush1.bf16.msra.mxu0 %v10501_v30  ;;  %10758 = vmatpush1.bf16.msra.mxu1 %v10757_v31  ;;  %v2418_v30 = vld [vmem:[#allocation3 + $0x340] sm:$0xff]  ;;  %v2420_v31 = vld [vmem:[#allocation3 + $0x350] sm:$0xff] }
 0x3b4   :  { %10504 = vmatprep.subr.bf16.mxu0 %v10503_v34  ;;  %10760 = vmatprep.subr.bf16.mxu1 %v10759_v35  ;;  %v10529_v34 = vunpack.c.l.s8.bf16 %v2418_v30  ;;  %v10785_v35 = vunpack.c.l.s8.bf16 %v2420_v31 }
 0x3b7   :  { %10506 = vmatpush1.bf16.msra.mxu0 %v10505_v38  ;;  %10762 = vmatpush1.bf16.msra.mxu1 %v10761_v39  ;;  %v2427_v38 = vld [vmem:[#allocation3 + $0x388] sm:$0xff]  ;;  %v2429_v39 = vld [vmem:[#allocation3 + $0x398] sm:$0xff] }
 0x3b8   :  { %10508 = vmatprep.subr.bf16.mxu0 %v10507_v47  ;;  %10764 = vmatprep.subr.bf16.mxu1 %v10763_v5  ;;  %v10533_v47 = vunpack.c.h.s8.bf16 %v2418_v30  ;;  %v10789_v5 = vunpack.c.h.s8.bf16 %v2420_v31  ;;  %v10535_v48 = vunpack.c.l.s8.bf16 %v2427_v38  ;;  %v10791_v4 = vunpack.c.l.s8.bf16 %v2429_v39 }
 0x3b9   :  { %v10539_v53 = vunpack.c.h.s8.bf16 %v2427_v38  ;;  %v10795_v54 = vunpack.c.h.s8.bf16 %v2429_v39 }
 0x3bb   :  { %10510 = vmatpush1.bf16.msra.mxu0 %v10509_v49  ;;  %10766 = vmatpush1.bf16.msra.mxu1 %v10765_v50  ;;  %v2426_v49 = vld [vmem:[#allocation3 + $0x380] sm:$0xff]  ;;  %v2428_v50 = vld [vmem:[#allocation3 + $0x390] sm:$0xff] }
 0x3bc   :  { %10512 = vmatprep.subr.bf16.mxu0 %v10511_v51  ;;  %10768 = vmatprep.subr.bf16.mxu1 %v10767_v52  ;;  %v10537_v51 = vunpack.c.l.s8.bf16 %v2426_v49  ;;  %v10793_v52 = vunpack.c.l.s8.bf16 %v2428_v50 }
 0x3bf   :  { %10514 = vmatpush1.bf16.msra.mxu0 %v10513_v55  ;;  %10770 = vmatpush1.bf16.msra.mxu1 %v10769_v56  ;;  %v2435_v55 = vld [vmem:[#allocation3 + $0x3c8] sm:$0xff]  ;;  %v2437_v56 = vld [vmem:[#allocation3 + $0x3d8] sm:$0xff] }
 0x3c0   :  { %10516 = vmatprep.subr.bf16.mxu0 %v10515_v3  ;;  %10772 = vmatprep.subr.bf16.mxu1 %v10771_v57  ;;  %v10541_v3 = vunpack.c.h.s8.bf16 %v2426_v49  ;;  %v10797_v57 = vunpack.c.h.s8.bf16 %v2428_v50  ;;  %v10543_v63 = vunpack.c.l.s8.bf16 %v2435_v55  ;;  %v10799_v7 = vunpack.c.l.s8.bf16 %v2437_v56 }
 0x3c1   :  { %v10547_v10 = vunpack.c.h.s8.bf16 %v2435_v55  ;;  %v10803_v11 = vunpack.c.h.s8.bf16 %v2437_v56 }
 0x3c3   :  { %10518 = vmatpush1.bf16.msra.mxu0 %v10517_v8  ;;  %10774 = vmatpush1.bf16.msra.mxu1 %v10773_v6  ;;  %v2434_v8 = vld [vmem:[#allocation3 + $0x3c0] sm:$0xff]  ;;  %v2436_v6 = vld [vmem:[#allocation3 + $0x3d0] sm:$0xff] }
 0x3c4   :  { %10520 = vmatprep.subr.bf16.mxu0 %v10519_v9  ;;  %10776 = vmatprep.subr.bf16.mxu1 %v10775_v60  ;;  %v10545_v9 = vunpack.c.l.s8.bf16 %v2434_v8  ;;  %v10801_v60 = vunpack.c.l.s8.bf16 %v2436_v6 }
 0x3c7   :  { %10522 = vmatpush1.bf16.msra.mxu0 %v10521_v14  ;;  %10778 = vmatpush1.bf16.msra.mxu1 %v10777_v15  ;;  %v2443_v14 = vld [vmem:[#allocation3 + $0x408] sm:$0xff]  ;;  %v2445_v15 = vld [vmem:[#allocation3 + $0x418] sm:$0xff] }
 0x3c8   :  { %10524 = vmatprep.subr.bf16.mxu0 %v10523_v16  ;;  %10780 = vmatprep.subr.bf16.mxu1 %v10779_v2  ;;  %v10549_v16 = vunpack.c.h.s8.bf16 %v2434_v8  ;;  %v10805_v2 = vunpack.c.h.s8.bf16 %v2436_v6  ;;  %v10551_v19 = vunpack.c.l.s8.bf16 %v2443_v14  ;;  %v10807_v20 = vunpack.c.l.s8.bf16 %v2445_v15 }
 0x3c9   :  { %v10555_v30 = vunpack.c.h.s8.bf16 %v2443_v14  ;;  %v10811_v31 = vunpack.c.h.s8.bf16 %v2445_v15 }
 0x3cb   :  { %10526 = vmatpush1.bf16.msra.mxu0 %v10525_v21  ;;  %10782 = vmatpush1.bf16.msra.mxu1 %v10781_v1  ;;  %v2442_v21 = vld [vmem:[#allocation3 + $0x400] sm:$0xff]  ;;  %v2444_v1 = vld [vmem:[#allocation3 + $0x410] sm:$0xff] }
 0x3cc   :  { %10528 = vmatprep.subr.bf16.mxu0 %v10527_v22  ;;  %10784 = vmatprep.subr.bf16.mxu1 %v10783_v23  ;;  %v10553_v22 = vunpack.c.l.s8.bf16 %v2442_v21  ;;  %v10809_v23 = vunpack.c.l.s8.bf16 %v2444_v1 }
 0x3cf   :  { %10530 = vmatpush1.bf16.msra.mxu0 %v10529_v34  ;;  %10786 = vmatpush1.bf16.msra.mxu1 %v10785_v35  ;;  %v2451_v34 = vld [vmem:[#allocation3 + $0x448] sm:$0xff]  ;;  %v2453_v35 = vld [vmem:[#allocation3 + $0x458] sm:$0xff] }
 0x3d0   :  { %10532 = vmatprep.subr.bf16.mxu0 %v10531_v36  ;;  %10788 = vmatprep.subr.bf16.mxu1 %v10787_v37  ;;  %v10557_v36 = vunpack.c.h.s8.bf16 %v2442_v21  ;;  %v10813_v37 = vunpack.c.h.s8.bf16 %v2444_v1  ;;  %v10559_v38 = vunpack.c.l.s8.bf16 %v2451_v34  ;;  %v10815_v39 = vunpack.c.l.s8.bf16 %v2453_v35 }
 0x3d1   :  { %v10563_v49 = vunpack.c.h.s8.bf16 %v2451_v34  ;;  %v10819_v50 = vunpack.c.h.s8.bf16 %v2453_v35 }
 0x3d3   :  { %10534 = vmatpush1.bf16.msra.mxu0 %v10533_v47  ;;  %10790 = vmatpush1.bf16.msra.mxu1 %v10789_v5  ;;  %v2450_v47 = vld [vmem:[#allocation3 + $0x440] sm:$0xff]  ;;  %v2452_v5 = vld [vmem:[#allocation3 + $0x450] sm:$0xff] }
 0x3d4   :  { %10536 = vmatprep.subr.bf16.mxu0 %v10535_v48  ;;  %10792 = vmatprep.subr.bf16.mxu1 %v10791_v4  ;;  %v10561_v48 = vunpack.c.l.s8.bf16 %v2450_v47  ;;  %v10817_v4 = vunpack.c.l.s8.bf16 %v2452_v5 }
 0x3d7   :  { %10538 = vmatpush1.bf16.msra.mxu0 %v10537_v51  ;;  %10794 = vmatpush1.bf16.msra.mxu1 %v10793_v52  ;;  %v2459_v51 = vld [vmem:[#allocation3 + $0x488] sm:$0xff]  ;;  %v2461_v52 = vld [vmem:[#allocation3 + $0x498] sm:$0xff] }
 0x3d8   :  { %10540 = vmatprep.subr.bf16.mxu0 %v10539_v53  ;;  %10796 = vmatprep.subr.bf16.mxu1 %v10795_v54  ;;  %v10565_v53 = vunpack.c.h.s8.bf16 %v2450_v47  ;;  %v10821_v54 = vunpack.c.h.s8.bf16 %v2452_v5  ;;  %v10567_v55 = vunpack.c.l.s8.bf16 %v2459_v51  ;;  %v10823_v56 = vunpack.c.l.s8.bf16 %v2461_v52 }
 0x3d9   :  { %v10571_v8 = vunpack.c.h.s8.bf16 %v2459_v51  ;;  %v10827_v6 = vunpack.c.h.s8.bf16 %v2461_v52 }
 0x3db   :  { %10542 = vmatpush1.bf16.msra.mxu0 %v10541_v3  ;;  %10798 = vmatpush1.bf16.msra.mxu1 %v10797_v57  ;;  %v2458_v3 = vld [vmem:[#allocation3 + $0x480] sm:$0xff]  ;;  %v2460_v57 = vld [vmem:[#allocation3 + $0x490] sm:$0xff] }
 0x3dc   :  { %10544 = vmatprep.subr.bf16.mxu0 %v10543_v63  ;;  %10800 = vmatprep.subr.bf16.mxu1 %v10799_v7  ;;  %v10569_v63 = vunpack.c.l.s8.bf16 %v2458_v3  ;;  %v10825_v7 = vunpack.c.l.s8.bf16 %v2460_v57 }
 0x3df   :  { %10546 = vmatpush1.bf16.msra.mxu0 %v10545_v9  ;;  %10802 = vmatpush1.bf16.msra.mxu1 %v10801_v60  ;;  %v2467_v9 = vld [vmem:[#allocation3 + $0x4c8] sm:$0xff]  ;;  %v2469_v60 = vld [vmem:[#allocation3 + $0x4d8] sm:$0xff] }
 0x3e0   :  { %10548 = vmatprep.subr.bf16.mxu0 %v10547_v10  ;;  %10804 = vmatprep.subr.bf16.mxu1 %v10803_v11  ;;  %v10573_v10 = vunpack.c.h.s8.bf16 %v2458_v3  ;;  %v10829_v11 = vunpack.c.h.s8.bf16 %v2460_v57  ;;  %v10575_v14 = vunpack.c.l.s8.bf16 %v2467_v9  ;;  %v10831_v15 = vunpack.c.l.s8.bf16 %v2469_v60 }
 0x3e1   :  { %v10579_v21 = vunpack.c.h.s8.bf16 %v2467_v9  ;;  %v10835_v1 = vunpack.c.h.s8.bf16 %v2469_v60 }
 0x3e3   :  { %10550 = vmatpush1.bf16.msra.mxu0 %v10549_v16  ;;  %10806 = vmatpush1.bf16.msra.mxu1 %v10805_v2  ;;  %v2466_v16 = vld [vmem:[#allocation3 + $0x4c0] sm:$0xff]  ;;  %v2468_v2 = vld [vmem:[#allocation3 + $0x4d0] sm:$0xff] }
 0x3e4   :  { %10552 = vmatprep.subr.bf16.mxu0 %v10551_v19  ;;  %10808 = vmatprep.subr.bf16.mxu1 %v10807_v20  ;;  %v10577_v19 = vunpack.c.l.s8.bf16 %v2466_v16  ;;  %v10833_v20 = vunpack.c.l.s8.bf16 %v2468_v2 }
 0x3e6   :  { %4760 = vmatmul.mubr.f32.vlgmr.msra.gmra.mrb[10].mxu0 %v13243_v27  ;;  %5068 = vmatmul.mubr.f32.vlgmr.msra.gmra.mrb[10].mxu1 %v13243_v27 }
 0x3e7   :  { %10554 = vmatpush1.bf16.msra.mxu0 %v10553_v22  ;;  %10810 = vmatpush1.bf16.msra.mxu1 %v10809_v23  ;;  %v2475_v22 = vld [vmem:[#allocation3 + $0x508] sm:$0xff]  ;;  %v2477_v23 = vld [vmem:[#allocation3 + $0x518] sm:$0xff] }
 0x3e8   :  { %10556 = vmatprep.subr.bf16.mxu0 %v10555_v30  ;;  %10812 = vmatprep.subr.bf16.mxu1 %v10811_v31  ;;  %v10581_v30 = vunpack.c.h.s8.bf16 %v2466_v16  ;;  %v10837_v31 = vunpack.c.h.s8.bf16 %v2468_v2  ;;  %v10583_v34 = vunpack.c.l.s8.bf16 %v2475_v22  ;;  %v10839_v35 = vunpack.c.l.s8.bf16 %v2477_v23 }
 0x3e9   :  { %4765 = vmatprep.mubr.f32.mxu0 %v13255_v0  ;;  %5073 = vmatprep.mubr.f32.mxu1 %v13255_v0  ;;  %v10587_v47 = vunpack.c.h.s8.bf16 %v2475_v22  ;;  %v10843_v5 = vunpack.c.h.s8.bf16 %v2477_v23 }
 0x3ea   :  { %4766 = vmatmul.mubr.f32.gmra.mrb[12].mxu0 %v13251_v41  ;;  %5074 = vmatmul.mubr.f32.gmra.mrb[12].mxu1 %v13251_v41 }
 0x3eb   :  { %10558 = vmatpush1.bf16.msra.mxu0 %v10557_v36  ;;  %10814 = vmatpush1.bf16.msra.mxu1 %v10813_v37  ;;  %v2474_v36 = vld [vmem:[#allocation3 + $0x500] sm:$0xff]  ;;  %v2476_v37 = vld [vmem:[#allocation3 + $0x510] sm:$0xff] }
 0x3ec   :  { %10560 = vmatprep.subr.bf16.mxu0 %v10559_v38  ;;  %10816 = vmatprep.subr.bf16.mxu1 %v10815_v39  ;;  %v10585_v38 = vunpack.c.l.s8.bf16 %v2474_v36  ;;  %v10841_v39 = vunpack.c.l.s8.bf16 %v2476_v37 }
 0x3ed   :  { %4836 = vmatprep.mubr.f32.mxu0 %v13277_v17  ;;  %5144 = vmatprep.mubr.f32.mxu1 %v13277_v17 }
 0x3ef   :  { %10562 = vmatpush1.bf16.msra.mxu0 %v10561_v48  ;;  %10818 = vmatpush1.bf16.msra.mxu1 %v10817_v4  ;;  %v2483_v48 = vld [vmem:[#allocation3 + $0x548] sm:$0xff]  ;;  %v2485_v4 = vld [vmem:[#allocation3 + $0x558] sm:$0xff] }
 0x3f0   :  { %10564 = vmatprep.subr.bf16.mxu0 %v10563_v49  ;;  %10820 = vmatprep.subr.bf16.mxu1 %v10819_v50  ;;  %v10589_v49 = vunpack.c.h.s8.bf16 %v2474_v36  ;;  %v10845_v50 = vunpack.c.h.s8.bf16 %v2476_v37  ;;  %v10591_v51 = vunpack.c.l.s8.bf16 %v2483_v48  ;;  %v10847_v52 = vunpack.c.l.s8.bf16 %v2485_v4 }
 0x3f1   :  { %v10595_v3 = vunpack.c.h.s8.bf16 %v2483_v48  ;;  %v10851_v57 = vunpack.c.h.s8.bf16 %v2485_v4 }
 0x3f3   :  { %10566 = vmatpush1.bf16.msra.mxu0 %v10565_v53  ;;  %10822 = vmatpush1.bf16.msra.mxu1 %v10821_v54  ;;  %v2482_v53 = vld [vmem:[#allocation3 + $0x540] sm:$0xff]  ;;  %v2484_v54 = vld [vmem:[#allocation3 + $0x550] sm:$0xff] }
 0x3f4   :  { %10568 = vmatprep.subr.bf16.mxu0 %v10567_v55  ;;  %10824 = vmatprep.subr.bf16.mxu1 %v10823_v56  ;;  %v10593_v55 = vunpack.c.l.s8.bf16 %v2482_v53  ;;  %v10849_v56 = vunpack.c.l.s8.bf16 %v2484_v54 }
 0x3f7   :  { %10570 = vmatpush1.bf16.msra.mxu0 %v10569_v63  ;;  %10826 = vmatpush1.bf16.msra.mxu1 %v10825_v7  ;;  %v2491_v63 = vld [vmem:[#allocation3 + $0x588] sm:$0xff]  ;;  %v2493_v7 = vld [vmem:[#allocation3 + $0x598] sm:$0xff] }
 0x3f8   :  { %10572 = vmatprep.subr.bf16.mxu0 %v10571_v8  ;;  %10828 = vmatprep.subr.bf16.mxu1 %v10827_v6  ;;  %v10597_v8 = vunpack.c.h.s8.bf16 %v2482_v53  ;;  %v10853_v6 = vunpack.c.h.s8.bf16 %v2484_v54  ;;  %v10599_v9 = vunpack.c.l.s8.bf16 %v2491_v63  ;;  %v10855_v60 = vunpack.c.l.s8.bf16 %v2493_v7 }
 0x3f9   :  { %v10603_v16 = vunpack.c.h.s8.bf16 %v2491_v63  ;;  %v10859_v2 = vunpack.c.h.s8.bf16 %v2493_v7 }
 0x3fb   :  { %10574 = vmatpush1.bf16.msra.mxu0 %v10573_v10  ;;  %10830 = vmatpush1.bf16.msra.mxu1 %v10829_v11  ;;  %v2490_v10 = vld [vmem:[#allocation3 + $0x580] sm:$0xff]  ;;  %v2492_v11 = vld [vmem:[#allocation3 + $0x590] sm:$0xff] }
 0x3fc   :  { %10576 = vmatprep.subr.bf16.mxu0 %v10575_v14  ;;  %10832 = vmatprep.subr.bf16.mxu1 %v10831_v15  ;;  %v10601_v14 = vunpack.c.l.s8.bf16 %v2490_v10  ;;  %v10857_v15 = vunpack.c.l.s8.bf16 %v2492_v11 }
 0x3ff   :  { %10578 = vmatpush1.bf16.msra.mxu0 %v10577_v19  ;;  %10834 = vmatpush1.bf16.msra.mxu1 %v10833_v20  ;;  %v2499_v19 = vld [vmem:[#allocation3 + $0x5c8] sm:$0xff]  ;;  %v2501_v20 = vld [vmem:[#allocation3 + $0x5d8] sm:$0xff] }
 0x400   :  { %10580 = vmatprep.subr.bf16.mxu0 %v10579_v21  ;;  %10836 = vmatprep.subr.bf16.mxu1 %v10835_v1  ;;  %v10605_v21 = vunpack.c.h.s8.bf16 %v2490_v10  ;;  %v10861_v1 = vunpack.c.h.s8.bf16 %v2492_v11  ;;  %v10607_v22 = vunpack.c.l.s8.bf16 %v2499_v19  ;;  %v10863_v23 = vunpack.c.l.s8.bf16 %v2501_v20 }
 0x401   :  { %v10611_v36 = vunpack.c.h.s8.bf16 %v2499_v19  ;;  %v10867_v37 = vunpack.c.h.s8.bf16 %v2501_v20 }
 0x403   :  { %10582 = vmatpush1.bf16.msra.mxu0 %v10581_v30  ;;  %10838 = vmatpush1.bf16.msra.mxu1 %v10837_v31  ;;  %v2498_v30 = vld [vmem:[#allocation3 + $0x5c0] sm:$0xff]  ;;  %v2500_v31 = vld [vmem:[#allocation3 + $0x5d0] sm:$0xff] }
 0x404   :  { %10584 = vmatprep.subr.bf16.mxu0 %v10583_v34  ;;  %10840 = vmatprep.subr.bf16.mxu1 %v10839_v35  ;;  %v10609_v34 = vunpack.c.l.s8.bf16 %v2498_v30  ;;  %v10865_v35 = vunpack.c.l.s8.bf16 %v2500_v31 }
 0x407   :  { %10586 = vmatpush1.bf16.msra.mxu0 %v10585_v38  ;;  %10842 = vmatpush1.bf16.msra.mxu1 %v10841_v39  ;;  %v2507_v38 = vld [vmem:[#allocation3 + $0x608] sm:$0xff]  ;;  %v2509_v39 = vld [vmem:[#allocation3 + $0x618] sm:$0xff] }
 0x408   :  { %10588 = vmatprep.subr.bf16.mxu0 %v10587_v47  ;;  %10844 = vmatprep.subr.bf16.mxu1 %v10843_v5  ;;  %v10613_v47 = vunpack.c.h.s8.bf16 %v2498_v30  ;;  %v10869_v5 = vunpack.c.h.s8.bf16 %v2500_v31  ;;  %v10615_v48 = vunpack.c.l.s8.bf16 %v2507_v38  ;;  %v10871_v4 = vunpack.c.l.s8.bf16 %v2509_v39 }
 0x409   :  { %v10619_v53 = vunpack.c.h.s8.bf16 %v2507_v38  ;;  %v10875_v54 = vunpack.c.h.s8.bf16 %v2509_v39 }
 0x40b   :  { %10590 = vmatpush1.bf16.msra.mxu0 %v10589_v49  ;;  %10846 = vmatpush1.bf16.msra.mxu1 %v10845_v50  ;;  %v2506_v49 = vld [vmem:[#allocation3 + $0x600] sm:$0xff]  ;;  %v2508_v50 = vld [vmem:[#allocation3 + $0x610] sm:$0xff] }
 0x40c   :  { %10592 = vmatprep.subr.bf16.mxu0 %v10591_v51  ;;  %10848 = vmatprep.subr.bf16.mxu1 %v10847_v52  ;;  %v10617_v51 = vunpack.c.l.s8.bf16 %v2506_v49  ;;  %v10873_v52 = vunpack.c.l.s8.bf16 %v2508_v50 }
 0x40f   :  { %10594 = vmatpush1.bf16.msra.mxu0 %v10593_v55  ;;  %10850 = vmatpush1.bf16.msra.mxu1 %v10849_v56  ;;  %v2515_v55 = vld [vmem:[#allocation3 + $0x648] sm:$0xff]  ;;  %v2517_v56 = vld [vmem:[#allocation3 + $0x658] sm:$0xff] }
 0x410   :  { %10596 = vmatprep.subr.bf16.mxu0 %v10595_v3  ;;  %10852 = vmatprep.subr.bf16.mxu1 %v10851_v57  ;;  %v10621_v3 = vunpack.c.h.s8.bf16 %v2506_v49  ;;  %v10877_v57 = vunpack.c.h.s8.bf16 %v2508_v50  ;;  %v10623_v63 = vunpack.c.l.s8.bf16 %v2515_v55  ;;  %v10879_v7 = vunpack.c.l.s8.bf16 %v2517_v56 }
 0x411   :  { %v10627_v10 = vunpack.c.h.s8.bf16 %v2515_v55  ;;  %v10883_v11 = vunpack.c.h.s8.bf16 %v2517_v56 }
 0x413   :  { %10598 = vmatpush1.bf16.msra.mxu0 %v10597_v8  ;;  %10854 = vmatpush1.bf16.msra.mxu1 %v10853_v6  ;;  %v2514_v8 = vld [vmem:[#allocation3 + $0x640] sm:$0xff]  ;;  %v2516_v6 = vld [vmem:[#allocation3 + $0x650] sm:$0xff] }
 0x414   :  { %10600 = vmatprep.subr.bf16.mxu0 %v10599_v9  ;;  %10856 = vmatprep.subr.bf16.mxu1 %v10855_v60  ;;  %v10625_v9 = vunpack.c.l.s8.bf16 %v2514_v8  ;;  %v10881_v60 = vunpack.c.l.s8.bf16 %v2516_v6 }
 0x417   :  { %10602 = vmatpush1.bf16.msra.mxu0 %v10601_v14  ;;  %10858 = vmatpush1.bf16.msra.mxu1 %v10857_v15  ;;  %v2523_v14 = vld [vmem:[#allocation3 + $0x688] sm:$0xff]  ;;  %v2525_v15 = vld [vmem:[#allocation3 + $0x698] sm:$0xff] }
 0x418   :  { %10604 = vmatprep.subr.bf16.mxu0 %v10603_v16  ;;  %10860 = vmatprep.subr.bf16.mxu1 %v10859_v2  ;;  %v10629_v16 = vunpack.c.h.s8.bf16 %v2514_v8  ;;  %v10885_v2 = vunpack.c.h.s8.bf16 %v2516_v6  ;;  %v10631_v19 = vunpack.c.l.s8.bf16 %v2523_v14  ;;  %v10887_v20 = vunpack.c.l.s8.bf16 %v2525_v15 }
 0x419   :  { %v10635_v30 = vunpack.c.h.s8.bf16 %v2523_v14  ;;  %v10891_v31 = vunpack.c.h.s8.bf16 %v2525_v15 }
 0x41b   :  { %10606 = vmatpush1.bf16.msra.mxu0 %v10605_v21  ;;  %10862 = vmatpush1.bf16.msra.mxu1 %v10861_v1  ;;  %v2522_v21 = vld [vmem:[#allocation3 + $0x680] sm:$0xff]  ;;  %v2524_v1 = vld [vmem:[#allocation3 + $0x690] sm:$0xff] }
 0x41c   :  { %10608 = vmatprep.subr.bf16.mxu0 %v10607_v22  ;;  %10864 = vmatprep.subr.bf16.mxu1 %v10863_v23  ;;  %v10633_v22 = vunpack.c.l.s8.bf16 %v2522_v21  ;;  %v10889_v23 = vunpack.c.l.s8.bf16 %v2524_v1 }
 0x41f   :  { %10610 = vmatpush1.bf16.msra.mxu0 %v10609_v34  ;;  %10866 = vmatpush1.bf16.msra.mxu1 %v10865_v35  ;;  %v2531_v34 = vld [vmem:[#allocation3 + $0x6c8] sm:$0xff]  ;;  %v2533_v35 = vld [vmem:[#allocation3 + $0x6d8] sm:$0xff] }
 0x420   :  { %10612 = vmatprep.subr.bf16.mxu0 %v10611_v36  ;;  %10868 = vmatprep.subr.bf16.mxu1 %v10867_v37  ;;  %v10637_v36 = vunpack.c.h.s8.bf16 %v2522_v21  ;;  %v10893_v37 = vunpack.c.h.s8.bf16 %v2524_v1  ;;  %v10639_v38 = vunpack.c.l.s8.bf16 %v2531_v34  ;;  %v10895_v39 = vunpack.c.l.s8.bf16 %v2533_v35 }
 0x421   :  { %v10643_v49 = vunpack.c.h.s8.bf16 %v2531_v34  ;;  %v10899_v50 = vunpack.c.h.s8.bf16 %v2533_v35 }
 0x423   :  { %10614 = vmatpush1.bf16.msra.mxu0 %v10613_v47  ;;  %10870 = vmatpush1.bf16.msra.mxu1 %v10869_v5  ;;  %v2530_v47 = vld [vmem:[#allocation3 + $0x6c0] sm:$0xff]  ;;  %v2532_v5 = vld [vmem:[#allocation3 + $0x6d0] sm:$0xff] }
 0x424   :  { %10616 = vmatprep.subr.bf16.mxu0 %v10615_v48  ;;  %10872 = vmatprep.subr.bf16.mxu1 %v10871_v4  ;;  %v10641_v48 = vunpack.c.l.s8.bf16 %v2530_v47  ;;  %v10897_v4 = vunpack.c.l.s8.bf16 %v2532_v5 }
 0x426   :  { %4837 = vmatmul.mubr.f32.vlgmr.msra.gmra.mrb[10].mxu0 %v13273_v12  ;;  %5145 = vmatmul.mubr.f32.vlgmr.msra.gmra.mrb[10].mxu1 %v13273_v12 }
 0x427   :  { %10618 = vmatpush1.bf16.msra.mxu0 %v10617_v51  ;;  %10874 = vmatpush1.bf16.msra.mxu1 %v10873_v52  ;;  %v2539_v51 = vld [vmem:[#allocation3 + $0x708] sm:$0xff]  ;;  %v2541_v52 = vld [vmem:[#allocation3 + $0x718] sm:$0xff] }
 0x428   :  { %10620 = vmatprep.subr.bf16.mxu0 %v10619_v53  ;;  %10876 = vmatprep.subr.bf16.mxu1 %v10875_v54  ;;  %v10645_v53 = vunpack.c.h.s8.bf16 %v2530_v47  ;;  %v10901_v54 = vunpack.c.h.s8.bf16 %v2532_v5  ;;  %v10647_v55 = vunpack.c.l.s8.bf16 %v2539_v51  ;;  %v10903_v56 = vunpack.c.l.s8.bf16 %v2541_v52 }
 0x429   :  { %4842 = vmatprep.mubr.f32.mxu0 %v13285_v28  ;;  %5150 = vmatprep.mubr.f32.mxu1 %v13285_v28  ;;  %v10651_v8 = vunpack.c.h.s8.bf16 %v2539_v51  ;;  %v10907_v6 = vunpack.c.h.s8.bf16 %v2541_v52 }
 0x42a   :  { %4843 = vmatmul.mubr.f32.gmra.mrb[12].mxu0 %v13281_v24  ;;  %5151 = vmatmul.mubr.f32.gmra.mrb[12].mxu1 %v13281_v24 }
 0x42b   :  { %10622 = vmatpush1.bf16.msra.mxu0 %v10621_v3  ;;  %10878 = vmatpush1.bf16.msra.mxu1 %v10877_v57  ;;  %v2538_v3 = vld [vmem:[#allocation3 + $0x700] sm:$0xff]  ;;  %v2540_v57 = vld [vmem:[#allocation3 + $0x710] sm:$0xff] }
 0x42c   :  { %10624 = vmatprep.subr.bf16.mxu0 %v10623_v63  ;;  %10880 = vmatprep.subr.bf16.mxu1 %v10879_v7  ;;  %v10649_v63 = vunpack.c.l.s8.bf16 %v2538_v3  ;;  %v10905_v7 = vunpack.c.l.s8.bf16 %v2540_v57 }
 0x42d   :  { %4913 = vmatprep.mubr.f32.mxu0 %v13279_v18  ;;  %5221 = vmatprep.mubr.f32.mxu1 %v13279_v18 }
 0x42f   :  { %10626 = vmatpush1.bf16.msra.mxu0 %v10625_v9  ;;  %10882 = vmatpush1.bf16.msra.mxu1 %v10881_v60  ;;  %v2547_v9 = vld [vmem:[#allocation3 + $0x748] sm:$0xff]  ;;  %v2549_v60 = vld [vmem:[#allocation3 + $0x758] sm:$0xff] }
 0x430   :  { %10628 = vmatprep.subr.bf16.mxu0 %v10627_v10  ;;  %10884 = vmatprep.subr.bf16.mxu1 %v10883_v11  ;;  %v10653_v10 = vunpack.c.h.s8.bf16 %v2538_v3  ;;  %v10909_v11 = vunpack.c.h.s8.bf16 %v2540_v57  ;;  %v10655_v14 = vunpack.c.l.s8.bf16 %v2547_v9  ;;  %v10911_v15 = vunpack.c.l.s8.bf16 %v2549_v60 }
 0x431   :  { %v10659_v21 = vunpack.c.h.s8.bf16 %v2547_v9  ;;  %v10915_v1 = vunpack.c.h.s8.bf16 %v2549_v60 }
 0x433   :  { %10630 = vmatpush1.bf16.msra.mxu0 %v10629_v16  ;;  %10886 = vmatpush1.bf16.msra.mxu1 %v10885_v2  ;;  %v2546_v16 = vld [vmem:[#allocation3 + $0x740] sm:$0xff]  ;;  %v2548_v2 = vld [vmem:[#allocation3 + $0x750] sm:$0xff] }
 0x434   :  { %10632 = vmatprep.subr.bf16.mxu0 %v10631_v19  ;;  %10888 = vmatprep.subr.bf16.mxu1 %v10887_v20  ;;  %v10657_v19 = vunpack.c.l.s8.bf16 %v2546_v16  ;;  %v10913_v20 = vunpack.c.l.s8.bf16 %v2548_v2 }
 0x437   :  { %10634 = vmatpush1.bf16.msra.mxu0 %v10633_v22  ;;  %10890 = vmatpush1.bf16.msra.mxu1 %v10889_v23  ;;  %v2555_v22 = vld [vmem:[#allocation3 + $0x788] sm:$0xff]  ;;  %v2557_v23 = vld [vmem:[#allocation3 + $0x798] sm:$0xff] }
 0x438   :  { %10636 = vmatprep.subr.bf16.mxu0 %v10635_v30  ;;  %10892 = vmatprep.subr.bf16.mxu1 %v10891_v31  ;;  %v10661_v30 = vunpack.c.h.s8.bf16 %v2546_v16  ;;  %v10917_v31 = vunpack.c.h.s8.bf16 %v2548_v2  ;;  %v10663_v34 = vunpack.c.l.s8.bf16 %v2555_v22  ;;  %v10919_v35 = vunpack.c.l.s8.bf16 %v2557_v23 }
 0x439   :  { %v10667_v47 = vunpack.c.h.s8.bf16 %v2555_v22  ;;  %v10923_v5 = vunpack.c.h.s8.bf16 %v2557_v23 }
 0x43b   :  { %10638 = vmatpush1.bf16.msra.mxu0 %v10637_v36  ;;  %10894 = vmatpush1.bf16.msra.mxu1 %v10893_v37  ;;  %v2554_v36 = vld [vmem:[#allocation3 + $0x780] sm:$0xff]  ;;  %v2556_v37 = vld [vmem:[#allocation3 + $0x790] sm:$0xff] }
 0x43c   :  { %10640 = vmatprep.subr.bf16.mxu0 %v10639_v38  ;;  %10896 = vmatprep.subr.bf16.mxu1 %v10895_v39  ;;  %v10665_v38 = vunpack.c.l.s8.bf16 %v2554_v36  ;;  %v10921_v39 = vunpack.c.l.s8.bf16 %v2556_v37 }
 0x43f   :  { %10642 = vmatpush1.bf16.msra.mxu0 %v10641_v48  ;;  %10898 = vmatpush1.bf16.msra.mxu1 %v10897_v4  ;;  %v2563_v48 = vld [vmem:[#allocation3 + $0x7c8] sm:$0xff]  ;;  %v2565_v4 = vld [vmem:[#allocation3 + $0x7d8] sm:$0xff] }
 0x440   :  { %10644 = vmatprep.subr.bf16.mxu0 %v10643_v49  ;;  %10900 = vmatprep.subr.bf16.mxu1 %v10899_v50  ;;  %v10669_v49 = vunpack.c.h.s8.bf16 %v2554_v36  ;;  %v10925_v50 = vunpack.c.h.s8.bf16 %v2556_v37  ;;  %v10671_v51 = vunpack.c.l.s8.bf16 %v2563_v48  ;;  %v10927_v52 = vunpack.c.l.s8.bf16 %v2565_v4 }
 0x441   :  { %v10675_v3 = vunpack.c.h.s8.bf16 %v2563_v48  ;;  %v10931_v57 = vunpack.c.h.s8.bf16 %v2565_v4 }
 0x443   :  { %10646 = vmatpush1.bf16.msra.mxu0 %v10645_v53  ;;  %10902 = vmatpush1.bf16.msra.mxu1 %v10901_v54  ;;  %v2562_v53 = vld [vmem:[#allocation3 + $0x7c0] sm:$0xff]  ;;  %v2564_v54 = vld [vmem:[#allocation3 + $0x7d0] sm:$0xff] }
 0x444   :  { %10648 = vmatprep.subr.bf16.mxu0 %v10647_v55  ;;  %10904 = vmatprep.subr.bf16.mxu1 %v10903_v56  ;;  %v10673_v55 = vunpack.c.l.s8.bf16 %v2562_v53  ;;  %v10929_v56 = vunpack.c.l.s8.bf16 %v2564_v54 }
 0x447   :  { %10650 = vmatpush1.bf16.msra.mxu0 %v10649_v63  ;;  %10906 = vmatpush1.bf16.msra.mxu1 %v10905_v7  ;;  %v2319_v63 = vld [vmem:[#allocation3 + $0x28] sm:$0xff]  ;;  %v2321_v7 = vld [vmem:[#allocation3 + $0x38] sm:$0xff] }
 0x448   :  { %10652 = vmatprep.subr.bf16.mxu0 %v10651_v8  ;;  %10908 = vmatprep.subr.bf16.mxu1 %v10907_v6  ;;  %v10677_v8 = vunpack.c.h.s8.bf16 %v2562_v53  ;;  %v10933_v6 = vunpack.c.h.s8.bf16 %v2564_v54  ;;  %v10935_v9 = vunpack.c.l.s8.bf16 %v2319_v63  ;;  %v11191_v60 = vunpack.c.l.s8.bf16 %v2321_v7 }
 0x449   :  { %v10939_v16 = vunpack.c.h.s8.bf16 %v2319_v63  ;;  %v11195_v2 = vunpack.c.h.s8.bf16 %v2321_v7  ;;  %v2342_v7 = vld [vmem:[#allocation3 + $0xe0] sm:$0xff] }
 0x44b   :  { %10654 = vmatpush1.bf16.msra.mxu0 %v10653_v10  ;;  %10910 = vmatpush1.bf16.msra.mxu1 %v10909_v11  ;;  %v2318_v10 = vld [vmem:[#allocation3 + $0x20] sm:$0xff]  ;;  %v2320_v11 = vld [vmem:[#allocation3 + $0x30] sm:$0xff] }
 0x44c   :  { %10656 = vmatprep.subr.bf16.mxu0 %v10655_v14  ;;  %10912 = vmatprep.subr.bf16.mxu1 %v10911_v15  ;;  %v10937_v14 = vunpack.c.l.s8.bf16 %v2318_v10  ;;  %v11193_v15 = vunpack.c.l.s8.bf16 %v2320_v11 }
 0x44f   :  { %10658 = vmatpush1.bf16.msra.mxu0 %v10657_v19  ;;  %10914 = vmatpush1.bf16.msra.mxu1 %v10913_v20  ;;  %v2327_v19 = vld [vmem:[#allocation3 + $0x68] sm:$0xff]  ;;  %v2329_v20 = vld [vmem:[#allocation3 + $0x78] sm:$0xff] }
 0x450   :  { %10660 = vmatprep.subr.bf16.mxu0 %v10659_v21  ;;  %10916 = vmatprep.subr.bf16.mxu1 %v10915_v1  ;;  %v10941_v21 = vunpack.c.h.s8.bf16 %v2318_v10  ;;  %v11197_v1 = vunpack.c.h.s8.bf16 %v2320_v11  ;;  %v10943_v22 = vunpack.c.l.s8.bf16 %v2327_v19  ;;  %v11199_v23 = vunpack.c.l.s8.bf16 %v2329_v20  ;;  %v2351_v11 = vld [vmem:[#allocation3 + $0x128] sm:$0xff] }
 0x451   :  { %v10947_v36 = vunpack.c.h.s8.bf16 %v2327_v19  ;;  %v11203_v37 = vunpack.c.h.s8.bf16 %v2329_v20  ;;  %v2350_v20 = vld [vmem:[#allocation3 + $0x120] sm:$0xff] }
 0x453   :  { %10662 = vmatpush1.bf16.msra.mxu0 %v10661_v30  ;;  %10918 = vmatpush1.bf16.msra.mxu1 %v10917_v31  ;;  %v2326_v30 = vld [vmem:[#allocation3 + $0x60] sm:$0xff]  ;;  %v2328_v31 = vld [vmem:[#allocation3 + $0x70] sm:$0xff] }
 0x454   :  { %10664 = vmatprep.subr.bf16.mxu0 %v10663_v34  ;;  %10920 = vmatprep.subr.bf16.mxu1 %v10919_v35  ;;  %v10945_v34 = vunpack.c.l.s8.bf16 %v2326_v30  ;;  %v11201_v35 = vunpack.c.l.s8.bf16 %v2328_v31 }
 0x457   :  { %10666 = vmatpush1.bf16.msra.mxu0 %v10665_v38  ;;  %10922 = vmatpush1.bf16.msra.mxu1 %v10921_v39  ;;  %v2335_v38 = vld [vmem:[#allocation3 + $0xa8] sm:$0xff]  ;;  %v2337_v39 = vld [vmem:[#allocation3 + $0xb8] sm:$0xff] }
 0x458   :  { %10668 = vmatprep.subr.bf16.mxu0 %v10667_v47  ;;  %10924 = vmatprep.subr.bf16.mxu1 %v10923_v5  ;;  %v10949_v47 = vunpack.c.h.s8.bf16 %v2326_v30  ;;  %v11205_v5 = vunpack.c.h.s8.bf16 %v2328_v31  ;;  %v10951_v48 = vunpack.c.l.s8.bf16 %v2335_v38  ;;  %v11207_v4 = vunpack.c.l.s8.bf16 %v2337_v39  ;;  %v2359_v31 = vld [vmem:[#allocation3 + $0x168] sm:$0xff] }
 0x459   :  { %v10955_v53 = vunpack.c.h.s8.bf16 %v2335_v38  ;;  %v11211_v54 = vunpack.c.h.s8.bf16 %v2337_v39  ;;  %v2358_v39 = vld [vmem:[#allocation3 + $0x160] sm:$0xff] }
 0x45b   :  { %10670 = vmatpush1.bf16.msra.mxu0 %v10669_v49  ;;  %10926 = vmatpush1.bf16.msra.mxu1 %v10925_v50  ;;  %v2334_v49 = vld [vmem:[#allocation3 + $0xa0] sm:$0xff]  ;;  %v2336_v50 = vld [vmem:[#allocation3 + $0xb0] sm:$0xff] }
 0x45c   :  { %10672 = vmatprep.subr.bf16.mxu0 %v10671_v51  ;;  %10928 = vmatprep.subr.bf16.mxu1 %v10927_v52  ;;  %v10953_v51 = vunpack.c.l.s8.bf16 %v2334_v49  ;;  %v11209_v52 = vunpack.c.l.s8.bf16 %v2336_v50 }
 0x45f   :  { %10674 = vmatpush1.bf16.msra.mxu0 %v10673_v55  ;;  %10930 = vmatpush1.bf16.msra.mxu1 %v10929_v56  ;;  %v2343_v55 = vld [vmem:[#allocation3 + $0xe8] sm:$0xff]  ;;  %v10957_v56 = vunpack.c.h.s8.bf16 %v2334_v49 }
 0x460   :  { %10676 = vmatprep.subr.bf16.mxu0 %v10675_v3  ;;  %10932 = vmatprep.subr.bf16.mxu1 %v10931_v57  ;;  %v11213_v3 = vunpack.c.h.s8.bf16 %v2336_v50  ;;  %v10959_v57 = vunpack.c.l.s8.bf16 %v2343_v55  ;;  %v2367_v50 = vld [vmem:[#allocation3 + $0x1a8] sm:$0xff] }
 0x463   :  { %10678 = vmatpush1.bf16.msra.mxu0 %v10677_v8  ;;  %10934 = vmatpush1.bf16.msra.mxu1 %v10933_v6  ;;  %v2344_v8 = vld [vmem:[#allocation3 + $0xf0] sm:$0xff]  ;;  %v10961_v6 = vunpack.c.l.s8.bf16 %v2342_v7 }
 0x464   :  { %10936 = vmatprep.subr.bf16.mxu0 %v10935_v9  ;;  %11192 = vmatprep.subr.bf16.mxu1 %v11191_v60  ;;  %v11217_v9 = vunpack.c.l.s8.bf16 %v2344_v8  ;;  %v10963_v60 = vunpack.c.h.s8.bf16 %v2343_v55 }
 0x466   :  { %4914 = vmatmul.mubr.f32.vlgmr.msra.gmra.mrb[10].mxu0 %v13275_v13  ;;  %5222 = vmatmul.mubr.f32.vlgmr.msra.gmra.mrb[10].mxu1 %v13275_v13 }
 0x467   :  { %10938 = vmatpush1.bf16.msra.mxu0 %v10937_v14  ;;  %11194 = vmatpush1.bf16.msra.mxu1 %v11193_v15  ;;  %v2353_v14 = vld [vmem:[#allocation3 + $0x138] sm:$0xff]  ;;  %v10965_v15 = vunpack.c.h.s8.bf16 %v2342_v7 }
 0x468   :  { %4919 = vmatprep.mubr.f32.mxu0 %v13287_v29  ;;  %5227 = vmatprep.mubr.f32.mxu1 %v13287_v29  ;;  %v11223_v19 = vunpack.c.l.s8.bf16 %v2353_v14  ;;  %v11227_v30 = vunpack.c.h.s8.bf16 %v2353_v14  ;;  %v2374_v14 = vld [vmem:[#allocation3 + $0x1e0] sm:$0xff] }
 0x469   :  { %10940 = vmatprep.subr.bf16.mxu0 %v10939_v16  ;;  %11196 = vmatprep.subr.bf16.mxu1 %v11195_v2  ;;  %v11221_v16 = vunpack.c.h.s8.bf16 %v2344_v8  ;;  %v10967_v2 = vunpack.c.l.s8.bf16 %v2351_v11  ;;  %v2375_v8 = vld [vmem:[#allocation3 + $0x1e8] sm:$0xff] }
 0x46a   :  { %4920 = vmatmul.mubr.f32.gmra.mrb[12].mxu0 %v13283_v25  ;;  %5228 = vmatmul.mubr.f32.gmra.mrb[12].mxu1 %v13283_v25 }
 0x46b   :  { %10942 = vmatpush1.bf16.msra.mxu0 %v10941_v21  ;;  %11198 = vmatpush1.bf16.msra.mxu1 %v11197_v1  ;;  %v2352_v21 = vld [vmem:[#allocation3 + $0x130] sm:$0xff]  ;;  %v10969_v1 = vunpack.c.l.s8.bf16 %v2350_v20 }
 0x46c   :  { %10944 = vmatprep.subr.bf16.mxu0 %v10943_v22  ;;  %11200 = vmatprep.subr.bf16.mxu1 %v11199_v23  ;;  %v11225_v22 = vunpack.c.l.s8.bf16 %v2352_v21  ;;  %v10971_v23 = vunpack.c.h.s8.bf16 %v2351_v11 }
 0x46d   :  { %5298 = vmatprep.mubr.f32.mxu0 %v13245_v32  ;;  %5606 = vmatprep.mubr.f32.mxu1 %v13245_v32  ;;  %v2345_v32 = vld [vmem:[#allocation3 + $0xf8] sm:$0xff] }
 0x46e   :  { %v11215_v63 = vunpack.c.l.s8.bf16 %v2345_v32  ;;  %v11219_v10 = vunpack.c.h.s8.bf16 %v2345_v32  ;;  %v2366_v32 = vld [vmem:[#allocation3 + $0x1a0] sm:$0xff] }
 0x46f   :  { %10946 = vmatpush1.bf16.msra.mxu0 %v10945_v34  ;;  %11202 = vmatpush1.bf16.msra.mxu1 %v11201_v35  ;;  %v2361_v34 = vld [vmem:[#allocation3 + $0x178] sm:$0xff]  ;;  %v10973_v35 = vunpack.c.h.s8.bf16 %v2350_v20 }
 0x470   :  { %10948 = vmatprep.subr.bf16.mxu0 %v10947_v36  ;;  %11204 = vmatprep.subr.bf16.mxu1 %v11203_v37  ;;  %v11229_v36 = vunpack.c.h.s8.bf16 %v2352_v21  ;;  %v10975_v37 = vunpack.c.l.s8.bf16 %v2359_v31  ;;  %v11231_v38 = vunpack.c.l.s8.bf16 %v2361_v34  ;;  %v11235_v49 = vunpack.c.h.s8.bf16 %v2361_v34  ;;  %v2383_v21 = vld [vmem:[#allocation3 + $0x228] sm:$0xff]  ;;  %v2382_v34 = vld [vmem:[#allocation3 + $0x220] sm:$0xff] }
 0x473   :  { %10950 = vmatpush1.bf16.msra.mxu0 %v10949_v47  ;;  %11206 = vmatpush1.bf16.msra.mxu1 %v11205_v5  ;;  %v2360_v47 = vld [vmem:[#allocation3 + $0x170] sm:$0xff]  ;;  %v10977_v5 = vunpack.c.l.s8.bf16 %v2358_v39 }
 0x474   :  { %10952 = vmatprep.subr.bf16.mxu0 %v10951_v48  ;;  %11208 = vmatprep.subr.bf16.mxu1 %v11207_v4  ;;  %v11233_v48 = vunpack.c.l.s8.bf16 %v2360_v47  ;;  %v10979_v4 = vunpack.c.h.s8.bf16 %v2359_v31 }
 0x477   :  { %10954 = vmatpush1.bf16.msra.mxu0 %v10953_v51  ;;  %11210 = vmatpush1.bf16.msra.mxu1 %v11209_v52  ;;  %v2369_v51 = vld [vmem:[#allocation3 + $0x1b8] sm:$0xff]  ;;  %v10981_v52 = vunpack.c.h.s8.bf16 %v2358_v39 }
 0x478   :  { %10956 = vmatprep.subr.bf16.mxu0 %v10955_v53  ;;  %11212 = vmatprep.subr.bf16.mxu1 %v11211_v54  ;;  %v11237_v53 = vunpack.c.h.s8.bf16 %v2360_v47  ;;  %v10983_v54 = vunpack.c.l.s8.bf16 %v2367_v50  ;;  %v11239_v55 = vunpack.c.l.s8.bf16 %v2369_v51  ;;  %v11243_v7 = vunpack.c.h.s8.bf16 %v2369_v51  ;;  %v2391_v47 = vld [vmem:[#allocation3 + $0x268] sm:$0xff]  ;;  %v2390_v51 = vld [vmem:[#allocation3 + $0x260] sm:$0xff] }
 0x47b   :  { %10958 = vmatpush1.bf16.msra.mxu0 %v10957_v56  ;;  %11214 = vmatpush1.bf16.msra.mxu1 %v11213_v3  ;;  %v2368_v56 = vld [vmem:[#allocation3 + $0x1b0] sm:$0xff]  ;;  %v10985_v3 = vunpack.c.l.s8.bf16 %v2366_v32 }
 0x47c   :  { %10960 = vmatprep.subr.bf16.mxu0 %v10959_v57  ;;  %11216 = vmatprep.subr.bf16.mxu1 %v11215_v63  ;;  %v11241_v57 = vunpack.c.l.s8.bf16 %v2368_v56  ;;  %v10987_v63 = vunpack.c.h.s8.bf16 %v2367_v50 }
 0x47f   :  { %10962 = vmatpush1.bf16.msra.mxu0 %v10961_v6  ;;  %11218 = vmatpush1.bf16.msra.mxu1 %v11217_v9  ;;  %v2377_v6 = vld [vmem:[#allocation3 + $0x1f8] sm:$0xff]  ;;  %v10989_v9 = vunpack.c.h.s8.bf16 %v2366_v32  ;;  %v2399_v32 = vld [vmem:[#allocation3 + $0x2a8] sm:$0xff] }
 0x480   :  { %10964 = vmatprep.subr.bf16.mxu0 %v10963_v60  ;;  %11220 = vmatprep.subr.bf16.mxu1 %v11219_v10  ;;  %v11245_v60 = vunpack.c.h.s8.bf16 %v2368_v56  ;;  %v10991_v10 = vunpack.c.l.s8.bf16 %v2375_v8  ;;  %v11247_v11 = vunpack.c.l.s8.bf16 %v2377_v6  ;;  %v11251_v20 = vunpack.c.h.s8.bf16 %v2377_v6  ;;  %v2401_v56 = vld [vmem:[#allocation3 + $0x2b8] sm:$0xff] }
 0x483   :  { %10966 = vmatpush1.bf16.msra.mxu0 %v10965_v15  ;;  %11222 = vmatpush1.bf16.msra.mxu1 %v11221_v16  ;;  %v2376_v15 = vld [vmem:[#allocation3 + $0x1f0] sm:$0xff]  ;;  %v10993_v16 = vunpack.c.l.s8.bf16 %v2374_v14 }
 0x484   :  { %10968 = vmatprep.subr.bf16.mxu0 %v10967_v2  ;;  %11224 = vmatprep.subr.bf16.mxu1 %v11223_v19  ;;  %v11249_v2 = vunpack.c.l.s8.bf16 %v2376_v15  ;;  %v10995_v19 = vunpack.c.h.s8.bf16 %v2375_v8 }
 0x487   :  { %10970 = vmatpush1.bf16.msra.mxu0 %v10969_v1  ;;  %11226 = vmatpush1.bf16.msra.mxu1 %v11225_v22  ;;  %v2385_v1 = vld [vmem:[#allocation3 + $0x238] sm:$0xff]  ;;  %v10997_v22 = vunpack.c.h.s8.bf16 %v2374_v14 }
 0x488   :  { %10972 = vmatprep.subr.bf16.mxu0 %v10971_v23  ;;  %11228 = vmatprep.subr.bf16.mxu1 %v11227_v30  ;;  %v11253_v23 = vunpack.c.h.s8.bf16 %v2376_v15  ;;  %v10999_v30 = vunpack.c.l.s8.bf16 %v2383_v21  ;;  %v11255_v31 = vunpack.c.l.s8.bf16 %v2385_v1  ;;  %v11259_v39 = vunpack.c.h.s8.bf16 %v2385_v1 }
 0x48b   :  { %10974 = vmatpush1.bf16.msra.mxu0 %v10973_v35  ;;  %11230 = vmatpush1.bf16.msra.mxu1 %v11229_v36  ;;  %v2384_v35 = vld [vmem:[#allocation3 + $0x230] sm:$0xff]  ;;  %v11001_v36 = vunpack.c.l.s8.bf16 %v2382_v34 }
 0x48c   :  { %10976 = vmatprep.subr.bf16.mxu0 %v10975_v37  ;;  %11232 = vmatprep.subr.bf16.mxu1 %v11231_v38  ;;  %v11257_v37 = vunpack.c.l.s8.bf16 %v2384_v35  ;;  %v11003_v38 = vunpack.c.h.s8.bf16 %v2383_v21 }
 0x48f   :  { %10978 = vmatpush1.bf16.msra.mxu0 %v10977_v5  ;;  %11234 = vmatpush1.bf16.msra.mxu1 %v11233_v48  ;;  %v2393_v5 = vld [vmem:[#allocation3 + $0x278] sm:$0xff]  ;;  %v11005_v48 = vunpack.c.h.s8.bf16 %v2382_v34 }
 0x490   :  { %10980 = vmatprep.subr.bf16.mxu0 %v10979_v4  ;;  %11236 = vmatprep.subr.bf16.mxu1 %v11235_v49  ;;  %v11261_v4 = vunpack.c.h.s8.bf16 %v2384_v35  ;;  %v11007_v49 = vunpack.c.l.s8.bf16 %v2391_v47  ;;  %v11263_v50 = vunpack.c.l.s8.bf16 %v2393_v5 }
 0x493   :  { %10982 = vmatpush1.bf16.msra.mxu0 %v10981_v52  ;;  %11238 = vmatpush1.bf16.msra.mxu1 %v11237_v53  ;;  %v2392_v52 = vld [vmem:[#allocation3 + $0x270] sm:$0xff] }
 0x494   :  { %10984 = vmatprep.subr.bf16.mxu0 %v10983_v54  ;;  %11240 = vmatprep.subr.bf16.mxu1 %v11239_v55  ;;  %v11265_v53 = vunpack.c.l.s8.bf16 %v2392_v52  ;;  %v11011_v54 = vunpack.c.h.s8.bf16 %v2391_v47  ;;  %v11267_v55 = vunpack.c.h.s8.bf16 %v2393_v5 }
 0x497   :  { %10986 = vmatpush1.bf16.msra.mxu0 %v10985_v3  ;;  %11242 = vmatpush1.bf16.msra.mxu1 %v11241_v57  ;;  %v11269_v3 = vunpack.c.h.s8.bf16 %v2392_v52  ;;  %v11271_v57 = vunpack.c.l.s8.bf16 %v2401_v56 }
 0x498   :  { %10988 = vmatprep.subr.bf16.mxu0 %v10987_v63  ;;  %11244 = vmatprep.subr.bf16.mxu1 %v11243_v7  ;;  %v2398_v63 = vld [vmem:[#allocation3 + $0x2a0] sm:$0xff]  ;;  %v2400_v7 = vld [vmem:[#allocation3 + $0x2b0] sm:$0xff] }
 0x499   :  { %v11017_v8 = vunpack.c.l.s8.bf16 %v2398_v63  ;;  %v11273_v6 = vunpack.c.l.s8.bf16 %v2400_v7  ;;  %v11277_v14 = vunpack.c.h.s8.bf16 %v2400_v7 }
 0x49b   :  { %10990 = vmatpush1.bf16.msra.mxu0 %v10989_v9  ;;  %11246 = vmatpush1.bf16.msra.mxu1 %v11245_v60  ;;  %v11019_v9 = vunpack.c.h.s8.bf16 %v2399_v32  ;;  %v11275_v60 = vunpack.c.h.s8.bf16 %v2401_v56 }
 0x49c   :  { %10992 = vmatprep.subr.bf16.mxu0 %v10991_v10  ;;  %11248 = vmatprep.subr.bf16.mxu1 %v11247_v11  ;;  %v2407_v10 = vld [vmem:[#allocation3 + $0x2e8] sm:$0xff]  ;;  %v11021_v11 = vunpack.c.h.s8.bf16 %v2398_v63 }
 0x49d   :  { %v11023_v15 = vunpack.c.l.s8.bf16 %v2407_v10  ;;  %v11027_v1 = vunpack.c.h.s8.bf16 %v2407_v10 }
 0x49f   :  { %10994 = vmatpush1.bf16.msra.mxu0 %v10993_v16  ;;  %11250 = vmatpush1.bf16.msra.mxu1 %v11249_v2  ;;  %v2406_v2 = vld [vmem:[#allocation3 + $0x2e0] sm:$0xff] }
 0x4a0   :  { %10996 = vmatprep.subr.bf16.mxu0 %v10995_v19  ;;  %11252 = vmatprep.subr.bf16.mxu1 %v11251_v20  ;;  %v2408_v19 = vld [vmem:[#allocation3 + $0x2f0] sm:$0xff]  ;;  %v11025_v20 = vunpack.c.l.s8.bf16 %v2406_v2 }
 0x4a1   :  { %v11281_v21 = vunpack.c.l.s8.bf16 %v2408_v19  ;;  %v11285_v34 = vunpack.c.h.s8.bf16 %v2408_v19 }
 0x4a3   :  { %10998 = vmatpush1.bf16.msra.mxu0 %v10997_v22  ;;  %11254 = vmatpush1.bf16.msra.mxu1 %v11253_v23  ;;  %v2415_v23 = vld [vmem:[#allocation3 + $0x328] sm:$0xff] }
 0x4a4   :  { %11000 = vmatprep.subr.bf16.mxu0 %v10999_v30  ;;  %11256 = vmatprep.subr.bf16.mxu1 %v11255_v31  ;;  %v2417_v30 = vld [vmem:[#allocation3 + $0x338] sm:$0xff]  ;;  %v11029_v31 = vunpack.c.h.s8.bf16 %v2406_v2  ;;  %v11031_v35 = vunpack.c.l.s8.bf16 %v2415_v23  ;;  %v11035_v5 = vunpack.c.h.s8.bf16 %v2415_v23 }
 0x4a6   :  { %5299 = vmatmul.mubr.f32.vlgmr.msra.gmra.mrb[14].mxu0 %v13241_v26  ;;  %5607 = vmatmul.mubr.f32.vlgmr.msra.gmra.mrb[14].mxu1 %v13241_v26  ;;  %v11009_v26 = vunpack.c.l.s8.bf16 %v2390_v51 }
 0x4a7   :  { %11002 = vmatpush1.bf16.msra.mxu0 %v11001_v36  ;;  %11258 = vmatpush1.bf16.msra.mxu1 %v11257_v37  ;;  %v11287_v36 = vunpack.c.l.s8.bf16 %v2417_v30  ;;  %v2414_v37 = vld [vmem:[#allocation3 + $0x320] sm:$0xff] }
 0x4a8   :  { %11004 = vmatprep.subr.bf16.mxu0 %v11003_v38  ;;  %11260 = vmatprep.subr.bf16.mxu1 %v11259_v39  ;;  %v2416_v38 = vld [vmem:[#allocation3 + $0x330] sm:$0xff]  ;;  %v11033_v39 = vunpack.c.l.s8.bf16 %v2414_v37 }
 0x4a9   :  { %5304 = vmatprep.mubr.f32.mxu0 %v13253_v42  ;;  %5612 = vmatprep.mubr.f32.mxu1 %v13253_v42  ;;  %v11013_v42 = vunpack.c.h.s8.bf16 %v2390_v51  ;;  %v11289_v47 = vunpack.c.l.s8.bf16 %v2416_v38  ;;  %v11293_v51 = vunpack.c.h.s8.bf16 %v2416_v38 }
 0x4aa   :  { %5305 = vmatmul.mubr.f32.gmra.mrb[16].mxu0 %v13249_v40  ;;  %5613 = vmatmul.mubr.f32.gmra.mrb[16].mxu1 %v13249_v40  ;;  %v11015_v40 = vunpack.c.l.s8.bf16 %v2399_v32 }
 0x4ab   :  { %11006 = vmatpush1.bf16.msra.mxu0 %v11005_v48  ;;  %11262 = vmatpush1.bf16.msra.mxu1 %v11261_v4  ;;  %v11291_v48 = vunpack.c.h.s8.bf16 %v2417_v30  ;;  %v2423_v4 = vld [vmem:[#allocation3 + $0x368] sm:$0xff] }
 0x4ac   :  { %11008 = vmatprep.subr.bf16.mxu0 %v11007_v49  ;;  %11264 = vmatprep.subr.bf16.mxu1 %v11263_v50  ;;  %v2425_v49 = vld [vmem:[#allocation3 + $0x378] sm:$0xff]  ;;  %v11037_v50 = vunpack.c.h.s8.bf16 %v2414_v37  ;;  %v11039_v52 = vunpack.c.l.s8.bf16 %v2423_v4  ;;  %v11043_v56 = vunpack.c.h.s8.bf16 %v2423_v4 }
 0x4ad   :  { %5375 = vmatprep.mubr.f32.mxu0 %v13247_v33  ;;  %5683 = vmatprep.mubr.f32.mxu1 %v13247_v33  ;;  %v2409_v33 = vld [vmem:[#allocation3 + $0x2f8] sm:$0xff] }
 0x4ae   :  { %v11279_v16 = vunpack.c.l.s8.bf16 %v2409_v33  ;;  %v11283_v22 = vunpack.c.h.s8.bf16 %v2409_v33 }
 0x4af   :  { %11010 = vmatpush1.bf16.msra.mxu0 %v11009_v26  ;;  %11266 = vmatpush1.bf16.msra.mxu1 %v11265_v53  ;;  %v11295_v26 = vunpack.c.l.s8.bf16 %v2425_v49  ;;  %v2422_v53 = vld [vmem:[#allocation3 + $0x360] sm:$0xff] }
 0x4b0   :  { %11012 = vmatprep.subr.bf16.mxu0 %v11011_v54  ;;  %11268 = vmatprep.subr.bf16.mxu1 %v11267_v55  ;;  %v2424_v54 = vld [vmem:[#allocation3 + $0x370] sm:$0xff]  ;;  %v11041_v55 = vunpack.c.l.s8.bf16 %v2422_v53 }
 0x4b1   :  { %v11297_v32 = vunpack.c.l.s8.bf16 %v2424_v54  ;;  %v11301_v63 = vunpack.c.h.s8.bf16 %v2424_v54 }
 0x4b3   :  { %11014 = vmatpush1.bf16.msra.mxu0 %v11013_v42  ;;  %11270 = vmatpush1.bf16.msra.mxu1 %v11269_v3  ;;  %v11299_v42 = vunpack.c.h.s8.bf16 %v2425_v49  ;;  %v2431_v3 = vld [vmem:[#allocation3 + $0x3a8] sm:$0xff] }
 0x4b4   :  { %11016 = vmatprep.subr.bf16.mxu0 %v11015_v40  ;;  %11272 = vmatprep.subr.bf16.mxu1 %v11271_v57  ;;  %v2433_v40 = vld [vmem:[#allocation3 + $0x3b8] sm:$0xff]  ;;  %v11045_v57 = vunpack.c.h.s8.bf16 %v2422_v53  ;;  %v11047_v7 = vunpack.c.l.s8.bf16 %v2431_v3  ;;  %v11051_v33 = vunpack.c.h.s8.bf16 %v2431_v3 }
 0x4b7   :  { %11018 = vmatpush1.bf16.msra.mxu0 %v11017_v8  ;;  %11274 = vmatpush1.bf16.msra.mxu1 %v11273_v6  ;;  %v11303_v8 = vunpack.c.l.s8.bf16 %v2433_v40  ;;  %v2430_v6 = vld [vmem:[#allocation3 + $0x3a0] sm:$0xff] }
 0x4b8   :  { %11020 = vmatprep.subr.bf16.mxu0 %v11019_v9  ;;  %11276 = vmatprep.subr.bf16.mxu1 %v11275_v60  ;;  %v2432_v9 = vld [vmem:[#allocation3 + $0x3b0] sm:$0xff]  ;;  %v11049_v60 = vunpack.c.l.s8.bf16 %v2430_v6 }
 0x4b9   :  { %v11305_v10 = vunpack.c.l.s8.bf16 %v2432_v9  ;;  %v11309_v2 = vunpack.c.h.s8.bf16 %v2432_v9  ;;  %v2464_v9 = vld [vmem:[#allocation3 + $0x4b0] sm:$0xff] }
 0x4bb   :  { %11022 = vmatpush1.bf16.msra.mxu0 %v11021_v11  ;;  %11278 = vmatpush1.bf16.msra.mxu1 %v11277_v14  ;;  %v11307_v11 = vunpack.c.h.s8.bf16 %v2433_v40  ;;  %v2439_v14 = vld [vmem:[#allocation3 + $0x3e8] sm:$0xff] }
 0x4bc   :  { %11024 = vmatprep.subr.bf16.mxu0 %v11023_v15  ;;  %11280 = vmatprep.subr.bf16.mxu1 %v11279_v16  ;;  %v2441_v15 = vld [vmem:[#allocation3 + $0x3f8] sm:$0xff]  ;;  %v11053_v16 = vunpack.c.h.s8.bf16 %v2430_v6  ;;  %v11055_v19 = vunpack.c.l.s8.bf16 %v2439_v14  ;;  %v11059_v30 = vunpack.c.h.s8.bf16 %v2439_v14  ;;  %v2462_v6 = vld [vmem:[#allocation3 + $0x4a0] sm:$0xff]  ;;  %v2471_v14 = vld [vmem:[#allocation3 + $0x4e8] sm:$0xff] }
 0x4bf   :  { %11026 = vmatpush1.bf16.msra.mxu0 %v11025_v20  ;;  %11282 = vmatpush1.bf16.msra.mxu1 %v11281_v21  ;;  %v11311_v20 = vunpack.c.l.s8.bf16 %v2441_v15  ;;  %v2438_v21 = vld [vmem:[#allocation3 + $0x3e0] sm:$0xff] }
 0x4c0   :  { %11028 = vmatprep.subr.bf16.mxu0 %v11027_v1  ;;  %11284 = vmatprep.subr.bf16.mxu1 %v11283_v22  ;;  %v2440_v1 = vld [vmem:[#allocation3 + $0x3f0] sm:$0xff]  ;;  %v11057_v22 = vunpack.c.l.s8.bf16 %v2438_v21 }
 0x4c1   :  { %v11313_v23 = vunpack.c.l.s8.bf16 %v2440_v1  ;;  %v11317_v37 = vunpack.c.h.s8.bf16 %v2440_v1 }
 0x4c3   :  { %11030 = vmatpush1.bf16.msra.mxu0 %v11029_v31  ;;  %11286 = vmatpush1.bf16.msra.mxu1 %v11285_v34  ;;  %v11315_v31 = vunpack.c.h.s8.bf16 %v2441_v15  ;;  %v2447_v34 = vld [vmem:[#allocation3 + $0x428] sm:$0xff]  ;;  %v11085_v15 = vunpack.c.h.s8.bf16 %v2462_v6 }
 0x4c4   :  { %11032 = vmatprep.subr.bf16.mxu0 %v11031_v35  ;;  %11288 = vmatprep.subr.bf16.mxu1 %v11287_v36  ;;  %v2449_v35 = vld [vmem:[#allocation3 + $0x438] sm:$0xff]  ;;  %v11061_v36 = vunpack.c.h.s8.bf16 %v2438_v21  ;;  %v11063_v38 = vunpack.c.l.s8.bf16 %v2447_v34  ;;  %v11067_v49 = vunpack.c.h.s8.bf16 %v2447_v34  ;;  %v2472_v21 = vld [vmem:[#allocation3 + $0x4f0] sm:$0xff] }
 0x4c5   :  { %v2481_v34 = vld [vmem:[#allocation3 + $0x538] sm:$0xff] }
 0x4c7   :  { %11034 = vmatpush1.bf16.msra.mxu0 %v11033_v39  ;;  %11290 = vmatpush1.bf16.msra.mxu1 %v11289_v47  ;;  %v11319_v39 = vunpack.c.l.s8.bf16 %v2449_v35  ;;  %v2446_v47 = vld [vmem:[#allocation3 + $0x420] sm:$0xff] }
 0x4c8   :  { %11036 = vmatprep.subr.bf16.mxu0 %v11035_v5  ;;  %11292 = vmatprep.subr.bf16.mxu1 %v11291_v48  ;;  %v2448_v5 = vld [vmem:[#allocation3 + $0x430] sm:$0xff]  ;;  %v11065_v48 = vunpack.c.l.s8.bf16 %v2446_v47 }
 0x4c9   :  { %v11321_v4 = vunpack.c.l.s8.bf16 %v2448_v5  ;;  %v11325_v53 = vunpack.c.h.s8.bf16 %v2448_v5 }
 0x4cb   :  { %11038 = vmatpush1.bf16.msra.mxu0 %v11037_v50  ;;  %11294 = vmatpush1.bf16.msra.mxu1 %v11293_v51  ;;  %v11323_v50 = vunpack.c.h.s8.bf16 %v2449_v35  ;;  %v2455_v51 = vld [vmem:[#allocation3 + $0x468] sm:$0xff] }
 0x4cc   :  { %11040 = vmatprep.subr.bf16.mxu0 %v11039_v52  ;;  %11296 = vmatprep.subr.bf16.mxu1 %v11295_v26  ;;  %v2457_v52 = vld [vmem:[#allocation3 + $0x478] sm:$0xff]  ;;  %v11069_v26 = vunpack.c.h.s8.bf16 %v2446_v47  ;;  %v11071_v54 = vunpack.c.l.s8.bf16 %v2455_v51  ;;  %v11075_v3 = vunpack.c.h.s8.bf16 %v2455_v51  ;;  %v2480_v47 = vld [vmem:[#allocation3 + $0x530] sm:$0xff] }
 0x4cd   :  { %v11331_v40 = vunpack.c.h.s8.bf16 %v2457_v52  ;;  %v2489_v51 = vld [vmem:[#allocation3 + $0x578] sm:$0xff] }
 0x4cf   :  { %11042 = vmatpush1.bf16.msra.mxu0 %v11041_v55  ;;  %11298 = vmatpush1.bf16.msra.mxu1 %v11297_v32  ;;  %v11327_v55 = vunpack.c.l.s8.bf16 %v2457_v52  ;;  %v2454_v32 = vld [vmem:[#allocation3 + $0x460] sm:$0xff] }
 0x4d0   :  { %11044 = vmatprep.subr.bf16.mxu0 %v11043_v56  ;;  %11300 = vmatprep.subr.bf16.mxu1 %v11299_v42  ;;  %v2456_v56 = vld [vmem:[#allocation3 + $0x470] sm:$0xff] }
 0x4d1   :  { %v11329_v42 = vunpack.c.l.s8.bf16 %v2456_v56 }
 0x4d3   :  { %11046 = vmatpush1.bf16.msra.mxu0 %v11045_v57  ;;  %11302 = vmatpush1.bf16.msra.mxu1 %v11301_v63  ;;  %v2463_v57 = vld [vmem:[#allocation3 + $0x4a8] sm:$0xff]  ;;  %v2465_v63 = vld [vmem:[#allocation3 + $0x4b8] sm:$0xff] }
 0x4d4   :  { %11048 = vmatprep.subr.bf16.mxu0 %v11047_v7  ;;  %11304 = vmatprep.subr.bf16.mxu1 %v11303_v8  ;;  %v11333_v7 = vunpack.c.h.s8.bf16 %v2456_v56  ;;  %v11335_v8 = vunpack.c.l.s8.bf16 %v2465_v63 }
 0x4d7   :  { %11050 = vmatpush1.bf16.msra.mxu0 %v11049_v60  ;;  %11306 = vmatpush1.bf16.msra.mxu1 %v11305_v10  ;;  %v11081_v60 = vunpack.c.l.s8.bf16 %v2462_v6  ;;  %v11337_v10 = vunpack.c.l.s8.bf16 %v2464_v9  ;;  %v2496_v6 = vld [vmem:[#allocation3 + $0x5b0] sm:$0xff] }
 0x4d8   :  { %11052 = vmatprep.subr.bf16.mxu0 %v11051_v33  ;;  %11308 = vmatprep.subr.bf16.mxu1 %v11307_v11  ;;  %v11083_v33 = vunpack.c.h.s8.bf16 %v2463_v57  ;;  %v11339_v11 = vunpack.c.h.s8.bf16 %v2465_v63 }
 0x4db   :  { %11054 = vmatpush1.bf16.msra.mxu0 %v11053_v16  ;;  %11310 = vmatpush1.bf16.msra.mxu1 %v11309_v2  ;;  %v11341_v16 = vunpack.c.h.s8.bf16 %v2464_v9  ;;  %v11087_v2 = vunpack.c.l.s8.bf16 %v2471_v14 }
 0x4dc   :  { %11056 = vmatprep.subr.bf16.mxu0 %v11055_v19  ;;  %11312 = vmatprep.subr.bf16.mxu1 %v11311_v20  ;;  %v2470_v20 = vld [vmem:[#allocation3 + $0x4e0] sm:$0xff] }
 0x4dd   :  { %v11089_v1 = vunpack.c.l.s8.bf16 %v2470_v20  ;;  %v11093_v35 = vunpack.c.h.s8.bf16 %v2470_v20  ;;  %v2504_v20 = vld [vmem:[#allocation3 + $0x5f0] sm:$0xff] }
 0x4df   :  { %11058 = vmatpush1.bf16.msra.mxu0 %v11057_v22  ;;  %11314 = vmatpush1.bf16.msra.mxu1 %v11313_v23  ;;  %v11345_v22 = vunpack.c.l.s8.bf16 %v2472_v21  ;;  %v11091_v23 = vunpack.c.h.s8.bf16 %v2471_v14  ;;  %v2505_v14 = vld [vmem:[#allocation3 + $0x5f8] sm:$0xff] }
 0x4e0   :  { %11060 = vmatprep.subr.bf16.mxu0 %v11059_v30  ;;  %11316 = vmatprep.subr.bf16.mxu1 %v11315_v31  ;;  %v2479_v31 = vld [vmem:[#allocation3 + $0x528] sm:$0xff] }
 0x4e3   :  { %11062 = vmatpush1.bf16.msra.mxu0 %v11061_v36  ;;  %11318 = vmatpush1.bf16.msra.mxu1 %v11317_v37  ;;  %v11349_v36 = vunpack.c.h.s8.bf16 %v2472_v21  ;;  %v11095_v37 = vunpack.c.l.s8.bf16 %v2479_v31 }
 0x4e4   :  { %11064 = vmatprep.subr.bf16.mxu0 %v11063_v38  ;;  %11320 = vmatprep.subr.bf16.mxu1 %v11319_v39  ;;  %v11351_v38 = vunpack.c.l.s8.bf16 %v2481_v34  ;;  %v2478_v39 = vld [vmem:[#allocation3 + $0x520] sm:$0xff] }
 0x4e5   :  { %v11097_v5 = vunpack.c.l.s8.bf16 %v2478_v39  ;;  %v11101_v52 = vunpack.c.h.s8.bf16 %v2478_v39  ;;  %v2512_v39 = vld [vmem:[#allocation3 + $0x630] sm:$0xff] }
 0x4e6   :  { %5376 = vmatmul.mubr.f32.vlgmr.msra.gmra.mrb[14].mxu0 %v13243_v27  ;;  %5684 = vmatmul.mubr.f32.vlgmr.msra.gmra.mrb[14].mxu1 %v13243_v27  ;;  %v11073_v27 = vunpack.c.l.s8.bf16 %v2454_v32 }
 0x4e7   :  { %11066 = vmatpush1.bf16.msra.mxu0 %v11065_v48  ;;  %11322 = vmatpush1.bf16.msra.mxu1 %v11321_v4  ;;  %v11353_v48 = vunpack.c.l.s8.bf16 %v2480_v47  ;;  %v11099_v4 = vunpack.c.h.s8.bf16 %v2479_v31  ;;  %v2513_v31 = vld [vmem:[#allocation3 + $0x638] sm:$0xff] }
 0x4e8   :  { %11068 = vmatprep.subr.bf16.mxu0 %v11067_v49  ;;  %11324 = vmatprep.subr.bf16.mxu1 %v11323_v50  ;;  %v11355_v49 = vunpack.c.h.s8.bf16 %v2481_v34  ;;  %v2487_v50 = vld [vmem:[#allocation3 + $0x568] sm:$0xff] }
 0x4e9   :  { %5381 = vmatprep.mubr.f32.mxu0 %v13255_v0  ;;  %5689 = vmatprep.mubr.f32.mxu1 %v13255_v0  ;;  %v11077_v0 = vunpack.c.h.s8.bf16 %v2454_v32  ;;  %v2488_v32 = vld [vmem:[#allocation3 + $0x570] sm:$0xff] }
 0x4ea   :  { %5382 = vmatmul.mubr.f32.gmra.mrb[16].mxu0 %v13251_v41  ;;  %5690 = vmatmul.mubr.f32.gmra.mrb[16].mxu1 %v13251_v41  ;;  %v11079_v41 = vunpack.c.l.s8.bf16 %v2463_v57  ;;  %v2497_v57 = vld [vmem:[#allocation3 + $0x5b8] sm:$0xff] }
 0x4eb   :  { %11070 = vmatpush1.bf16.msra.mxu0 %v11069_v26  ;;  %11326 = vmatpush1.bf16.msra.mxu1 %v11325_v53  ;;  %v11357_v26 = vunpack.c.h.s8.bf16 %v2480_v47  ;;  %v11103_v53 = vunpack.c.l.s8.bf16 %v2487_v50 }
 0x4ec   :  { %11072 = vmatprep.subr.bf16.mxu0 %v11071_v54  ;;  %11328 = vmatprep.subr.bf16.mxu1 %v11327_v55  ;;  %v11359_v54 = vunpack.c.l.s8.bf16 %v2489_v51  ;;  %v2486_v55 = vld [vmem:[#allocation3 + $0x560] sm:$0xff] }
 0x4ed   :  { %5452 = vmatprep.mubr.f32.mxu0 %v13277_v17  ;;  %5760 = vmatprep.mubr.f32.mxu1 %v13277_v17  ;;  %v2473_v17 = vld [vmem:[#allocation3 + $0x4f8] sm:$0xff]  ;;  %v11105_v56 = vunpack.c.l.s8.bf16 %v2486_v55  ;;  %v11109_v63 = vunpack.c.h.s8.bf16 %v2486_v55  ;;  %v2520_v55 = vld [vmem:[#allocation3 + $0x670] sm:$0xff] }
 0x4ee   :  { %v11343_v19 = vunpack.c.l.s8.bf16 %v2473_v17  ;;  %v11347_v30 = vunpack.c.h.s8.bf16 %v2473_v17 }
 0x4ef   :  { %11074 = vmatpush1.bf16.msra.mxu0 %v11073_v27  ;;  %11330 = vmatpush1.bf16.msra.mxu1 %v11329_v42  ;;  %v11361_v27 = vunpack.c.l.s8.bf16 %v2488_v32  ;;  %v11107_v42 = vunpack.c.h.s8.bf16 %v2487_v50  ;;  %v2521_v50 = vld [vmem:[#allocation3 + $0x678] sm:$0xff] }
 0x4f0   :  { %11076 = vmatprep.subr.bf16.mxu0 %v11075_v3  ;;  %11332 = vmatprep.subr.bf16.mxu1 %v11331_v40  ;;  %v11363_v3 = vunpack.c.h.s8.bf16 %v2489_v51  ;;  %v2495_v40 = vld [vmem:[#allocation3 + $0x5a8] sm:$0xff] }
 0x4f3   :  { %11078 = vmatpush1.bf16.msra.mxu0 %v11077_v0  ;;  %11334 = vmatpush1.bf16.msra.mxu1 %v11333_v7  ;;  %v11365_v0 = vunpack.c.h.s8.bf16 %v2488_v32  ;;  %v11111_v7 = vunpack.c.l.s8.bf16 %v2495_v40  ;;  %v11393_v32 = vunpack.c.l.s8.bf16 %v2520_v55 }
 0x4f4   :  { %11080 = vmatprep.subr.bf16.mxu0 %v11079_v41  ;;  %11336 = vmatprep.subr.bf16.mxu1 %v11335_v8  ;;  %v11367_v41 = vunpack.c.l.s8.bf16 %v2497_v57  ;;  %v2494_v8 = vld [vmem:[#allocation3 + $0x5a0] sm:$0xff] }
 0x4f5   :  { %v11113_v9 = vunpack.c.l.s8.bf16 %v2494_v8  ;;  %v11117_v17 = vunpack.c.h.s8.bf16 %v2494_v8  ;;  %v13350_v8 = vld [vmem:[%s13654_s3] sm:$0xff] }
 0x4f7   :  { %11082 = vmatpush1.bf16.msra.mxu0 %v11081_v60  ;;  %11338 = vmatpush1.bf16.msra.mxu1 %v11337_v10  ;;  %v11369_v60 = vunpack.c.l.s8.bf16 %v2496_v6  ;;  %v11115_v10 = vunpack.c.h.s8.bf16 %v2495_v40  ;;  %v11397_v40 = vunpack.c.h.s8.bf16 %v2520_v55 }
 0x4f8   :  { %11084 = vmatprep.subr.bf16.mxu0 %v11083_v33  ;;  %11340 = vmatprep.subr.bf16.mxu1 %v11339_v11  ;;  %v11371_v33 = vunpack.c.h.s8.bf16 %v2497_v57  ;;  %v2503_v11 = vld [vmem:[#allocation3 + $0x5e8] sm:$0xff] }
 0x4fb   :  { %11086 = vmatpush1.bf16.msra.mxu0 %v11085_v15  ;;  %11342 = vmatpush1.bf16.msra.mxu1 %v11341_v16  ;;  %v11373_v15 = vunpack.c.h.s8.bf16 %v2496_v6  ;;  %v11119_v16 = vunpack.c.l.s8.bf16 %v2503_v11 }
 0x4fc   :  { %11088 = vmatprep.subr.bf16.mxu0 %v11087_v2  ;;  %11344 = vmatprep.subr.bf16.mxu1 %v11343_v19  ;;  %v11375_v2 = vunpack.c.l.s8.bf16 %v2505_v14  ;;  %v2502_v19 = vld [vmem:[#allocation3 + $0x5e0] sm:$0xff] }
 0x4fd   :  { %v11121_v21 = vunpack.c.l.s8.bf16 %v2502_v19  ;;  %v11125_v34 = vunpack.c.h.s8.bf16 %v2502_v19 }
 0x4ff   :  { %11090 = vmatpush1.bf16.msra.mxu0 %v11089_v1  ;;  %11346 = vmatpush1.bf16.msra.mxu1 %v11345_v22  ;;  %v11377_v1 = vunpack.c.l.s8.bf16 %v2504_v20  ;;  %v11123_v22 = vunpack.c.h.s8.bf16 %v2503_v11  ;;  %v5863_v11 = vrot.slane %v13350_v8, %v13227_v59 }
 0x500   :  { %11092 = vmatprep.subr.bf16.mxu0 %v11091_v23  ;;  %11348 = vmatprep.subr.bf16.mxu1 %v11347_v30  ;;  %v11379_v23 = vunpack.c.h.s8.bf16 %v2505_v14  ;;  %v2511_v30 = vld [vmem:[#allocation3 + $0x628] sm:$0xff]  ;;  %v5859_v14 = vrot.slane %v13350_v8, %v13229_v61 }
 0x503   :  { %11094 = vmatpush1.bf16.msra.mxu0 %v11093_v35  ;;  %11350 = vmatpush1.bf16.msra.mxu1 %v11349_v36  ;;  %v11381_v35 = vunpack.c.h.s8.bf16 %v2504_v20  ;;  %v11127_v36 = vunpack.c.l.s8.bf16 %v2511_v30 }
 0x504   :  { %11096 = vmatprep.subr.bf16.mxu0 %v11095_v37  ;;  %11352 = vmatprep.subr.bf16.mxu1 %v11351_v38  ;;  %v11383_v37 = vunpack.c.l.s8.bf16 %v2513_v31  ;;  %v2510_v38 = vld [vmem:[#allocation3 + $0x620] sm:$0xff] }
 0x505   :  { %v11129_v47 = vunpack.c.l.s8.bf16 %v2510_v38  ;;  %v11133_v51 = vunpack.c.h.s8.bf16 %v2510_v38 }
 0x507   :  { %11098 = vmatpush1.bf16.msra.mxu0 %v11097_v5  ;;  %11354 = vmatpush1.bf16.msra.mxu1 %v11353_v48  ;;  %v11385_v5 = vunpack.c.l.s8.bf16 %v2512_v39  ;;  %v11131_v48 = vunpack.c.h.s8.bf16 %v2511_v30 }
 0x508   :  { %11100 = vmatprep.subr.bf16.mxu0 %v11099_v4  ;;  %11356 = vmatprep.subr.bf16.mxu1 %v11355_v49  ;;  %v11387_v4 = vunpack.c.h.s8.bf16 %v2513_v31  ;;  %v2519_v49 = vld [vmem:[#allocation3 + $0x668] sm:$0xff] }
 0x50b   :  { %11102 = vmatpush1.bf16.msra.mxu0 %v11101_v52  ;;  %11358 = vmatpush1.bf16.msra.mxu1 %v11357_v26  ;;  %v11389_v52 = vunpack.c.h.s8.bf16 %v2512_v39  ;;  %v11135_v26 = vunpack.c.l.s8.bf16 %v2519_v49 }
 0x50c   :  { %11104 = vmatprep.subr.bf16.mxu0 %v11103_v53  ;;  %11360 = vmatprep.subr.bf16.mxu1 %v11359_v54  ;;  %v11391_v53 = vunpack.c.l.s8.bf16 %v2521_v50  ;;  %v2518_v54 = vld [vmem:[#allocation3 + $0x660] sm:$0xff] }
 0x50f   :  { %11106 = vmatpush1.bf16.msra.mxu0 %v11105_v56  ;;  %11362 = vmatpush1.bf16.msra.mxu1 %v11361_v27  ;;  %v11139_v56 = vunpack.c.h.s8.bf16 %v2519_v49  ;;  %v11395_v27 = vunpack.c.h.s8.bf16 %v2521_v50 }
 0x510   :  { %11108 = vmatprep.subr.bf16.mxu0 %v11107_v42  ;;  %11364 = vmatprep.subr.bf16.mxu1 %v11363_v3  ;;  %v2527_v42 = vld [vmem:[#allocation3 + $0x6a8] sm:$0xff]  ;;  %v2529_v3 = vld [vmem:[#allocation3 + $0x6b8] sm:$0xff] }
 0x511   :  { %v11399_v57 = vunpack.c.l.s8.bf16 %v2529_v3  ;;  %v11403_v6 = vunpack.c.h.s8.bf16 %v2529_v3 }
 0x513   :  { %11110 = vmatpush1.bf16.msra.mxu0 %v11109_v63  ;;  %11366 = vmatpush1.bf16.msra.mxu1 %v11365_v0  ;;  %v2526_v63 = vld [vmem:[#allocation3 + $0x6a0] sm:$0xff]  ;;  %v2528_v0 = vld [vmem:[#allocation3 + $0x6b0] sm:$0xff] }
 0x514   :  { %11112 = vmatprep.subr.bf16.mxu0 %v11111_v7  ;;  %11368 = vmatprep.subr.bf16.mxu1 %v11367_v41  ;;  %v11145_v7 = vunpack.c.l.s8.bf16 %v2526_v63  ;;  %v11401_v41 = vunpack.c.l.s8.bf16 %v2528_v0 }
 0x517   :  { %11114 = vmatpush1.bf16.msra.mxu0 %v11113_v9  ;;  %11370 = vmatpush1.bf16.msra.mxu1 %v11369_v60  ;;  %v13352_v9 = vld [vmem:[#allocation12] sm:$0xff]  ;;  %v2535_v60 = vld [vmem:[#allocation3 + $0x6e8] sm:$0xff] }
 0x518   :  { %11116 = vmatprep.subr.bf16.mxu0 %v11115_v10  ;;  %11372 = vmatprep.subr.bf16.mxu1 %v11371_v33  ;;  %v2537_v10 = vld [vmem:[#allocation3 + $0x6f8] sm:$0xff]  ;;  %v5855_v33 = vrot.slane %v13350_v8, %v13225_v58  ;;  %v5921_v19 = vrot.slane %v13352_v9, %v13227_v59  ;;  %v11151_v20 = vunpack.c.l.s8.bf16 %v2535_v60  ;;  %v5917_v31 = vrot.slane %v13352_v9, %v13229_v61 }
 0x519   :  { %v11155_v50 = vunpack.c.h.s8.bf16 %v2535_v60 }
 0x51b   :  { %11118 = vmatpush1.bf16.msra.mxu0 %v11117_v17  ;;  %11374 = vmatpush1.bf16.msra.mxu1 %v11373_v15  ;;  %v5867_v17 = vrot.slane %v13350_v8, %v13231_v62  ;;  %v11149_v15 = vunpack.c.h.s8.bf16 %v2526_v63 }
 0x51c   :  { %11120 = vmatprep.subr.bf16.mxu0 %v11119_v16  ;;  %11376 = vmatprep.subr.bf16.mxu1 %v11375_v2  ;;  %v11405_v16 = vunpack.c.h.s8.bf16 %v2528_v0  ;;  %v5913_v2 = vrot.slane %v13352_v9, %v13225_v58 }
 0x51f   :  { %11122 = vmatpush1.bf16.msra.mxu0 %v11121_v21  ;;  %11378 = vmatpush1.bf16.msra.mxu1 %v11377_v1  ;;  %v11407_v21 = vunpack.c.l.s8.bf16 %v2537_v10  ;;  %v2534_v1 = vld [vmem:[#allocation3 + $0x6e0] sm:$0xff] }
 0x520   :  { %11124 = vmatprep.subr.bf16.mxu0 %v11123_v22  ;;  %11380 = vmatprep.subr.bf16.mxu1 %v11379_v23  ;;  %v2536_v22 = vld [vmem:[#allocation3 + $0x6f0] sm:$0xff]  ;;  %v11157_v55 = vunpack.c.h.s8.bf16 %v2534_v1 }
 0x523   :  { %11126 = vmatpush1.bf16.msra.mxu0 %v11125_v34  ;;  %11382 = vmatpush1.bf16.msra.mxu1 %v11381_v35  ;;  %v5925_v34 = vrot.slane %v13352_v9, %v13231_v62 }
 0x524   :  { %11128 = vmatprep.subr.bf16.mxu0 %v11127_v36  ;;  %11384 = vmatprep.subr.bf16.mxu1 %v11383_v37 }
 0x526   :  { %5453 = vmatmul.mubr.f32.vlgmr.msra.gmra.mrb[14].mxu0 %v13273_v12  ;;  %5761 = vmatmul.mubr.f32.vlgmr.msra.gmra.mrb[14].mxu1 %v13273_v12  ;;  %v11137_v12 = vunpack.c.l.s8.bf16 %v2518_v54 }
 0x527   :  { %11130 = vmatpush1.bf16.msra.mxu0 %v11129_v47  ;;  %11386 = vmatpush1.bf16.msra.mxu1 %v11385_v5  ;;  %v11153_v5 = vunpack.c.l.s8.bf16 %v2534_v1 }
 0x528   :  { %11132 = vmatprep.subr.bf16.mxu0 %v11131_v48  ;;  %11388 = vmatprep.subr.bf16.mxu1 %v11387_v4  ;;  %v11409_v48 = vunpack.c.l.s8.bf16 %v2536_v22 }
 0x529   :  { %5458 = vmatprep.mubr.f32.mxu0 %v13285_v28  ;;  %5766 = vmatprep.mubr.f32.mxu1 %v13285_v28  ;;  %v11141_v28 = vunpack.c.h.s8.bf16 %v2518_v54 }
 0x52a   :  { %5459 = vmatmul.mubr.f32.gmra.mrb[16].mxu0 %v13281_v24  ;;  %5767 = vmatmul.mubr.f32.gmra.mrb[16].mxu1 %v13281_v24  ;;  %v11143_v24 = vunpack.c.l.s8.bf16 %v2527_v42 }
 0x52b   :  { %11134 = vmatpush1.bf16.msra.mxu0 %v11133_v51  ;;  %11390 = vmatpush1.bf16.msra.mxu1 %v11389_v52  ;;  %v11411_v51 = vunpack.c.h.s8.bf16 %v2537_v10  ;;  %v2542_v10 = vld [vmem:[#allocation3 + $0x720] sm:$0xff] }
 0x52c   :  { %11136 = vmatprep.subr.bf16.mxu0 %v11135_v26  ;;  %11392 = vmatprep.subr.bf16.mxu1 %v11391_v53 }
 0x52d   :  { %5529 = vmatprep.mubr.f32.mxu0 %v13279_v18  ;;  %5837 = vmatprep.mubr.f32.mxu1 %v13279_v18  ;;  %v11147_v18 = vunpack.c.h.s8.bf16 %v2527_v42 }
 0x52f   :  { %11138 = vmatpush1.bf16.msra.mxu0 %v11137_v12  ;;  %11394 = vmatpush1.bf16.msra.mxu1 %v11393_v32  ;;  %v11413_v12 = vunpack.c.h.s8.bf16 %v2536_v22  ;;  %v2543_v32 = vld [vmem:[#allocation3 + $0x728] sm:$0xff] }
 0x530   :  { %11140 = vmatprep.subr.bf16.mxu0 %v11139_v56  ;;  %11396 = vmatprep.subr.bf16.mxu1 %v11395_v27  ;;  %v2545_v56 = vld [vmem:[#allocation3 + $0x738] sm:$0xff]  ;;  %v2551_v22 = vld [vmem:[#allocation3 + $0x768] sm:$0xff] }
 0x531   :  { %v11415_v60 = vunpack.c.l.s8.bf16 %v2545_v56  ;;  %v11419_v1 = vunpack.c.h.s8.bf16 %v2545_v56  ;;  %v2567_v56 = vld [vmem:[#allocation3 + $0x7e8] sm:$0xff] }
 0x533   :  { %11142 = vmatpush1.bf16.msra.mxu0 %v11141_v28  ;;  %11398 = vmatpush1.bf16.msra.mxu1 %v11397_v40 }
 0x534   :  { %11144 = vmatprep.subr.bf16.mxu0 %v11143_v24  ;;  %11400 = vmatprep.subr.bf16.mxu1 %v11399_v57 }
 0x537   :  { %11146 = vmatpush1.bf16.msra.mxu0 %v11145_v7  ;;  %11402 = vmatpush1.bf16.msra.mxu1 %v11401_v41 }
 0x538   :  { %11148 = vmatprep.subr.bf16.mxu0 %v11147_v18  ;;  %11404 = vmatprep.subr.bf16.mxu1 %v11403_v6  ;;  %v11159_v6 = vunpack.c.l.s8.bf16 %v2543_v32 }
 0x539   :  { %v4915_v23 = vpop.f32.mrb[10].mxu0  ;;  %v5223_v30 = vpop.f32.mrb[10].mxu1 }
 0x53a   :  { %v5892_v35 = vmul.f32 %v5855_v33, %v4915_v23  ;;  %v5894_v36 = vmul.f32 %v5863_v11, %v5223_v30  ;;  %v4917_v37 = vpop.f32.mrb[11].mxu0  ;;  %v5225_v38 = vpop.f32.mrb[11].mxu1  ;;  %v2553_v23 = vld [vmem:[#allocation3 + $0x778] sm:$0xff]  ;;  %v11165_v30 = vunpack.c.h.s8.bf16 %v2542_v10 }
 0x53b   :  { %v5893_v39 = vmul.f32 %v5859_v14, %v4917_v37  ;;  %v5895_v47 = vmul.f32 %v5867_v17, %v5225_v38  ;;  %11150 = vmatpush1.bf16.msra.mxu0 %v11149_v15  ;;  %11406 = vmatpush1.bf16.msra.mxu1 %v11405_v16  ;;  %v2544_v15 = vld [vmem:[#allocation3 + $0x730] sm:$0xff] }
 0x53c   :  { %v5950_v4 = vadd.f32 %v5913_v2, %v5892_v35  ;;  %v5952_v49 = vadd.f32 %v5921_v19, %v5894_v36  ;;  %11152 = vmatprep.subr.bf16.mxu0 %v11151_v20  ;;  %11408 = vmatprep.subr.bf16.mxu1 %v11407_v21  ;;  %v11423_v35 = vunpack.c.l.s8.bf16 %v2553_v23  ;;  %v2550_v36 = vld [vmem:[#allocation3 + $0x760] sm:$0xff]  ;;  %v2552_v37 = vld [vmem:[#allocation3 + $0x770] sm:$0xff] }
 0x53d   :  { %v5951_v52 = vadd.f32 %v5917_v31, %v5893_v39  ;;  %v5953_v26 = vadd.f32 %v5925_v34, %v5895_v47  ;;  %v4921_v53 = vpop.f32.mrb[12].mxu0  ;;  %v5229_v54 = vpop.f32.mrb[12].mxu1  ;;  %v11169_v38 = vunpack.c.l.s8.bf16 %v2550_v36  ;;  %v11425_v39 = vunpack.c.l.s8.bf16 %v2552_v37 }
 0x53e   :  { %v13370_v27 = vmax.f32 %v5950_v4, 0.0  ;;  %v13372_v42 = vmax.f32 %v5952_v49, 0.0  ;;  %v5900_v3 = vmul.f32 %v5855_v33, %v4921_v53  ;;  %v5902_v28 = vmul.f32 %v5863_v11, %v5229_v54  ;;  %v4923_v40 = vpop.f32.mrb[13].mxu0  ;;  %v5231_v24 = vpop.f32.mrb[13].mxu1  ;;  %v2561_v4 = vld [vmem:[#allocation3 + $0x7b8] sm:$0xff]  ;;  %v2560_v53 = vld [vmem:[#allocation3 + $0x7b0] sm:$0xff] }
 0x53f   :  { %v13374_v57 = vmax.f32 %v5951_v52, 0.0  ;;  %v13376_v63 = vmax.f32 %v5953_v26, 0.0  ;;  %v5901_v0 = vmul.f32 %v5859_v14, %v4923_v40  ;;  %v5903_v7 = vmul.f32 %v5867_v17, %v5231_v24  ;;  %11154 = vmatpush1.bf16.msra.mxu0 %v11153_v5  ;;  %11410 = vmatpush1.bf16.msra.mxu1 %v11409_v48  ;;  %v2559_v48 = vld [vmem:[#allocation3 + $0x7a8] sm:$0xff]  ;;  %v2558_v26 = vld [vmem:[#allocation3 + $0x7a0] sm:$0xff] }
 0x540   :  { %v5958_v41 = vadd.f32 %v5913_v2, %v5900_v3  ;;  %v5960_v18 = vadd.f32 %v5921_v19, %v5902_v28  ;;  %11156 = vmatprep.subr.bf16.mxu0 %v11155_v50  ;;  %11412 = vmatprep.subr.bf16.mxu1 %v11411_v51  ;;  %v11161_v17 = vunpack.c.l.s8.bf16 %v2542_v10  ;;  %v11417_v2 = vunpack.c.l.s8.bf16 %v2544_v15  ;;  %v2569_v3 = vld [vmem:[#allocation3 + $0x7f8] sm:$0xff] }
 0x541   :  { %v5959_v33 = vadd.f32 %v5917_v31, %v5901_v0  ;;  %v5961_v11 = vadd.f32 %v5925_v34, %v5903_v7  ;;  %v11163_v19 = vunpack.c.h.s8.bf16 %v2543_v32  ;;  %v11421_v31 = vunpack.c.h.s8.bf16 %v2544_v15  ;;  %v2566_v7 = vld [vmem:[#allocation3 + $0x7e0] sm:$0xff] }
 0x542   :  { %v13378_v16 = vmax.f32 %v5958_v41, 0.0  ;;  %v13380_v20 = vmax.f32 %v5960_v18, 0.0  ;;  %v11167_v34 = vunpack.c.l.s8.bf16 %v2551_v22  ;;  %v11171_v47 = vunpack.c.h.s8.bf16 %v2551_v22  ;;  %v2568_v41 = vld [vmem:[#allocation3 + $0x7f0] sm:$0xff] }
 0x543   :  { %v13382_v21 = vmax.f32 %v5959_v33, 0.0  ;;  %v13384_v14 = vmax.f32 %v5961_v11, 0.0  ;;  %11158 = vmatpush1.bf16.msra.mxu0 %v11157_v55  ;;  %11414 = vmatpush1.bf16.msra.mxu1 %v11413_v12  ;;  %v11427_v5 = vunpack.c.h.s8.bf16 %v2553_v23  ;;  %v11173_v49 = vunpack.c.h.s8.bf16 %v2550_v36 }
 0x544   :  { %11160 = vmatprep.subr.bf16.mxu0 %v11159_v6  ;;  %11416 = vmatprep.subr.bf16.mxu1 %v11415_v60  ;;  %v11429_v50 = vunpack.c.h.s8.bf16 %v2552_v37  ;;  %v11175_v51 = vunpack.c.l.s8.bf16 %v2559_v48  ;;  %v11431_v52 = vunpack.c.l.s8.bf16 %v2561_v4  ;;  %v11177_v54 = vunpack.c.l.s8.bf16 %v2558_v26 }
 0x545   :  { %v11433_v55 = vunpack.c.l.s8.bf16 %v2560_v53  ;;  %v11179_v12 = vunpack.c.h.s8.bf16 %v2559_v48  ;;  %v11435_v32 = vunpack.c.h.s8.bf16 %v2561_v4  ;;  %v11181_v28 = vunpack.c.h.s8.bf16 %v2558_v26 }
 0x546   :  { %v11437_v40 = vunpack.c.h.s8.bf16 %v2560_v53  ;;  %v11183_v24 = vunpack.c.l.s8.bf16 %v2567_v56  ;;  %v11439_v0 = vunpack.c.l.s8.bf16 %v2569_v3  ;;  %v11185_v18 = vunpack.c.l.s8.bf16 %v2566_v7 }
 0x547   :  { %11162 = vmatpush1.bf16.msra.mxu0 %v11161_v17  ;;  %11418 = vmatpush1.bf16.msra.mxu1 %v11417_v2  ;;  %v11441_v6 = vunpack.c.l.s8.bf16 %v2568_v41  ;;  %v11187_v60 = vunpack.c.h.s8.bf16 %v2567_v56  ;;  %v11443_v10 = vunpack.c.h.s8.bf16 %v2569_v3  ;;  %v11189_v15 = vunpack.c.h.s8.bf16 %v2566_v7 }
 0x548   :  { %11164 = vmatprep.subr.bf16.mxu0 %v11163_v19  ;;  %11420 = vmatprep.subr.bf16.mxu1 %v11419_v1  ;;  %v11445_v33 = vunpack.c.h.s8.bf16 %v2568_v41  ;;  %v5871_v11 = vrot.slane %v13350_v8, %v13257_v43  ;;  %v5879_v17 = vrot.slane %v13350_v8, %v13259_v44  ;;  %v5875_v2 = vrot.slane %v13350_v8, %v13261_v45 }
 0x549   :  { %v5929_v19 = vrot.slane %v13352_v9, %v13257_v43  ;;  %v5933_v22 = vrot.slane %v13352_v9, %v13261_v45  ;;  %v5941_v23 = vrot.slane %v13352_v9, %v13263_v46 }
 0x54b   :  { %11166 = vmatpush1.bf16.msra.mxu0 %v11165_v30  ;;  %11422 = vmatpush1.bf16.msra.mxu1 %v11421_v31 }
 0x54c   :  { %11168 = vmatprep.subr.bf16.mxu0 %v11167_v34  ;;  %11424 = vmatprep.subr.bf16.mxu1 %v11423_v35 }
 0x54f   :  { %11170 = vmatpush1.bf16.msra.mxu0 %v11169_v38  ;;  %11426 = vmatpush1.bf16.msra.mxu1 %v11425_v39 }
 0x550   :  { %11172 = vmatprep.subr.bf16.mxu0 %v11171_v47  ;;  %11428 = vmatprep.subr.bf16.mxu1 %v11427_v5 }
 0x553   :  { %11174 = vmatpush1.bf16.msra.mxu0 %v11173_v49  ;;  %11430 = vmatpush1.bf16.msra.mxu1 %v11429_v50 }
 0x554   :  { %11176 = vmatprep.subr.bf16.mxu0 %v11175_v51  ;;  %11432 = vmatprep.subr.bf16.mxu1 %v11431_v52 }
 0x557   :  { %11178 = vmatpush1.bf16.msra.mxu0 %v11177_v54  ;;  %11434 = vmatpush1.bf16.msra.mxu1 %v11433_v55 }
 0x558   :  { %11180 = vmatprep.subr.bf16.mxu0 %v11179_v12  ;;  %11436 = vmatprep.subr.bf16.mxu1 %v11435_v32 }
 0x55b   :  { %11182 = vmatpush1.bf16.msra.mxu0 %v11181_v28  ;;  %11438 = vmatpush1.bf16.msra.mxu1 %v11437_v40 }
 0x55c   :  { %11184 = vmatprep.subr.bf16.mxu0 %v11183_v24  ;;  %11440 = vmatprep.subr.bf16.mxu1 %v11439_v0 }
 0x55f   :  { %11186 = vmatpush1.bf16.msra.mxu0 %v11185_v18  ;;  %11442 = vmatpush1.bf16.msra.mxu1 %v11441_v6 }
 0x560   :  { %11188 = vmatprep.subr.bf16.mxu0 %v11187_v60  ;;  %11444 = vmatprep.subr.bf16.mxu1 %v11443_v10 }
 0x563   :  { %11190 = vmatpush1.bf16.msra.mxu0 %v11189_v15  ;;  %11446 = vmatpush1.bf16.msra.mxu1 %v11445_v33 }
 0x566   :  { %5530 = vmatmul.mubr.f32.vlgmr.msra.gmra.mrb[14].mxu0 %v13275_v13  ;;  %5838 = vmatmul.mubr.f32.vlgmr.msra.gmra.mrb[14].mxu1 %v13275_v13  ;;  %v5883_v13 = vrot.slane %v13350_v8, %v13263_v46 }
 0x567   :  { %5535 = vmatprep.mubr.f32.mxu0 %v13287_v29  ;;  %5843 = vmatprep.mubr.f32.mxu1 %v13287_v29  ;;  %v5937_v29 = vrot.slane %v13352_v9, %v13259_v44 }
 0x56a   :  { %5536 = vmatmul.mubr.f32.gmra.mrb[16].mxu0 %v13283_v25  ;;  %5844 = vmatmul.mubr.f32.gmra.mrb[16].mxu1 %v13283_v25 }
 0x639   :  { %v5531_v1 = vpop.f32.mrb[14].mxu0  ;;  %v5839_v25 = vpop.f32.mrb[14].mxu1 }
 0x63a   :  { %v5896_v30 = vmul.f32 %v5871_v11, %v5531_v1  ;;  %v5898_v31 = vmul.f32 %v5879_v17, %v5839_v25  ;;  %v5533_v34 = vpop.f32.mrb[15].mxu0  ;;  %v5841_v35 = vpop.f32.mrb[15].mxu1 }
 0x63b   :  { %v5897_v36 = vmul.f32 %v5875_v2, %v5533_v34  ;;  %v5899_v8 = vmul.f32 %v5883_v13, %v5841_v35 }
 0x63c   :  { %v5954_v37 = vadd.f32 %v5929_v19, %v5896_v30  ;;  %v5956_v38 = vadd.f32 %v5937_v29, %v5898_v31 }
 0x63d   :  { %v5955_v39 = vadd.f32 %v5933_v22, %v5897_v36  ;;  %v5957_v47 = vadd.f32 %v5941_v23, %v5899_v8  ;;  %v5537_v5 = vpop.f32.mrb[16].mxu0  ;;  %v5845_v48 = vpop.f32.mrb[16].mxu1 }
 0x63e   :  { %v13408_v4 = vmax.f32 %v5954_v37, 0.0  ;;  %v13410_v49 = vmax.f32 %v5956_v38, 0.0  ;;  %v5904_v50 = vmul.f32 %v5871_v11, %v5537_v5  ;;  %v5906_v51 = vmul.f32 %v5879_v17, %v5845_v48  ;;  %v5539_v52 = vpop.f32.mrb[17].mxu0  ;;  %v5847_v9 = vpop.f32.mrb[17].mxu1 }
 0x63f   :  { %v13412_v26 = vmax.f32 %v5955_v39, 0.0  ;;  %v13414_v53 = vmax.f32 %v5957_v47, 0.0  ;;  %v5905_v54 = vmul.f32 %v5875_v2, %v5539_v52  ;;  %v5907_v55 = vmul.f32 %v5883_v13, %v5847_v9 }
 0x640   :  { %v5962_v12 = vadd.f32 %v5929_v19, %v5904_v50  ;;  %v5964_v32 = vadd.f32 %v5937_v29, %v5906_v51 }
 0x641   :  { %v5963_v56 = vadd.f32 %v5933_v22, %v5905_v54  ;;  %v5965_v3 = vadd.f32 %v5941_v23, %v5907_v55 }
 0x642   :  { %v13416_v28 = vmax.f32 %v5962_v12, 0.0  ;;  %v13418_v40 = vmax.f32 %v5964_v32, 0.0 }
 0x643   :  { %v13420_v24 = vmax.f32 %v5963_v56, 0.0  ;;  %v13422_v0 = vmax.f32 %v5965_v3, 0.0 }
 0x644   :  { %12906 = dma.done.wait [#allocation5 + $0x2], 32768 }
 0x645   :  { %12907 = vsyncadd [#allocation5 + $0x2], 4294934528  ;;  %8352 = vmatprep.mubr.f32.mxu0 %v13374_v57  ;;  %8660 = vmatprep.mubr.f32.mxu1 %v13374_v57  ;;  %v5985_v7 = vld [vmem:[#allocation4 + $0x8] sm:$0xff]  ;;  %v5987_v41 = vld [vmem:[#allocation4 + $0x18] sm:$0xff]  ;;  %s12926_s3 = smov [#allocation19]  }
 0x646   :  { %v5984_v18 = vld [vmem:[#allocation4] sm:$0xff]  ;;  %v11447_v6 = vunpack.c.l.s8.bf16 %v5985_v7  ;;  %v11451_v60 = vunpack.c.h.s8.bf16 %v5985_v7  ;;  %v11703_v10 = vunpack.c.l.s8.bf16 %v5987_v41  ;;  %v11707_v15 = vunpack.c.h.s8.bf16 %v5987_v41  ;;  %v5986_v33 = vld [vmem:[#allocation4 + $0x10] sm:$0xff]  ;;  %v5993_v2 = vld [vmem:[#allocation4 + $0x48] sm:$0xff]  ;;  %s9724_s6 = sshll.u32 %s12926_s3, 4  ;;  %s9725_s6 = int_to_ptr.vmem [resolvable:$true] %s9724_s6 }
 0x647   :  { %v11449_v11 = vunpack.c.l.s8.bf16 %v5984_v18  ;;  %v11705_v17 = vunpack.c.l.s8.bf16 %v5986_v33  ;;  %v5995_v13 = vld [vmem:[#allocation4 + $0x58] sm:$0xff]  ;;  %v11453_v19 = vunpack.c.h.s8.bf16 %v5984_v18  ;;  %v11709_v29 = vunpack.c.h.s8.bf16 %v5986_v33  ;;  %v5992_v22 = vld [vmem:[#allocation4 + $0x40] sm:$0xff]  ;;  %v5994_v23 = vld [vmem:[#allocation4 + $0x50] sm:$0xff]  ;;  %s12828_s28 = scalar_lea.vmem %s9725_s6, 128  ;;  %p12833_p11 = scmp.lt.s32.totalorder %s9725_s6, %s9725_s6 }
 0x648   :  { %11448 = vmatprep.subr.bf16.mxu0 %v11447_v6  ;;  %11704 = vmatprep.subr.bf16.mxu1 %v11703_v10  ;;  %v11455_v1 = vunpack.c.l.s8.bf16 %v5993_v2  ;;  %v11711_v25 = vunpack.c.l.s8.bf16 %v5995_v13  ;;  %v11457_v30 = vunpack.c.l.s8.bf16 %v5992_v22  ;;  %v11713_v31 = vunpack.c.l.s8.bf16 %v5994_v23  ;;  %v6001_v36 = vld [vmem:[#allocation4 + $0x88] sm:$0xff]  ;;  %v6003_v8 = vld [vmem:[#allocation4 + $0x98] sm:$0xff]  ;;  %v6000_v5 = vld [vmem:[#allocation4 + $0x80] sm:$0xff]  ;;  %p12829_p10 = scmp.ne.s32.totalorder %s9725_s6, %s12828_s28  ;;  %p12834_p12 = scmp.lt.s32.totalorder %s12828_s28, %s12828_s28 }
 0x649   :  { %11450 = vmatpush1.bf16.msra.mxu0 %v11449_v11  ;;  %11706 = vmatpush1.bf16.msra.mxu1 %v11705_v17  ;;  %v11459_v34 = vunpack.c.h.s8.bf16 %v5993_v2  ;;  %v11715_v35 = vunpack.c.h.s8.bf16 %v5995_v13  ;;  %v11461_v37 = vunpack.c.h.s8.bf16 %v5992_v22  ;;  %v11717_v38 = vunpack.c.h.s8.bf16 %v5994_v23  ;;  %v6002_v48 = vld [vmem:[#allocation4 + $0x90] sm:$0xff]  ;;  %v6009_v54 = vld [vmem:[#allocation4 + $0xc8] sm:$0xff]  ;;  %v6011_v55 = vld [vmem:[#allocation4 + $0xd8] sm:$0xff] }
 0x64a   :  { %11452 = vmatprep.subr.bf16.mxu0 %v11451_v60  ;;  %11708 = vmatprep.subr.bf16.mxu1 %v11707_v15  ;;  %v11463_v39 = vunpack.c.l.s8.bf16 %v6001_v36  ;;  %v11719_v47 = vunpack.c.l.s8.bf16 %v6003_v8  ;;  %v11465_v50 = vunpack.c.l.s8.bf16 %v6000_v5  ;;  %v11721_v51 = vunpack.c.l.s8.bf16 %v6002_v48  ;;  %v6008_v7 = vld [vmem:[#allocation4 + $0xc0] sm:$0xff]  ;;  %v6010_v41 = vld [vmem:[#allocation4 + $0xd0] sm:$0xff]  ;;  %v6017_v15 = vld [vmem:[#allocation4 + $0x108] sm:$0xff]  ;;  %p12835_p13 = por %p12834_p12, %p12833_p11 }
 0x64b   :  { %v11467_v52 = vunpack.c.h.s8.bf16 %v6001_v36  ;;  %v11723_v9 = vunpack.c.h.s8.bf16 %v6003_v8  ;;  %v11469_v12 = vunpack.c.h.s8.bf16 %v6000_v5  ;;  %v11725_v32 = vunpack.c.h.s8.bf16 %v6002_v48  ;;  %v6019_v33 = vld [vmem:[#allocation4 + $0x118] sm:$0xff] }
 0x64c   :  { %v11471_v56 = vunpack.c.l.s8.bf16 %v6009_v54  ;;  %v11727_v3 = vunpack.c.l.s8.bf16 %v6011_v55  ;;  %v11473_v18 = vunpack.c.l.s8.bf16 %v6008_v7  ;;  %v11729_v6 = vunpack.c.l.s8.bf16 %v6010_v41  ;;  %p12836_p0 = pnand %p12835_p13, %p12829_p10 }
 0x64d   :  { %11454 = vmatpush1.bf16.msra.mxu0 %v11453_v19  ;;  %11710 = vmatpush1.bf16.msra.mxu1 %v11709_v29  ;;  %v11475_v60 = vunpack.c.h.s8.bf16 %v6009_v54  ;;  %v11731_v10 = vunpack.c.h.s8.bf16 %v6011_v55  ;;  %v11477_v11 = vunpack.c.h.s8.bf16 %v6008_v7  ;;  %v11733_v17 = vunpack.c.h.s8.bf16 %v6010_v41  ;;  %v6016_v19 = vld [vmem:[#allocation4 + $0x100] sm:$0xff]  ;;  %v6018_v29 = vld [vmem:[#allocation4 + $0x110] sm:$0xff] }
 0x64e   :  { %11456 = vmatprep.subr.bf16.mxu0 %v11455_v1  ;;  %11712 = vmatprep.subr.bf16.mxu1 %v11711_v25  ;;  %v11479_v2 = vunpack.c.l.s8.bf16 %v6017_v15  ;;  %v11735_v13 = vunpack.c.l.s8.bf16 %v6019_v33  ;;  %v11481_v1 = vunpack.c.l.s8.bf16 %v6016_v19  ;;  %v11737_v25 = vunpack.c.l.s8.bf16 %v6018_v29 }
 0x64f   :  { %v11483_v22 = vunpack.c.h.s8.bf16 %v6017_v15  ;;  %v11739_v23 = vunpack.c.h.s8.bf16 %v6019_v33 }
 0x651   :  { %11458 = vmatpush1.bf16.msra.mxu0 %v11457_v30  ;;  %11714 = vmatpush1.bf16.msra.mxu1 %v11713_v31  ;;  %v6025_v30 = vld [vmem:[#allocation4 + $0x148] sm:$0xff]  ;;  %v6027_v31 = vld [vmem:[#allocation4 + $0x158] sm:$0xff] }
 0x652   :  { %11460 = vmatprep.subr.bf16.mxu0 %v11459_v34  ;;  %11716 = vmatprep.subr.bf16.mxu1 %v11715_v35  ;;  %v11485_v34 = vunpack.c.h.s8.bf16 %v6016_v19  ;;  %v11741_v35 = vunpack.c.h.s8.bf16 %v6018_v29  ;;  %v11487_v36 = vunpack.c.l.s8.bf16 %v6025_v30  ;;  %v11743_v8 = vunpack.c.l.s8.bf16 %v6027_v31 }
 0x653   :  { %v11491_v5 = vunpack.c.h.s8.bf16 %v6025_v30  ;;  %v11747_v48 = vunpack.c.h.s8.bf16 %v6027_v31 }
 0x655   :  { %11462 = vmatpush1.bf16.msra.mxu0 %v11461_v37  ;;  %11718 = vmatpush1.bf16.msra.mxu1 %v11717_v38  ;;  %v6024_v37 = vld [vmem:[#allocation4 + $0x140] sm:$0xff]  ;;  %v6026_v38 = vld [vmem:[#allocation4 + $0x150] sm:$0xff] }
 0x656   :  { %11464 = vmatprep.subr.bf16.mxu0 %v11463_v39  ;;  %11720 = vmatprep.subr.bf16.mxu1 %v11719_v47  ;;  %v11489_v39 = vunpack.c.l.s8.bf16 %v6024_v37  ;;  %v11745_v47 = vunpack.c.l.s8.bf16 %v6026_v38 }
 0x659   :  { %11466 = vmatpush1.bf16.msra.mxu0 %v11465_v50  ;;  %11722 = vmatpush1.bf16.msra.mxu1 %v11721_v51  ;;  %v6033_v50 = vld [vmem:[#allocation4 + $0x188] sm:$0xff]  ;;  %v6035_v51 = vld [vmem:[#allocation4 + $0x198] sm:$0xff] }
 0x65a   :  { %11468 = vmatprep.subr.bf16.mxu0 %v11467_v52  ;;  %11724 = vmatprep.subr.bf16.mxu1 %v11723_v9  ;;  %v11493_v52 = vunpack.c.h.s8.bf16 %v6024_v37  ;;  %v11749_v9 = vunpack.c.h.s8.bf16 %v6026_v38  ;;  %v11495_v54 = vunpack.c.l.s8.bf16 %v6033_v50  ;;  %v11751_v55 = vunpack.c.l.s8.bf16 %v6035_v51 }
 0x65b   :  { %v11499_v7 = vunpack.c.h.s8.bf16 %v6033_v50  ;;  %v11755_v41 = vunpack.c.h.s8.bf16 %v6035_v51 }
 0x65d   :  { %11470 = vmatpush1.bf16.msra.mxu0 %v11469_v12  ;;  %11726 = vmatpush1.bf16.msra.mxu1 %v11725_v32  ;;  %v6032_v12 = vld [vmem:[#allocation4 + $0x180] sm:$0xff]  ;;  %v6034_v32 = vld [vmem:[#allocation4 + $0x190] sm:$0xff] }
 0x65e   :  { %11472 = vmatprep.subr.bf16.mxu0 %v11471_v56  ;;  %11728 = vmatprep.subr.bf16.mxu1 %v11727_v3  ;;  %v11497_v56 = vunpack.c.l.s8.bf16 %v6032_v12  ;;  %v11753_v3 = vunpack.c.l.s8.bf16 %v6034_v32 }
 0x661   :  { %11474 = vmatpush1.bf16.msra.mxu0 %v11473_v18  ;;  %11730 = vmatpush1.bf16.msra.mxu1 %v11729_v6  ;;  %v6041_v18 = vld [vmem:[#allocation4 + $0x1c8] sm:$0xff]  ;;  %v6043_v6 = vld [vmem:[#allocation4 + $0x1d8] sm:$0xff] }
 0x662   :  { %11476 = vmatprep.subr.bf16.mxu0 %v11475_v60  ;;  %11732 = vmatprep.subr.bf16.mxu1 %v11731_v10  ;;  %v11501_v60 = vunpack.c.h.s8.bf16 %v6032_v12  ;;  %v11757_v10 = vunpack.c.h.s8.bf16 %v6034_v32  ;;  %v11503_v15 = vunpack.c.l.s8.bf16 %v6041_v18  ;;  %v11759_v33 = vunpack.c.l.s8.bf16 %v6043_v6 }
 0x663   :  { %v11507_v19 = vunpack.c.h.s8.bf16 %v6041_v18  ;;  %v11763_v29 = vunpack.c.h.s8.bf16 %v6043_v6 }
 0x665   :  { %11478 = vmatpush1.bf16.msra.mxu0 %v11477_v11  ;;  %11734 = vmatpush1.bf16.msra.mxu1 %v11733_v17  ;;  %v6040_v11 = vld [vmem:[#allocation4 + $0x1c0] sm:$0xff]  ;;  %v6042_v17 = vld [vmem:[#allocation4 + $0x1d0] sm:$0xff] }
 0x666   :  { %11480 = vmatprep.subr.bf16.mxu0 %v11479_v2  ;;  %11736 = vmatprep.subr.bf16.mxu1 %v11735_v13  ;;  %v11505_v2 = vunpack.c.l.s8.bf16 %v6040_v11  ;;  %v11761_v13 = vunpack.c.l.s8.bf16 %v6042_v17 }
 0x669   :  { %11482 = vmatpush1.bf16.msra.mxu0 %v11481_v1  ;;  %11738 = vmatpush1.bf16.msra.mxu1 %v11737_v25  ;;  %v6049_v1 = vld [vmem:[#allocation4 + $0x208] sm:$0xff]  ;;  %v6051_v25 = vld [vmem:[#allocation4 + $0x218] sm:$0xff] }
 0x66a   :  { %11484 = vmatprep.subr.bf16.mxu0 %v11483_v22  ;;  %11740 = vmatprep.subr.bf16.mxu1 %v11739_v23  ;;  %v11509_v22 = vunpack.c.h.s8.bf16 %v6040_v11  ;;  %v11765_v23 = vunpack.c.h.s8.bf16 %v6042_v17  ;;  %v11511_v30 = vunpack.c.l.s8.bf16 %v6049_v1  ;;  %v11767_v31 = vunpack.c.l.s8.bf16 %v6051_v25 }
 0x66b   :  { %v11515_v37 = vunpack.c.h.s8.bf16 %v6049_v1  ;;  %v11771_v38 = vunpack.c.h.s8.bf16 %v6051_v25 }
 0x66d   :  { %11486 = vmatpush1.bf16.msra.mxu0 %v11485_v34  ;;  %11742 = vmatpush1.bf16.msra.mxu1 %v11741_v35  ;;  %v6048_v34 = vld [vmem:[#allocation4 + $0x200] sm:$0xff]  ;;  %v6050_v35 = vld [vmem:[#allocation4 + $0x210] sm:$0xff] }
 0x66e   :  { %11488 = vmatprep.subr.bf16.mxu0 %v11487_v36  ;;  %11744 = vmatprep.subr.bf16.mxu1 %v11743_v8  ;;  %v11513_v36 = vunpack.c.l.s8.bf16 %v6048_v34  ;;  %v11769_v8 = vunpack.c.l.s8.bf16 %v6050_v35 }
 0x671   :  { %11490 = vmatpush1.bf16.msra.mxu0 %v11489_v39  ;;  %11746 = vmatpush1.bf16.msra.mxu1 %v11745_v47  ;;  %v6057_v39 = vld [vmem:[#allocation4 + $0x248] sm:$0xff]  ;;  %v6059_v47 = vld [vmem:[#allocation4 + $0x258] sm:$0xff] }
 0x672   :  { %11492 = vmatprep.subr.bf16.mxu0 %v11491_v5  ;;  %11748 = vmatprep.subr.bf16.mxu1 %v11747_v48  ;;  %v11517_v5 = vunpack.c.h.s8.bf16 %v6048_v34  ;;  %v11773_v48 = vunpack.c.h.s8.bf16 %v6050_v35  ;;  %v11519_v50 = vunpack.c.l.s8.bf16 %v6057_v39  ;;  %v11775_v51 = vunpack.c.l.s8.bf16 %v6059_v47 }
 0x673   :  { %v11523_v12 = vunpack.c.h.s8.bf16 %v6057_v39  ;;  %v11779_v32 = vunpack.c.h.s8.bf16 %v6059_v47 }
 0x675   :  { %11494 = vmatpush1.bf16.msra.mxu0 %v11493_v52  ;;  %11750 = vmatpush1.bf16.msra.mxu1 %v11749_v9  ;;  %v6056_v52 = vld [vmem:[#allocation4 + $0x240] sm:$0xff]  ;;  %v6058_v9 = vld [vmem:[#allocation4 + $0x250] sm:$0xff] }
 0x676   :  { %11496 = vmatprep.subr.bf16.mxu0 %v11495_v54  ;;  %11752 = vmatprep.subr.bf16.mxu1 %v11751_v55  ;;  %v11521_v54 = vunpack.c.l.s8.bf16 %v6056_v52  ;;  %v11777_v55 = vunpack.c.l.s8.bf16 %v6058_v9 }
 0x679   :  { %11498 = vmatpush1.bf16.msra.mxu0 %v11497_v56  ;;  %11754 = vmatpush1.bf16.msra.mxu1 %v11753_v3  ;;  %v6065_v56 = vld [vmem:[#allocation4 + $0x288] sm:$0xff]  ;;  %v6067_v3 = vld [vmem:[#allocation4 + $0x298] sm:$0xff] }
 0x67a   :  { %11500 = vmatprep.subr.bf16.mxu0 %v11499_v7  ;;  %11756 = vmatprep.subr.bf16.mxu1 %v11755_v41  ;;  %v11525_v7 = vunpack.c.h.s8.bf16 %v6056_v52  ;;  %v11781_v41 = vunpack.c.h.s8.bf16 %v6058_v9  ;;  %v11527_v18 = vunpack.c.l.s8.bf16 %v6065_v56  ;;  %v11783_v6 = vunpack.c.l.s8.bf16 %v6067_v3 }
 0x67b   :  { %v11531_v11 = vunpack.c.h.s8.bf16 %v6065_v56  ;;  %v11787_v17 = vunpack.c.h.s8.bf16 %v6067_v3 }
 0x67d   :  { %11502 = vmatpush1.bf16.msra.mxu0 %v11501_v60  ;;  %11758 = vmatpush1.bf16.msra.mxu1 %v11757_v10  ;;  %v6064_v60 = vld [vmem:[#allocation4 + $0x280] sm:$0xff]  ;;  %v6066_v10 = vld [vmem:[#allocation4 + $0x290] sm:$0xff] }
 0x67e   :  { %11504 = vmatprep.subr.bf16.mxu0 %v11503_v15  ;;  %11760 = vmatprep.subr.bf16.mxu1 %v11759_v33  ;;  %v11529_v15 = vunpack.c.l.s8.bf16 %v6064_v60  ;;  %v11785_v33 = vunpack.c.l.s8.bf16 %v6066_v10 }
 0x681   :  { %11506 = vmatpush1.bf16.msra.mxu0 %v11505_v2  ;;  %11762 = vmatpush1.bf16.msra.mxu1 %v11761_v13  ;;  %v6073_v2 = vld [vmem:[#allocation4 + $0x2c8] sm:$0xff]  ;;  %v6075_v13 = vld [vmem:[#allocation4 + $0x2d8] sm:$0xff] }
 0x682   :  { %11508 = vmatprep.subr.bf16.mxu0 %v11507_v19  ;;  %11764 = vmatprep.subr.bf16.mxu1 %v11763_v29  ;;  %v11533_v19 = vunpack.c.h.s8.bf16 %v6064_v60  ;;  %v11789_v29 = vunpack.c.h.s8.bf16 %v6066_v10  ;;  %v11535_v1 = vunpack.c.l.s8.bf16 %v6073_v2  ;;  %v11791_v25 = vunpack.c.l.s8.bf16 %v6075_v13 }
 0x683   :  { %v11539_v34 = vunpack.c.h.s8.bf16 %v6073_v2  ;;  %v11795_v35 = vunpack.c.h.s8.bf16 %v6075_v13 }
 0x685   :  { %11510 = vmatpush1.bf16.msra.mxu0 %v11509_v22  ;;  %11766 = vmatpush1.bf16.msra.mxu1 %v11765_v23  ;;  %v6072_v22 = vld [vmem:[#allocation4 + $0x2c0] sm:$0xff]  ;;  %v6074_v23 = vld [vmem:[#allocation4 + $0x2d0] sm:$0xff] }
 0x686   :  { %11512 = vmatprep.subr.bf16.mxu0 %v11511_v30  ;;  %11768 = vmatprep.subr.bf16.mxu1 %v11767_v31  ;;  %v11537_v30 = vunpack.c.l.s8.bf16 %v6072_v22  ;;  %v11793_v31 = vunpack.c.l.s8.bf16 %v6074_v23 }
 0x688   :  { %8353 = vmatmul.mubr.f32.vlgmr.msra.gmra.mrb[18].mxu0 %v13370_v27  ;;  %8661 = vmatmul.mubr.f32.vlgmr.msra.gmra.mrb[18].mxu1 %v13370_v27 }
 0x689   :  { %11514 = vmatpush1.bf16.msra.mxu0 %v11513_v36  ;;  %11770 = vmatpush1.bf16.msra.mxu1 %v11769_v8  ;;  %v6081_v36 = vld [vmem:[#allocation4 + $0x308] sm:$0xff]  ;;  %v6083_v8 = vld [vmem:[#allocation4 + $0x318] sm:$0xff] }
 0x68a   :  { %11516 = vmatprep.subr.bf16.mxu0 %v11515_v37  ;;  %11772 = vmatprep.subr.bf16.mxu1 %v11771_v38  ;;  %v11541_v37 = vunpack.c.h.s8.bf16 %v6072_v22  ;;  %v11797_v38 = vunpack.c.h.s8.bf16 %v6074_v23  ;;  %v11543_v39 = vunpack.c.l.s8.bf16 %v6081_v36  ;;  %v11799_v47 = vunpack.c.l.s8.bf16 %v6083_v8 }
 0x68b   :  { %8358 = vmatprep.mubr.f32.mxu0 %v13382_v21  ;;  %8666 = vmatprep.mubr.f32.mxu1 %v13382_v21  ;;  %v11547_v52 = vunpack.c.h.s8.bf16 %v6081_v36  ;;  %v11803_v9 = vunpack.c.h.s8.bf16 %v6083_v8 }
 0x68c   :  { %8359 = vmatmul.mubr.f32.gmra.mrb[20].mxu0 %v13378_v16  ;;  %8667 = vmatmul.mubr.f32.gmra.mrb[20].mxu1 %v13378_v16 }
 0x68d   :  { %11518 = vmatpush1.bf16.msra.mxu0 %v11517_v5  ;;  %11774 = vmatpush1.bf16.msra.mxu1 %v11773_v48  ;;  %v6080_v5 = vld [vmem:[#allocation4 + $0x300] sm:$0xff]  ;;  %v6082_v48 = vld [vmem:[#allocation4 + $0x310] sm:$0xff] }
 0x68e   :  { %11520 = vmatprep.subr.bf16.mxu0 %v11519_v50  ;;  %11776 = vmatprep.subr.bf16.mxu1 %v11775_v51  ;;  %v11545_v50 = vunpack.c.l.s8.bf16 %v6080_v5  ;;  %v11801_v51 = vunpack.c.l.s8.bf16 %v6082_v48 }
 0x68f   :  { %8429 = vmatprep.mubr.f32.mxu0 %v13376_v63  ;;  %8737 = vmatprep.mubr.f32.mxu1 %v13376_v63 }
 0x691   :  { %11522 = vmatpush1.bf16.msra.mxu0 %v11521_v54  ;;  %11778 = vmatpush1.bf16.msra.mxu1 %v11777_v55  ;;  %v6089_v54 = vld [vmem:[#allocation4 + $0x348] sm:$0xff]  ;;  %v6091_v55 = vld [vmem:[#allocation4 + $0x358] sm:$0xff] }
 0x692   :  { %11524 = vmatprep.subr.bf16.mxu0 %v11523_v12  ;;  %11780 = vmatprep.subr.bf16.mxu1 %v11779_v32  ;;  %v11549_v12 = vunpack.c.h.s8.bf16 %v6080_v5  ;;  %v11805_v32 = vunpack.c.h.s8.bf16 %v6082_v48  ;;  %v11551_v56 = vunpack.c.l.s8.bf16 %v6089_v54  ;;  %v11807_v3 = vunpack.c.l.s8.bf16 %v6091_v55 }
 0x693   :  { %v11555_v60 = vunpack.c.h.s8.bf16 %v6089_v54  ;;  %v11811_v10 = vunpack.c.h.s8.bf16 %v6091_v55 }
 0x695   :  { %11526 = vmatpush1.bf16.msra.mxu0 %v11525_v7  ;;  %11782 = vmatpush1.bf16.msra.mxu1 %v11781_v41  ;;  %v6088_v7 = vld [vmem:[#allocation4 + $0x340] sm:$0xff]  ;;  %v6090_v41 = vld [vmem:[#allocation4 + $0x350] sm:$0xff] }
 0x696   :  { %11528 = vmatprep.subr.bf16.mxu0 %v11527_v18  ;;  %11784 = vmatprep.subr.bf16.mxu1 %v11783_v6  ;;  %v11553_v18 = vunpack.c.l.s8.bf16 %v6088_v7  ;;  %v11809_v6 = vunpack.c.l.s8.bf16 %v6090_v41 }
 0x699   :  { %11530 = vmatpush1.bf16.msra.mxu0 %v11529_v15  ;;  %11786 = vmatpush1.bf16.msra.mxu1 %v11785_v33  ;;  %v6097_v15 = vld [vmem:[#allocation4 + $0x388] sm:$0xff]  ;;  %v6099_v33 = vld [vmem:[#allocation4 + $0x398] sm:$0xff] }
 0x69a   :  { %11532 = vmatprep.subr.bf16.mxu0 %v11531_v11  ;;  %11788 = vmatprep.subr.bf16.mxu1 %v11787_v17  ;;  %v11557_v11 = vunpack.c.h.s8.bf16 %v6088_v7  ;;  %v11813_v17 = vunpack.c.h.s8.bf16 %v6090_v41  ;;  %v11559_v2 = vunpack.c.l.s8.bf16 %v6097_v15  ;;  %v11815_v13 = vunpack.c.l.s8.bf16 %v6099_v33 }
 0x69b   :  { %v11563_v22 = vunpack.c.h.s8.bf16 %v6097_v15  ;;  %v11819_v23 = vunpack.c.h.s8.bf16 %v6099_v33 }
 0x69d   :  { %11534 = vmatpush1.bf16.msra.mxu0 %v11533_v19  ;;  %11790 = vmatpush1.bf16.msra.mxu1 %v11789_v29  ;;  %v6096_v19 = vld [vmem:[#allocation4 + $0x380] sm:$0xff]  ;;  %v6098_v29 = vld [vmem:[#allocation4 + $0x390] sm:$0xff] }
 0x69e   :  { %11536 = vmatprep.subr.bf16.mxu0 %v11535_v1  ;;  %11792 = vmatprep.subr.bf16.mxu1 %v11791_v25  ;;  %v11561_v1 = vunpack.c.l.s8.bf16 %v6096_v19  ;;  %v11817_v25 = vunpack.c.l.s8.bf16 %v6098_v29 }
 0x6a1   :  { %11538 = vmatpush1.bf16.msra.mxu0 %v11537_v30  ;;  %11794 = vmatpush1.bf16.msra.mxu1 %v11793_v31  ;;  %v6105_v30 = vld [vmem:[#allocation4 + $0x3c8] sm:$0xff]  ;;  %v6107_v31 = vld [vmem:[#allocation4 + $0x3d8] sm:$0xff] }
 0x6a2   :  { %11540 = vmatprep.subr.bf16.mxu0 %v11539_v34  ;;  %11796 = vmatprep.subr.bf16.mxu1 %v11795_v35  ;;  %v11565_v34 = vunpack.c.h.s8.bf16 %v6096_v19  ;;  %v11821_v35 = vunpack.c.h.s8.bf16 %v6098_v29  ;;  %v11567_v36 = vunpack.c.l.s8.bf16 %v6105_v30  ;;  %v11823_v8 = vunpack.c.l.s8.bf16 %v6107_v31 }
 0x6a3   :  { %v11571_v5 = vunpack.c.h.s8.bf16 %v6105_v30  ;;  %v11827_v48 = vunpack.c.h.s8.bf16 %v6107_v31 }
 0x6a5   :  { %11542 = vmatpush1.bf16.msra.mxu0 %v11541_v37  ;;  %11798 = vmatpush1.bf16.msra.mxu1 %v11797_v38  ;;  %v6104_v37 = vld [vmem:[#allocation4 + $0x3c0] sm:$0xff]  ;;  %v6106_v38 = vld [vmem:[#allocation4 + $0x3d0] sm:$0xff] }
 0x6a6   :  { %11544 = vmatprep.subr.bf16.mxu0 %v11543_v39  ;;  %11800 = vmatprep.subr.bf16.mxu1 %v11799_v47  ;;  %v11569_v39 = vunpack.c.l.s8.bf16 %v6104_v37  ;;  %v11825_v47 = vunpack.c.l.s8.bf16 %v6106_v38 }
 0x6a9   :  { %11546 = vmatpush1.bf16.msra.mxu0 %v11545_v50  ;;  %11802 = vmatpush1.bf16.msra.mxu1 %v11801_v51  ;;  %v6113_v50 = vld [vmem:[#allocation4 + $0x408] sm:$0xff]  ;;  %v6115_v51 = vld [vmem:[#allocation4 + $0x418] sm:$0xff] }
 0x6aa   :  { %11548 = vmatprep.subr.bf16.mxu0 %v11547_v52  ;;  %11804 = vmatprep.subr.bf16.mxu1 %v11803_v9  ;;  %v11573_v52 = vunpack.c.h.s8.bf16 %v6104_v37  ;;  %v11829_v9 = vunpack.c.h.s8.bf16 %v6106_v38  ;;  %v11575_v54 = vunpack.c.l.s8.bf16 %v6113_v50  ;;  %v11831_v55 = vunpack.c.l.s8.bf16 %v6115_v51 }
 0x6ab   :  { %v11579_v7 = vunpack.c.h.s8.bf16 %v6113_v50  ;;  %v11835_v41 = vunpack.c.h.s8.bf16 %v6115_v51 }
 0x6ad   :  { %11550 = vmatpush1.bf16.msra.mxu0 %v11549_v12  ;;  %11806 = vmatpush1.bf16.msra.mxu1 %v11805_v32  ;;  %v6112_v12 = vld [vmem:[#allocation4 + $0x400] sm:$0xff]  ;;  %v6114_v32 = vld [vmem:[#allocation4 + $0x410] sm:$0xff] }
 0x6ae   :  { %11552 = vmatprep.subr.bf16.mxu0 %v11551_v56  ;;  %11808 = vmatprep.subr.bf16.mxu1 %v11807_v3  ;;  %v11577_v56 = vunpack.c.l.s8.bf16 %v6112_v12  ;;  %v11833_v3 = vunpack.c.l.s8.bf16 %v6114_v32 }
 0x6b1   :  { %11554 = vmatpush1.bf16.msra.mxu0 %v11553_v18  ;;  %11810 = vmatpush1.bf16.msra.mxu1 %v11809_v6  ;;  %v6121_v18 = vld [vmem:[#allocation4 + $0x448] sm:$0xff]  ;;  %v6123_v6 = vld [vmem:[#allocation4 + $0x458] sm:$0xff] }
 0x6b2   :  { %11556 = vmatprep.subr.bf16.mxu0 %v11555_v60  ;;  %11812 = vmatprep.subr.bf16.mxu1 %v11811_v10  ;;  %v11581_v60 = vunpack.c.h.s8.bf16 %v6112_v12  ;;  %v11837_v10 = vunpack.c.h.s8.bf16 %v6114_v32  ;;  %v11583_v15 = vunpack.c.l.s8.bf16 %v6121_v18  ;;  %v11839_v33 = vunpack.c.l.s8.bf16 %v6123_v6 }
 0x6b3   :  { %v11587_v19 = vunpack.c.h.s8.bf16 %v6121_v18  ;;  %v11843_v29 = vunpack.c.h.s8.bf16 %v6123_v6 }
 0x6b5   :  { %11558 = vmatpush1.bf16.msra.mxu0 %v11557_v11  ;;  %11814 = vmatpush1.bf16.msra.mxu1 %v11813_v17  ;;  %v6120_v11 = vld [vmem:[#allocation4 + $0x440] sm:$0xff]  ;;  %v6122_v17 = vld [vmem:[#allocation4 + $0x450] sm:$0xff] }
 0x6b6   :  { %11560 = vmatprep.subr.bf16.mxu0 %v11559_v2  ;;  %11816 = vmatprep.subr.bf16.mxu1 %v11815_v13  ;;  %v11585_v2 = vunpack.c.l.s8.bf16 %v6120_v11  ;;  %v11841_v13 = vunpack.c.l.s8.bf16 %v6122_v17 }
 0x6b9   :  { %11562 = vmatpush1.bf16.msra.mxu0 %v11561_v1  ;;  %11818 = vmatpush1.bf16.msra.mxu1 %v11817_v25  ;;  %v6129_v1 = vld [vmem:[#allocation4 + $0x488] sm:$0xff]  ;;  %v6131_v25 = vld [vmem:[#allocation4 + $0x498] sm:$0xff] }
 0x6ba   :  { %11564 = vmatprep.subr.bf16.mxu0 %v11563_v22  ;;  %11820 = vmatprep.subr.bf16.mxu1 %v11819_v23  ;;  %v11589_v22 = vunpack.c.h.s8.bf16 %v6120_v11  ;;  %v11845_v23 = vunpack.c.h.s8.bf16 %v6122_v17  ;;  %v11591_v30 = vunpack.c.l.s8.bf16 %v6129_v1  ;;  %v11847_v31 = vunpack.c.l.s8.bf16 %v6131_v25 }
 0x6bb   :  { %v11595_v37 = vunpack.c.h.s8.bf16 %v6129_v1  ;;  %v11851_v38 = vunpack.c.h.s8.bf16 %v6131_v25 }
 0x6bd   :  { %11566 = vmatpush1.bf16.msra.mxu0 %v11565_v34  ;;  %11822 = vmatpush1.bf16.msra.mxu1 %v11821_v35  ;;  %v6128_v34 = vld [vmem:[#allocation4 + $0x480] sm:$0xff]  ;;  %v6130_v35 = vld [vmem:[#allocation4 + $0x490] sm:$0xff] }
 0x6be   :  { %11568 = vmatprep.subr.bf16.mxu0 %v11567_v36  ;;  %11824 = vmatprep.subr.bf16.mxu1 %v11823_v8  ;;  %v11593_v36 = vunpack.c.l.s8.bf16 %v6128_v34  ;;  %v11849_v8 = vunpack.c.l.s8.bf16 %v6130_v35 }
 0x6c1   :  { %11570 = vmatpush1.bf16.msra.mxu0 %v11569_v39  ;;  %11826 = vmatpush1.bf16.msra.mxu1 %v11825_v47  ;;  %v6137_v39 = vld [vmem:[#allocation4 + $0x4c8] sm:$0xff]  ;;  %v6139_v47 = vld [vmem:[#allocation4 + $0x4d8] sm:$0xff] }
 0x6c2   :  { %11572 = vmatprep.subr.bf16.mxu0 %v11571_v5  ;;  %11828 = vmatprep.subr.bf16.mxu1 %v11827_v48  ;;  %v11597_v5 = vunpack.c.h.s8.bf16 %v6128_v34  ;;  %v11853_v48 = vunpack.c.h.s8.bf16 %v6130_v35  ;;  %v11599_v50 = vunpack.c.l.s8.bf16 %v6137_v39  ;;  %v11855_v51 = vunpack.c.l.s8.bf16 %v6139_v47 }
 0x6c3   :  { %v11603_v12 = vunpack.c.h.s8.bf16 %v6137_v39  ;;  %v11859_v32 = vunpack.c.h.s8.bf16 %v6139_v47 }
 0x6c5   :  { %11574 = vmatpush1.bf16.msra.mxu0 %v11573_v52  ;;  %11830 = vmatpush1.bf16.msra.mxu1 %v11829_v9  ;;  %v6136_v52 = vld [vmem:[#allocation4 + $0x4c0] sm:$0xff]  ;;  %v6138_v9 = vld [vmem:[#allocation4 + $0x4d0] sm:$0xff] }
 0x6c6   :  { %11576 = vmatprep.subr.bf16.mxu0 %v11575_v54  ;;  %11832 = vmatprep.subr.bf16.mxu1 %v11831_v55  ;;  %v11601_v54 = vunpack.c.l.s8.bf16 %v6136_v52  ;;  %v11857_v55 = vunpack.c.l.s8.bf16 %v6138_v9 }
 0x6c8   :  { %8430 = vmatmul.mubr.f32.vlgmr.msra.gmra.mrb[18].mxu0 %v13372_v42  ;;  %8738 = vmatmul.mubr.f32.vlgmr.msra.gmra.mrb[18].mxu1 %v13372_v42 }
 0x6c9   :  { %11578 = vmatpush1.bf16.msra.mxu0 %v11577_v56  ;;  %11834 = vmatpush1.bf16.msra.mxu1 %v11833_v3  ;;  %v6145_v56 = vld [vmem:[#allocation4 + $0x508] sm:$0xff]  ;;  %v6147_v3 = vld [vmem:[#allocation4 + $0x518] sm:$0xff] }
 0x6ca   :  { %11580 = vmatprep.subr.bf16.mxu0 %v11579_v7  ;;  %11836 = vmatprep.subr.bf16.mxu1 %v11835_v41  ;;  %v11605_v7 = vunpack.c.h.s8.bf16 %v6136_v52  ;;  %v11861_v41 = vunpack.c.h.s8.bf16 %v6138_v9  ;;  %v11607_v18 = vunpack.c.l.s8.bf16 %v6145_v56  ;;  %v11863_v6 = vunpack.c.l.s8.bf16 %v6147_v3 }
 0x6cb   :  { %8435 = vmatprep.mubr.f32.mxu0 %v13384_v14  ;;  %8743 = vmatprep.mubr.f32.mxu1 %v13384_v14  ;;  %v11611_v11 = vunpack.c.h.s8.bf16 %v6145_v56  ;;  %v11867_v17 = vunpack.c.h.s8.bf16 %v6147_v3 }
 0x6cc   :  { %8436 = vmatmul.mubr.f32.gmra.mrb[20].mxu0 %v13380_v20  ;;  %8744 = vmatmul.mubr.f32.gmra.mrb[20].mxu1 %v13380_v20 }
 0x6cd   :  { %11582 = vmatpush1.bf16.msra.mxu0 %v11581_v60  ;;  %11838 = vmatpush1.bf16.msra.mxu1 %v11837_v10  ;;  %v6144_v60 = vld [vmem:[#allocation4 + $0x500] sm:$0xff]  ;;  %v6146_v10 = vld [vmem:[#allocation4 + $0x510] sm:$0xff] }
 0x6ce   :  { %11584 = vmatprep.subr.bf16.mxu0 %v11583_v15  ;;  %11840 = vmatprep.subr.bf16.mxu1 %v11839_v33  ;;  %v11609_v15 = vunpack.c.l.s8.bf16 %v6144_v60  ;;  %v11865_v33 = vunpack.c.l.s8.bf16 %v6146_v10 }
 0x6cf   :  { %8506 = vmatprep.mubr.f32.mxu0 %v13412_v26  ;;  %8814 = vmatprep.mubr.f32.mxu1 %v13412_v26 }
 0x6d1   :  { %11586 = vmatpush1.bf16.msra.mxu0 %v11585_v2  ;;  %11842 = vmatpush1.bf16.msra.mxu1 %v11841_v13  ;;  %v6153_v2 = vld [vmem:[#allocation4 + $0x548] sm:$0xff]  ;;  %v6155_v13 = vld [vmem:[#allocation4 + $0x558] sm:$0xff] }
 0x6d2   :  { %11588 = vmatprep.subr.bf16.mxu0 %v11587_v19  ;;  %11844 = vmatprep.subr.bf16.mxu1 %v11843_v29  ;;  %v11613_v19 = vunpack.c.h.s8.bf16 %v6144_v60  ;;  %v11869_v29 = vunpack.c.h.s8.bf16 %v6146_v10  ;;  %v11615_v1 = vunpack.c.l.s8.bf16 %v6153_v2  ;;  %v11871_v25 = vunpack.c.l.s8.bf16 %v6155_v13 }
 0x6d3   :  { %v11619_v34 = vunpack.c.h.s8.bf16 %v6153_v2  ;;  %v11875_v35 = vunpack.c.h.s8.bf16 %v6155_v13 }
 0x6d5   :  { %11590 = vmatpush1.bf16.msra.mxu0 %v11589_v22  ;;  %11846 = vmatpush1.bf16.msra.mxu1 %v11845_v23  ;;  %v6152_v22 = vld [vmem:[#allocation4 + $0x540] sm:$0xff]  ;;  %v6154_v23 = vld [vmem:[#allocation4 + $0x550] sm:$0xff] }
 0x6d6   :  { %11592 = vmatprep.subr.bf16.mxu0 %v11591_v30  ;;  %11848 = vmatprep.subr.bf16.mxu1 %v11847_v31  ;;  %v11617_v30 = vunpack.c.l.s8.bf16 %v6152_v22  ;;  %v11873_v31 = vunpack.c.l.s8.bf16 %v6154_v23 }
 0x6d9   :  { %11594 = vmatpush1.bf16.msra.mxu0 %v11593_v36  ;;  %11850 = vmatpush1.bf16.msra.mxu1 %v11849_v8  ;;  %v6161_v36 = vld [vmem:[#allocation4 + $0x588] sm:$0xff]  ;;  %v6163_v8 = vld [vmem:[#allocation4 + $0x598] sm:$0xff] }
 0x6da   :  { %11596 = vmatprep.subr.bf16.mxu0 %v11595_v37  ;;  %11852 = vmatprep.subr.bf16.mxu1 %v11851_v38  ;;  %v11621_v37 = vunpack.c.h.s8.bf16 %v6152_v22  ;;  %v11877_v38 = vunpack.c.h.s8.bf16 %v6154_v23  ;;  %v11623_v39 = vunpack.c.l.s8.bf16 %v6161_v36  ;;  %v11879_v47 = vunpack.c.l.s8.bf16 %v6163_v8 }
 0x6db   :  { %v11627_v52 = vunpack.c.h.s8.bf16 %v6161_v36  ;;  %v11883_v9 = vunpack.c.h.s8.bf16 %v6163_v8 }
 0x6dd   :  { %11598 = vmatpush1.bf16.msra.mxu0 %v11597_v5  ;;  %11854 = vmatpush1.bf16.msra.mxu1 %v11853_v48  ;;  %v6160_v5 = vld [vmem:[#allocation4 + $0x580] sm:$0xff]  ;;  %v6162_v48 = vld [vmem:[#allocation4 + $0x590] sm:$0xff] }
 0x6de   :  { %11600 = vmatprep.subr.bf16.mxu0 %v11599_v50  ;;  %11856 = vmatprep.subr.bf16.mxu1 %v11855_v51  ;;  %v11625_v50 = vunpack.c.l.s8.bf16 %v6160_v5  ;;  %v11881_v51 = vunpack.c.l.s8.bf16 %v6162_v48 }
 0x6e1   :  { %11602 = vmatpush1.bf16.msra.mxu0 %v11601_v54  ;;  %11858 = vmatpush1.bf16.msra.mxu1 %v11857_v55  ;;  %v6169_v54 = vld [vmem:[#allocation4 + $0x5c8] sm:$0xff]  ;;  %v6171_v55 = vld [vmem:[#allocation4 + $0x5d8] sm:$0xff] }
 0x6e2   :  { %11604 = vmatprep.subr.bf16.mxu0 %v11603_v12  ;;  %11860 = vmatprep.subr.bf16.mxu1 %v11859_v32  ;;  %v11629_v12 = vunpack.c.h.s8.bf16 %v6160_v5  ;;  %v11885_v32 = vunpack.c.h.s8.bf16 %v6162_v48  ;;  %v11631_v56 = vunpack.c.l.s8.bf16 %v6169_v54  ;;  %v11887_v3 = vunpack.c.l.s8.bf16 %v6171_v55 }
 0x6e3   :  { %v11635_v60 = vunpack.c.h.s8.bf16 %v6169_v54  ;;  %v11891_v10 = vunpack.c.h.s8.bf16 %v6171_v55 }
 0x6e5   :  { %11606 = vmatpush1.bf16.msra.mxu0 %v11605_v7  ;;  %11862 = vmatpush1.bf16.msra.mxu1 %v11861_v41  ;;  %v6168_v7 = vld [vmem:[#allocation4 + $0x5c0] sm:$0xff]  ;;  %v6170_v41 = vld [vmem:[#allocation4 + $0x5d0] sm:$0xff] }
 0x6e6   :  { %11608 = vmatprep.subr.bf16.mxu0 %v11607_v18  ;;  %11864 = vmatprep.subr.bf16.mxu1 %v11863_v6  ;;  %v11633_v18 = vunpack.c.l.s8.bf16 %v6168_v7  ;;  %v11889_v6 = vunpack.c.l.s8.bf16 %v6170_v41 }
 0x6e9   :  { %11610 = vmatpush1.bf16.msra.mxu0 %v11609_v15  ;;  %11866 = vmatpush1.bf16.msra.mxu1 %v11865_v33  ;;  %v6177_v15 = vld [vmem:[#allocation4 + $0x608] sm:$0xff]  ;;  %v6179_v33 = vld [vmem:[#allocation4 + $0x618] sm:$0xff] }
 0x6ea   :  { %11612 = vmatprep.subr.bf16.mxu0 %v11611_v11  ;;  %11868 = vmatprep.subr.bf16.mxu1 %v11867_v17  ;;  %v11637_v11 = vunpack.c.h.s8.bf16 %v6168_v7  ;;  %v11893_v17 = vunpack.c.h.s8.bf16 %v6170_v41  ;;  %v11639_v2 = vunpack.c.l.s8.bf16 %v6177_v15  ;;  %v11895_v13 = vunpack.c.l.s8.bf16 %v6179_v33 }
 0x6eb   :  { %v11643_v22 = vunpack.c.h.s8.bf16 %v6177_v15  ;;  %v11899_v23 = vunpack.c.h.s8.bf16 %v6179_v33 }
 0x6ed   :  { %11614 = vmatpush1.bf16.msra.mxu0 %v11613_v19  ;;  %11870 = vmatpush1.bf16.msra.mxu1 %v11869_v29  ;;  %v6176_v19 = vld [vmem:[#allocation4 + $0x600] sm:$0xff]  ;;  %v6178_v29 = vld [vmem:[#allocation4 + $0x610] sm:$0xff] }
 0x6ee   :  { %11616 = vmatprep.subr.bf16.mxu0 %v11615_v1  ;;  %11872 = vmatprep.subr.bf16.mxu1 %v11871_v25  ;;  %v11641_v1 = vunpack.c.l.s8.bf16 %v6176_v19  ;;  %v11897_v25 = vunpack.c.l.s8.bf16 %v6178_v29 }
 0x6f1   :  { %11618 = vmatpush1.bf16.msra.mxu0 %v11617_v30  ;;  %11874 = vmatpush1.bf16.msra.mxu1 %v11873_v31  ;;  %v6185_v30 = vld [vmem:[#allocation4 + $0x648] sm:$0xff]  ;;  %v6187_v31 = vld [vmem:[#allocation4 + $0x658] sm:$0xff] }
 0x6f2   :  { %11620 = vmatprep.subr.bf16.mxu0 %v11619_v34  ;;  %11876 = vmatprep.subr.bf16.mxu1 %v11875_v35  ;;  %v11645_v34 = vunpack.c.h.s8.bf16 %v6176_v19  ;;  %v11901_v35 = vunpack.c.h.s8.bf16 %v6178_v29  ;;  %v11647_v36 = vunpack.c.l.s8.bf16 %v6185_v30  ;;  %v11903_v8 = vunpack.c.l.s8.bf16 %v6187_v31 }
 0x6f3   :  { %v11651_v5 = vunpack.c.h.s8.bf16 %v6185_v30  ;;  %v11907_v48 = vunpack.c.h.s8.bf16 %v6187_v31 }
 0x6f5   :  { %11622 = vmatpush1.bf16.msra.mxu0 %v11621_v37  ;;  %11878 = vmatpush1.bf16.msra.mxu1 %v11877_v38  ;;  %v6184_v37 = vld [vmem:[#allocation4 + $0x640] sm:$0xff]  ;;  %v6186_v38 = vld [vmem:[#allocation4 + $0x650] sm:$0xff] }
 0x6f6   :  { %11624 = vmatprep.subr.bf16.mxu0 %v11623_v39  ;;  %11880 = vmatprep.subr.bf16.mxu1 %v11879_v47  ;;  %v11649_v39 = vunpack.c.l.s8.bf16 %v6184_v37  ;;  %v11905_v47 = vunpack.c.l.s8.bf16 %v6186_v38 }
 0x6f9   :  { %11626 = vmatpush1.bf16.msra.mxu0 %v11625_v50  ;;  %11882 = vmatpush1.bf16.msra.mxu1 %v11881_v51  ;;  %v6193_v50 = vld [vmem:[#allocation4 + $0x688] sm:$0xff]  ;;  %v6195_v51 = vld [vmem:[#allocation4 + $0x698] sm:$0xff] }
 0x6fa   :  { %11628 = vmatprep.subr.bf16.mxu0 %v11627_v52  ;;  %11884 = vmatprep.subr.bf16.mxu1 %v11883_v9  ;;  %v11653_v52 = vunpack.c.h.s8.bf16 %v6184_v37  ;;  %v11909_v9 = vunpack.c.h.s8.bf16 %v6186_v38  ;;  %v11655_v54 = vunpack.c.l.s8.bf16 %v6193_v50  ;;  %v11911_v55 = vunpack.c.l.s8.bf16 %v6195_v51 }
 0x6fb   :  { %v11659_v7 = vunpack.c.h.s8.bf16 %v6193_v50  ;;  %v11915_v41 = vunpack.c.h.s8.bf16 %v6195_v51 }
 0x6fd   :  { %11630 = vmatpush1.bf16.msra.mxu0 %v11629_v12  ;;  %11886 = vmatpush1.bf16.msra.mxu1 %v11885_v32  ;;  %v6192_v12 = vld [vmem:[#allocation4 + $0x680] sm:$0xff]  ;;  %v6194_v32 = vld [vmem:[#allocation4 + $0x690] sm:$0xff] }
 0x6fe   :  { %11632 = vmatprep.subr.bf16.mxu0 %v11631_v56  ;;  %11888 = vmatprep.subr.bf16.mxu1 %v11887_v3  ;;  %v11657_v56 = vunpack.c.l.s8.bf16 %v6192_v12  ;;  %v11913_v3 = vunpack.c.l.s8.bf16 %v6194_v32 }
 0x701   :  { %11634 = vmatpush1.bf16.msra.mxu0 %v11633_v18  ;;  %11890 = vmatpush1.bf16.msra.mxu1 %v11889_v6  ;;  %v6201_v18 = vld [vmem:[#allocation4 + $0x6c8] sm:$0xff]  ;;  %v6203_v6 = vld [vmem:[#allocation4 + $0x6d8] sm:$0xff] }
 0x702   :  { %11636 = vmatprep.subr.bf16.mxu0 %v11635_v60  ;;  %11892 = vmatprep.subr.bf16.mxu1 %v11891_v10  ;;  %v11661_v60 = vunpack.c.h.s8.bf16 %v6192_v12  ;;  %v11917_v10 = vunpack.c.h.s8.bf16 %v6194_v32  ;;  %v11663_v15 = vunpack.c.l.s8.bf16 %v6201_v18  ;;  %v11919_v33 = vunpack.c.l.s8.bf16 %v6203_v6 }
 0x703   :  { %v11667_v19 = vunpack.c.h.s8.bf16 %v6201_v18  ;;  %v11923_v29 = vunpack.c.h.s8.bf16 %v6203_v6 }
 0x705   :  { %11638 = vmatpush1.bf16.msra.mxu0 %v11637_v11  ;;  %11894 = vmatpush1.bf16.msra.mxu1 %v11893_v17  ;;  %v6200_v11 = vld [vmem:[#allocation4 + $0x6c0] sm:$0xff]  ;;  %v6202_v17 = vld [vmem:[#allocation4 + $0x6d0] sm:$0xff] }
 0x706   :  { %11640 = vmatprep.subr.bf16.mxu0 %v11639_v2  ;;  %11896 = vmatprep.subr.bf16.mxu1 %v11895_v13  ;;  %v11665_v2 = vunpack.c.l.s8.bf16 %v6200_v11  ;;  %v11921_v13 = vunpack.c.l.s8.bf16 %v6202_v17 }
 0x708   :  { %8507 = vmatmul.mubr.f32.vlgmr.msra.gmra.mrb[18].mxu0 %v13408_v4  ;;  %8815 = vmatmul.mubr.f32.vlgmr.msra.gmra.mrb[18].mxu1 %v13408_v4 }
 0x709   :  { %11642 = vmatpush1.bf16.msra.mxu0 %v11641_v1  ;;  %11898 = vmatpush1.bf16.msra.mxu1 %v11897_v25  ;;  %v6209_v1 = vld [vmem:[#allocation4 + $0x708] sm:$0xff]  ;;  %v6211_v25 = vld [vmem:[#allocation4 + $0x718] sm:$0xff] }
 0x70a   :  { %11644 = vmatprep.subr.bf16.mxu0 %v11643_v22  ;;  %11900 = vmatprep.subr.bf16.mxu1 %v11899_v23  ;;  %v11669_v22 = vunpack.c.h.s8.bf16 %v6200_v11  ;;  %v11925_v23 = vunpack.c.h.s8.bf16 %v6202_v17  ;;  %v11671_v30 = vunpack.c.l.s8.bf16 %v6209_v1  ;;  %v11927_v31 = vunpack.c.l.s8.bf16 %v6211_v25 }
 0x70b   :  { %8512 = vmatprep.mubr.f32.mxu0 %v13420_v24  ;;  %8820 = vmatprep.mubr.f32.mxu1 %v13420_v24  ;;  %v11675_v37 = vunpack.c.h.s8.bf16 %v6209_v1  ;;  %v11931_v38 = vunpack.c.h.s8.bf16 %v6211_v25 }
 0x70c   :  { %8513 = vmatmul.mubr.f32.gmra.mrb[20].mxu0 %v13416_v28  ;;  %8821 = vmatmul.mubr.f32.gmra.mrb[20].mxu1 %v13416_v28 }
 0x70d   :  { %11646 = vmatpush1.bf16.msra.mxu0 %v11645_v34  ;;  %11902 = vmatpush1.bf16.msra.mxu1 %v11901_v35  ;;  %v6208_v34 = vld [vmem:[#allocation4 + $0x700] sm:$0xff]  ;;  %v6210_v35 = vld [vmem:[#allocation4 + $0x710] sm:$0xff] }
 0x70e   :  { %11648 = vmatprep.subr.bf16.mxu0 %v11647_v36  ;;  %11904 = vmatprep.subr.bf16.mxu1 %v11903_v8  ;;  %v11673_v36 = vunpack.c.l.s8.bf16 %v6208_v34  ;;  %v11929_v8 = vunpack.c.l.s8.bf16 %v6210_v35 }
 0x70f   :  { %8583 = vmatprep.mubr.f32.mxu0 %v13414_v53  ;;  %8891 = vmatprep.mubr.f32.mxu1 %v13414_v53 }
 0x711   :  { %11650 = vmatpush1.bf16.msra.mxu0 %v11649_v39  ;;  %11906 = vmatpush1.bf16.msra.mxu1 %v11905_v47  ;;  %v6217_v39 = vld [vmem:[#allocation4 + $0x748] sm:$0xff]  ;;  %v6219_v47 = vld [vmem:[#allocation4 + $0x758] sm:$0xff] }
 0x712   :  { %11652 = vmatprep.subr.bf16.mxu0 %v11651_v5  ;;  %11908 = vmatprep.subr.bf16.mxu1 %v11907_v48  ;;  %v11677_v5 = vunpack.c.h.s8.bf16 %v6208_v34  ;;  %v11933_v48 = vunpack.c.h.s8.bf16 %v6210_v35  ;;  %v11679_v50 = vunpack.c.l.s8.bf16 %v6217_v39  ;;  %v11935_v51 = vunpack.c.l.s8.bf16 %v6219_v47 }
 0x713   :  { %v11683_v12 = vunpack.c.h.s8.bf16 %v6217_v39  ;;  %v11939_v32 = vunpack.c.h.s8.bf16 %v6219_v47 }
 0x715   :  { %11654 = vmatpush1.bf16.msra.mxu0 %v11653_v52  ;;  %11910 = vmatpush1.bf16.msra.mxu1 %v11909_v9  ;;  %v6216_v52 = vld [vmem:[#allocation4 + $0x740] sm:$0xff]  ;;  %v6218_v9 = vld [vmem:[#allocation4 + $0x750] sm:$0xff] }
 0x716   :  { %11656 = vmatprep.subr.bf16.mxu0 %v11655_v54  ;;  %11912 = vmatprep.subr.bf16.mxu1 %v11911_v55  ;;  %v11681_v54 = vunpack.c.l.s8.bf16 %v6216_v52  ;;  %v11937_v55 = vunpack.c.l.s8.bf16 %v6218_v9 }
 0x719   :  { %11658 = vmatpush1.bf16.msra.mxu0 %v11657_v56  ;;  %11914 = vmatpush1.bf16.msra.mxu1 %v11913_v3  ;;  %v6225_v56 = vld [vmem:[#allocation4 + $0x788] sm:$0xff]  ;;  %v6227_v3 = vld [vmem:[#allocation4 + $0x798] sm:$0xff] }
 0x71a   :  { %11660 = vmatprep.subr.bf16.mxu0 %v11659_v7  ;;  %11916 = vmatprep.subr.bf16.mxu1 %v11915_v41  ;;  %v11685_v7 = vunpack.c.h.s8.bf16 %v6216_v52  ;;  %v11941_v41 = vunpack.c.h.s8.bf16 %v6218_v9  ;;  %v11687_v18 = vunpack.c.l.s8.bf16 %v6225_v56  ;;  %v11943_v6 = vunpack.c.l.s8.bf16 %v6227_v3 }
 0x71b   :  { %v11691_v11 = vunpack.c.h.s8.bf16 %v6225_v56  ;;  %v11947_v17 = vunpack.c.h.s8.bf16 %v6227_v3 }
 0x71d   :  { %11662 = vmatpush1.bf16.msra.mxu0 %v11661_v60  ;;  %11918 = vmatpush1.bf16.msra.mxu1 %v11917_v10  ;;  %v6224_v60 = vld [vmem:[#allocation4 + $0x780] sm:$0xff]  ;;  %v6226_v10 = vld [vmem:[#allocation4 + $0x790] sm:$0xff] }
 0x71e   :  { %11664 = vmatprep.subr.bf16.mxu0 %v11663_v15  ;;  %11920 = vmatprep.subr.bf16.mxu1 %v11919_v33  ;;  %v11689_v15 = vunpack.c.l.s8.bf16 %v6224_v60  ;;  %v11945_v33 = vunpack.c.l.s8.bf16 %v6226_v10 }
 0x721   :  { %11666 = vmatpush1.bf16.msra.mxu0 %v11665_v2  ;;  %11922 = vmatpush1.bf16.msra.mxu1 %v11921_v13  ;;  %v6233_v2 = vld [vmem:[#allocation4 + $0x7c8] sm:$0xff]  ;;  %v6235_v13 = vld [vmem:[#allocation4 + $0x7d8] sm:$0xff] }
 0x722   :  { %11668 = vmatprep.subr.bf16.mxu0 %v11667_v19  ;;  %11924 = vmatprep.subr.bf16.mxu1 %v11923_v29  ;;  %v11693_v19 = vunpack.c.h.s8.bf16 %v6224_v60  ;;  %v11949_v29 = vunpack.c.h.s8.bf16 %v6226_v10  ;;  %v11695_v1 = vunpack.c.l.s8.bf16 %v6233_v2  ;;  %v11951_v25 = vunpack.c.l.s8.bf16 %v6235_v13 }
 0x723   :  { %v11699_v34 = vunpack.c.h.s8.bf16 %v6233_v2  ;;  %v11955_v35 = vunpack.c.h.s8.bf16 %v6235_v13 }
 0x725   :  { %11670 = vmatpush1.bf16.msra.mxu0 %v11669_v22  ;;  %11926 = vmatpush1.bf16.msra.mxu1 %v11925_v23  ;;  %v6232_v22 = vld [vmem:[#allocation4 + $0x7c0] sm:$0xff]  ;;  %v6234_v23 = vld [vmem:[#allocation4 + $0x7d0] sm:$0xff] }
 0x726   :  { %11672 = vmatprep.subr.bf16.mxu0 %v11671_v30  ;;  %11928 = vmatprep.subr.bf16.mxu1 %v11927_v31  ;;  %v11697_v30 = vunpack.c.l.s8.bf16 %v6232_v22  ;;  %v11953_v31 = vunpack.c.l.s8.bf16 %v6234_v23 }
 0x729   :  { %11674 = vmatpush1.bf16.msra.mxu0 %v11673_v36  ;;  %11930 = vmatpush1.bf16.msra.mxu1 %v11929_v8  ;;  %v5989_v36 = vld [vmem:[#allocation4 + $0x28] sm:$0xff]  ;;  %v5991_v8 = vld [vmem:[#allocation4 + $0x38] sm:$0xff] }
 0x72a   :  { %11676 = vmatprep.subr.bf16.mxu0 %v11675_v37  ;;  %11932 = vmatprep.subr.bf16.mxu1 %v11931_v38  ;;  %v11701_v37 = vunpack.c.h.s8.bf16 %v6232_v22  ;;  %v11957_v38 = vunpack.c.h.s8.bf16 %v6234_v23  ;;  %v11959_v39 = vunpack.c.l.s8.bf16 %v5989_v36  ;;  %v12215_v47 = vunpack.c.l.s8.bf16 %v5991_v8 }
 0x72b   :  { %v11963_v52 = vunpack.c.h.s8.bf16 %v5989_v36  ;;  %v12219_v9 = vunpack.c.h.s8.bf16 %v5991_v8  ;;  %v6012_v8 = vld [vmem:[#allocation4 + $0xe0] sm:$0xff] }
 0x72d   :  { %11678 = vmatpush1.bf16.msra.mxu0 %v11677_v5  ;;  %11934 = vmatpush1.bf16.msra.mxu1 %v11933_v48  ;;  %v5988_v5 = vld [vmem:[#allocation4 + $0x20] sm:$0xff]  ;;  %v5990_v48 = vld [vmem:[#allocation4 + $0x30] sm:$0xff] }
 0x72e   :  { %11680 = vmatprep.subr.bf16.mxu0 %v11679_v50  ;;  %11936 = vmatprep.subr.bf16.mxu1 %v11935_v51  ;;  %v11961_v50 = vunpack.c.l.s8.bf16 %v5988_v5  ;;  %v12217_v51 = vunpack.c.l.s8.bf16 %v5990_v48 }
 0x731   :  { %11682 = vmatpush1.bf16.msra.mxu0 %v11681_v54  ;;  %11938 = vmatpush1.bf16.msra.mxu1 %v11937_v55  ;;  %v5997_v54 = vld [vmem:[#allocation4 + $0x68] sm:$0xff]  ;;  %v5999_v55 = vld [vmem:[#allocation4 + $0x78] sm:$0xff] }
 0x732   :  { %11684 = vmatprep.subr.bf16.mxu0 %v11683_v12  ;;  %11940 = vmatprep.subr.bf16.mxu1 %v11939_v32  ;;  %v11965_v12 = vunpack.c.h.s8.bf16 %v5988_v5  ;;  %v12221_v32 = vunpack.c.h.s8.bf16 %v5990_v48  ;;  %v11967_v56 = vunpack.c.l.s8.bf16 %v5997_v54  ;;  %v12223_v3 = vunpack.c.l.s8.bf16 %v5999_v55  ;;  %v6021_v48 = vld [vmem:[#allocation4 + $0x128] sm:$0xff] }
 0x733   :  { %v11971_v60 = vunpack.c.h.s8.bf16 %v5997_v54  ;;  %v12227_v10 = vunpack.c.h.s8.bf16 %v5999_v55  ;;  %v6020_v55 = vld [vmem:[#allocation4 + $0x120] sm:$0xff] }
 0x735   :  { %11686 = vmatpush1.bf16.msra.mxu0 %v11685_v7  ;;  %11942 = vmatpush1.bf16.msra.mxu1 %v11941_v41  ;;  %v5996_v7 = vld [vmem:[#allocation4 + $0x60] sm:$0xff]  ;;  %v5998_v41 = vld [vmem:[#allocation4 + $0x70] sm:$0xff] }
 0x736   :  { %11688 = vmatprep.subr.bf16.mxu0 %v11687_v18  ;;  %11944 = vmatprep.subr.bf16.mxu1 %v11943_v6  ;;  %v11969_v18 = vunpack.c.l.s8.bf16 %v5996_v7  ;;  %v12225_v6 = vunpack.c.l.s8.bf16 %v5998_v41 }
 0x739   :  { %11690 = vmatpush1.bf16.msra.mxu0 %v11689_v15  ;;  %11946 = vmatpush1.bf16.msra.mxu1 %v11945_v33  ;;  %v6005_v15 = vld [vmem:[#allocation4 + $0xa8] sm:$0xff]  ;;  %v6007_v33 = vld [vmem:[#allocation4 + $0xb8] sm:$0xff] }
 0x73a   :  { %11692 = vmatprep.subr.bf16.mxu0 %v11691_v11  ;;  %11948 = vmatprep.subr.bf16.mxu1 %v11947_v17  ;;  %v11973_v11 = vunpack.c.h.s8.bf16 %v5996_v7  ;;  %v12229_v17 = vunpack.c.h.s8.bf16 %v5998_v41  ;;  %v11975_v2 = vunpack.c.l.s8.bf16 %v6005_v15  ;;  %v12231_v13 = vunpack.c.l.s8.bf16 %v6007_v33  ;;  %v6029_v41 = vld [vmem:[#allocation4 + $0x168] sm:$0xff] }
 0x73b   :  { %v11979_v22 = vunpack.c.h.s8.bf16 %v6005_v15  ;;  %v12235_v23 = vunpack.c.h.s8.bf16 %v6007_v33  ;;  %v6028_v33 = vld [vmem:[#allocation4 + $0x160] sm:$0xff] }
 0x73d   :  { %11694 = vmatpush1.bf16.msra.mxu0 %v11693_v19  ;;  %11950 = vmatpush1.bf16.msra.mxu1 %v11949_v29  ;;  %v6004_v19 = vld [vmem:[#allocation4 + $0xa0] sm:$0xff]  ;;  %v6006_v29 = vld [vmem:[#allocation4 + $0xb0] sm:$0xff] }
 0x73e   :  { %11696 = vmatprep.subr.bf16.mxu0 %v11695_v1  ;;  %11952 = vmatprep.subr.bf16.mxu1 %v11951_v25  ;;  %v11977_v1 = vunpack.c.l.s8.bf16 %v6004_v19  ;;  %v12233_v25 = vunpack.c.l.s8.bf16 %v6006_v29 }
 0x741   :  { %11698 = vmatpush1.bf16.msra.mxu0 %v11697_v30  ;;  %11954 = vmatpush1.bf16.msra.mxu1 %v11953_v31  ;;  %v6013_v30 = vld [vmem:[#allocation4 + $0xe8] sm:$0xff]  ;;  %v11981_v31 = vunpack.c.h.s8.bf16 %v6004_v19 }
 0x742   :  { %11700 = vmatprep.subr.bf16.mxu0 %v11699_v34  ;;  %11956 = vmatprep.subr.bf16.mxu1 %v11955_v35  ;;  %v12237_v34 = vunpack.c.h.s8.bf16 %v6006_v29  ;;  %v11983_v35 = vunpack.c.l.s8.bf16 %v6013_v30  ;;  %v6037_v29 = vld [vmem:[#allocation4 + $0x1a8] sm:$0xff] }
 0x745   :  { %11702 = vmatpush1.bf16.msra.mxu0 %v11701_v37  ;;  %11958 = vmatpush1.bf16.msra.mxu1 %v11957_v38  ;;  %v6014_v37 = vld [vmem:[#allocation4 + $0xf0] sm:$0xff]  ;;  %v11985_v38 = vunpack.c.l.s8.bf16 %v6012_v8 }
 0x746   :  { %11960 = vmatprep.subr.bf16.mxu0 %v11959_v39  ;;  %12216 = vmatprep.subr.bf16.mxu1 %v12215_v47  ;;  %v12241_v39 = vunpack.c.l.s8.bf16 %v6014_v37  ;;  %v11987_v47 = vunpack.c.h.s8.bf16 %v6013_v30 }
 0x748   :  { %8584 = vmatmul.mubr.f32.vlgmr.msra.gmra.mrb[18].mxu0 %v13410_v49  ;;  %8892 = vmatmul.mubr.f32.vlgmr.msra.gmra.mrb[18].mxu1 %v13410_v49 }
 0x749   :  { %11962 = vmatpush1.bf16.msra.mxu0 %v11961_v50  ;;  %12218 = vmatpush1.bf16.msra.mxu1 %v12217_v51  ;;  %v6023_v50 = vld [vmem:[#allocation4 + $0x138] sm:$0xff]  ;;  %v11989_v51 = vunpack.c.h.s8.bf16 %v6012_v8 }
 0x74a   :  { %8589 = vmatprep.mubr.f32.mxu0 %v13422_v0  ;;  %8897 = vmatprep.mubr.f32.mxu1 %v13422_v0  ;;  %v12247_v54 = vunpack.c.l.s8.bf16 %v6023_v50  ;;  %v12251_v7 = vunpack.c.h.s8.bf16 %v6023_v50  ;;  %v6044_v50 = vld [vmem:[#allocation4 + $0x1e0] sm:$0xff] }
 0x74b   :  { %11964 = vmatprep.subr.bf16.mxu0 %v11963_v52  ;;  %12220 = vmatprep.subr.bf16.mxu1 %v12219_v9  ;;  %v12245_v52 = vunpack.c.h.s8.bf16 %v6014_v37  ;;  %v11991_v9 = vunpack.c.l.s8.bf16 %v6021_v48  ;;  %v6045_v37 = vld [vmem:[#allocation4 + $0x1e8] sm:$0xff] }
 0x74c   :  { %8590 = vmatmul.mubr.f32.gmra.mrb[20].mxu0 %v13418_v40  ;;  %8898 = vmatmul.mubr.f32.gmra.mrb[20].mxu1 %v13418_v40 }
 0x74d   :  { %11966 = vmatpush1.bf16.msra.mxu0 %v11965_v12  ;;  %12222 = vmatpush1.bf16.msra.mxu1 %v12221_v32  ;;  %v6022_v12 = vld [vmem:[#allocation4 + $0x130] sm:$0xff]  ;;  %v11993_v32 = vunpack.c.l.s8.bf16 %v6020_v55 }
 0x74e   :  { %11968 = vmatprep.subr.bf16.mxu0 %v11967_v56  ;;  %12224 = vmatprep.subr.bf16.mxu1 %v12223_v3  ;;  %v12249_v56 = vunpack.c.l.s8.bf16 %v6022_v12  ;;  %v11995_v3 = vunpack.c.h.s8.bf16 %v6021_v48 }
 0x74f   :  { %8968 = vmatprep.mubr.f32.mxu0 %v13374_v57  ;;  %9276 = vmatprep.mubr.f32.mxu1 %v13374_v57  ;;  %v6015_v57 = vld [vmem:[#allocation4 + $0xf8] sm:$0xff] }
 0x750   :  { %v12239_v36 = vunpack.c.l.s8.bf16 %v6015_v57  ;;  %v12243_v5 = vunpack.c.h.s8.bf16 %v6015_v57  ;;  %v6036_v57 = vld [vmem:[#allocation4 + $0x1a0] sm:$0xff] }
 0x751   :  { %11970 = vmatpush1.bf16.msra.mxu0 %v11969_v18  ;;  %12226 = vmatpush1.bf16.msra.mxu1 %v12225_v6  ;;  %v6031_v18 = vld [vmem:[#allocation4 + $0x178] sm:$0xff]  ;;  %v11997_v6 = vunpack.c.h.s8.bf16 %v6020_v55 }
 0x752   :  { %11972 = vmatprep.subr.bf16.mxu0 %v11971_v60  ;;  %12228 = vmatprep.subr.bf16.mxu1 %v12227_v10  ;;  %v12253_v60 = vunpack.c.h.s8.bf16 %v6022_v12  ;;  %v11999_v10 = vunpack.c.l.s8.bf16 %v6029_v41  ;;  %v12255_v15 = vunpack.c.l.s8.bf16 %v6031_v18  ;;  %v12259_v19 = vunpack.c.h.s8.bf16 %v6031_v18  ;;  %v6053_v12 = vld [vmem:[#allocation4 + $0x228] sm:$0xff]  ;;  %v6052_v18 = vld [vmem:[#allocation4 + $0x220] sm:$0xff] }
 0x755   :  { %11974 = vmatpush1.bf16.msra.mxu0 %v11973_v11  ;;  %12230 = vmatpush1.bf16.msra.mxu1 %v12229_v17  ;;  %v6030_v11 = vld [vmem:[#allocation4 + $0x170] sm:$0xff]  ;;  %v12001_v17 = vunpack.c.l.s8.bf16 %v6028_v33 }
 0x756   :  { %11976 = vmatprep.subr.bf16.mxu0 %v11975_v2  ;;  %12232 = vmatprep.subr.bf16.mxu1 %v12231_v13  ;;  %v12257_v2 = vunpack.c.l.s8.bf16 %v6030_v11  ;;  %v12003_v13 = vunpack.c.h.s8.bf16 %v6029_v41 }
 0x759   :  { %11978 = vmatpush1.bf16.msra.mxu0 %v11977_v1  ;;  %12234 = vmatpush1.bf16.msra.mxu1 %v12233_v25  ;;  %v6039_v1 = vld [vmem:[#allocation4 + $0x1b8] sm:$0xff]  ;;  %v12005_v25 = vunpack.c.h.s8.bf16 %v6028_v33 }
 0x75a   :  { %11980 = vmatprep.subr.bf16.mxu0 %v11979_v22  ;;  %12236 = vmatprep.subr.bf16.mxu1 %v12235_v23  ;;  %v12261_v22 = vunpack.c.h.s8.bf16 %v6030_v11  ;;  %v12007_v23 = vunpack.c.l.s8.bf16 %v6037_v29  ;;  %v12263_v30 = vunpack.c.l.s8.bf16 %v6039_v1  ;;  %v12267_v8 = vunpack.c.h.s8.bf16 %v6039_v1  ;;  %v6061_v11 = vld [vmem:[#allocation4 + $0x268] sm:$0xff]  ;;  %v6060_v1 = vld [vmem:[#allocation4 + $0x260] sm:$0xff] }
 0x75d   :  { %11982 = vmatpush1.bf16.msra.mxu0 %v11981_v31  ;;  %12238 = vmatpush1.bf16.msra.mxu1 %v12237_v34  ;;  %v6038_v31 = vld [vmem:[#allocation4 + $0x1b0] sm:$0xff]  ;;  %v12009_v34 = vunpack.c.l.s8.bf16 %v6036_v57 }
 0x75e   :  { %11984 = vmatprep.subr.bf16.mxu0 %v11983_v35  ;;  %12240 = vmatprep.subr.bf16.mxu1 %v12239_v36  ;;  %v12265_v35 = vunpack.c.l.s8.bf16 %v6038_v31  ;;  %v12011_v36 = vunpack.c.h.s8.bf16 %v6037_v29 }
 0x761   :  { %11986 = vmatpush1.bf16.msra.mxu0 %v11985_v38  ;;  %12242 = vmatpush1.bf16.msra.mxu1 %v12241_v39  ;;  %v6047_v38 = vld [vmem:[#allocation4 + $0x1f8] sm:$0xff]  ;;  %v12013_v39 = vunpack.c.h.s8.bf16 %v6036_v57  ;;  %v6069_v57 = vld [vmem:[#allocation4 + $0x2a8] sm:$0xff] }
 0x762   :  { %11988 = vmatprep.subr.bf16.mxu0 %v11987_v47  ;;  %12244 = vmatprep.subr.bf16.mxu1 %v12243_v5  ;;  %v12269_v47 = vunpack.c.h.s8.bf16 %v6038_v31  ;;  %v12015_v5 = vunpack.c.l.s8.bf16 %v6045_v37  ;;  %v12271_v48 = vunpack.c.l.s8.bf16 %v6047_v38  ;;  %v12275_v55 = vunpack.c.h.s8.bf16 %v6047_v38  ;;  %v6071_v31 = vld [vmem:[#allocation4 + $0x2b8] sm:$0xff] }
 0x765   :  { %11990 = vmatpush1.bf16.msra.mxu0 %v11989_v51  ;;  %12246 = vmatpush1.bf16.msra.mxu1 %v12245_v52  ;;  %v6046_v51 = vld [vmem:[#allocation4 + $0x1f0] sm:$0xff]  ;;  %v12017_v52 = vunpack.c.l.s8.bf16 %v6044_v50 }
 0x766   :  { %11992 = vmatprep.subr.bf16.mxu0 %v11991_v9  ;;  %12248 = vmatprep.subr.bf16.mxu1 %v12247_v54  ;;  %v12273_v9 = vunpack.c.l.s8.bf16 %v6046_v51  ;;  %v12019_v54 = vunpack.c.h.s8.bf16 %v6045_v37 }
 0x769   :  { %11994 = vmatpush1.bf16.msra.mxu0 %v11993_v32  ;;  %12250 = vmatpush1.bf16.msra.mxu1 %v12249_v56  ;;  %v6055_v32 = vld [vmem:[#allocation4 + $0x238] sm:$0xff]  ;;  %v12021_v56 = vunpack.c.h.s8.bf16 %v6044_v50 }
 0x76a   :  { %11996 = vmatprep.subr.bf16.mxu0 %v11995_v3  ;;  %12252 = vmatprep.subr.bf16.mxu1 %v12251_v7  ;;  %v12277_v3 = vunpack.c.h.s8.bf16 %v6046_v51  ;;  %v12023_v7 = vunpack.c.l.s8.bf16 %v6053_v12  ;;  %v12279_v41 = vunpack.c.l.s8.bf16 %v6055_v32  ;;  %v12283_v33 = vunpack.c.h.s8.bf16 %v6055_v32 }
 0x76d   :  { %11998 = vmatpush1.bf16.msra.mxu0 %v11997_v6  ;;  %12254 = vmatpush1.bf16.msra.mxu1 %v12253_v60  ;;  %v6054_v6 = vld [vmem:[#allocation4 + $0x230] sm:$0xff]  ;;  %v12025_v60 = vunpack.c.l.s8.bf16 %v6052_v18 }
 0x76e   :  { %12000 = vmatprep.subr.bf16.mxu0 %v11999_v10  ;;  %12256 = vmatprep.subr.bf16.mxu1 %v12255_v15  ;;  %v12281_v10 = vunpack.c.l.s8.bf16 %v6054_v6  ;;  %v12027_v15 = vunpack.c.h.s8.bf16 %v6053_v12 }
 0x771   :  { %12002 = vmatpush1.bf16.msra.mxu0 %v12001_v17  ;;  %12258 = vmatpush1.bf16.msra.mxu1 %v12257_v2  ;;  %v6063_v17 = vld [vmem:[#allocation4 + $0x278] sm:$0xff]  ;;  %v12029_v2 = vunpack.c.h.s8.bf16 %v6052_v18 }
 0x772   :  { %12004 = vmatprep.subr.bf16.mxu0 %v12003_v13  ;;  %12260 = vmatprep.subr.bf16.mxu1 %v12259_v19  ;;  %v12285_v13 = vunpack.c.h.s8.bf16 %v6054_v6  ;;  %v12031_v19 = vunpack.c.l.s8.bf16 %v6061_v11  ;;  %v12287_v29 = vunpack.c.l.s8.bf16 %v6063_v17 }
 0x775   :  { %12006 = vmatpush1.bf16.msra.mxu0 %v12005_v25  ;;  %12262 = vmatpush1.bf16.msra.mxu1 %v12261_v22  ;;  %v6062_v25 = vld [vmem:[#allocation4 + $0x270] sm:$0xff] }
 0x776   :  { %12008 = vmatprep.subr.bf16.mxu0 %v12007_v23  ;;  %12264 = vmatprep.subr.bf16.mxu1 %v12263_v30  ;;  %v12289_v22 = vunpack.c.l.s8.bf16 %v6062_v25  ;;  %v12035_v23 = vunpack.c.h.s8.bf16 %v6061_v11  ;;  %v12291_v30 = vunpack.c.h.s8.bf16 %v6063_v17 }
 0x779   :  { %12010 = vmatpush1.bf16.msra.mxu0 %v12009_v34  ;;  %12266 = vmatpush1.bf16.msra.mxu1 %v12265_v35  ;;  %v12293_v34 = vunpack.c.h.s8.bf16 %v6062_v25  ;;  %v12295_v35 = vunpack.c.l.s8.bf16 %v6071_v31 }
 0x77a   :  { %12012 = vmatprep.subr.bf16.mxu0 %v12011_v36  ;;  %12268 = vmatprep.subr.bf16.mxu1 %v12267_v8  ;;  %v6068_v36 = vld [vmem:[#allocation4 + $0x2a0] sm:$0xff]  ;;  %v6070_v8 = vld [vmem:[#allocation4 + $0x2b0] sm:$0xff] }
 0x77b   :  { %v12041_v37 = vunpack.c.l.s8.bf16 %v6068_v36  ;;  %v12297_v38 = vunpack.c.l.s8.bf16 %v6070_v8  ;;  %v12301_v50 = vunpack.c.h.s8.bf16 %v6070_v8 }
 0x77d   :  { %12014 = vmatpush1.bf16.msra.mxu0 %v12013_v39  ;;  %12270 = vmatpush1.bf16.msra.mxu1 %v12269_v47  ;;  %v12043_v39 = vunpack.c.h.s8.bf16 %v6069_v57  ;;  %v12299_v47 = vunpack.c.h.s8.bf16 %v6071_v31 }
 0x77e   :  { %12016 = vmatprep.subr.bf16.mxu0 %v12015_v5  ;;  %12272 = vmatprep.subr.bf16.mxu1 %v12271_v48  ;;  %v6077_v5 = vld [vmem:[#allocation4 + $0x2e8] sm:$0xff]  ;;  %v12045_v48 = vunpack.c.h.s8.bf16 %v6068_v36 }
 0x77f   :  { %v12047_v51 = vunpack.c.l.s8.bf16 %v6077_v5  ;;  %v12051_v32 = vunpack.c.h.s8.bf16 %v6077_v5 }
 0x781   :  { %12018 = vmatpush1.bf16.msra.mxu0 %v12017_v52  ;;  %12274 = vmatpush1.bf16.msra.mxu1 %v12273_v9  ;;  %v6076_v9 = vld [vmem:[#allocation4 + $0x2e0] sm:$0xff] }
 0x782   :  { %12020 = vmatprep.subr.bf16.mxu0 %v12019_v54  ;;  %12276 = vmatprep.subr.bf16.mxu1 %v12275_v55  ;;  %v6078_v54 = vld [vmem:[#allocation4 + $0x2f0] sm:$0xff]  ;;  %v12049_v55 = vunpack.c.l.s8.bf16 %v6076_v9 }
 0x783   :  { %v12305_v12 = vunpack.c.l.s8.bf16 %v6078_v54  ;;  %v12309_v18 = vunpack.c.h.s8.bf16 %v6078_v54 }
 0x785   :  { %12022 = vmatpush1.bf16.msra.mxu0 %v12021_v56  ;;  %12278 = vmatpush1.bf16.msra.mxu1 %v12277_v3  ;;  %v6085_v3 = vld [vmem:[#allocation4 + $0x328] sm:$0xff] }
 0x786   :  { %12024 = vmatprep.subr.bf16.mxu0 %v12023_v7  ;;  %12280 = vmatprep.subr.bf16.mxu1 %v12279_v41  ;;  %v6087_v7 = vld [vmem:[#allocation4 + $0x338] sm:$0xff]  ;;  %v12053_v41 = vunpack.c.h.s8.bf16 %v6076_v9  ;;  %v12055_v6 = vunpack.c.l.s8.bf16 %v6085_v3  ;;  %v12059_v17 = vunpack.c.h.s8.bf16 %v6085_v3 }
 0x788   :  { %8969 = vmatmul.mubr.f32.vlgmr.msra.gmra.mrb[22].mxu0 %v13370_v27  ;;  %9277 = vmatmul.mubr.f32.vlgmr.msra.gmra.mrb[22].mxu1 %v13370_v27  ;;  %v12033_v27 = vunpack.c.l.s8.bf16 %v6060_v1 }
 0x789   :  { %12026 = vmatpush1.bf16.msra.mxu0 %v12025_v60  ;;  %12282 = vmatpush1.bf16.msra.mxu1 %v12281_v10  ;;  %v12311_v60 = vunpack.c.l.s8.bf16 %v6087_v7  ;;  %v6084_v10 = vld [vmem:[#allocation4 + $0x320] sm:$0xff] }
 0x78a   :  { %12028 = vmatprep.subr.bf16.mxu0 %v12027_v15  ;;  %12284 = vmatprep.subr.bf16.mxu1 %v12283_v33  ;;  %v6086_v15 = vld [vmem:[#allocation4 + $0x330] sm:$0xff]  ;;  %v12057_v33 = vunpack.c.l.s8.bf16 %v6084_v10 }
 0x78b   :  { %8974 = vmatprep.mubr.f32.mxu0 %v13382_v21  ;;  %9282 = vmatprep.mubr.f32.mxu1 %v13382_v21  ;;  %v12037_v21 = vunpack.c.h.s8.bf16 %v6060_v1  ;;  %v12313_v11 = vunpack.c.l.s8.bf16 %v6086_v15  ;;  %v12317_v1 = vunpack.c.h.s8.bf16 %v6086_v15 }
 0x78c   :  { %8975 = vmatmul.mubr.f32.gmra.mrb[24].mxu0 %v13378_v16  ;;  %9283 = vmatmul.mubr.f32.gmra.mrb[24].mxu1 %v13378_v16  ;;  %v12039_v16 = vunpack.c.l.s8.bf16 %v6069_v57 }
 0x78d   :  { %12030 = vmatpush1.bf16.msra.mxu0 %v12029_v2  ;;  %12286 = vmatpush1.bf16.msra.mxu1 %v12285_v13  ;;  %v12315_v2 = vunpack.c.h.s8.bf16 %v6087_v7  ;;  %v6093_v13 = vld [vmem:[#allocation4 + $0x368] sm:$0xff] }
 0x78e   :  { %12032 = vmatprep.subr.bf16.mxu0 %v12031_v19  ;;  %12288 = vmatprep.subr.bf16.mxu1 %v12287_v29  ;;  %v6095_v19 = vld [vmem:[#allocation4 + $0x378] sm:$0xff]  ;;  %v12061_v29 = vunpack.c.h.s8.bf16 %v6084_v10  ;;  %v12063_v25 = vunpack.c.l.s8.bf16 %v6093_v13  ;;  %v12067_v31 = vunpack.c.h.s8.bf16 %v6093_v13 }
 0x78f   :  { %9045 = vmatprep.mubr.f32.mxu0 %v13376_v63  ;;  %9353 = vmatprep.mubr.f32.mxu1 %v13376_v63  ;;  %v6079_v63 = vld [vmem:[#allocation4 + $0x2f8] sm:$0xff] }
 0x790   :  { %v12303_v52 = vunpack.c.l.s8.bf16 %v6079_v63  ;;  %v12307_v56 = vunpack.c.h.s8.bf16 %v6079_v63 }
 0x791   :  { %12034 = vmatpush1.bf16.msra.mxu0 %v12033_v27  ;;  %12290 = vmatpush1.bf16.msra.mxu1 %v12289_v22  ;;  %v12319_v27 = vunpack.c.l.s8.bf16 %v6095_v19  ;;  %v6092_v22 = vld [vmem:[#allocation4 + $0x360] sm:$0xff] }
 0x792   :  { %12036 = vmatprep.subr.bf16.mxu0 %v12035_v23  ;;  %12292 = vmatprep.subr.bf16.mxu1 %v12291_v30  ;;  %v6094_v23 = vld [vmem:[#allocation4 + $0x370] sm:$0xff]  ;;  %v12065_v30 = vunpack.c.l.s8.bf16 %v6092_v22 }
 0x793   :  { %v12321_v57 = vunpack.c.l.s8.bf16 %v6094_v23  ;;  %v12325_v36 = vunpack.c.h.s8.bf16 %v6094_v23 }
 0x795   :  { %12038 = vmatpush1.bf16.msra.mxu0 %v12037_v21  ;;  %12294 = vmatpush1.bf16.msra.mxu1 %v12293_v34  ;;  %v12323_v21 = vunpack.c.h.s8.bf16 %v6095_v19  ;;  %v6101_v34 = vld [vmem:[#allocation4 + $0x3a8] sm:$0xff] }
 0x796   :  { %12040 = vmatprep.subr.bf16.mxu0 %v12039_v16  ;;  %12296 = vmatprep.subr.bf16.mxu1 %v12295_v35  ;;  %v6103_v16 = vld [vmem:[#allocation4 + $0x3b8] sm:$0xff]  ;;  %v12069_v35 = vunpack.c.h.s8.bf16 %v6092_v22  ;;  %v12071_v8 = vunpack.c.l.s8.bf16 %v6101_v34  ;;  %v12075_v63 = vunpack.c.h.s8.bf16 %v6101_v34 }
 0x799   :  { %12042 = vmatpush1.bf16.msra.mxu0 %v12041_v37  ;;  %12298 = vmatpush1.bf16.msra.mxu1 %v12297_v38  ;;  %v12327_v37 = vunpack.c.l.s8.bf16 %v6103_v16  ;;  %v6100_v38 = vld [vmem:[#allocation4 + $0x3a0] sm:$0xff] }
 0x79a   :  { %12044 = vmatprep.subr.bf16.mxu0 %v12043_v39  ;;  %12300 = vmatprep.subr.bf16.mxu1 %v12299_v47  ;;  %v6102_v39 = vld [vmem:[#allocation4 + $0x3b0] sm:$0xff]  ;;  %v12073_v47 = vunpack.c.l.s8.bf16 %v6100_v38 }
 0x79b   :  { %v12329_v5 = vunpack.c.l.s8.bf16 %v6102_v39  ;;  %v12333_v9 = vunpack.c.h.s8.bf16 %v6102_v39  ;;  %v6134_v39 = vld [vmem:[#allocation4 + $0x4b0] sm:$0xff] }
 0x79d   :  { %12046 = vmatpush1.bf16.msra.mxu0 %v12045_v48  ;;  %12302 = vmatpush1.bf16.msra.mxu1 %v12301_v50  ;;  %v12331_v48 = vunpack.c.h.s8.bf16 %v6103_v16  ;;  %v6109_v50 = vld [vmem:[#allocation4 + $0x3e8] sm:$0xff] }
 0x79e   :  { %12048 = vmatprep.subr.bf16.mxu0 %v12047_v51  ;;  %12304 = vmatprep.subr.bf16.mxu1 %v12303_v52  ;;  %v6111_v51 = vld [vmem:[#allocation4 + $0x3f8] sm:$0xff]  ;;  %v12077_v52 = vunpack.c.h.s8.bf16 %v6100_v38  ;;  %v12079_v54 = vunpack.c.l.s8.bf16 %v6109_v50  ;;  %v12083_v7 = vunpack.c.h.s8.bf16 %v6109_v50  ;;  %v6132_v38 = vld [vmem:[#allocation4 + $0x4a0] sm:$0xff]  ;;  %v6141_v50 = vld [vmem:[#allocation4 + $0x4e8] sm:$0xff] }
 0x7a1   :  { %12050 = vmatpush1.bf16.msra.mxu0 %v12049_v55  ;;  %12306 = vmatpush1.bf16.msra.mxu1 %v12305_v12  ;;  %v12335_v55 = vunpack.c.l.s8.bf16 %v6111_v51  ;;  %v6108_v12 = vld [vmem:[#allocation4 + $0x3e0] sm:$0xff] }
 0x7a2   :  { %12052 = vmatprep.subr.bf16.mxu0 %v12051_v32  ;;  %12308 = vmatprep.subr.bf16.mxu1 %v12307_v56  ;;  %v6110_v32 = vld [vmem:[#allocation4 + $0x3f0] sm:$0xff]  ;;  %v12081_v56 = vunpack.c.l.s8.bf16 %v6108_v12 }
 0x7a3   :  { %v12337_v3 = vunpack.c.l.s8.bf16 %v6110_v32  ;;  %v12341_v10 = vunpack.c.h.s8.bf16 %v6110_v32 }
 0x7a5   :  { %12054 = vmatpush1.bf16.msra.mxu0 %v12053_v41  ;;  %12310 = vmatpush1.bf16.msra.mxu1 %v12309_v18  ;;  %v12339_v41 = vunpack.c.h.s8.bf16 %v6111_v51  ;;  %v6117_v18 = vld [vmem:[#allocation4 + $0x428] sm:$0xff]  ;;  %v12109_v51 = vunpack.c.h.s8.bf16 %v6132_v38 }
 0x7a6   :  { %12056 = vmatprep.subr.bf16.mxu0 %v12055_v6  ;;  %12312 = vmatprep.subr.bf16.mxu1 %v12311_v60  ;;  %v6119_v6 = vld [vmem:[#allocation4 + $0x438] sm:$0xff]  ;;  %v12085_v60 = vunpack.c.h.s8.bf16 %v6108_v12  ;;  %v12087_v15 = vunpack.c.l.s8.bf16 %v6117_v18  ;;  %v12091_v19 = vunpack.c.h.s8.bf16 %v6117_v18  ;;  %v6142_v12 = vld [vmem:[#allocation4 + $0x4f0] sm:$0xff] }
 0x7a7   :  { %v6151_v18 = vld [vmem:[#allocation4 + $0x538] sm:$0xff] }
 0x7a9   :  { %12058 = vmatpush1.bf16.msra.mxu0 %v12057_v33  ;;  %12314 = vmatpush1.bf16.msra.mxu1 %v12313_v11  ;;  %v12343_v33 = vunpack.c.l.s8.bf16 %v6119_v6  ;;  %v6116_v11 = vld [vmem:[#allocation4 + $0x420] sm:$0xff] }
 0x7aa   :  { %12060 = vmatprep.subr.bf16.mxu0 %v12059_v17  ;;  %12316 = vmatprep.subr.bf16.mxu1 %v12315_v2  ;;  %v6118_v17 = vld [vmem:[#allocation4 + $0x430] sm:$0xff]  ;;  %v12089_v2 = vunpack.c.l.s8.bf16 %v6116_v11 }
 0x7ab   :  { %v12345_v13 = vunpack.c.l.s8.bf16 %v6118_v17  ;;  %v12349_v22 = vunpack.c.h.s8.bf16 %v6118_v17 }
 0x7ad   :  { %12062 = vmatpush1.bf16.msra.mxu0 %v12061_v29  ;;  %12318 = vmatpush1.bf16.msra.mxu1 %v12317_v1  ;;  %v12347_v29 = vunpack.c.h.s8.bf16 %v6119_v6  ;;  %v6125_v1 = vld [vmem:[#allocation4 + $0x468] sm:$0xff] }
 0x7ae   :  { %12064 = vmatprep.subr.bf16.mxu0 %v12063_v25  ;;  %12320 = vmatprep.subr.bf16.mxu1 %v12319_v27  ;;  %v6127_v25 = vld [vmem:[#allocation4 + $0x478] sm:$0xff]  ;;  %v12093_v27 = vunpack.c.h.s8.bf16 %v6116_v11  ;;  %v12095_v23 = vunpack.c.l.s8.bf16 %v6125_v1  ;;  %v12099_v34 = vunpack.c.h.s8.bf16 %v6125_v1  ;;  %v6150_v11 = vld [vmem:[#allocation4 + $0x530] sm:$0xff] }
 0x7af   :  { %v12355_v16 = vunpack.c.h.s8.bf16 %v6127_v25  ;;  %v6159_v1 = vld [vmem:[#allocation4 + $0x578] sm:$0xff] }
 0x7b1   :  { %12066 = vmatpush1.bf16.msra.mxu0 %v12065_v30  ;;  %12322 = vmatpush1.bf16.msra.mxu1 %v12321_v57  ;;  %v12351_v30 = vunpack.c.l.s8.bf16 %v6127_v25  ;;  %v6124_v57 = vld [vmem:[#allocation4 + $0x460] sm:$0xff] }
 0x7b2   :  { %12068 = vmatprep.subr.bf16.mxu0 %v12067_v31  ;;  %12324 = vmatprep.subr.bf16.mxu1 %v12323_v21  ;;  %v6126_v31 = vld [vmem:[#allocation4 + $0x470] sm:$0xff] }
 0x7b3   :  { %v12353_v21 = vunpack.c.l.s8.bf16 %v6126_v31 }
 0x7b5   :  { %12070 = vmatpush1.bf16.msra.mxu0 %v12069_v35  ;;  %12326 = vmatpush1.bf16.msra.mxu1 %v12325_v36  ;;  %v6133_v35 = vld [vmem:[#allocation4 + $0x4a8] sm:$0xff]  ;;  %v6135_v36 = vld [vmem:[#allocation4 + $0x4b8] sm:$0xff] }
 0x7b6   :  { %12072 = vmatprep.subr.bf16.mxu0 %v12071_v8  ;;  %12328 = vmatprep.subr.bf16.mxu1 %v12327_v37  ;;  %v12357_v8 = vunpack.c.h.s8.bf16 %v6126_v31  ;;  %v12359_v37 = vunpack.c.l.s8.bf16 %v6135_v36 }
 0x7b9   :  { %12074 = vmatpush1.bf16.msra.mxu0 %v12073_v47  ;;  %12330 = vmatpush1.bf16.msra.mxu1 %v12329_v5  ;;  %v12105_v47 = vunpack.c.l.s8.bf16 %v6132_v38  ;;  %v12361_v5 = vunpack.c.l.s8.bf16 %v6134_v39  ;;  %v6166_v38 = vld [vmem:[#allocation4 + $0x5b0] sm:$0xff] }
 0x7ba   :  { %12076 = vmatprep.subr.bf16.mxu0 %v12075_v63  ;;  %12332 = vmatprep.subr.bf16.mxu1 %v12331_v48  ;;  %v12107_v63 = vunpack.c.h.s8.bf16 %v6133_v35  ;;  %v12363_v48 = vunpack.c.h.s8.bf16 %v6135_v36 }
 0x7bd   :  { %12078 = vmatpush1.bf16.msra.mxu0 %v12077_v52  ;;  %12334 = vmatpush1.bf16.msra.mxu1 %v12333_v9  ;;  %v12365_v52 = vunpack.c.h.s8.bf16 %v6134_v39  ;;  %v12111_v9 = vunpack.c.l.s8.bf16 %v6141_v50 }
 0x7be   :  { %12080 = vmatprep.subr.bf16.mxu0 %v12079_v54  ;;  %12336 = vmatprep.subr.bf16.mxu1 %v12335_v55  ;;  %v6140_v55 = vld [vmem:[#allocation4 + $0x4e0] sm:$0xff] }
 0x7bf   :  { %v12113_v32 = vunpack.c.l.s8.bf16 %v6140_v55  ;;  %v12117_v6 = vunpack.c.h.s8.bf16 %v6140_v55  ;;  %v6174_v55 = vld [vmem:[#allocation4 + $0x5f0] sm:$0xff] }
 0x7c1   :  { %12082 = vmatpush1.bf16.msra.mxu0 %v12081_v56  ;;  %12338 = vmatpush1.bf16.msra.mxu1 %v12337_v3  ;;  %v12369_v56 = vunpack.c.l.s8.bf16 %v6142_v12  ;;  %v12115_v3 = vunpack.c.h.s8.bf16 %v6141_v50  ;;  %v6175_v50 = vld [vmem:[#allocation4 + $0x5f8] sm:$0xff] }
 0x7c2   :  { %12084 = vmatprep.subr.bf16.mxu0 %v12083_v7  ;;  %12340 = vmatprep.subr.bf16.mxu1 %v12339_v41  ;;  %v6149_v41 = vld [vmem:[#allocation4 + $0x528] sm:$0xff] }
 0x7c5   :  { %12086 = vmatpush1.bf16.msra.mxu0 %v12085_v60  ;;  %12342 = vmatpush1.bf16.msra.mxu1 %v12341_v10  ;;  %v12373_v60 = vunpack.c.h.s8.bf16 %v6142_v12  ;;  %v12119_v10 = vunpack.c.l.s8.bf16 %v6149_v41 }
 0x7c6   :  { %12088 = vmatprep.subr.bf16.mxu0 %v12087_v15  ;;  %12344 = vmatprep.subr.bf16.mxu1 %v12343_v33  ;;  %v12375_v15 = vunpack.c.l.s8.bf16 %v6151_v18  ;;  %v6148_v33 = vld [vmem:[#allocation4 + $0x520] sm:$0xff] }
 0x7c7   :  { %v12121_v17 = vunpack.c.l.s8.bf16 %v6148_v33  ;;  %v12125_v25 = vunpack.c.h.s8.bf16 %v6148_v33  ;;  %v6182_v33 = vld [vmem:[#allocation4 + $0x630] sm:$0xff] }
 0x7c8   :  { %9046 = vmatmul.mubr.f32.vlgmr.msra.gmra.mrb[22].mxu0 %v13372_v42  ;;  %9354 = vmatmul.mubr.f32.vlgmr.msra.gmra.mrb[22].mxu1 %v13372_v42  ;;  %v12097_v42 = vunpack.c.l.s8.bf16 %v6124_v57 }
 0x7c9   :  { %12090 = vmatpush1.bf16.msra.mxu0 %v12089_v2  ;;  %12346 = vmatpush1.bf16.msra.mxu1 %v12345_v13  ;;  %v12377_v2 = vunpack.c.l.s8.bf16 %v6150_v11  ;;  %v12123_v13 = vunpack.c.h.s8.bf16 %v6149_v41  ;;  %v6183_v41 = vld [vmem:[#allocation4 + $0x638] sm:$0xff] }
 0x7ca   :  { %12092 = vmatprep.subr.bf16.mxu0 %v12091_v19  ;;  %12348 = vmatprep.subr.bf16.mxu1 %v12347_v29  ;;  %v12379_v19 = vunpack.c.h.s8.bf16 %v6151_v18  ;;  %v6157_v29 = vld [vmem:[#allocation4 + $0x568] sm:$0xff] }
 0x7cb   :  { %9051 = vmatprep.mubr.f32.mxu0 %v13384_v14  ;;  %9359 = vmatprep.mubr.f32.mxu1 %v13384_v14  ;;  %v12101_v14 = vunpack.c.h.s8.bf16 %v6124_v57  ;;  %v6158_v57 = vld [vmem:[#allocation4 + $0x570] sm:$0xff] }
 0x7cc   :  { %9052 = vmatmul.mubr.f32.gmra.mrb[24].mxu0 %v13380_v20  ;;  %9360 = vmatmul.mubr.f32.gmra.mrb[24].mxu1 %v13380_v20  ;;  %v12103_v20 = vunpack.c.l.s8.bf16 %v6133_v35  ;;  %v6167_v35 = vld [vmem:[#allocation4 + $0x5b8] sm:$0xff] }
 0x7cd   :  { %12094 = vmatpush1.bf16.msra.mxu0 %v12093_v27  ;;  %12350 = vmatpush1.bf16.msra.mxu1 %v12349_v22  ;;  %v12381_v27 = vunpack.c.h.s8.bf16 %v6150_v11  ;;  %v12127_v22 = vunpack.c.l.s8.bf16 %v6157_v29 }
 0x7ce   :  { %12096 = vmatprep.subr.bf16.mxu0 %v12095_v23  ;;  %12352 = vmatprep.subr.bf16.mxu1 %v12351_v30  ;;  %v12383_v23 = vunpack.c.l.s8.bf16 %v6159_v1  ;;  %v6156_v30 = vld [vmem:[#allocation4 + $0x560] sm:$0xff] }
 0x7cf   :  { %9122 = vmatprep.mubr.f32.mxu0 %v13412_v26  ;;  %9430 = vmatprep.mubr.f32.mxu1 %v13412_v26  ;;  %v6143_v26 = vld [vmem:[#allocation4 + $0x4f8] sm:$0xff]  ;;  %v12129_v31 = vunpack.c.l.s8.bf16 %v6156_v30  ;;  %v12133_v36 = vunpack.c.h.s8.bf16 %v6156_v30  ;;  %v6190_v30 = vld [vmem:[#allocation4 + $0x670] sm:$0xff] }
 0x7d0   :  { %v12367_v54 = vunpack.c.l.s8.bf16 %v6143_v26  ;;  %v12371_v7 = vunpack.c.h.s8.bf16 %v6143_v26 }
 0x7d1   :  { %12098 = vmatpush1.bf16.msra.mxu0 %v12097_v42  ;;  %12354 = vmatpush1.bf16.msra.mxu1 %v12353_v21  ;;  %v12385_v42 = vunpack.c.l.s8.bf16 %v6158_v57  ;;  %v12131_v21 = vunpack.c.h.s8.bf16 %v6157_v29  ;;  %v6191_v29 = vld [vmem:[#allocation4 + $0x678] sm:$0xff] }
 0x7d2   :  { %12100 = vmatprep.subr.bf16.mxu0 %v12099_v34  ;;  %12356 = vmatprep.subr.bf16.mxu1 %v12355_v16  ;;  %v12387_v34 = vunpack.c.h.s8.bf16 %v6159_v1  ;;  %v6165_v16 = vld [vmem:[#allocation4 + $0x5a8] sm:$0xff] }
 0x7d5   :  { %12102 = vmatpush1.bf16.msra.mxu0 %v12101_v14  ;;  %12358 = vmatpush1.bf16.msra.mxu1 %v12357_v8  ;;  %v12389_v14 = vunpack.c.h.s8.bf16 %v6158_v57  ;;  %v12135_v8 = vunpack.c.l.s8.bf16 %v6165_v16  ;;  %v12417_v57 = vunpack.c.l.s8.bf16 %v6190_v30 }
 0x7d6   :  { %12104 = vmatprep.subr.bf16.mxu0 %v12103_v20  ;;  %12360 = vmatprep.subr.bf16.mxu1 %v12359_v37  ;;  %v12391_v20 = vunpack.c.l.s8.bf16 %v6167_v35  ;;  %v6164_v37 = vld [vmem:[#allocation4 + $0x5a0] sm:$0xff] }
 0x7d7   :  { %v12137_v39 = vunpack.c.l.s8.bf16 %v6164_v37  ;;  %v12141_v26 = vunpack.c.h.s8.bf16 %v6164_v37 }
 0x7d9   :  { %12106 = vmatpush1.bf16.msra.mxu0 %v12105_v47  ;;  %12362 = vmatpush1.bf16.msra.mxu1 %v12361_v5  ;;  %v12393_v47 = vunpack.c.l.s8.bf16 %v6166_v38  ;;  %v12139_v5 = vunpack.c.h.s8.bf16 %v6165_v16  ;;  %v12421_v16 = vunpack.c.h.s8.bf16 %v6190_v30 }
 0x7da   :  { %12108 = vmatprep.subr.bf16.mxu0 %v12107_v63  ;;  %12364 = vmatprep.subr.bf16.mxu1 %v12363_v48  ;;  %v12395_v63 = vunpack.c.h.s8.bf16 %v6167_v35  ;;  %v6173_v48 = vld [vmem:[#allocation4 + $0x5e8] sm:$0xff] }
 0x7dd   :  { %12110 = vmatpush1.bf16.msra.mxu0 %v12109_v51  ;;  %12366 = vmatpush1.bf16.msra.mxu1 %v12365_v52  ;;  %v12397_v51 = vunpack.c.h.s8.bf16 %v6166_v38  ;;  %v12143_v52 = vunpack.c.l.s8.bf16 %v6173_v48 }
 0x7de   :  { %12112 = vmatprep.subr.bf16.mxu0 %v12111_v9  ;;  %12368 = vmatprep.subr.bf16.mxu1 %v12367_v54  ;;  %v12399_v9 = vunpack.c.l.s8.bf16 %v6175_v50  ;;  %v6172_v54 = vld [vmem:[#allocation4 + $0x5e0] sm:$0xff] }
 0x7df   :  { %v12145_v12 = vunpack.c.l.s8.bf16 %v6172_v54  ;;  %v12149_v18 = vunpack.c.h.s8.bf16 %v6172_v54 }
 0x7e1   :  { %12114 = vmatpush1.bf16.msra.mxu0 %v12113_v32  ;;  %12370 = vmatpush1.bf16.msra.mxu1 %v12369_v56  ;;  %v12401_v32 = vunpack.c.l.s8.bf16 %v6174_v55  ;;  %v12147_v56 = vunpack.c.h.s8.bf16 %v6173_v48 }
 0x7e2   :  { %12116 = vmatprep.subr.bf16.mxu0 %v12115_v3  ;;  %12372 = vmatprep.subr.bf16.mxu1 %v12371_v7  ;;  %v12403_v3 = vunpack.c.h.s8.bf16 %v6175_v50  ;;  %v6181_v7 = vld [vmem:[#allocation4 + $0x628] sm:$0xff]  ;;  %v6204_v50 = vld [vmem:[#allocation4 + $0x6e0] sm:$0xff] }
 0x7e5   :  { %12118 = vmatpush1.bf16.msra.mxu0 %v12117_v6  ;;  %12374 = vmatpush1.bf16.msra.mxu1 %v12373_v60  ;;  %v12405_v6 = vunpack.c.h.s8.bf16 %v6174_v55  ;;  %v12151_v60 = vunpack.c.l.s8.bf16 %v6181_v7  ;;  %v12177_v55 = vunpack.c.l.s8.bf16 %v6204_v50 }
 0x7e6   :  { %12120 = vmatprep.subr.bf16.mxu0 %v12119_v10  ;;  %12376 = vmatprep.subr.bf16.mxu1 %v12375_v15  ;;  %v12407_v10 = vunpack.c.l.s8.bf16 %v6183_v41  ;;  %v6180_v15 = vld [vmem:[#allocation4 + $0x620] sm:$0xff] }
 0x7e7   :  { %v12153_v11 = vunpack.c.l.s8.bf16 %v6180_v15  ;;  %v12157_v1 = vunpack.c.h.s8.bf16 %v6180_v15 }
 0x7e9   :  { %12122 = vmatpush1.bf16.msra.mxu0 %v12121_v17  ;;  %12378 = vmatpush1.bf16.msra.mxu1 %v12377_v2  ;;  %v12409_v17 = vunpack.c.l.s8.bf16 %v6182_v33  ;;  %v12155_v2 = vunpack.c.h.s8.bf16 %v6181_v7 }
 0x7ea   :  { %12124 = vmatprep.subr.bf16.mxu0 %v12123_v13  ;;  %12380 = vmatprep.subr.bf16.mxu1 %v12379_v19  ;;  %v12411_v13 = vunpack.c.h.s8.bf16 %v6183_v41  ;;  %v6189_v19 = vld [vmem:[#allocation4 + $0x668] sm:$0xff] }
 0x7eb   :  { %v6213_v41 = vld [vmem:[#allocation4 + $0x728] sm:$0xff] }
 0x7ed   :  { %12126 = vmatpush1.bf16.msra.mxu0 %v12125_v25  ;;  %12382 = vmatpush1.bf16.msra.mxu1 %v12381_v27  ;;  %v12413_v25 = vunpack.c.h.s8.bf16 %v6182_v33  ;;  %v12159_v27 = vunpack.c.l.s8.bf16 %v6189_v19  ;;  %v12183_v33 = vunpack.c.l.s8.bf16 %v6213_v41 }
 0x7ee   :  { %12128 = vmatprep.subr.bf16.mxu0 %v12127_v22  ;;  %12384 = vmatprep.subr.bf16.mxu1 %v12383_v23  ;;  %v12415_v22 = vunpack.c.l.s8.bf16 %v6191_v29  ;;  %v6188_v23 = vld [vmem:[#allocation4 + $0x660] sm:$0xff] }
 0x7f1   :  { %12130 = vmatpush1.bf16.msra.mxu0 %v12129_v31  ;;  %12386 = vmatpush1.bf16.msra.mxu1 %v12385_v42  ;;  %v12163_v31 = vunpack.c.h.s8.bf16 %v6189_v19  ;;  %v12419_v42 = vunpack.c.h.s8.bf16 %v6191_v29  ;;  %v12187_v29 = vunpack.c.h.s8.bf16 %v6213_v41 }
 0x7f2   :  { %12132 = vmatprep.subr.bf16.mxu0 %v12131_v21  ;;  %12388 = vmatprep.subr.bf16.mxu1 %v12387_v34  ;;  %v6197_v21 = vld [vmem:[#allocation4 + $0x6a8] sm:$0xff]  ;;  %v6199_v34 = vld [vmem:[#allocation4 + $0x6b8] sm:$0xff] }
 0x7f3   :  { %v12423_v35 = vunpack.c.l.s8.bf16 %v6199_v34  ;;  %v12171_v37 = vunpack.c.h.s8.bf16 %v6197_v21  ;;  %v12427_v38 = vunpack.c.h.s8.bf16 %v6199_v34 }
 0x7f5   :  { %12134 = vmatpush1.bf16.msra.mxu0 %v12133_v36  ;;  %12390 = vmatpush1.bf16.msra.mxu1 %v12389_v14  ;;  %v6196_v36 = vld [vmem:[#allocation4 + $0x6a0] sm:$0xff]  ;;  %v6198_v14 = vld [vmem:[#allocation4 + $0x6b0] sm:$0xff] }
 0x7f6   :  { %12136 = vmatprep.subr.bf16.mxu0 %v12135_v8  ;;  %12392 = vmatprep.subr.bf16.mxu1 %v12391_v20  ;;  %v12169_v8 = vunpack.c.l.s8.bf16 %v6196_v36  ;;  %v12425_v20 = vunpack.c.l.s8.bf16 %v6198_v14 }
 0x7f9   :  { %12138 = vmatpush1.bf16.msra.mxu0 %v12137_v39  ;;  %12394 = vmatpush1.bf16.msra.mxu1 %v12393_v47  ;;  %v6205_v39 = vld [vmem:[#allocation4 + $0x6e8] sm:$0xff]  ;;  %v12173_v47 = vunpack.c.h.s8.bf16 %v6196_v36 }
 0x7fa   :  { %12140 = vmatprep.subr.bf16.mxu0 %v12139_v5  ;;  %12396 = vmatprep.subr.bf16.mxu1 %v12395_v63  ;;  %v12429_v5 = vunpack.c.h.s8.bf16 %v6198_v14  ;;  %v12175_v63 = vunpack.c.l.s8.bf16 %v6205_v39 }
 0x7fd   :  { %12142 = vmatpush1.bf16.msra.mxu0 %v12141_v26  ;;  %12398 = vmatpush1.bf16.msra.mxu1 %v12397_v51 }
 0x7fe   :  { %12144 = vmatprep.subr.bf16.mxu0 %v12143_v52  ;;  %12400 = vmatprep.subr.bf16.mxu1 %v12399_v9  ;;  %v6206_v52 = vld [vmem:[#allocation4 + $0x6f0] sm:$0xff] }
 0x7ff   :  { %v12437_v15 = vunpack.c.h.s8.bf16 %v6206_v52 }
 0x801   :  { %12146 = vmatpush1.bf16.msra.mxu0 %v12145_v12  ;;  %12402 = vmatpush1.bf16.msra.mxu1 %v12401_v32  ;;  %v12433_v12 = vunpack.c.l.s8.bf16 %v6206_v52  ;;  %v12179_v32 = vunpack.c.h.s8.bf16 %v6205_v39 }
 0x802   :  { %12148 = vmatprep.subr.bf16.mxu0 %v12147_v56  ;;  %12404 = vmatprep.subr.bf16.mxu1 %v12403_v3 }
 0x805   :  { %12150 = vmatpush1.bf16.msra.mxu0 %v12149_v18  ;;  %12406 = vmatpush1.bf16.msra.mxu1 %v12405_v6 }
 0x806   :  { %12152 = vmatprep.subr.bf16.mxu0 %v12151_v60  ;;  %12408 = vmatprep.subr.bf16.mxu1 %v12407_v10  ;;  %v6215_v60 = vld [vmem:[#allocation4 + $0x738] sm:$0xff]  ;;  %v12181_v10 = vunpack.c.h.s8.bf16 %v6204_v50 }
 0x808   :  { %9123 = vmatmul.mubr.f32.vlgmr.msra.gmra.mrb[22].mxu0 %v13408_v4  ;;  %9431 = vmatmul.mubr.f32.vlgmr.msra.gmra.mrb[22].mxu1 %v13408_v4  ;;  %v12161_v4 = vunpack.c.l.s8.bf16 %v6188_v23 }
 0x809   :  { %12154 = vmatpush1.bf16.msra.mxu0 %v12153_v11  ;;  %12410 = vmatpush1.bf16.msra.mxu1 %v12409_v17  ;;  %v6212_v11 = vld [vmem:[#allocation4 + $0x720] sm:$0xff]  ;;  %v12439_v17 = vunpack.c.l.s8.bf16 %v6215_v60 }
 0x80a   :  { %12156 = vmatprep.subr.bf16.mxu0 %v12155_v2  ;;  %12412 = vmatprep.subr.bf16.mxu1 %v12411_v13  ;;  %v6214_v2 = vld [vmem:[#allocation4 + $0x730] sm:$0xff]  ;;  %v12185_v13 = vunpack.c.l.s8.bf16 %v6212_v11 }
 0x80b   :  { %9128 = vmatprep.mubr.f32.mxu0 %v13420_v24  ;;  %9436 = vmatprep.mubr.f32.mxu1 %v13420_v24  ;;  %v12165_v24 = vunpack.c.h.s8.bf16 %v6188_v23  ;;  %v12441_v19 = vunpack.c.l.s8.bf16 %v6214_v2  ;;  %v12445_v23 = vunpack.c.h.s8.bf16 %v6214_v2 }
 0x80c   :  { %9129 = vmatmul.mubr.f32.gmra.mrb[24].mxu0 %v13416_v28  ;;  %9437 = vmatmul.mubr.f32.gmra.mrb[24].mxu1 %v13416_v28  ;;  %v12167_v28 = vunpack.c.l.s8.bf16 %v6197_v21 }
 0x80d   :  { %12158 = vmatpush1.bf16.msra.mxu0 %v12157_v1  ;;  %12414 = vmatpush1.bf16.msra.mxu1 %v12413_v25  ;;  %v12443_v1 = vunpack.c.h.s8.bf16 %v6215_v60  ;;  %v6221_v25 = vld [vmem:[#allocation4 + $0x768] sm:$0xff] }
 0x80e   :  { %12160 = vmatprep.subr.bf16.mxu0 %v12159_v27  ;;  %12416 = vmatprep.subr.bf16.mxu1 %v12415_v22  ;;  %v6223_v27 = vld [vmem:[#allocation4 + $0x778] sm:$0xff]  ;;  %v12189_v22 = vunpack.c.h.s8.bf16 %v6212_v11  ;;  %v12191_v30 = vunpack.c.l.s8.bf16 %v6221_v25  ;;  %v12195_v34 = vunpack.c.h.s8.bf16 %v6221_v25 }
 0x80f   :  { %9199 = vmatprep.mubr.f32.mxu0 %v13414_v53  ;;  %9507 = vmatprep.mubr.f32.mxu1 %v13414_v53  ;;  %v6207_v53 = vld [vmem:[#allocation4 + $0x6f8] sm:$0xff] }
 0x810   :  { %v12431_v48 = vunpack.c.l.s8.bf16 %v6207_v53  ;;  %v12435_v7 = vunpack.c.h.s8.bf16 %v6207_v53  ;;  %v9520_v11 = vld [vmem:[#allocation14] sm:$0xff] }
 0x811   :  { %12162 = vmatpush1.bf16.msra.mxu0 %v12161_v4  ;;  %12418 = vmatpush1.bf16.msra.mxu1 %v12417_v57  ;;  %v6220_v4 = vld [vmem:[#allocation4 + $0x760] sm:$0xff]  ;;  %v12447_v57 = vunpack.c.l.s8.bf16 %v6223_v27  ;;  %v9529_v2 = vrot.slane %v9520_v11, %v13229_v61 }
 0x812   :  { %12164 = vmatprep.subr.bf16.mxu0 %v12163_v31  ;;  %12420 = vmatprep.subr.bf16.mxu1 %v12419_v42  ;;  %v6222_v31 = vld [vmem:[#allocation4 + $0x770] sm:$0xff]  ;;  %v12193_v42 = vunpack.c.l.s8.bf16 %v6220_v4 }
 0x813   :  { %v12449_v21 = vunpack.c.l.s8.bf16 %v6222_v31  ;;  %v12453_v36 = vunpack.c.h.s8.bf16 %v6222_v31 }
 0x815   :  { %12166 = vmatpush1.bf16.msra.mxu0 %v12165_v24  ;;  %12422 = vmatpush1.bf16.msra.mxu1 %v12421_v16  ;;  %v12451_v24 = vunpack.c.h.s8.bf16 %v6223_v27  ;;  %v6229_v16 = vld [vmem:[#allocation4 + $0x7a8] sm:$0xff] }
 0x816   :  { %12168 = vmatprep.subr.bf16.mxu0 %v12167_v28  ;;  %12424 = vmatprep.subr.bf16.mxu1 %v12423_v35  ;;  %v6231_v28 = vld [vmem:[#allocation4 + $0x7b8] sm:$0xff]  ;;  %v12197_v35 = vunpack.c.h.s8.bf16 %v6220_v4  ;;  %v12199_v14 = vunpack.c.l.s8.bf16 %v6229_v16  ;;  %v12203_v53 = vunpack.c.h.s8.bf16 %v6229_v16  ;;  %v9545_v16 = vrot.slane %v9520_v11, %v13261_v45 }
 0x819   :  { %12170 = vmatpush1.bf16.msra.mxu0 %v12169_v8  ;;  %12426 = vmatpush1.bf16.msra.mxu1 %v12425_v20  ;;  %v6228_v8 = vld [vmem:[#allocation4 + $0x7a0] sm:$0xff]  ;;  %v12455_v20 = vunpack.c.l.s8.bf16 %v6231_v28 }
 0x81a   :  { %12172 = vmatprep.subr.bf16.mxu0 %v12171_v37  ;;  %12428 = vmatprep.subr.bf16.mxu1 %v12427_v38  ;;  %v6230_v37 = vld [vmem:[#allocation4 + $0x7b0] sm:$0xff]  ;;  %v12201_v38 = vunpack.c.l.s8.bf16 %v6228_v8 }
 0x81b   :  { %v13482_v26 = vpop.f32.mrb[18].mxu0  ;;  %v13484_v51 = vpop.f32.mrb[18].mxu1  ;;  %v12457_v39 = vunpack.c.l.s8.bf16 %v6230_v37  ;;  %v12461_v50 = vunpack.c.h.s8.bf16 %v6230_v37 }
 0x81c   :  { %v13486_v9 = vpop.f32.mrb[19].mxu0  ;;  %v13488_v54 = vpop.f32.mrb[19].mxu1 }
 0x81d   :  { %12174 = vmatpush1.bf16.msra.mxu0 %v12173_v47  ;;  %12430 = vmatpush1.bf16.msra.mxu1 %v12429_v5  ;;  %v12459_v47 = vunpack.c.h.s8.bf16 %v6231_v28  ;;  %v6237_v5 = vld [vmem:[#allocation4 + $0x7e8] sm:$0xff] }
 0x81e   :  { %12176 = vmatprep.subr.bf16.mxu0 %v12175_v63  ;;  %12432 = vmatprep.subr.bf16.mxu1 %v12431_v48  ;;  %v6239_v63 = vld [vmem:[#allocation4 + $0x7f8] sm:$0xff]  ;;  %v12205_v48 = vunpack.c.h.s8.bf16 %v6228_v8  ;;  %v12207_v52 = vunpack.c.l.s8.bf16 %v6237_v5  ;;  %v12211_v60 = vunpack.c.h.s8.bf16 %v6237_v5 }
 0x81f   :  { %v13490_v56 = vpop.f32.mrb[20].mxu0  ;;  %v13492_v3 = vpop.f32.mrb[20].mxu1 }
 0x820   :  { %v13494_v18 = vpop.f32.mrb[21].mxu0  ;;  %v13496_v6 = vpop.f32.mrb[21].mxu1 }
 0x821   :  { %12178 = vmatpush1.bf16.msra.mxu0 %v12177_v55  ;;  %12434 = vmatpush1.bf16.msra.mxu1 %v12433_v12  ;;  %v6236_v55 = vld [vmem:[#allocation4 + $0x7e0] sm:$0xff]  ;;  %v12463_v12 = vunpack.c.l.s8.bf16 %v6239_v63 }
 0x822   :  { %12180 = vmatprep.subr.bf16.mxu0 %v12179_v32  ;;  %12436 = vmatprep.subr.bf16.mxu1 %v12435_v7  ;;  %v6238_v32 = vld [vmem:[#allocation4 + $0x7f0] sm:$0xff]  ;;  %v12209_v7 = vunpack.c.l.s8.bf16 %v6236_v55 }
 0x823   :  { %v12465_v41 = vunpack.c.l.s8.bf16 %v6238_v32 }
 0x825   :  { %12182 = vmatpush1.bf16.msra.mxu0 %v12181_v10  ;;  %12438 = vmatpush1.bf16.msra.mxu1 %v12437_v15  ;;  %v12467_v10 = vunpack.c.h.s8.bf16 %v6239_v63  ;;  %v12213_v15 = vunpack.c.h.s8.bf16 %v6236_v55 }
 0x826   :  { %12184 = vmatprep.subr.bf16.mxu0 %v12183_v33  ;;  %12440 = vmatprep.subr.bf16.mxu1 %v12439_v17  ;;  %v12469_v33 = vunpack.c.h.s8.bf16 %v6238_v32  ;;  %v9525_v17 = vrot.slane %v9520_v11, %v13225_v58 }
 0x828   :  { %v9570_v25 = vmul.f32 %v9525_v17, %v13490_v56 }
 0x829   :  { %12186 = vmatpush1.bf16.msra.mxu0 %v12185_v13  ;;  %12442 = vmatpush1.bf16.msra.mxu1 %v12441_v19  ;;  %v9578_v13 = vld [vmem:[#allocation15] sm:$0xff]  ;;  %v9562_v19 = vmul.f32 %v9525_v17, %v13482_v26 }
 0x82a   :  { %12188 = vmatprep.subr.bf16.mxu0 %v12187_v29  ;;  %12444 = vmatprep.subr.bf16.mxu1 %v12443_v1  ;;  %v9583_v29 = vrot.slane %v9578_v13, %v13225_v58  ;;  %v9587_v1 = vrot.slane %v9578_v13, %v13229_v61  ;;  %v9591_v26 = vrot.slane %v9578_v13, %v13227_v59 }
 0x82b   :  { %v9537_v58 = vrot.slane %v9520_v11, %v13231_v62  ;;  %v9599_v28 = vrot.slane %v9578_v13, %v13257_v43  ;;  %v9603_v8 = vrot.slane %v9578_v13, %v13261_v45 }
 0x82c   :  { %v13513_v27 = vadd.f32 %v9583_v29, %v9562_v19 }
 0x82d   :  { %12190 = vmatpush1.bf16.msra.mxu0 %v12189_v22  ;;  %12446 = vmatpush1.bf16.msra.mxu1 %v12445_v23 }
 0x82e   :  { %12192 = vmatprep.subr.bf16.mxu0 %v12191_v30  ;;  %12448 = vmatprep.subr.bf16.mxu1 %v12447_v57  ;;  %v13520_v30 = vadd.f32 %v9583_v29, %v9570_v25  ;;  %v9636_v61 = vmul.f32 %v13513_v27, %v13513_v27 }
 0x830   :  { %v9644_v57 = vmul.f32 %v13520_v30, %v13520_v30 }
 0x831   :  { %12194 = vmatpush1.bf16.msra.mxu0 %v12193_v42  ;;  %12450 = vmatpush1.bf16.msra.mxu1 %v12449_v21  ;;  %v9541_v21 = vrot.slane %v9520_v11, %v13257_v43 }
 0x832   :  { %12196 = vmatprep.subr.bf16.mxu0 %v12195_v34  ;;  %12452 = vmatprep.subr.bf16.mxu1 %v12451_v24  ;;  %v9573_v24 = vmul.f32 %v9537_v58, %v13496_v6 }
 0x835   :  { %12198 = vmatpush1.bf16.msra.mxu0 %v12197_v35  ;;  %12454 = vmatpush1.bf16.msra.mxu1 %v12453_v36  ;;  %v9553_v35 = vrot.slane %v9520_v11, %v13263_v46 }
 0x836   :  { %12200 = vmatprep.subr.bf16.mxu0 %v12199_v14  ;;  %12456 = vmatprep.subr.bf16.mxu1 %v12455_v20 }
 0x839   :  { %12202 = vmatpush1.bf16.msra.mxu0 %v12201_v38  ;;  %12458 = vmatpush1.bf16.msra.mxu1 %v12457_v39  ;;  %v9607_v38 = vrot.slane %v9578_v13, %v13259_v44 }
 0x83a   :  { %12204 = vmatprep.subr.bf16.mxu0 %v12203_v53  ;;  %12460 = vmatprep.subr.bf16.mxu1 %v12459_v47 }
 0x83d   :  { %12206 = vmatpush1.bf16.msra.mxu0 %v12205_v48  ;;  %12462 = vmatpush1.bf16.msra.mxu1 %v12461_v50 }
 0x83e   :  { %12208 = vmatprep.subr.bf16.mxu0 %v12207_v52  ;;  %12464 = vmatprep.subr.bf16.mxu1 %v12463_v12  ;;  %v9611_v52 = vrot.slane %v9578_v13, %v13263_v46 }
 0x841   :  { %12210 = vmatpush1.bf16.msra.mxu0 %v12209_v7  ;;  %12466 = vmatpush1.bf16.msra.mxu1 %v12465_v41 }
 0x842   :  { %12212 = vmatprep.subr.bf16.mxu0 %v12211_v60  ;;  %12468 = vmatprep.subr.bf16.mxu1 %v12467_v10 }
 0x845   :  { %12214 = vmatpush1.bf16.msra.mxu0 %v12213_v15  ;;  %12470 = vmatpush1.bf16.msra.mxu1 %v12469_v33 }
 0x848   :  { %9200 = vmatmul.mubr.f32.vlgmr.msra.gmra.mrb[22].mxu0 %v13410_v49  ;;  %9508 = vmatmul.mubr.f32.vlgmr.msra.gmra.mrb[22].mxu1 %v13410_v49  ;;  %v9563_v49 = vmul.f32 %v9529_v2, %v13486_v9 }
 0x849   :  { %9205 = vmatprep.mubr.f32.mxu0 %v13422_v0  ;;  %9513 = vmatprep.mubr.f32.mxu1 %v13422_v0  ;;  %v9533_v0 = vrot.slane %v9520_v11, %v13227_v59  ;;  %v9595_v59 = vrot.slane %v9578_v13, %v13231_v62 }
 0x84a   :  { %v13515_v22 = vadd.f32 %v9587_v1, %v9563_v49 }
 0x84b   :  { %v9564_v23 = vmul.f32 %v9533_v0, %v13484_v51  ;;  %v9565_v51 = vmul.f32 %v9537_v58, %v13488_v54  ;;  %v13553_v47 = vadd.f32 %v9595_v59, %v9573_v24 }
 0x84c   :  { %9206 = vmatmul.mubr.f32.gmra.mrb[24].mxu0 %v13418_v40  ;;  %9514 = vmatmul.mubr.f32.gmra.mrb[24].mxu1 %v13418_v40  ;;  %v9571_v40 = vmul.f32 %v9529_v2, %v13494_v18  ;;  %v9637_v56 = vmul.f32 %v13515_v22, %v13515_v22  ;;  %v9572_v18 = vmul.f32 %v9533_v0, %v13492_v3 }
 0x84d   :  { %v13529_v4 = vadd.f32 %v9591_v26, %v9564_v23  ;;  %v9549_v3 = vrot.slane %v9520_v11, %v13259_v44  ;;  %v13545_v54 = vadd.f32 %v9595_v59, %v9565_v51  ;;  %v9647_v33 = vmul.f32 %v13553_v47, %v13553_v47 }
 0x84e   :  { %v13522_v9 = vadd.f32 %v9587_v1, %v9571_v40  ;;  %v9652_v42 = vadd.f32 %v9637_v56, %v9636_v61  ;;  %v13538_v34 = vadd.f32 %v9591_v26, %v9572_v18 }
 0x84f   :  { %v9638_v62 = vmul.f32 %v13529_v4, %v13529_v4  ;;  %v9639_v48 = vmul.f32 %v13545_v54, %v13545_v54 }
 0x850   :  { %v9645_v31 = vmul.f32 %v13522_v9, %v13522_v9  ;;  %v9646_v53 = vmul.f32 %v13538_v34, %v13538_v34 }
 0x851   :  { %v9653_v20 = vadd.f32 %v9652_v42, %v9638_v62 }
 0x852   :  { %v9661_v36 = vadd.f32 %v9645_v31, %v9644_v57 }
 0x853   :  { %v9654_v32 = vadd.f32 %v9653_v20, %v9639_v48 }
 0x854   :  { %v9662_v55 = vadd.f32 %v9661_v36, %v9646_v53 }
 0x856   :  { %v9663_v1 = vadd.f32 %v9662_v55, %v9647_v33 }
 0x91b   :  { %v9201_v14 = vpop.f32.mrb[22].mxu0  ;;  %v9509_v6 = vpop.f32.mrb[22].mxu1 }
 0x91c   :  { %v9566_v37 = vmul.f32 %v9541_v21, %v9201_v14  ;;  %v9203_v39 = vpop.f32.mrb[23].mxu0  ;;  %v9568_v5 = vmul.f32 %v9549_v3, %v9509_v6  ;;  %v9511_v43 = vpop.f32.mrb[23].mxu1 }
 0x91d   :  { %v9567_v63 = vmul.f32 %v9545_v16, %v9203_v39  ;;  %v9569_v45 = vmul.f32 %v9553_v35, %v9511_v43 }
 0x91e   :  { %v13557_v50 = vadd.f32 %v9599_v28, %v9566_v37  ;;  %v13564_v41 = vadd.f32 %v9607_v38, %v9568_v5 }
 0x91f   :  { %v13560_v12 = vadd.f32 %v9603_v8, %v9567_v63  ;;  %v9207_v44 = vpop.f32.mrb[24].mxu0  ;;  %v9515_v10 = vpop.f32.mrb[24].mxu1  ;;  %v13570_v13 = vadd.f32 %v9611_v52, %v9569_v45 }
 0x920   :  { %v9640_v7 = vmul.f32 %v13557_v50, %v13557_v50  ;;  %v9574_v60 = vmul.f32 %v9541_v21, %v9207_v44  ;;  %v9209_v15 = vpop.f32.mrb[25].mxu0  ;;  %v9576_v46 = vmul.f32 %v9549_v3, %v9515_v10  ;;  %v9517_v2 = vpop.f32.mrb[25].mxu1  ;;  %v9642_v23 = vmul.f32 %v13564_v41, %v13564_v41 }
 0x921   :  { %v9641_v11 = vmul.f32 %v13560_v12, %v13560_v12  ;;  %v9575_v17 = vmul.f32 %v9545_v16, %v9209_v15  ;;  %v9577_v29 = vmul.f32 %v9553_v35, %v9517_v2  ;;  %v9643_v18 = vmul.f32 %v13570_v13, %v13570_v13 }
 0x922   :  { %v13572_v19 = vadd.f32 %v9599_v28, %v9574_v60  ;;  %v9655_v49 = vadd.f32 %v9654_v32, %v9640_v7  ;;  %v13578_v40 = vadd.f32 %v9607_v38, %v9576_v46 }
 0x923   :  { %v13574_v0 = vadd.f32 %v9603_v8, %v9575_v17  ;;  %v13584_v56 = vadd.f32 %v9611_v52, %v9577_v29 }
 0x924   :  { %v9648_v25 = vmul.f32 %v13572_v19, %v13572_v19  ;;  %v9656_v26 = vadd.f32 %v9655_v49, %v9641_v11  ;;  %v9650_v59 = vmul.f32 %v13578_v40, %v13578_v40 }
 0x925   :  { %v9649_v58 = vmul.f32 %v13574_v0, %v13574_v0  ;;  %v9651_v42 = vmul.f32 %v13584_v56, %v13584_v56 }
 0x926   :  { %v9664_v61 = vadd.f32 %v9663_v1, %v9648_v25  ;;  %v9657_v51 = vadd.f32 %v9656_v26, %v9642_v23 }
 0x928   :  { %v9658_v57 = vadd.f32 %v9657_v51, %v9643_v18  ;;  %v9665_v31 = vadd.f32 %v9664_v61, %v9649_v58 }
 0x92a   :  { %9659 = vadd.xlane.f32.xlu0 %v9658_v57  ;;  %v9666_v21 = vadd.f32 %v9665_v31, %v9650_v59 }
 0x92c   :  { %v9667_v24 = vadd.f32 %v9666_v21, %v9651_v42 }
 0x92e   :  { %9668 = vadd.xlane.f32.xlu0 %v9667_v24 }
 0x92f   :  { %12839 = shalt.err (!%p12836_p0)
}
 0x930   :  { %s12840_s22 = scalar_lea.hbm %s13665_s14, 128 }
 0x931   :  { %p12841_p1 = scmp.ne.s32.totalorder %s13665_s14, %s12840_s22  ;;  %p12844_p2 = scmp.lt.u32.totalorder %s12840_s22, %s13665_s14 }
 0x933   :  { %p12846_p3 = pnand %p12844_p2, %p12841_p1 }
 0x935   :  { %12849 = shalt.err (!%p12846_p3)
}
 0x936   :  { %9727 = dma.vmem_to_hbm [thread:$0]  %s9725_s6, 128, %s13665_s14, [#allocation20]  }
 0x937   :  { %s12927_s10 = smov [#allocation21]  }
 0x938   :  { %s9734_s26 = sshll.u32 %s12927_s10, 4  ;;  %s9735_s26 = int_to_ptr.vmem [resolvable:$true] %s9734_s26 }
 0x939   :  { %s12850_s1 = scalar_lea.vmem %s9735_s26, 512  ;;  %p12855_p5 = scmp.lt.s32.totalorder %s9735_s26, %s9735_s26 }
 0x93a   :  { %p12851_p4 = scmp.ne.s32.totalorder %s9735_s26, %s12850_s1  ;;  %p12856_p6 = scmp.lt.s32.totalorder %s12850_s1, %s12850_s1 }
 0x93c   :  { %p12857_p7 = por %p12856_p6, %p12855_p5 }
 0x93e   :  { %p12858_p8 = pnand %p12857_p7, %p12851_p4 }
 0x940   :  { %12861 = shalt.err (!%p12858_p8)
}
 0x941   :  { %s12862_s16 = scalar_lea.hbm %s13666_s15, 512 }
 0x942   :  { %p12863_p9 = scmp.ne.s32.totalorder %s13666_s15, %s12862_s16  ;;  %p12866_p10 = scmp.lt.u32.totalorder %s12862_s16, %s13666_s15 }
 0x944   :  { %p12868_p11 = pnand %p12866_p10, %p12863_p9 }
 0x946   :  { %12871 = shalt.err (!%p12868_p11)
}
 0x947   :  { %9737 = dma.vmem_to_hbm [thread:$0]  %s9735_s26, 512, %s13666_s15, [#allocation20]  }
 0x948   :  { %s12928_s15 = smov [#allocation18]  }
 0x949   :  { %s9711_s19 = sshll.u32 %s12928_s15, 4  ;;  %s13628_s19 = int_to_ptr.vmem [resolvable:$true] %s9711_s19 }
 0x94a   :  { %s12872_s5 = scalar_lea.vmem %s13628_s19, 2048  ;;  %p12877_p13 = scmp.lt.s32.totalorder %s13628_s19, %s13628_s19 }
 0x94b   :  { %p12873_p12 = scmp.ne.s32.totalorder %s13628_s19, %s12872_s5  ;;  %p12878_p0 = scmp.lt.s32.totalorder %s12872_s5, %s12872_s5 }
 0x94d   :  { %p12879_p1 = por %p12878_p0, %p12877_p13 }
 0x94f   :  { %p12880_p2 = pnand %p12879_p1, %p12873_p12 }
 0x9b7   :  { %v9660_v3 = vpop.xlane.xlu0 %9659 }
 0x9b8   :  { %v9670_v16 = vadd.f32 1e-12, %v9660_v3 }
 0x9ba   :  { %12604 = vrsqrt.f32 %v9670_v16 }
 0x9bb   :  { %v9669_v62 = vpop.xlane.xlu0 %9668 }
 0x9bc   :  { %v9671_v28 = vadd.f32 1e-12, %v9669_v62 }
 0x9be   :  { %12606 = vrsqrt.f32 %v9671_v28 }
 0x9c4   :  { %v12605_v35 = vpop.eup %12604 }
 0x9c5   :  { %v9674_v36 = vmul.f32 %v12605_v35, %v13513_v27  ;;  %v9675_v14 = vmul.f32 %v12605_v35, %v13515_v22  ;;  %v9676_v8 = vmul.f32 %v12605_v35, %v13529_v4  ;;  %v9677_v20 = vmul.f32 %v12605_v35, %v13545_v54 }
 0x9c6   :  { %v9678_v37 = vmul.f32 %v12605_v35, %v13557_v50  ;;  %v9679_v6 = vmul.f32 %v12605_v35, %v13560_v12  ;;  %v9680_v38 = vmul.f32 %v12605_v35, %v13564_v41  ;;  %v9681_v39 = vmul.f32 %v12605_v35, %v13570_v13 }
 0x9c7   :  { %9690 = vst [vmem:[#allocation18] sm:$0xff] %v9674_v36  ;;  %9691 = vst [vmem:[#allocation18 + $0x8] sm:$0xff] %v9675_v14 }
 0x9c8   :  { %9692 = vst [vmem:[#allocation18 + $0x10] sm:$0xff] %v9676_v8  ;;  %9693 = vst [vmem:[#allocation18 + $0x18] sm:$0xff] %v9677_v20  ;;  %v12607_v27 = vpop.eup %12606 }
 0x9c9   :  { %9694 = vst [vmem:[#allocation18 + $0x20] sm:$0xff] %v9678_v37  ;;  %9695 = vst [vmem:[#allocation18 + $0x28] sm:$0xff] %v9679_v6  ;;  %v9682_v22 = vmul.f32 %v12607_v27, %v13520_v30  ;;  %v9683_v4 = vmul.f32 %v12607_v27, %v13522_v9  ;;  %v9684_v54 = vmul.f32 %v12607_v27, %v13538_v34 }
 0x9ca   :  { %9696 = vst [vmem:[#allocation18 + $0x30] sm:$0xff] %v9680_v38  ;;  %9697 = vst [vmem:[#allocation18 + $0x38] sm:$0xff] %v9681_v39  ;;  %v9685_v53 = vmul.f32 %v12607_v27, %v13553_v47  ;;  %v9686_v5 = vmul.f32 %v12607_v27, %v13572_v19  ;;  %v9687_v63 = vmul.f32 %v12607_v27, %v13574_v0 }
 0x9cb   :  { %v9688_v43 = vmul.f32 %v12607_v27, %v13578_v40  ;;  %v9689_v48 = vmul.f32 %v12607_v27, %v13584_v56  ;;  %9698 = vst [vmem:[#allocation18 + $0x40] sm:$0xff] %v9682_v22  ;;  %9699 = vst [vmem:[#allocation18 + $0x48] sm:$0xff] %v9683_v4 }
 0x9cc   :  { %9700 = vst [vmem:[#allocation18 + $0x50] sm:$0xff] %v9684_v54  ;;  %9701 = vst [vmem:[#allocation18 + $0x58] sm:$0xff] %v9685_v53 }
 0x9cd   :  { %9702 = vst [vmem:[#allocation18 + $0x60] sm:$0xff] %v9686_v5  ;;  %9703 = vst [vmem:[#allocation18 + $0x68] sm:$0xff] %v9687_v63 }
 0x9ce   :  { %9704 = vst [vmem:[#allocation18 + $0x70] sm:$0xff] %v9688_v43  ;;  %9705 = vst [vmem:[#allocation18 + $0x78] sm:$0xff] %v9689_v48 }
 0x9cf   :  { %12883 = shalt.err (!%p12880_p2)
}
 0x9d0   :  { %s12884_s12 = scalar_lea.hbm %s13664_s13, 2048 }
 0x9d1   :  { %p12885_p3 = scmp.ne.s32.totalorder %s13664_s13, %s12884_s12  ;;  %p12888_p4 = scmp.lt.u32.totalorder %s12884_s12, %s13664_s13 }
 0x9d3   :  { %p12890_p5 = pnand %p12888_p4, %p12885_p3 }
 0x9d5   :  { %12893 = shalt.err (!%p12890_p5)
}
 0x9d6   :  { %s12929_s20 = smov 1024   ;;  %s12930_s22 = smov 64  }
 0x9d7   :  { %9717 = dma.vmem_to_hbm [thread:$0]  %s13628_s19, 2048, %s13664_s13, [#allocation8], %s12929_s20, %s12929_s20, %s12930_s22  }
 0x9d8   :  { %12908 = dma.done.wait [#allocation8], 2048  }
 0x9d9   :  { %12909 = vsyncadd [#allocation8], 4294965248 }
 0x9da   :  { %12910 = dma.done.wait [#allocation20], 640  }
 0x9db   :  { %12911 = vsyncadd [#allocation20], 4294966656 }
 0x9dc   :  { %9747 = vsyncpa [#allocation7], 1 }
 0x9dd   :  { %9748 = vsyncpa [#allocation10], 1 }
 0x9de   :  { %9749 = vsyncpa [#allocation13], 1 }
 0x9df   :  { %9750 = vsyncpa [#allocation16], 1 }
 0x9e0   :  { %9751 = vsyncpa [#allocation8], 1 }
 0x9e1   :  { %9752 = vsyncpa [#allocation20], 1 }
 0x9e2   :  { %9753 = vsyncmov [#allocation5] }
 0x9e5   :  { %s9754_s25 = vpop.sfrf %9753 }
 0x9e6   :  { %p9774_p6 = scmp.ne.s32.totalorder %s9754_s25, 0 }
 0x9e8   :  { %9758 = shalt.err (%p9774_p6)  }
 0x9e9   :  { %9760 = vsyncmov [#allocation5 + $0x1] }
 0x9ec   :  { %s9761_s2 = vpop.sfrf %9760 }
 0x9ed   :  { %p9775_p7 = scmp.ne.s32.totalorder %s9761_s2, 0 }
 0x9ef   :  { %9765 = shalt.err (%p9775_p7)  }
 0x9f0   :  { %9767 = vsyncmov [#allocation5 + $0x2] }
 0x9f3   :  { %s9768_s13 = vpop.sfrf %9767 }
 0x9f4   :  { %p9776_p8 = scmp.ne.s32.totalorder %s9768_s13, 0 }
 0x9f6   :  { %9772 = shalt.err (%p9776_p8)  }

</bundles_post_ra>
